<compile_context>
chip_gen: v6e
topology: v6e:2x2x1
jax: 0.10.0
libtpu: 0.0.40
codegen_flags: <defaults>
</compile_context>

<pallas_src>
import functools

import jax
import jax.numpy as jnp
from jax.experimental import pallas as pl
from jax.experimental.pallas import tpu as pltpu

LATENT_DIM = 100          # PyTorch latent_dim
LATENT_PAD = 128          # padded K for the first matmul (aligned MXU pass)
H1, H2, H3 = 256, 512, 1024
OUT_DIM = 28 * 28         # 784
OUT_PAD = 896             # 7 * 128 -> lane-aligned last matmul N


def _round_up(n, m):
    return ((n + m - 1) // m) * m


def _num_tensorcores():
    """Best-effort TensorCore count per chip; defaults to 1 (v5e/v6e)."""
    try:
        info = pltpu.get_tpu_info()
    except Exception:
        return 1
    for attr in ("num_cores", "tensorcores_per_chip", "tensor_cores_per_chip",
                 "cores_per_chip", "num_tensorcores"):
        v = getattr(info, attr, None)
        if isinstance(v, int) and v > 0:
            return v
    return 1


def _generator_kernel(x_ref,
                      w1_ref, b1_ref,
                      w2_ref, b2_ref,
                      w3_ref, b3_ref,
                      w4_ref, b4_ref,
                      o_ref):
    # bf16 matmul operands, f32 accumulation; f32 epilogue (bias/ReLU/tanh).
    x = x_ref[...].astype(jnp.bfloat16)

    h = jnp.dot(x, w1_ref[...], preferred_element_type=jnp.float32) + b1_ref[...]
    h = jnp.maximum(h, 0.0).astype(jnp.bfloat16)

    h = jnp.dot(h, w2_ref[...], preferred_element_type=jnp.float32) + b2_ref[...]
    h = jnp.maximum(h, 0.0).astype(jnp.bfloat16)

    h = jnp.dot(h, w3_ref[...], preferred_element_type=jnp.float32) + b3_ref[...]
    h = jnp.maximum(h, 0.0).astype(jnp.bfloat16)

    h = jnp.dot(h, w4_ref[...], preferred_element_type=jnp.float32) + b4_ref[...]
    # Fold the 896 -> 784 trim into the store (masked tail vst on 16 lanes).
    o_ref[...] = jnp.tanh(h[:, :OUT_DIM])


@functools.partial(jax.jit, static_argnames=("block_b", "single_buffer_weights"))
def generator_forward(x, params, *, block_b=None, single_buffer_weights=True):
    """x: (B, LATENT_DIM) f32 -> (B, 1, 28, 28) f32.

    `params` are the kernel-ready (padded) weights from `init_params`:
      w1 (128, 256), w2 (256, 512), w3 (512, 1024), w4 (1024, 896) in bf16,
      biases (1, N) in f32.  Weights are (in_features, out_features), i.e.
      transposed vs PyTorch, so each layer is y = x @ W + b.
    """
    w1, b1, w2, b2, w3, b3, w4, b4 = params
    batch, latent = x.shape
    assert latent == LATENT_DIM, latent
    assert w1.shape == (LATENT_PAD, H1) and w4.shape == (H3, OUT_PAD)

    # ---- choose the batch tile (static Python math on static shapes) ----
    if block_b is None:
        block_b = 1024 if batch >= 4096 else 512
    block = _round_up(max(int(block_b), 8), 8)       # sublane-aligned tile
    block = min(block, _round_up(batch, 8))          # don't over-tile tiny batches
    padded_b = _round_up(batch, block)
    # Only split the tile (to get >= 2 grid steps) on multi-TensorCore chips
    # (v7x); on single-TC v5e/v6e the grid is a serial loop and splitting just
    # adds a ~0.35 us grid step and halves the MXU M-tile.
    if (_num_tensorcores() > 1 and padded_b // block == 1
            and block >= 16 and block % 16 == 0):
        block //= 2
        padded_b = _round_up(batch, block)
    grid = padded_b // block

    # ---- pad x: rows to the tile multiple, K 100 -> 128 ----
    x_p = jnp.pad(x.astype(jnp.float32),
                  ((0, padded_b - batch), (0, LATENT_PAD - latent)))

    # Weight / bias blocks are grid-invariant -> request single buffering.
    weight_kwargs = {}
    if single_buffer_weights and hasattr(pl, "Buffered"):
        weight_kwargs = dict(pipeline_mode=pl.Buffered(1))

    def weight_spec(arr):
        return pl.BlockSpec(arr.shape, lambda i: (0, 0), **weight_kwargs)

    # ---- scoped-VMEM budget: weights + double-buffered tiles + temporaries ----
    consts = (w1, b1, w2, b2, w3, b3, w4, b4)
    const_bytes = sum(int(a.size) * a.dtype.itemsize for a in consts)
    const_buf = 1 if weight_kwargs else 2
    tile_bytes = 2 * block * LATENT_PAD * 4 + 2 * block * OUT_DIM * 4   # in/out, 2 bufs
    inter_bytes = block * (H1 + H2 + H3 + OUT_PAD) * (4 + 2)            # f32 + bf16 temps
    vmem_limit = int(1.5 * (const_buf * const_bytes + tile_bytes + inter_bytes)) + (4 << 20)
    vmem_limit = min(max(vmem_limit, 32 << 20), 56 << 20)               # v7x: 64 MiB physical

    cost = pl.CostEstimate(
        flops=2 * padded_b * (LATENT_PAD * H1 + H1 * H2 + H2 * H3 + H3 * OUT_PAD),
        transcendentals=padded_b * OUT_DIM,
        bytes_accessed=padded_b * LATENT_PAD * 4 + padded_b * OUT_DIM * 4 + const_bytes,
    )

    flat = pl.pallas_call(
        _generator_kernel,
        out_shape=jax.ShapeDtypeStruct((padded_b, OUT_DIM), jnp.float32),
        grid_spec=pltpu.PrefetchScalarGridSpec(
            num_scalar_prefetch=0,
            grid=(grid,),
            in_specs=[
                pl.BlockSpec((block, LATENT_PAD), lambda i: (i, 0)),
                weight_spec(w1), weight_spec(b1),
                weight_spec(w2), weight_spec(b2),
                weight_spec(w3), weight_spec(b3),
                weight_spec(w4), weight_spec(b4),
            ],
            # Last block dim 784 == full array dim, so the (8,128) rule holds.
            out_specs=pl.BlockSpec((block, OUT_DIM), lambda i: (i, 0)),
        ),
        compiler_params=pltpu.CompilerParams(
            dimension_semantics=("parallel",),
            vmem_limit_bytes=vmem_limit,
        ),
        cost_estimate=cost,
    )(x_p, w1, b1, w2, b2, w3, b3, w4, b4)

    # Drop padded rows (only when batch % block != 0), then NCHW reshape.
    return flat[:batch].reshape(-1, 1, 28, 28)


def init_params(key):
    """nn.Linear-style uniform(-1/sqrt(fan_in), 1/sqrt(fan_in)) init.

    Returns kernel-ready params: weights are (in_features, out_features),
    zero-padded once (K 100->128 on layer 1, N 784->896 on layer 4) and cast
    to bf16; biases stay f32.
    """
    # TODO(synk): optional v5e/v6e-only int8 per-channel quantization of w3/w4
    # (v7x MXU is bf16/fp8-only, so it is intentionally not done here).
    dims = [
        (LATENT_DIM, H1, LATENT_PAD, H1),
        (H1, H2, H1, H2),
        (H2, H3, H2, H3),
        (H3, OUT_DIM, H3, OUT_PAD),
    ]
    params = []
    for fan_in, fan_out, pad_in, pad_out in dims:
        key, kw, kb = jax.random.split(key, 3)
        bound = float(fan_in) ** -0.5
        w = jax.random.uniform(kw, (fan_in, fan_out), jnp.float32, -bound, bound)
        b = jax.random.uniform(kb, (1, fan_out), jnp.float32, -bound, bound)
        w = jnp.pad(w, ((0, pad_in - fan_in), (0, pad_out - fan_out)))
        b = jnp.pad(b, ((0, 0), (0, pad_out - fan_out)))
        params += [w.astype(jnp.bfloat16), b]
    return tuple(params)


def reference_forward(x, params):
    """Pure-JAX reference mirroring the kernel's numerics (bf16 dot, f32 acc)."""
    w1, b1, w2, b2, w3, b3, w4, b4 = params

    def dot16(a, w):
        return jnp.dot(a.astype(jnp.bfloat16), w.astype(jnp.bfloat16),
                       preferred_element_type=jnp.float32)

    xp = jnp.pad(x.astype(jnp.float32), ((0, 0), (0, LATENT_PAD - x.shape[1])))
    h = jnp.maximum(dot16(xp, w1) + b1, 0.0)
    h = jnp.maximum(dot16(h, w2) + b2, 0.0)
    h = jnp.maximum(dot16(h, w3) + b3, 0.0)
    h = jnp.tanh(dot16(h, w4) + b4)[:, :OUT_DIM]
    return h.reshape(-1, 1, 28, 28)


if __name__ == "__main__":
    key = jax.random.PRNGKey(0)
    key, kx = jax.random.split(key)

    batch = 6  # deliberately not a multiple of 8: exercises the row-padding path
    x = jax.random.normal(kx, (batch, LATENT_DIM), dtype=jnp.float32)
    params = init_params(key)
    ref = reference_forward(x, params)

    try:
        out = generator_forward(x, params)  # single-buffered weight blocks
    except Exception:
        # Fallback only for Pallas versions rejecting pipeline_mode=Buffered(1);
        # correctness checks below still run (and fail) on the fallback output.
        out = generator_forward(x, params, single_buffer_weights=False)
    out = jax.block_until_ready(out)

    assert out.shape == (batch, 1, 28, 28), out.shape
    max_err = float(jnp.max(jnp.abs(out - ref)))
    assert jnp.allclose(out, ref, atol=2e-3, rtol=2e-3), f"mismatch vs reference: {max_err}"
    print("KERNEL_OK")
</pallas_src>

<mosaic_0001>
module attributes {stable_mosaic.version = 11 : i64} {
  func.func @_generator_kernel(%arg0: i32, %arg1: memref<8x128xf32, #tpu.memory_space<vmem>>, %arg2: memref<128x256xbf16, #tpu.memory_space<vmem>>, %arg3: memref<1x256xf32, #tpu.memory_space<vmem>>, %arg4: memref<256x512xbf16, #tpu.memory_space<vmem>>, %arg5: memref<1x512xf32, #tpu.memory_space<vmem>>, %arg6: memref<512x1024xbf16, #tpu.memory_space<vmem>>, %arg7: memref<1x1024xf32, #tpu.memory_space<vmem>>, %arg8: memref<1024x896xbf16, #tpu.memory_space<vmem>>, %arg9: memref<1x896xf32, #tpu.memory_space<vmem>>, %arg10: memref<8x784xf32, #tpu.memory_space<vmem>>) attributes {dimension_semantics = [#tpu.dimension_semantics<parallel>], iteration_bounds = array<i64: 1>, scalar_prefetch = 0 : i64, scratch_operands = 0 : i64, tpu.core_type = #tpu.core_type<tc>, window_params = [{transform_indices = @transform_0, window_bounds = array<i64: 8, 128>}, {pipeline_mode = #tpu.pipeline_mode<synchronous>, transform_indices = @transform_1, window_bounds = array<i64: 128, 256>}, {pipeline_mode = #tpu.pipeline_mode<synchronous>, transform_indices = @transform_2, window_bounds = array<i64: 1, 256>}, {pipeline_mode = #tpu.pipeline_mode<synchronous>, transform_indices = @transform_3, window_bounds = array<i64: 256, 512>}, {pipeline_mode = #tpu.pipeline_mode<synchronous>, transform_indices = @transform_4, window_bounds = array<i64: 1, 512>}, {pipeline_mode = #tpu.pipeline_mode<synchronous>, transform_indices = @transform_5, window_bounds = array<i64: 512, 1024>}, {pipeline_mode = #tpu.pipeline_mode<synchronous>, transform_indices = @transform_6, window_bounds = array<i64: 1, 1024>}, {pipeline_mode = #tpu.pipeline_mode<synchronous>, transform_indices = @transform_7, window_bounds = array<i64: 1024, 896>}, {pipeline_mode = #tpu.pipeline_mode<synchronous>, transform_indices = @transform_8, window_bounds = array<i64: 1, 896>}, {transform_indices = @transform_9, window_bounds = array<i64: 8, 784>}]} {
    %c0 = arith.constant 0 : index
    %c0_0 = arith.constant 0 : index
    %0 = vector.load %arg1[%c0, %c0_0] : memref<8x128xf32, #tpu.memory_space<vmem>>, vector<8x128xf32>
    %1 = arith.truncf %0 : vector<8x128xf32> to vector<8x128xbf16>
    %c0_1 = arith.constant 0 : index
    %c0_2 = arith.constant 0 : index
    %2 = vector.load %arg2[%c0_1, %c0_2] : memref<128x256xbf16, #tpu.memory_space<vmem>>, vector<128x256xbf16>
    %cst = arith.constant dense<0.000000e+00> : vector<8x256xf32>
    %3 = tpu.matmul %1, %2, %cst {dimension_numbers = #tpu.dot_dimension_numbers<[1], [0], [0], [1], [0, 0, 1, 1], [], []>} : vector<8x128xbf16>, vector<128x256xbf16>, vector<8x256xf32> -> vector<8x256xf32>
    %c0_3 = arith.constant 0 : index
    %c0_4 = arith.constant 0 : index
    %4 = vector.load %arg3[%c0_3, %c0_4] : memref<1x256xf32, #tpu.memory_space<vmem>>, vector<1x256xf32>
    %5 = vector.broadcast %4 : vector<1x256xf32> to vector<8x256xf32>
    %6 = arith.addf %3, %5 : vector<8x256xf32>
    %cst_5 = arith.constant 0.000000e+00 : f32
    %7 = vector.broadcast %cst_5 : f32 to vector<8x256xf32>
    %8 = arith.maximumf %6, %7 : vector<8x256xf32>
    %9 = arith.truncf %8 : vector<8x256xf32> to vector<8x256xbf16>
    %c0_6 = arith.constant 0 : index
    %c0_7 = arith.constant 0 : index
    %10 = vector.load %arg4[%c0_6, %c0_7] : memref<256x512xbf16, #tpu.memory_space<vmem>>, vector<256x512xbf16>
    %cst_8 = arith.constant dense<0.000000e+00> : vector<8x512xf32>
    %11 = tpu.matmul %9, %10, %cst_8 {dimension_numbers = #tpu.dot_dimension_numbers<[1], [0], [0], [1], [0, 0, 1, 1], [], []>} : vector<8x256xbf16>, vector<256x512xbf16>, vector<8x512xf32> -> vector<8x512xf32>
    %c0_9 = arith.constant 0 : index
    %c0_10 = arith.constant 0 : index
    %12 = vector.load %arg5[%c0_9, %c0_10] : memref<1x512xf32, #tpu.memory_space<vmem>>, vector<1x512xf32>
    %13 = vector.broadcast %12 : vector<1x512xf32> to vector<8x512xf32>
    %14 = arith.addf %11, %13 : vector<8x512xf32>
    %cst_11 = arith.constant 0.000000e+00 : f32
    %15 = vector.broadcast %cst_11 : f32 to vector<8x512xf32>
    %16 = arith.maximumf %14, %15 : vector<8x512xf32>
    %17 = arith.truncf %16 : vector<8x512xf32> to vector<8x512xbf16>
    %c0_12 = arith.constant 0 : index
    %c0_13 = arith.constant 0 : index
    %18 = vector.load %arg6[%c0_12, %c0_13] : memref<512x1024xbf16, #tpu.memory_space<vmem>>, vector<512x1024xbf16>
    %cst_14 = arith.constant dense<0.000000e+00> : vector<8x1024xf32>
    %19 = tpu.matmul %17, %18, %cst_14 {dimension_numbers = #tpu.dot_dimension_numbers<[1], [0], [0], [1], [0, 0, 1, 1], [], []>} : vector<8x512xbf16>, vector<512x1024xbf16>, vector<8x1024xf32> -> vector<8x1024xf32>
    %c0_15 = arith.constant 0 : index
    %c0_16 = arith.constant 0 : index
    %20 = vector.load %arg7[%c0_15, %c0_16] : memref<1x1024xf32, #tpu.memory_space<vmem>>, vector<1x1024xf32>
    %21 = vector.broadcast %20 : vector<1x1024xf32> to vector<8x1024xf32>
    %22 = arith.addf %19, %21 : vector<8x1024xf32>
    %cst_17 = arith.constant 0.000000e+00 : f32
    %23 = vector.broadcast %cst_17 : f32 to vector<8x1024xf32>
    %24 = arith.maximumf %22, %23 : vector<8x1024xf32>
    %25 = arith.truncf %24 : vector<8x1024xf32> to vector<8x1024xbf16>
    %c0_18 = arith.constant 0 : index
    %c0_19 = arith.constant 0 : index
    %26 = vector.load %arg8[%c0_18, %c0_19] : memref<1024x896xbf16, #tpu.memory_space<vmem>>, vector<1024x896xbf16>
    %cst_20 = arith.constant dense<0.000000e+00> : vector<8x896xf32>
    %27 = tpu.matmul %25, %26, %cst_20 {dimension_numbers = #tpu.dot_dimension_numbers<[1], [0], [0], [1], [0, 0, 1, 1], [], []>} : vector<8x1024xbf16>, vector<1024x896xbf16>, vector<8x896xf32> -> vector<8x896xf32>
    %c0_21 = arith.constant 0 : index
    %c0_22 = arith.constant 0 : index
    %28 = vector.load %arg9[%c0_21, %c0_22] : memref<1x896xf32, #tpu.memory_space<vmem>>, vector<1x896xf32>
    %29 = vector.broadcast %28 : vector<1x896xf32> to vector<8x896xf32>
    %30 = arith.addf %27, %29 : vector<8x896xf32>
    %31 = vector.extract_strided_slice %30 {offsets = [0, 0], sizes = [8, 784], strides = [1, 1]} : vector<8x896xf32> to vector<8x784xf32>
    %32 = math.tanh %31 : vector<8x784xf32>
    %c0_23 = arith.constant 0 : index
    %c0_24 = arith.constant 0 : index
    %33 = vector.load %arg10[%c0_23, %c0_24] : memref<8x784xf32, #tpu.memory_space<vmem>>, vector<8x784xf32>
    tpu.vector_store %arg10[%c0_23, %c0_24], %32 {strides = array<i32>} : memref<8x784xf32, #tpu.memory_space<vmem>>, vector<8x784xf32>,
    return
  }
  func.func @transform_0(%arg0: i32) -> (i32, i32) {
    %c0_i32 = arith.constant 0 : i32
    %c0_i32_0 = arith.constant 0 : i32
    return %arg0, %c0_i32 : i32, i32
  }
  func.func @transform_1(%arg0: i32) -> (i32, i32) {
    %c0_i32 = arith.constant 0 : i32
    %c0_i32_0 = arith.constant 0 : i32
    %c0_i32_1 = arith.constant 0 : i32
    return %c0_i32, %c0_i32_0 : i32, i32
  }
  func.func @transform_2(%arg0: i32) -> (i32, i32) {
    %c0_i32 = arith.constant 0 : i32
    %c0_i32_0 = arith.constant 0 : i32
    %c0_i32_1 = arith.constant 0 : i32
    return %c0_i32, %c0_i32_0 : i32, i32
  }
  func.func @transform_3(%arg0: i32) -> (i32, i32) {
    %c0_i32 = arith.constant 0 : i32
    %c0_i32_0 = arith.constant 0 : i32
    %c0_i32_1 = arith.constant 0 : i32
    return %c0_i32, %c0_i32_0 : i32, i32
  }
  func.func @transform_4(%arg0: i32) -> (i32, i32) {
    %c0_i32 = arith.constant 0 : i32
    %c0_i32_0 = arith.constant 0 : i32
    %c0_i32_1 = arith.constant 0 : i32
    return %c0_i32, %c0_i32_0 : i32, i32
  }
  func.func @transform_5(%arg0: i32) -> (i32, i32) {
    %c0_i32 = arith.constant 0 : i32
    %c0_i32_0 = arith.constant 0 : i32
    %c0_i32_1 = arith.constant 0 : i32
    return %c0_i32, %c0_i32_0 : i32, i32
  }
  func.func @transform_6(%arg0: i32) -> (i32, i32) {
    %c0_i32 = arith.constant 0 : i32
    %c0_i32_0 = arith.constant 0 : i32
    %c0_i32_1 = arith.constant 0 : i32
    return %c0_i32, %c0_i32_0 : i32, i32
  }
  func.func @transform_7(%arg0: i32) -> (i32, i32) {
    %c0_i32 = arith.constant 0 : i32
    %c0_i32_0 = arith.constant 0 : i32
    %c0_i32_1 = arith.constant 0 : i32
    return %c0_i32, %c0_i32_0 : i32, i32
  }
  func.func @transform_8(%arg0: i32) -> (i32, i32) {
    %c0_i32 = arith.constant 0 : i32
    %c0_i32_0 = arith.constant 0 : i32
    %c0_i32_1 = arith.constant 0 : i32
    return %c0_i32, %c0_i32_0 : i32, i32
  }
  func.func @transform_9(%arg0: i32) -> (i32, i32) {
    %c0_i32 = arith.constant 0 : i32
    %c0_i32_0 = arith.constant 0 : i32
    return %arg0, %c0_i32 : i32, i32
  }
}

module attributes {stable_mosaic.version = 11 : i64} {
  func.func @_generator_kernel(%arg0: i32, %arg1: memref<8x128xf32, #tpu.memory_space<vmem>>, %arg2: memref<128x256xbf16, #tpu.memory_space<vmem>>, %arg3: memref<1x256xf32, #tpu.memory_space<vmem>>, %arg4: memref<256x512xbf16, #tpu.memory_space<vmem>>, %arg5: memref<1x512xf32, #tpu.memory_space<vmem>>, %arg6: memref<512x1024xbf16, #tpu.memory_space<vmem>>, %arg7: memref<1x1024xf32, #tpu.memory_space<vmem>>, %arg8: memref<1024x896xbf16, #tpu.memory_space<vmem>>, %arg9: memref<1x896xf32, #tpu.memory_space<vmem>>, %arg10: memref<8x784xf32, #tpu.memory_space<vmem>>) attributes {dimension_semantics = [#tpu.dimension_semantics<parallel>], iteration_bounds = array<i64: 1>, scalar_prefetch = 0 : i64, scratch_operands = 0 : i64, tpu.core_type = #tpu.core_type<tc>, window_params = [{transform_indices = @transform_0, window_bounds = array<i64: 8, 128>}, {pipeline_mode = #tpu.pipeline_mode<synchronous>, transform_indices = @transform_1, window_bounds = array<i64: 128, 256>}, {pipeline_mode = #tpu.pipeline_mode<synchronous>, transform_indices = @transform_2, window_bounds = array<i64: 1, 256>}, {pipeline_mode = #tpu.pipeline_mode<synchronous>, transform_indices = @transform_3, window_bounds = array<i64: 256, 512>}, {pipeline_mode = #tpu.pipeline_mode<synchronous>, transform_indices = @transform_4, window_bounds = array<i64: 1, 512>}, {pipeline_mode = #tpu.pipeline_mode<synchronous>, transform_indices = @transform_5, window_bounds = array<i64: 512, 1024>}, {pipeline_mode = #tpu.pipeline_mode<synchronous>, transform_indices = @transform_6, window_bounds = array<i64: 1, 1024>}, {pipeline_mode = #tpu.pipeline_mode<synchronous>, transform_indices = @transform_7, window_bounds = array<i64: 1024, 896>}, {pipeline_mode = #tpu.pipeline_mode<synchronous>, transform_indices = @transform_8, window_bounds = array<i64: 1, 896>}, {transform_indices = @transform_9, window_bounds = array<i64: 8, 784>}]} {
    %c0 = arith.constant 0 : index
    %c0_0 = arith.constant 0 : index
    %0 = vector.load %arg1[%c0, %c0_0] : memref<8x128xf32, #tpu.memory_space<vmem>>, vector<8x128xf32>
    %1 = arith.truncf %0 : vector<8x128xf32> to vector<8x128xbf16>
    %c0_1 = arith.constant 0 : index
    %c0_2 = arith.constant 0 : index
    %2 = vector.load %arg2[%c0_1, %c0_2] : memref<128x256xbf16, #tpu.memory_space<vmem>>, vector<128x256xbf16>
    %cst = arith.constant dense<0.000000e+00> : vector<8x256xf32>
    %3 = tpu.matmul %1, %2, %cst {dimension_numbers = #tpu.dot_dimension_numbers<[1], [0], [0], [1], [0, 0, 1, 1], [], []>} : vector<8x128xbf16>, vector<128x256xbf16>, vector<8x256xf32> -> vector<8x256xf32>
    %c0_3 = arith.constant 0 : index
    %c0_4 = arith.constant 0 : index
    %4 = vector.load %arg3[%c0_3, %c0_4] : memref<1x256xf32, #tpu.memory_space<vmem>>, vector<1x256xf32>
    %5 = vector.broadcast %4 : vector<1x256xf32> to vector<8x256xf32>
    %6 = arith.addf %3, %5 : vector<8x256xf32>
    %cst_5 = arith.constant 0.000000e+00 : f32
    %7 = vector.broadcast %cst_5 : f32 to vector<8x256xf32>
    %8 = arith.maximumf %6, %7 : vector<8x256xf32>
    %9 = arith.truncf %8 : vector<8x256xf32> to vector<8x256xbf16>
    %c0_6 = arith.constant 0 : index
    %c0_7 = arith.constant 0 : index
    %10 = vector.load %arg4[%c0_6, %c0_7] : memref<256x512xbf16, #tpu.memory_space<vmem>>, vector<256x512xbf16>
    %cst_8 = arith.constant dense<0.000000e+00> : vector<8x512xf32>
    %11 = tpu.matmul %9, %10, %cst_8 {dimension_numbers = #tpu.dot_dimension_numbers<[1], [0], [0], [1], [0, 0, 1, 1], [], []>} : vector<8x256xbf16>, vector<256x512xbf16>, vector<8x512xf32> -> vector<8x512xf32>
    %c0_9 = arith.constant 0 : index
    %c0_10 = arith.constant 0 : index
    %12 = vector.load %arg5[%c0_9, %c0_10] : memref<1x512xf32, #tpu.memory_space<vmem>>, vector<1x512xf32>
    %13 = vector.broadcast %12 : vector<1x512xf32> to vector<8x512xf32>
    %14 = arith.addf %11, %13 : vector<8x512xf32>
    %cst_11 = arith.constant 0.000000e+00 : f32
    %15 = vector.broadcast %cst_11 : f32 to vector<8x512xf32>
    %16 = arith.maximumf %14, %15 : vector<8x512xf32>
    %17 = arith.truncf %16 : vector<8x512xf32> to vector<8x512xbf16>
    %c0_12 = arith.constant 0 : index
    %c0_13 = arith.constant 0 : index
    %18 = vector.load %arg6[%c0_12, %c0_13] : memref<512x1024xbf16, #tpu.memory_space<vmem>>, vector<512x1024xbf16>
    %cst_14 = arith.constant dense<0.000000e+00> : vector<8x1024xf32>
    %19 = tpu.matmul %17, %18, %cst_14 {dimension_numbers = #tpu.dot_dimension_numbers<[1], [0], [0], [1], [0, 0, 1, 1], [], []>} : vector<8x512xbf16>, vector<512x1024xbf16>, vector<8x1024xf32> -> vector<8x1024xf32>
    %c0_15 = arith.constant 0 : index
    %c0_16 = arith.constant 0 : index
    %20 = vector.load %arg7[%c0_15, %c0_16] : memref<1x1024xf32, #tpu.memory_space<vmem>>, vector<1x1024xf32>
    %21 = vector.broadcast %20 : vector<1x1024xf32> to vector<8x1024xf32>
    %22 = arith.addf %19, %21 : vector<8x1024xf32>
    %cst_17 = arith.constant 0.000000e+00 : f32
    %23 = vector.broadcast %cst_17 : f32 to vector<8x1024xf32>
    %24 = arith.maximumf %22, %23 : vector<8x1024xf32>
    %25 = arith.truncf %24 : vector<8x1024xf32> to vector<8x1024xbf16>
    %c0_18 = arith.constant 0 : index
    %c0_19 = arith.constant 0 : index
    %26 = vector.load %arg8[%c0_18, %c0_19] : memref<1024x896xbf16, #tpu.memory_space<vmem>>, vector<1024x896xbf16>
    %cst_20 = arith.constant dense<0.000000e+00> : vector<8x896xf32>
    %27 = tpu.matmul %25, %26, %cst_20 {dimension_numbers = #tpu.dot_dimension_numbers<[1], [0], [0], [1], [0, 0, 1, 1], [], []>} : vector<8x1024xbf16>, vector<1024x896xbf16>, vector<8x896xf32> -> vector<8x896xf32>
    %c0_21 = arith.constant 0 : index
    %c0_22 = arith.constant 0 : index
    %28 = vector.load %arg9[%c0_21, %c0_22] : memref<1x896xf32, #tpu.memory_space<vmem>>, vector<1x896xf32>
    %29 = vector.broadcast %28 : vector<1x896xf32> to vector<8x896xf32>
    %30 = arith.addf %27, %29 : vector<8x896xf32>
    %31 = vector.extract_strided_slice %30 {offsets = [0, 0], sizes = [8, 784], strides = [1, 1]} : vector<8x896xf32> to vector<8x784xf32>
    %32 = math.tanh %31 : vector<8x784xf32>
    %c0_23 = arith.constant 0 : index
    %c0_24 = arith.constant 0 : index
    %33 = vector.load %arg10[%c0_23, %c0_24] : memref<8x784xf32, #tpu.memory_space<vmem>>, vector<8x784xf32>
    tpu.vector_store %arg10[%c0_23, %c0_24], %32 {strides = array<i32>} : memref<8x784xf32, #tpu.memory_space<vmem>>, vector<8x784xf32>,
    return
  }
  func.func @transform_0(%arg0: i32) -> (i32, i32) {
    %c0_i32 = arith.constant 0 : i32
    %c0_i32_0 = arith.constant 0 : i32
    return %arg0, %c0_i32 : i32, i32
  }
  func.func @transform_1(%arg0: i32) -> (i32, i32) {
    %c0_i32 = arith.constant 0 : i32
    %c0_i32_0 = arith.constant 0 : i32
    %c0_i32_1 = arith.constant 0 : i32
    return %c0_i32, %c0_i32_0 : i32, i32
  }
  func.func @transform_2(%arg0: i32) -> (i32, i32) {
    %c0_i32 = arith.constant 0 : i32
    %c0_i32_0 = arith.constant 0 : i32
    %c0_i32_1 = arith.constant 0 : i32
    return %c0_i32, %c0_i32_0 : i32, i32
  }
  func.func @transform_3(%arg0: i32) -> (i32, i32) {
    %c0_i32 = arith.constant 0 : i32
    %c0_i32_0 = arith.constant 0 : i32
    %c0_i32_1 = arith.constant 0 : i32
    return %c0_i32, %c0_i32_0 : i32, i32
  }
  func.func @transform_4(%arg0: i32) -> (i32, i32) {
    %c0_i32 = arith.constant 0 : i32
    %c0_i32_0 = arith.constant 0 : i32
    %c0_i32_1 = arith.constant 0 : i32
    return %c0_i32, %c0_i32_0 : i32, i32
  }
  func.func @transform_5(%arg0: i32) -> (i32, i32) {
    %c0_i32 = arith.constant 0 : i32
    %c0_i32_0 = arith.constant 0 : i32
    %c0_i32_1 = arith.constant 0 : i32
    return %c0_i32, %c0_i32_0 : i32, i32
  }
  func.func @transform_6(%arg0: i32) -> (i32, i32) {
    %c0_i32 = arith.constant 0 : i32
    %c0_i32_0 = arith.constant 0 : i32
    %c0_i32_1 = arith.constant 0 : i32
    return %c0_i32, %c0_i32_0 : i32, i32
  }
  func.func @transform_7(%arg0: i32) -> (i32, i32) {
    %c0_i32 = arith.constant 0 : i32
    %c0_i32_0 = arith.constant 0 : i32
    %c0_i32_1 = arith.constant 0 : i32
    return %c0_i32, %c0_i32_0 : i32, i32
  }
  func.func @transform_8(%arg0: i32) -> (i32, i32) {
    %c0_i32 = arith.constant 0 : i32
    %c0_i32_0 = arith.constant 0 : i32
    %c0_i32_1 = arith.constant 0 : i32
    return %c0_i32, %c0_i32_0 : i32, i32
  }
  func.func @transform_9(%arg0: i32) -> (i32, i32) {
    %c0_i32 = arith.constant 0 : i32
    %c0_i32_0 = arith.constant 0 : i32
    return %arg0, %c0_i32 : i32, i32
  }
}

</mosaic_0001>

<bundles_post_ra>
// kernel: generator_forward.1
= control target key start
LH: loop header
LB: loop body
LE: loop exit
PB: predicated region body
PF: predicated region fallthrough
CT: control target
= control target key end

     0   :  { %14 = vsyncpa [#allocation3], 0  ;;  %s8358_s0 = inlined_call_operand.vmem [shape: f32[8,128], index: 0, kind: input, shape index: {}]   ;;  %s8359_s1 = inlined_call_operand.hbm [shape: bf16[128,256], index: 1, kind: input, shape index: {}]   ;;  %s8360_s2 = inlined_call_operand.hbm [shape: f32[1,256], index: 2, kind: input, shape index: {}]   ;;  %s8361_s3 = inlined_call_operand.hbm [shape: bf16[256,512], index: 3, kind: input, shape index: {}]   ;;  %s8362_s4 = inlined_call_operand.hbm [shape: f32[1,512], index: 4, kind: input, shape index: {}]   ;;  %s8363_s5 = inlined_call_operand.hbm [shape: bf16[512,1024], index: 5, kind: input, shape index: {}]   ;;  %s8364_s6 = inlined_call_operand.hbm [shape: f32[1,1024], index: 6, kind: input, shape index: {}]   ;;  %s8365_s7 = inlined_call_operand.hbm [shape: bf16[1024,896], index: 7, kind: input, shape index: {}]   ;;  %s8366_s8 = inlined_call_operand.hbm [shape: f32[1,896], index: 8, kind: input, shape index: {}]   ;;  %s8367_s9 = inlined_call_operand.vmem [shape: f32[8,784], index: 9, kind: output, shape index: {}]  }
   0x1   :  { %15 = vsyncpa [#allocation5], 0 }
   0x2   :  { %16 = vsyncpa [#allocation8], 0 }
   0x3   :  { %17 = vsyncpa [#allocation11], 0 }
   0x4   :  { %18 = vsyncpa [#allocation14], 0  ;;  %s8070_s30 = smov [#allocation4]   ;;  %s8071_s11 = smov [#allocation7]  }
   0x5   :  { %s39_s10 = sshll.u32 %s8070_s30, 4  ;;  %s61_s12 = sshll.u32 %s8071_s11, 4  ;;  %s40_s10 = int_to_ptr.vmem [resolvable:$true] %s39_s10  ;;  %s62_s12 = int_to_ptr.vmem [resolvable:$true] %s61_s12 }
   0x6   :  { %s7908_s13 = scalar_lea.vmem %s40_s10, 32  ;;  %p7913_p1 = scmp.lt.s32.totalorder %s40_s10, %s40_s10 }
   0x7   :  { %p7909_p0 = scmp.ne.s32.totalorder %s40_s10, %s7908_s13  ;;  %p7914_p2 = scmp.lt.s32.totalorder %s7908_s13, %s7908_s13 }
   0x9   :  { %p7915_p3 = por %p7914_p2, %p7913_p1 }
   0xb   :  { %p7916_p4 = pnand %p7915_p3, %p7909_p0 }
   0xd   :  { %7919 = shalt.err (!%p7916_p4)
}
   0xe   :  { %42 = dma.hbm_to_vmem [thread:$0]  %s8360_s2, 32, %s40_s10, [#allocation5]  }
   0xf   :  { %s7928_s16 = scalar_lea.vmem %s62_s12, 64  ;;  %p7933_p6 = scmp.lt.s32.totalorder %s62_s12, %s62_s12 }
  0x10   :  { %p7929_p5 = scmp.ne.s32.totalorder %s62_s12, %s7928_s16  ;;  %p7934_p7 = scmp.lt.s32.totalorder %s7928_s16, %s7928_s16 }
  0x12   :  { %p7935_p8 = por %p7934_p7, %p7933_p6 }
  0x14   :  { %p7936_p9 = pnand %p7935_p8, %p7929_p5 }
  0x16   :  { %7939 = shalt.err (!%p7936_p9)
}
  0x17   :  { %64 = dma.hbm_to_vmem [thread:$0]  %s8362_s4, 64, %s62_s12, [#allocation8]  }
  0x18   :  { %s8072_s19 = smov [#allocation10]   ;;  %s8073_s21 = smov [#allocation2]  }
  0x19   :  { %s83_s20 = sshll.u32 %s8072_s19, 4  ;;  %s26_s22 = sshll.u32 %s8073_s21, 4  ;;  %s84_s20 = int_to_ptr.vmem [resolvable:$true] %s83_s20  ;;  %s27_s22 = int_to_ptr.vmem [resolvable:$true] %s26_s22 }
  0x1a   :  { %s7948_s23 = scalar_lea.vmem %s84_s20, 128  ;;  %p7953_p11 = scmp.lt.s32.totalorder %s84_s20, %s84_s20 }
  0x1b   :  { %p7949_p10 = scmp.ne.s32.totalorder %s84_s20, %s7948_s23  ;;  %p7954_p12 = scmp.lt.s32.totalorder %s7948_s23, %s7948_s23 }
  0x1d   :  { %p7955_p13 = por %p7954_p12, %p7953_p11 }
  0x1f   :  { %p7956_p0 = pnand %p7955_p13, %p7949_p10 }
  0x21   :  { %7959 = shalt.err (!%p7956_p0)
}
  0x22   :  { %86 = dma.hbm_to_vmem [thread:$0]  %s8364_s6, 128, %s84_s20, [#allocation11]  }
  0x23   :  { %s7968_s25 = scalar_lea.vmem %s27_s22, 2048  ;;  %p7973_p2 = scmp.lt.s32.totalorder %s27_s22, %s27_s22 }
  0x24   :  { %p7969_p1 = scmp.ne.s32.totalorder %s27_s22, %s7968_s25  ;;  %p7974_p3 = scmp.lt.s32.totalorder %s7968_s25, %s7968_s25 }
  0x26   :  { %p7975_p4 = por %p7974_p3, %p7973_p2 }
  0x28   :  { %p7976_p5 = pnand %p7975_p4, %p7969_p1 }
  0x2a   :  { %7979 = shalt.err (!%p7976_p5)
}
  0x2b   :  { %s8074_s4 = smov 128   ;;  %s8075_s26 = smov 8  }
  0x2c   :  { %32 = dma.hbm_to_vmem [thread:$0]  %s8359_s1, 2048, %s27_s22, [#allocation3], %s8074_s4, %s8074_s4, %s8075_s26  }
  0x2d   :  { %s8076_s29 = smov [#allocation6]  }
  0x2e   :  { %s48_s30 = sshll.u32 %s8076_s29, 4  ;;  %s49_s30 = int_to_ptr.vmem [resolvable:$true] %s48_s30 }
  0x2f   :  { %s7988_s10 = scalar_lea.vmem %s49_s30, 8192  ;;  %p7993_p7 = scmp.lt.s32.totalorder %s49_s30, %s49_s30 }
  0x30   :  { %p7989_p6 = scmp.ne.s32.totalorder %s49_s30, %s7988_s10  ;;  %p7994_p8 = scmp.lt.s32.totalorder %s7988_s10, %s7988_s10 }
  0x32   :  { %p7995_p9 = por %p7994_p8, %p7993_p7 }
  0x34   :  { %p7996_p10 = pnand %p7995_p9, %p7989_p6 }
  0x36   :  { %7999 = shalt.err (!%p7996_p10)
}
  0x37   :  { %s8077_s6 = smov 256   ;;  %s8078_s11 = smov 16  }
  0x38   :  { %54 = dma.hbm_to_vmem [thread:$0]  %s8361_s3, 8192, %s49_s30, [#allocation5], %s8077_s6, %s8077_s6, %s8078_s11  }
  0x39   :  { %s8079_s14 = smov [#allocation9]  }
  0x3a   :  { %s70_s15 = sshll.u32 %s8079_s14, 4  ;;  %s71_s15 = int_to_ptr.vmem [resolvable:$true] %s70_s15 }
  0x3b   :  { %s8008_s1 = scalar_lea.vmem %s71_s15, 32768  ;;  %p8013_p12 = scmp.lt.s32.totalorder %s71_s15, %s71_s15 }
  0x3c   :  { %p8009_p11 = scmp.ne.s32.totalorder %s71_s15, %s8008_s1  ;;  %p8014_p13 = scmp.lt.s32.totalorder %s8008_s1, %s8008_s1 }
  0x3e   :  { %p8015_p0 = por %p8014_p13, %p8013_p12 }
  0x40   :  { %p8016_p1 = pnand %p8015_p0, %p8009_p11 }
  0x42   :  { %8019 = shalt.err (!%p8016_p1)
}
  0x43   :  { %s8080_s16 = smov 512   ;;  %s8081_s17 = smov 32  }
  0x44   :  { %76 = dma.hbm_to_vmem [thread:$0]  %s8363_s5, 32768, %s71_s15, [#allocation8], %s8080_s16, %s8080_s16, %s8081_s17  }
  0x45   :  { %s8082_s20 = smov [#allocation12]  }
  0x46   :  { %s92_s21 = sshll.u32 %s8082_s20, 4  ;;  %s93_s21 = int_to_ptr.vmem [resolvable:$true] %s92_s21 }
  0x47   :  { %s8028_s3 = scalar_lea.vmem %s93_s21, 57344  ;;  %p8033_p3 = scmp.lt.s32.totalorder %s93_s21, %s93_s21 }
  0x48   :  { %p8029_p2 = scmp.ne.s32.totalorder %s93_s21, %s8028_s3  ;;  %p8034_p4 = scmp.lt.s32.totalorder %s8028_s3, %s8028_s3 }
  0x4a   :  { %p8035_p5 = por %p8034_p4, %p8033_p3 }
  0x4c   :  { %p8036_p6 = pnand %p8035_p5, %p8029_p2 }
  0x4e   :  { %8039 = shalt.err (!%p8036_p6)
}
  0x4f   :  { %s8083_s22 = smov 448   ;;  %s8084_s23 = smov 28  }
  0x50   :  { %98 = dma.hbm_to_vmem [thread:$0]  %s8365_s7, 57344, %s93_s21, [#allocation11], %s8083_s22, %s8083_s22, %s8084_s23  }
  0x51   :  { %s8085_s25 = smov [#allocation13]  }
  0x52   :  { %s105_s4 = sshll.u32 %s8085_s25, 4  ;;  %s106_s4 = int_to_ptr.vmem [resolvable:$true] %s105_s4 }
  0x53   :  { %s8048_s5 = scalar_lea.vmem %s106_s4, 112  ;;  %s8052_s26 = scalar_lea.vmem %s106_s4, 128 }
  0x54   :  { %p8049_p7 = scmp.ne.s32.totalorder %s106_s4, %s8048_s5  ;;  %p8053_p8 = scmp.lt.s32.totalorder %s106_s4, %s106_s4 }
  0x55   :  { %p8054_p9 = scmp.lt.s32.totalorder %s8052_s26, %s8048_s5 }
  0x57   :  { %p8055_p10 = por %p8054_p9, %p8053_p8 }
  0x59   :  { %p8056_p11 = pnand %p8055_p10, %p8049_p7 }
  0x5b   :  { %8059 = shalt.err (!%p8056_p11)
}
  0x5c   :  { %108 = dma.hbm_to_vmem [thread:$0]  %s8366_s8, 112, %s106_s4, [#allocation14]  }
  0x5d   :  { %8060 = dma.done.wait [#allocation3], 2048  }
  0x5e   :  { %8061 = vsyncadd [#allocation3], 4294965248 }
  0x5f   :  { %8062 = dma.done.wait [#allocation5], 8224  }
  0x60   :  { %8063 = vsyncadd [#allocation5], 4294959072 }
  0x61   :  { %8064 = dma.done.wait [#allocation8], 32832  }
  0x62   :  { %8065 = vsyncadd [#allocation8], 4294934464 }
  0x63   :  { %8066 = dma.done.wait [#allocation11], 57472  }
  0x64   :  { %8067 = vsyncadd [#allocation11], 4294909824 }
  0x65   :  { %8068 = dma.done.wait [#allocation14], 112  }
  0x66   :  { %8069 = vsyncadd [#allocation14], 4294967184  ;;  %v8086_v0 = vmov 0   ;;  %v7125_v1 = vld [vmem:[#allocation2 + $0x74] ss:$8 sps:$4 sm:$0xff]   ;;  %v134_v26 = vld [vmem:[%s8358_s0] sm:$0xff] }
  0x67   :  { %276 = vmatprep.mubr.bf16.mxu0 %v8086_v0  ;;  %v7127_v2 = vld [vmem:[#allocation2 + $0x70] ss:$8 sps:$4 sm:$0xff]   ;;  %244 = vmatprep.subr.bf16.mxu0 %v7125_v1  ;;  %v7128_v3 = vld [vmem:[#allocation2 + $0x64] ss:$8 sps:$4 sm:$0xff]   ;;  %v7130_v4 = vld [vmem:[#allocation2 + $0x60] ss:$8 sps:$4 sm:$0xff]   ;;  %v135_v30 = vpack.c.bf16 %v134_v26, %v134_v26 }
  0x68   :  { %245 = vmatpush1.bf16.msra.mxu0 %v7127_v2  ;;  %v7131_v5 = vld [vmem:[#allocation2 + $0x54] ss:$8 sps:$4 sm:$0xff]   ;;  %v7133_v6 = vld [vmem:[#allocation2 + $0x50] ss:$8 sps:$4 sm:$0xff]   ;;  %v7134_v7 = vld [vmem:[#allocation2 + $0x44] ss:$8 sps:$4 sm:$0xff]  }
  0x69   :  { %246 = vmatprep.subr.bf16.mxu0 %v7128_v3  ;;  %v7136_v8 = vld [vmem:[#allocation2 + $0x40] ss:$8 sps:$4 sm:$0xff]   ;;  %v7137_v10 = vld [vmem:[#allocation2 + $0x34] ss:$8 sps:$4 sm:$0xff]   ;;  %v7139_v13 = vld [vmem:[#allocation2 + $0x30] ss:$8 sps:$4 sm:$0xff]  }
  0x6a   :  { %v7149_v9 = vld [vmem:[#allocation6 + $0xe4] ss:$16 sps:$4 sm:$0xff]   ;;  %v7154_v11 = vld [vmem:[#allocation6 + $0xe0] ss:$16 sps:$4 sm:$0xff]   ;;  %v7153_v27 = vld [vmem:[#allocation6 + $0xec] ss:$16 sps:$4 sm:$0xff]  }
  0x6b   :  { %695 = vmatprep.subr.bf16.mxu1 %v7149_v9  ;;  %v7155_v12 = vld [vmem:[#allocation6 + $0xc4] ss:$16 sps:$4 sm:$0xff]   ;;  %v7160_v15 = vld [vmem:[#allocation6 + $0xc0] ss:$16 sps:$4 sm:$0xff]   ;;  %v7151_v31 = vld [vmem:[#allocation6 + $0xe8] ss:$16 sps:$4 sm:$0xff]  }
  0x6c   :  { %247 = vmatpush1.bf16.msra.mxu0 %v7130_v4  ;;  %v7140_v14 = vld [vmem:[#allocation2 + $0x24] ss:$8 sps:$4 sm:$0xff]   ;;  %696 = vmatpush1.bf16.msra.mxu1 %v7154_v11  ;;  %v7142_v17 = vld [vmem:[#allocation2 + $0x20] ss:$8 sps:$4 sm:$0xff]   ;;  %v7143_v18 = vld [vmem:[#allocation2 + $0x14] ss:$8 sps:$4 sm:$0xff]  }
  0x6d   :  { %248 = vmatprep.subr.bf16.mxu0 %v7131_v5  ;;  %697 = vmatprep.subr.bf16.mxu1 %v7155_v12  ;;  %v7161_v16 = vld [vmem:[#allocation6 + $0xa4] ss:$16 sps:$4 sm:$0xff]   ;;  %v7166_v19 = vld [vmem:[#allocation6 + $0xa0] ss:$16 sps:$4 sm:$0xff]   ;;  %v7159_v32 = vld [vmem:[#allocation6 + $0xcc] ss:$16 sps:$4 sm:$0xff]  }
  0x6e   :  { %v7167_v20 = vld [vmem:[#allocation6 + $0x84] ss:$16 sps:$4 sm:$0xff]   ;;  %v7172_v23 = vld [vmem:[#allocation6 + $0x80] ss:$16 sps:$4 sm:$0xff]   ;;  %v7157_v35 = vld [vmem:[#allocation6 + $0xc8] ss:$16 sps:$4 sm:$0xff]  }
  0x6f   :  { %v7145_v21 = vld [vmem:[#allocation2 + $0x10] ss:$8 sps:$4 sm:$0xff]   ;;  %v7146_v22 = vld [vmem:[#allocation2 + $0x4] ss:$8 sps:$4 sm:$0xff]   ;;  %v7148_v25 = vld [vmem:[#allocation2] ss:$8 sps:$4 sm:$0xff]  }
  0x70   :  { %249 = vmatpush1.bf16.msra.mxu0 %v7133_v6  ;;  %698 = vmatpush1.bf16.msra.mxu1 %v7160_v15  ;;  %v7173_v24 = vld [vmem:[#allocation6 + $0x64] ss:$16 sps:$4 sm:$0xff]   ;;  %v7178_v28 = vld [vmem:[#allocation6 + $0x60] ss:$16 sps:$4 sm:$0xff]   ;;  %v7165_v36 = vld [vmem:[#allocation6 + $0xac] ss:$16 sps:$4 sm:$0xff]  }
  0x71   :  { %250 = vmatprep.subr.bf16.mxu0 %v7134_v7  ;;  %699 = vmatprep.subr.bf16.mxu1 %v7161_v16  ;;  %v7179_v29 = vld [vmem:[#allocation6 + $0x44] ss:$16 sps:$4 sm:$0xff]   ;;  %v7184_v33 = vld [vmem:[#allocation6 + $0x40] ss:$16 sps:$4 sm:$0xff]   ;;  %v7163_v39 = vld [vmem:[#allocation6 + $0xa8] ss:$16 sps:$4 sm:$0xff]  }
  0x72   :  { %v7185_v34 = vld [vmem:[#allocation6 + $0x24] ss:$16 sps:$4 sm:$0xff]   ;;  %v7190_v37 = vld [vmem:[#allocation6 + $0x20] ss:$16 sps:$4 sm:$0xff]   ;;  %v7171_v40 = vld [vmem:[#allocation6 + $0x8c] ss:$16 sps:$4 sm:$0xff]  }
  0x73   :  { %v7191_v38 = vld [vmem:[#allocation6 + $0x4] ss:$16 sps:$4 sm:$0xff]   ;;  %v7196_v41 = vld [vmem:[#allocation6] ss:$16 sps:$4 sm:$0xff]   ;;  %v7169_v43 = vld [vmem:[#allocation6 + $0x88] ss:$16 sps:$4 sm:$0xff]  }
  0x74   :  { %251 = vmatpush1.bf16.msra.mxu0 %v7136_v8  ;;  %700 = vmatpush1.bf16.msra.mxu1 %v7166_v19  ;;  %v7197_v42 = vld [vmem:[#allocation6 + $0x1e4] ss:$16 sps:$4 sm:$0xff]   ;;  %v7177_v44 = vld [vmem:[#allocation6 + $0x6c] ss:$16 sps:$4 sm:$0xff]   ;;  %v7202_v45 = vld [vmem:[#allocation6 + $0x1e0] ss:$16 sps:$4 sm:$0xff]  }
  0x75   :  { %252 = vmatprep.subr.bf16.mxu0 %v7137_v10  ;;  %701 = vmatprep.subr.bf16.mxu1 %v7167_v20  ;;  %v7203_v46 = vld [vmem:[#allocation6 + $0x1c4] ss:$16 sps:$4 sm:$0xff]   ;;  %v7175_v47 = vld [vmem:[#allocation6 + $0x68] ss:$16 sps:$4 sm:$0xff]   ;;  %v7208_v48 = vld [vmem:[#allocation6 + $0x1c0] ss:$16 sps:$4 sm:$0xff]  }
  0x76   :  { %v7183_v49 = vld [vmem:[#allocation6 + $0x4c] ss:$16 sps:$4 sm:$0xff]   ;;  %v7209_v50 = vld [vmem:[#allocation6 + $0x1a4] ss:$16 sps:$4 sm:$0xff]   ;;  %v7181_v51 = vld [vmem:[#allocation6 + $0x48] ss:$16 sps:$4 sm:$0xff]  }
  0x77   :  { %v7214_v52 = vld [vmem:[#allocation6 + $0x1a0] ss:$16 sps:$4 sm:$0xff]   ;;  %v7189_v53 = vld [vmem:[#allocation6 + $0x2c] ss:$16 sps:$4 sm:$0xff]   ;;  %v7215_v54 = vld [vmem:[#allocation6 + $0x184] ss:$16 sps:$4 sm:$0xff]  }
  0x78   :  { %253 = vmatpush1.bf16.msra.mxu0 %v7139_v13  ;;  %702 = vmatpush1.bf16.msra.mxu1 %v7172_v23  ;;  %v7187_v55 = vld [vmem:[#allocation6 + $0x28] ss:$16 sps:$4 sm:$0xff]   ;;  %v7220_v56 = vld [vmem:[#allocation6 + $0x180] ss:$16 sps:$4 sm:$0xff]   ;;  %v7195_v57 = vld [vmem:[#allocation6 + $0xc] ss:$16 sps:$4 sm:$0xff]  }
  0x79   :  { %254 = vmatprep.subr.bf16.mxu0 %v7140_v14  ;;  %703 = vmatprep.subr.bf16.mxu1 %v7173_v24  ;;  %v7221_v58 = vld [vmem:[#allocation6 + $0x164] ss:$16 sps:$4 sm:$0xff]   ;;  %v7193_v59 = vld [vmem:[#allocation6 + $0x8] ss:$16 sps:$4 sm:$0xff]   ;;  %v7226_v60 = vld [vmem:[#allocation6 + $0x160] ss:$16 sps:$4 sm:$0xff]  }
  0x7a   :  { %v7201_v61 = vld [vmem:[#allocation6 + $0x1ec] ss:$16 sps:$4 sm:$0xff]   ;;  %v7227_v62 = vld [vmem:[#allocation6 + $0x144] ss:$16 sps:$4 sm:$0xff]   ;;  %v7199_v63 = vld [vmem:[#allocation6 + $0x1e8] ss:$16 sps:$4 sm:$0xff]  }
  0x7b   :  { %v7232_v0 = vld [vmem:[#allocation6 + $0x140] ss:$16 sps:$4 sm:$0xff]   ;;  %v7207_v1 = vld [vmem:[#allocation6 + $0x1cc] ss:$16 sps:$4 sm:$0xff]   ;;  %v7205_v2 = vld [vmem:[#allocation6 + $0x1c8] ss:$16 sps:$4 sm:$0xff]  }
  0x7c   :  { %255 = vmatpush1.bf16.msra.mxu0 %v7142_v17  ;;  %704 = vmatpush1.bf16.msra.mxu1 %v7178_v28  ;;  %v7213_v3 = vld [vmem:[#allocation6 + $0x1ac] ss:$16 sps:$4 sm:$0xff]   ;;  %v7211_v4 = vld [vmem:[#allocation6 + $0x1a8] ss:$16 sps:$4 sm:$0xff]   ;;  %v7233_v11 = vld [vmem:[#allocation6 + $0x124] ss:$16 sps:$4 sm:$0xff]  }
  0x7d   :  { %256 = vmatprep.subr.bf16.mxu0 %v7143_v18  ;;  %705 = vmatprep.subr.bf16.mxu1 %v7179_v29  ;;  %v7219_v5 = vld [vmem:[#allocation6 + $0x18c] ss:$16 sps:$4 sm:$0xff]   ;;  %v7217_v6 = vld [vmem:[#allocation6 + $0x188] ss:$16 sps:$4 sm:$0xff]   ;;  %v7238_v14 = vld [vmem:[#allocation6 + $0x120] ss:$16 sps:$4 sm:$0xff]  }
  0x7e   :  { %v7225_v7 = vld [vmem:[#allocation6 + $0x16c] ss:$16 sps:$4 sm:$0xff]   ;;  %v7223_v8 = vld [vmem:[#allocation6 + $0x168] ss:$16 sps:$4 sm:$0xff]   ;;  %v7239_v15 = vld [vmem:[#allocation6 + $0x104] ss:$16 sps:$4 sm:$0xff]  }
  0x7f   :  { %v7231_v9 = vld [vmem:[#allocation6 + $0x14c] ss:$16 sps:$4 sm:$0xff]   ;;  %v7229_v10 = vld [vmem:[#allocation6 + $0x148] ss:$16 sps:$4 sm:$0xff]   ;;  %v7244_v18 = vld [vmem:[#allocation6 + $0x100] ss:$16 sps:$4 sm:$0xff]  }
  0x80   :  { %257 = vmatpush1.bf16.msra.mxu0 %v7145_v21  ;;  %706 = vmatpush1.bf16.msra.mxu1 %v7184_v33  ;;  %v7237_v12 = vld [vmem:[#allocation6 + $0x12c] ss:$16 sps:$4 sm:$0xff]   ;;  %v7235_v13 = vld [vmem:[#allocation6 + $0x128] ss:$16 sps:$4 sm:$0xff]   ;;  %vm6225_vm0 = vcmask 130048  }
  0x81   :  { %258 = vmatprep.subr.bf16.mxu0 %v7146_v22  ;;  %707 = vmatprep.subr.bf16.mxu1 %v7185_v34  ;;  %v7243_v16 = vld [vmem:[#allocation6 + $0x10c] ss:$16 sps:$4 sm:$0xff]   ;;  %v7241_v17 = vld [vmem:[#allocation6 + $0x108] ss:$16 sps:$4 sm:$0xff]  }
  0x82   :  { %v841_v19 = vld [vmem:[#allocation9 + $0x1c0] sm:$0xff]  ;;  %v152_v29 = vld [vmem:[#allocation4] sm:$0x3] }
  0x83   :  { %v845_v20 = vld [vmem:[#allocation9 + $0x1e0] sm:$0xff] }
  0x84   :  { %259 = vmatpush1.bf16.msra.mxu0 %v7148_v25  ;;  %708 = vmatpush1.bf16.msra.mxu1 %v7190_v37  ;;  %v969_v21 = vld [vmem:[#allocation9 + $0x5c0] sm:$0xff]  ;;  %v6372_v22 = vcombine.low %v841_v19, %v845_v20  ;;  %v6373_v23 = vcombine.high %v841_v19, %v845_v20 }
  0x85   :  { %736 = vmatprep.subr.bf16.mxu0 %v7153_v27  ;;  %709 = vmatprep.subr.bf16.mxu1 %v7191_v38  ;;  %v973_v24 = vld [vmem:[#allocation9 + $0x5e0] sm:$0xff]  ;;  %v154_v27 = vlaneseq }
  0x86   :  { %v6500_v25 = vcombine.low %v969_v21, %v973_v24  ;;  %v6501_v26 = vcombine.high %v969_v21, %v973_v24  ;;  %v797_v19 = vld [vmem:[#allocation9 + $0x60] sm:$0xff] }
  0x87   :  { %277 = vmatmul.mubr.bf16.vlgmr.msra.gmra.mxu0 %v135_v30  ;;  %v8164_v28 = vshrl.u32 %v154_v27, 7  ;;  %v921_v20 = vld [vmem:[#allocation9 + $0x440] sm:$0xff] }
  0x88   :  { %737 = vmatpush1.bf16.msra.mxu0 %v7151_v31  ;;  %710 = vmatpush1.bf16.msra.mxu1 %v7196_v41  ;;  %v961_v41 = vld [vmem:[#allocation9 + $0x580] sm:$0xff] }
  0x89   :  { %738 = vmatprep.subr.bf16.mxu0 %v7159_v32  ;;  %711 = vmatprep.subr.bf16.mxu1 %v7197_v42  ;;  %v8167_v30 = vsub.s32 0, %v8164_v28  ;;  %v8170_v31 = vsub.s32 1, %v8164_v28  ;;  %v925_v21 = vld [vmem:[#allocation9 + $0x460] sm:$0xff] }
  0x8a   :  { %v789_v27 = vld [vmem:[#allocation9 + $0x20] sm:$0xff] }
  0x8b   :  { %v157_v32 = vrot.slane %v152_v29, %v8167_v30  ;;  %v161_v33 = vrot.slane %v152_v29, %v8170_v31  ;;  %v913_v29 = vld [vmem:[#allocation9 + $0x400] sm:$0xff] }
  0x8c   :  { %739 = vmatpush1.bf16.msra.mxu0 %v7157_v35  ;;  %712 = vmatpush2.bf16.msra.mxu1 %v7202_v45 }
  0x8d   :  { %740 = vmatprep.subr.bf16.mxu0 %v7165_v36  ;;  %713 = vmatprep.subr.bf16.mxu1 %v7203_v46 }
  0x90   :  { %741 = vmatpush1.bf16.msra.mxu0 %v7163_v39  ;;  %714 = vmatpush2.bf16.msra.mxu1 %v7208_v48  ;;  %v833_v39 = vld [vmem:[#allocation9 + $0x180] sm:$0xff] }
  0x91   :  { %742 = vmatprep.subr.bf16.mxu0 %v7171_v40  ;;  %715 = vmatprep.subr.bf16.mxu1 %v7209_v50  ;;  %v837_v40 = vld [vmem:[#allocation9 + $0x1a0] sm:$0xff] }
  0x92   :  { %v829_v48 = vld [vmem:[#allocation9 + $0x160] sm:$0xff] }
  0x93   :  { %v957_v50 = vld [vmem:[#allocation9 + $0x560] sm:$0xff] }
  0x94   :  { %743 = vmatpush1.bf16.msra.mxu0 %v7169_v43  ;;  %716 = vmatpush2.bf16.msra.mxu1 %v7214_v52  ;;  %v6365_v52 = vcombine.high %v833_v39, %v837_v40 }
  0x95   :  { %744 = vmatprep.subr.bf16.mxu0 %v7177_v44  ;;  %717 = vmatprep.subr.bf16.mxu1 %v7215_v54  ;;  %v965_v44 = vld [vmem:[#allocation9 + $0x5a0] sm:$0xff]  ;;  %v6364_v54 = vcombine.low %v833_v39, %v837_v40 }
  0x96   :  { %v1033_v39 = vld [vmem:[#allocation9 + $0x7c0] sm:$0xff] }
  0x97   :  { %v1037_v40 = vld [vmem:[#allocation9 + $0x7e0] sm:$0xff] }
  0x98   :  { %745 = vmatpush1.bf16.msra.mxu0 %v7175_v47  ;;  %718 = vmatpush2.bf16.msra.mxu1 %v7220_v56  ;;  %v825_v47 = vld [vmem:[#allocation9 + $0x140] sm:$0xff] }
  0x99   :  { %746 = vmatprep.subr.bf16.mxu0 %v7183_v49  ;;  %719 = vmatprep.subr.bf16.mxu1 %v7221_v58  ;;  %v953_v49 = vld [vmem:[#allocation9 + $0x540] sm:$0xff] }
  0x9a   :  { %v817_v56 = vld [vmem:[#allocation9 + $0x100] sm:$0xff] }
  0x9b   :  { %v945_v58 = vld [vmem:[#allocation9 + $0x500] sm:$0xff] }
  0x9c   :  { %747 = vmatpush1.bf16.msra.mxu0 %v7181_v51  ;;  %720 = vmatpush2.bf16.msra.mxu1 %v7226_v60  ;;  %v6357_v60 = vcombine.high %v825_v47, %v829_v48 }
  0x9d   :  { %748 = vmatprep.subr.bf16.mxu0 %v7189_v53  ;;  %721 = vmatprep.subr.bf16.mxu1 %v7227_v62  ;;  %v6493_v53 = vcombine.high %v961_v41, %v965_v44  ;;  %v6356_v62 = vcombine.low %v825_v47, %v829_v48  ;;  %v1025_v47 = vld [vmem:[#allocation9 + $0x780] sm:$0xff] }
  0x9e   :  { %v1029_v48 = vld [vmem:[#allocation9 + $0x7a0] sm:$0xff] }
  0xa0   :  { %749 = vmatpush1.bf16.msra.mxu0 %v7187_v55  ;;  %722 = vmatpush2.bf16.msra.mxu1 %v7232_v0  ;;  %v6492_v55 = vcombine.low %v961_v41, %v965_v44  ;;  %v809_v0 = vld [vmem:[#allocation9 + $0xc0] sm:$0xff]  ;;  %v6565_v44 = vcombine.high %v1033_v39, %v1037_v40 }
  0xa1   :  { %750 = vmatprep.subr.bf16.mxu0 %v7195_v57  ;;  %723 = vmatprep.subr.bf16.mxu1 %v7233_v11  ;;  %v821_v57 = vld [vmem:[#allocation9 + $0x120] sm:$0xff] }
  0xa2   :  { %v805_v11 = vld [vmem:[#allocation9 + $0xa0] sm:$0xff] }
  0xa4   :  { %751 = vmatpush1.bf16.msra.mxu0 %v7193_v59  ;;  %724 = vmatpush2.bf16.msra.mxu1 %v7238_v14  ;;  %v949_v59 = vld [vmem:[#allocation9 + $0x520] sm:$0xff] }
  0xa5   :  { %752 = vmatprep.subr.bf16.mxu0 %v7201_v61  ;;  %725 = vmatprep.subr.bf16.mxu1 %v7239_v15  ;;  %v6485_v61 = vcombine.high %v953_v49, %v957_v50 }
  0xa8   :  { %753 = vmatpush2.bf16.msra.mxu0 %v7199_v63  ;;  %726 = vmatpush2.bf16.msra.mxu1 %v7244_v18  ;;  %v6484_v63 = vcombine.low %v953_v49, %v957_v50  ;;  %v793_v18 = vld [vmem:[#allocation9 + $0x40] sm:$0xff]  ;;  %v6564_v50 = vcombine.low %v1033_v39, %v1037_v40 }
  0xa9   :  { %754 = vmatprep.subr.bf16.mxu0 %v7207_v1  ;;  %2363 = vmatprep.subr.bf16.mxu1 %v6373_v23  ;;  %v813_v1 = vld [vmem:[#allocation9 + $0xe0] sm:$0xff]  ;;  %v6325_v24 = vcombine.high %v793_v18, %v797_v19 }
  0xaa   :  { %v6340_v14 = vcombine.low %v809_v0, %v813_v1 }
  0xac   :  { %755 = vmatpush2.bf16.msra.mxu0 %v7205_v2  ;;  %v937_v2 = vld [vmem:[#allocation9 + $0x4c0] sm:$0xff] }
  0xad   :  { %756 = vmatprep.subr.bf16.mxu0 %v7213_v3  ;;  %v941_v3 = vld [vmem:[#allocation9 + $0x4e0] sm:$0xff] }
  0xae   :  { %v6468_v15 = vcombine.low %v937_v2, %v941_v3 }
  0xb0   :  { %757 = vmatpush2.bf16.msra.mxu0 %v7211_v4  ;;  %v6349_v4 = vcombine.high %v817_v56, %v821_v57 }
  0xb1   :  { %758 = vmatprep.subr.bf16.mxu0 %v7219_v5  ;;  %v6477_v5 = vcombine.high %v945_v58, %v949_v59 }
  0xb4   :  { %759 = vmatpush2.bf16.msra.mxu0 %v7217_v6  ;;  %v6348_v6 = vcombine.low %v817_v56, %v821_v57  ;;  %v1021_v56 = vld [vmem:[#allocation9 + $0x760] sm:$0xff] }
  0xb5   :  { %760 = vmatprep.subr.bf16.mxu0 %v7225_v7  ;;  %v6476_v7 = vcombine.low %v945_v58, %v949_v59  ;;  %v6556_v58 = vcombine.low %v1025_v47, %v1029_v48 }
  0xb8   :  { %761 = vmatpush2.bf16.msra.mxu0 %v7223_v8  ;;  %v6341_v8 = vcombine.high %v809_v0, %v813_v1  ;;  %v1013_v0 = vld [vmem:[#allocation9 + $0x720] sm:$0xff] }
  0xb9   :  { %762 = vmatprep.subr.bf16.mxu0 %v7231_v9  ;;  %v6469_v9 = vcombine.high %v937_v2, %v941_v3 }
  0xbc   :  { %763 = vmatpush2.bf16.msra.mxu0 %v7229_v10  ;;  %v801_v10 = vld [vmem:[#allocation9 + $0x80] sm:$0xff] }
  0xbd   :  { %764 = vmatprep.subr.bf16.mxu0 %v7237_v12  ;;  %v929_v12 = vld [vmem:[#allocation9 + $0x480] sm:$0xff] }
  0xc0   :  { %765 = vmatpush2.bf16.msra.mxu0 %v7235_v13  ;;  %v933_v13 = vld [vmem:[#allocation9 + $0x4a0] sm:$0xff] }
  0xc1   :  { %766 = vmatprep.subr.bf16.mxu0 %v7243_v16  ;;  %v6333_v16 = vcombine.high %v801_v10, %v805_v11  ;;  %v6460_v23 = vcombine.low %v929_v12, %v933_v13 }
  0xc4   :  { %767 = vmatpush2.bf16.msra.mxu0 %v7241_v17  ;;  %v6461_v17 = vcombine.high %v929_v12, %v933_v13  ;;  %v865_v13 = vld [vmem:[#allocation9 + $0x280] sm:$0xff] }
  0xc5   :  { %2404 = vmatprep.subr.bf16.mxu0 %v6501_v26  ;;  %v785_v26 = vld [vmem:[#allocation9] sm:$0xff] }
  0xc6   :  { %v6316_v41 = vcombine.low %v785_v26, %v789_v27 }
 0x147   :  { %v278_v34 = vpop.f32.mrf.mxu0 }
 0x148   :  { %v279_v35 = vadd.f32 %v278_v34, %v157_v32  ;;  %v917_v32 = vld [vmem:[#allocation9 + $0x420] sm:$0xff]  ;;  %v6452_v34 = vcombine.low %v921_v20, %v925_v21 }
 0x149   :  { %v280_v36 = vpop.f32.mrf.mxu0 }
 0x14a   :  { %v285_v37 = vmax.f32 %v279_v35, 0.0  ;;  %v281_v38 = vadd.f32 %v280_v36, %v161_v33  ;;  %v6324_v33 = vcombine.low %v793_v18, %v797_v19  ;;  %v6317_v35 = vcombine.high %v785_v26, %v789_v27  ;;  %v989_v27 = vld [vmem:[#allocation9 + $0x660] sm:$0xff] }
 0x14b   :  { %v282_v42 = vpop.f32.mrf.mxu0  ;;  %v6445_v36 = vcombine.high %v913_v29, %v917_v32 }
 0x14c   :  { %v286_v43 = vmax.f32 %v281_v38, 0.0  ;;  %v287_v51 = vpack.c.bf16 %v285_v37, %v285_v37  ;;  %v905_v37 = vld [vmem:[#allocation9 + $0x3c0] sm:$0xff]  ;;  %v6444_v42 = vcombine.low %v913_v29, %v917_v32 }
 0x14d   :  { %v283_v45 = vpop.f32.mrf.mxu0  ;;  %v909_v38 = vld [vmem:[#allocation9 + $0x3e0] sm:$0xff] }
 0x14e   :  { %v288_v46 = vpack.c.bf16 %v286_v43, %v286_v43  ;;  %v6437_v43 = vcombine.high %v905_v37, %v909_v38  ;;  %v897_v45 = vld [vmem:[#allocation9 + $0x380] sm:$0xff]  ;;  %v6436_v49 = vcombine.low %v905_v37, %v909_v38 }
 0x14f   :  { %v981_v38 = vld [vmem:[#allocation9 + $0x620] sm:$0xff] }
 0x150   :  { %727 = vmatprep.mubr.bf16.mxu1 %v288_v46  ;;  %768 = vmatprep.mubr.bf16.mxu0 %v288_v46  ;;  %v901_v46 = vld [vmem:[#allocation9 + $0x3a0] sm:$0xff] }
 0x151   :  { %728 = vmatmul.mubr.bf16.vlgmr.msra.gmra.mxu1 %v287_v51  ;;  %769 = vmatmul.mubr.bf16.vlgmr.msra.gmra.mxu0 %v287_v51  ;;  %v6429_v51 = vcombine.high %v897_v45, %v901_v46  ;;  %v6428_v57 = vcombine.low %v897_v45, %v901_v46  ;;  %v974_v46 = vld [vmem:[#allocation9 + $0x5e8] sm:$0xff] }
 0x152   :  { %2364 = vmatpush1.bf16.msra.mxu1 %v6372_v22  ;;  %2405 = vmatpush1.bf16.msra.mxu0 %v6500_v25  ;;  %v6332_v22 = vcombine.low %v801_v10, %v805_v11  ;;  %v6453_v25 = vcombine.high %v921_v20, %v925_v21 }
 0x153   :  { %2365 = vmatprep.subr.bf16.mxu1 %v6365_v52  ;;  %2406 = vmatprep.subr.bf16.mxu0 %v6493_v53  ;;  %v6557_v52 = vcombine.high %v1025_v47, %v1029_v48  ;;  %v889_v53 = vld [vmem:[#allocation9 + $0x340] sm:$0xff] }
 0x156   :  { %2366 = vmatpush1.bf16.msra.mxu1 %v6364_v54  ;;  %2407 = vmatpush1.bf16.msra.mxu0 %v6492_v55  ;;  %v893_v54 = vld [vmem:[#allocation9 + $0x360] sm:$0xff] }
 0x157   :  { %2367 = vmatprep.subr.bf16.mxu1 %v6357_v60  ;;  %2408 = vmatprep.subr.bf16.mxu0 %v6485_v61  ;;  %v1017_v55 = vld [vmem:[#allocation9 + $0x740] sm:$0xff]  ;;  %v6421_v59 = vcombine.high %v889_v53, %v893_v54  ;;  %v6420_v1 = vcombine.low %v889_v53, %v893_v54 }
 0x158   :  { %v6549_v60 = vcombine.high %v1017_v55, %v1021_v56  ;;  %v881_v61 = vld [vmem:[#allocation9 + $0x300] sm:$0xff]  ;;  %v6548_v2 = vcombine.low %v1017_v55, %v1021_v56 }
 0x15a   :  { %2368 = vmatpush1.bf16.msra.mxu1 %v6356_v62  ;;  %2409 = vmatpush1.bf16.msra.mxu0 %v6484_v63  ;;  %v885_v62 = vld [vmem:[#allocation9 + $0x320] sm:$0xff] }
 0x15b   :  { %2369 = vmatprep.subr.bf16.mxu1 %v6349_v4  ;;  %2410 = vmatprep.subr.bf16.mxu0 %v6477_v5  ;;  %v1009_v63 = vld [vmem:[#allocation9 + $0x700] sm:$0xff]  ;;  %v6413_v3 = vcombine.high %v881_v61, %v885_v62 }
 0x15c   :  { %v6541_v4 = vcombine.high %v1009_v63, %v1013_v0  ;;  %v873_v5 = vld [vmem:[#allocation9 + $0x2c0] sm:$0xff]  ;;  %v6540_v10 = vcombine.low %v1009_v63, %v1013_v0 }
 0x15e   :  { %2370 = vmatpush1.bf16.msra.mxu1 %v6348_v6  ;;  %2411 = vmatpush1.bf16.msra.mxu0 %v6476_v7  ;;  %v877_v6 = vld [vmem:[#allocation9 + $0x2e0] sm:$0xff] }
 0x15f   :  { %2371 = vmatprep.subr.bf16.mxu1 %v6341_v8  ;;  %2412 = vmatprep.subr.bf16.mxu0 %v6469_v9  ;;  %v1001_v7 = vld [vmem:[#allocation9 + $0x6c0] sm:$0xff]  ;;  %v6412_v9 = vcombine.low %v881_v61, %v885_v62  ;;  %v6405_v11 = vcombine.high %v873_v5, %v877_v6 }
 0x160   :  { %v1005_v8 = vld [vmem:[#allocation9 + $0x6e0] sm:$0xff] }
 0x161   :  { %v6533_v12 = vcombine.high %v1001_v7, %v1005_v8  ;;  %v6532_v18 = vcombine.low %v1001_v7, %v1005_v8  ;;  %v834_v7 = vld [vmem:[#allocation9 + $0x188] sm:$0xff] }
 0x162   :  { %2372 = vmatpush1.bf16.msra.mxu1 %v6340_v14  ;;  %2413 = vmatpush1.bf16.msra.mxu0 %v6468_v15  ;;  %v869_v14 = vld [vmem:[#allocation9 + $0x2a0] sm:$0xff] }
 0x163   :  { %2373 = vmatprep.subr.bf16.mxu1 %v6333_v16  ;;  %2414 = vmatprep.subr.bf16.mxu0 %v6461_v17  ;;  %v993_v15 = vld [vmem:[#allocation9 + $0x680] sm:$0xff]  ;;  %v6404_v17 = vcombine.low %v873_v5, %v877_v6  ;;  %v6397_v19 = vcombine.high %v865_v13, %v869_v14  ;;  %v6396_v21 = vcombine.low %v865_v13, %v869_v14 }
 0x164   :  { %v997_v16 = vld [vmem:[#allocation9 + $0x6a0] sm:$0xff] }
 0x165   :  { %v6525_v20 = vcombine.high %v993_v15, %v997_v16 }
 0x166   :  { %2374 = vmatpush1.bf16.msra.mxu1 %v6332_v22  ;;  %2415 = vmatpush1.bf16.msra.mxu0 %v6460_v23  ;;  %v6524_v22 = vcombine.low %v993_v15, %v997_v16  ;;  %v857_v23 = vld [vmem:[#allocation9 + $0x240] sm:$0xff] }
 0x167   :  { %2375 = vmatprep.subr.bf16.mxu1 %v6325_v24  ;;  %2416 = vmatprep.subr.bf16.mxu0 %v6453_v25  ;;  %v861_v24 = vld [vmem:[#allocation9 + $0x260] sm:$0xff] }
 0x168   :  { %v985_v25 = vld [vmem:[#allocation9 + $0x640] sm:$0xff]  ;;  %v6389_v26 = vcombine.high %v857_v23, %v861_v24  ;;  %v6388_v29 = vcombine.low %v857_v23, %v861_v24 }
 0x169   :  { %v6516_v32 = vcombine.low %v985_v25, %v989_v27 }
 0x16a   :  { %2376 = vmatpush1.bf16.msra.mxu1 %v6324_v33  ;;  %2417 = vmatpush1.bf16.msra.mxu0 %v6452_v34  ;;  %v6517_v33 = vcombine.high %v985_v25, %v989_v27  ;;  %v849_v34 = vld [vmem:[#allocation9 + $0x200] sm:$0xff]  ;;  %v818_v27 = vld [vmem:[#allocation9 + $0x108] sm:$0xff] }
 0x16b   :  { %2377 = vmatprep.subr.bf16.mxu1 %v6317_v35  ;;  %2418 = vmatprep.subr.bf16.mxu0 %v6445_v36  ;;  %v853_v35 = vld [vmem:[#allocation9 + $0x220] sm:$0xff] }
 0x16c   :  { %v977_v36 = vld [vmem:[#allocation9 + $0x600] sm:$0xff]  ;;  %v6381_v37 = vcombine.high %v849_v34, %v853_v35  ;;  %v6380_v39 = vcombine.low %v849_v34, %v853_v35 }
 0x16d   :  { %v6508_v40 = vcombine.low %v977_v36, %v981_v38 }
 0x16e   :  { %2378 = vmatpush1.bf16.msra.mxu1 %v6316_v41  ;;  %2419 = vmatpush1.bf16.msra.mxu0 %v6444_v42  ;;  %v6509_v41 = vcombine.high %v977_v36, %v981_v38  ;;  %v842_v42 = vld [vmem:[#allocation9 + $0x1c8] sm:$0xff] }
 0x16f   :  { %2379 = vmatprep.subr.bf16.mxu1 %v6437_v43  ;;  %2420 = vmatprep.subr.bf16.mxu0 %v6565_v44  ;;  %v846_v43 = vld [vmem:[#allocation9 + $0x1e8] sm:$0xff] }
 0x170   :  { %v970_v44 = vld [vmem:[#allocation9 + $0x5c8] sm:$0xff]  ;;  %v6375_v45 = vcombine.high %v842_v42, %v846_v43  ;;  %v6374_v47 = vcombine.low %v842_v42, %v846_v43 }
 0x171   :  { %v6502_v48 = vcombine.low %v970_v44, %v974_v46  ;;  %v810_v38 = vld [vmem:[#allocation9 + $0xc8] sm:$0xff] }
 0x172   :  { %2380 = vmatpush2.bf16.msra.mxu1 %v6436_v49  ;;  %2421 = vmatpush2.bf16.msra.mxu0 %v6564_v50  ;;  %v6503_v49 = vcombine.high %v970_v44, %v974_v46  ;;  %v8175_v50 = vsub.s32 2, %v8164_v28  ;;  %v802_v46 = vld [vmem:[#allocation9 + $0x88] sm:$0xff] }
 0x173   :  { %2381 = vmatprep.subr.bf16.mxu1 %v6429_v51  ;;  %2422 = vmatprep.subr.bf16.mxu0 %v6557_v52  ;;  %v353_v51 = vld [vmem:[#allocation7] sm:$0xf]  ;;  %v8178_v52 = vsub.s32 3, %v8164_v28 }
 0x174   :  { %v358_v53 = vrot.slane %v353_v51, %v8167_v30  ;;  %v366_v54 = vrot.slane %v353_v51, %v8175_v50  ;;  %v362_v55 = vrot.slane %v353_v51, %v8170_v31 }
 0x175   :  { %v370_v56 = vrot.slane %v353_v51, %v8178_v52 }
 0x176   :  { %2382 = vmatpush2.bf16.msra.mxu1 %v6428_v57  ;;  %2423 = vmatpush2.bf16.msra.mxu0 %v6556_v58 }
 0x177   :  { %2383 = vmatprep.subr.bf16.mxu1 %v6421_v59  ;;  %2424 = vmatprep.subr.bf16.mxu0 %v6549_v60 }
 0x17a   :  { %2384 = vmatpush2.bf16.msra.mxu1 %v6420_v1  ;;  %2425 = vmatpush2.bf16.msra.mxu0 %v6548_v2 }
 0x17b   :  { %2385 = vmatprep.subr.bf16.mxu1 %v6413_v3  ;;  %2426 = vmatprep.subr.bf16.mxu0 %v6541_v4 }
 0x17e   :  { %2386 = vmatpush2.bf16.msra.mxu1 %v6412_v9  ;;  %2427 = vmatpush2.bf16.msra.mxu0 %v6540_v10  ;;  %v838_v10 = vld [vmem:[#allocation9 + $0x1a8] sm:$0xff] }
 0x17f   :  { %2387 = vmatprep.subr.bf16.mxu1 %v6405_v11  ;;  %2428 = vmatprep.subr.bf16.mxu0 %v6533_v12  ;;  %v962_v11 = vld [vmem:[#allocation9 + $0x588] sm:$0xff]  ;;  %v6366_v23 = vcombine.low %v834_v7, %v838_v10 }
 0x180   :  { %v966_v12 = vld [vmem:[#allocation9 + $0x5a8] sm:$0xff] }
 0x181   :  { %v6494_v24 = vcombine.low %v962_v11, %v966_v12 }
 0x182   :  { %2388 = vmatpush2.bf16.msra.mxu1 %v6404_v17  ;;  %2429 = vmatpush2.bf16.msra.mxu0 %v6532_v18  ;;  %v826_v17 = vld [vmem:[#allocation9 + $0x148] sm:$0xff]  ;;  %v6367_v18 = vcombine.high %v834_v7, %v838_v10 }
 0x183   :  { %2389 = vmatprep.subr.bf16.mxu1 %v6397_v19  ;;  %2430 = vmatprep.subr.bf16.mxu0 %v6525_v20  ;;  %v6495_v19 = vcombine.high %v962_v11, %v966_v12  ;;  %v830_v20 = vld [vmem:[#allocation9 + $0x168] sm:$0xff] }
 0x184   :  { %v6359_v25 = vcombine.high %v826_v17, %v830_v20  ;;  %v6358_v34 = vcombine.low %v826_v17, %v830_v20  ;;  %v1034_v10 = vld [vmem:[#allocation9 + $0x7c8] sm:$0xff] }
 0x185   :  { %v1038_v11 = vld [vmem:[#allocation9 + $0x7e8] sm:$0xff] }
 0x186   :  { %2390 = vmatpush2.bf16.msra.mxu1 %v6396_v21  ;;  %2431 = vmatpush2.bf16.msra.mxu0 %v6524_v22  ;;  %v954_v21 = vld [vmem:[#allocation9 + $0x548] sm:$0xff] }
 0x187   :  { %2391 = vmatprep.subr.bf16.mxu1 %v6389_v26  ;;  %2432 = vmatprep.subr.bf16.mxu0 %v6517_v33  ;;  %v958_v22 = vld [vmem:[#allocation9 + $0x568] sm:$0xff] }
 0x188   :  { %v6487_v26 = vcombine.high %v954_v21, %v958_v22  ;;  %v950_v33 = vld [vmem:[#allocation9 + $0x528] sm:$0xff]  ;;  %v6486_v35 = vcombine.low %v954_v21, %v958_v22 }
 0x189   :  { %v898_v20 = vld [vmem:[#allocation9 + $0x388] sm:$0xff] }
 0x18a   :  { %2392 = vmatpush2.bf16.msra.mxu1 %v6388_v29  ;;  %2433 = vmatpush2.bf16.msra.mxu0 %v6516_v32  ;;  %v822_v29 = vld [vmem:[#allocation9 + $0x128] sm:$0xff] }
 0x18b   :  { %2393 = vmatprep.subr.bf16.mxu1 %v6381_v37  ;;  %2434 = vmatprep.subr.bf16.mxu0 %v6509_v41  ;;  %v946_v32 = vld [vmem:[#allocation9 + $0x508] sm:$0xff]  ;;  %v6351_v36 = vcombine.high %v818_v27, %v822_v29  ;;  %v6350_v42 = vcombine.low %v818_v27, %v822_v29 }
 0x18c   :  { %v6479_v37 = vcombine.high %v946_v32, %v950_v33  ;;  %v942_v41 = vld [vmem:[#allocation9 + $0x4e8] sm:$0xff]  ;;  %v6478_v43 = vcombine.low %v946_v32, %v950_v33 }
 0x18d   :  { %v902_v21 = vld [vmem:[#allocation9 + $0x3a8] sm:$0xff] }
 0x18e   :  { %2394 = vmatpush2.bf16.msra.mxu1 %v6380_v39  ;;  %2435 = vmatpush2.bf16.msra.mxu0 %v6508_v40  ;;  %v814_v39 = vld [vmem:[#allocation9 + $0xe8] sm:$0xff] }
 0x18f   :  { %2445 = vmatprep.subr.bf16.mxu1 %v6375_v45  ;;  %2486 = vmatprep.subr.bf16.mxu0 %v6503_v49  ;;  %v938_v40 = vld [vmem:[#allocation9 + $0x4c8] sm:$0xff]  ;;  %v6343_v44 = vcombine.high %v810_v38, %v814_v39  ;;  %v6342_v51 = vcombine.low %v810_v38, %v814_v39 }
 0x190   :  { %v6471_v45 = vcombine.high %v938_v40, %v942_v41  ;;  %v934_v49 = vld [vmem:[#allocation9 + $0x4a8] sm:$0xff] }
 0x191   :  { %v1026_v22 = vld [vmem:[#allocation9 + $0x788] sm:$0xff] }
 0x192   :  { %v890_v29 = vld [vmem:[#allocation9 + $0x348] sm:$0xff] }
 0x193   :  { %v894_v32 = vld [vmem:[#allocation9 + $0x368] sm:$0xff] }
 0x194   :  { %v1018_v33 = vld [vmem:[#allocation9 + $0x748] sm:$0xff] }
 0x195   :  { %v882_v39 = vld [vmem:[#allocation9 + $0x308] sm:$0xff] }
 0x211   :  { %v729_v57 = vpop.f32.mrf.mxu1  ;;  %v770_v58 = vpop.f32.mrf.mxu0 }
 0x212   :  { %v730_v59 = vadd.f32 %v729_v57, %v358_v53  ;;  %v771_v60 = vadd.f32 %v770_v58, %v366_v54  ;;  %v6470_v53 = vcombine.low %v938_v40, %v942_v41  ;;  %v798_v57 = vld [vmem:[#allocation9 + $0x68] sm:$0xff] }
 0x213   :  { %v731_v61 = vpop.f32.mrf.mxu1  ;;  %v772_v62 = vpop.f32.mrf.mxu0  ;;  %v922_v58 = vld [vmem:[#allocation9 + $0x448] sm:$0xff] }
 0x214   :  { %v732_v63 = vadd.f32 %v731_v61, %v362_v55  ;;  %v773_v0 = vadd.f32 %v772_v62, %v370_v56  ;;  %v777_v1 = vmax.f32 %v730_v59, 0.0  ;;  %v779_v2 = vmax.f32 %v771_v60, 0.0  ;;  %v794_v56 = vld [vmem:[#allocation9 + $0x48] sm:$0xff] }
 0x215   :  { %v733_v3 = vpop.f32.mrf.mxu1  ;;  %v774_v4 = vpop.f32.mrf.mxu0  ;;  %v926_v59 = vld [vmem:[#allocation9 + $0x468] sm:$0xff]  ;;  %v6327_v62 = vcombine.high %v794_v56, %v798_v57 }
 0x216   :  { %v778_v5 = vmax.f32 %v732_v63, 0.0  ;;  %v780_v6 = vmax.f32 %v773_v0, 0.0  ;;  %v8188_v15 = vpack.c.bf16 %v777_v1, %v777_v1  ;;  %v8190_v16 = vpack.c.bf16 %v779_v2, %v779_v2  ;;  %v786_v0 = vld [vmem:[#allocation9 + $0x8] sm:$0xff] }
 0x217   :  { %v734_v8 = vpop.f32.mrf.mxu1  ;;  %v775_v9 = vpop.f32.mrf.mxu0  ;;  %v6455_v63 = vcombine.high %v922_v58, %v926_v59  ;;  %v790_v1 = vld [vmem:[#allocation9 + $0x28] sm:$0xff]  ;;  %v6326_v4 = vcombine.low %v794_v56, %v798_v57 }
 0x218   :  { %v8184_v13 = vpack.c.bf16 %v778_v5, %v778_v5  ;;  %v8186_v14 = vpack.c.bf16 %v780_v6, %v780_v6  ;;  %v914_v2 = vld [vmem:[#allocation9 + $0x408] sm:$0xff]  ;;  %v6454_v5 = vcombine.low %v922_v58, %v926_v59  ;;  %v6319_v6 = vcombine.high %v786_v0, %v790_v1 }
 0x219   :  { %v918_v3 = vld [vmem:[#allocation9 + $0x428] sm:$0xff]  ;;  %v6318_v12 = vcombine.low %v786_v0, %v790_v1 }
 0x21a   :  { %2395 = vmatprep.mubr.bf16.mxu1 %v8184_v13  ;;  %2436 = vmatprep.mubr.bf16.mxu0 %v8186_v14  ;;  %v6447_v7 = vcombine.high %v914_v2, %v918_v3  ;;  %v906_v8 = vld [vmem:[#allocation9 + $0x3c8] sm:$0xff]  ;;  %v6446_v17 = vcombine.low %v914_v2, %v918_v3 }
 0x21b   :  { %2396 = vmatmul.mubr.bf16.vlgmr.msra.gmra.mxu1 %v8188_v15  ;;  %2437 = vmatmul.mubr.bf16.vlgmr.msra.gmra.mxu0 %v8190_v16  ;;  %v910_v9 = vld [vmem:[#allocation9 + $0x3e8] sm:$0xff] }
 0x21c   :  { %2446 = vmatpush1.bf16.msra.mxu1 %v6374_v47  ;;  %2487 = vmatpush1.bf16.msra.mxu0 %v6502_v48  ;;  %v806_v47 = vld [vmem:[#allocation9 + $0xa8] sm:$0xff] }
 0x21d   :  { %2477 = vmatprep.mubr.bf16.mxu1 %v8184_v13  ;;  %2518 = vmatprep.mubr.bf16.mxu0 %v8186_v14  ;;  %v930_v48 = vld [vmem:[#allocation9 + $0x488] sm:$0xff]  ;;  %v6335_v54 = vcombine.high %v802_v46, %v806_v47  ;;  %v6334_v60 = vcombine.low %v802_v46, %v806_v47 }
 0x21e   :  { %2447 = vmatprep.subr.bf16.mxu1 %v6367_v18  ;;  %2488 = vmatprep.subr.bf16.mxu0 %v6495_v19  ;;  %v6463_v55 = vcombine.high %v930_v48, %v934_v49  ;;  %v6462_v61 = vcombine.low %v930_v48, %v934_v49  ;;  %v6439_v18 = vcombine.high %v906_v8, %v910_v9  ;;  %v886_v40 = vld [vmem:[#allocation9 + $0x328] sm:$0xff] }
 0x21f   :  { %v6567_v19 = vcombine.high %v1034_v10, %v1038_v11  ;;  %v1010_v41 = vld [vmem:[#allocation9 + $0x708] sm:$0xff] }
 0x220   :  { %2448 = vmatpush1.bf16.msra.mxu1 %v6366_v23  ;;  %2489 = vmatpush1.bf16.msra.mxu0 %v6494_v24  ;;  %v1030_v23 = vld [vmem:[#allocation9 + $0x7a8] sm:$0xff]  ;;  %v6438_v24 = vcombine.low %v906_v8, %v910_v9 }
 0x221   :  { %2449 = vmatprep.subr.bf16.mxu1 %v6359_v25  ;;  %2490 = vmatprep.subr.bf16.mxu0 %v6487_v26  ;;  %v6566_v25 = vcombine.low %v1034_v10, %v1038_v11  ;;  %v6431_v26 = vcombine.high %v898_v20, %v902_v21  ;;  %v6559_v27 = vcombine.high %v1026_v22, %v1030_v23  ;;  %v874_v47 = vld [vmem:[#allocation9 + $0x2c8] sm:$0xff] }
 0x222   :  { %v878_v48 = vld [vmem:[#allocation9 + $0x2e8] sm:$0xff] }
 0x223   :  { %v1002_v49 = vld [vmem:[#allocation9 + $0x6c8] sm:$0xff] }
 0x224   :  { %2450 = vmatpush1.bf16.msra.mxu1 %v6358_v34  ;;  %2491 = vmatpush1.bf16.msra.mxu0 %v6486_v35  ;;  %v1022_v34 = vld [vmem:[#allocation9 + $0x768] sm:$0xff]  ;;  %v6430_v35 = vcombine.low %v898_v20, %v902_v21  ;;  %v843_v21 = vld [vmem:[#allocation9 + $0x1d0] sm:$0xff] }
 0x225   :  { %2451 = vmatprep.subr.bf16.mxu1 %v6351_v36  ;;  %2492 = vmatprep.subr.bf16.mxu0 %v6479_v37  ;;  %v6558_v36 = vcombine.low %v1026_v22, %v1030_v23  ;;  %v6423_v37 = vcombine.high %v890_v29, %v894_v32  ;;  %v6551_v38 = vcombine.high %v1018_v33, %v1022_v34  ;;  %v866_v57 = vld [vmem:[#allocation9 + $0x288] sm:$0xff]  ;;  %v847_v22 = vld [vmem:[#allocation9 + $0x1f0] sm:$0xff] }
 0x226   :  { %v870_v58 = vld [vmem:[#allocation9 + $0x2a8] sm:$0xff]  ;;  %v971_v23 = vld [vmem:[#allocation9 + $0x5d0] sm:$0xff] }
 0x227   :  { %v994_v59 = vld [vmem:[#allocation9 + $0x688] sm:$0xff] }
 0x228   :  { %2452 = vmatpush1.bf16.msra.mxu1 %v6350_v42  ;;  %2493 = vmatpush1.bf16.msra.mxu0 %v6478_v43  ;;  %v1014_v42 = vld [vmem:[#allocation9 + $0x728] sm:$0xff]  ;;  %v6422_v43 = vcombine.low %v890_v29, %v894_v32  ;;  %v835_v32 = vld [vmem:[#allocation9 + $0x190] sm:$0xff] }
 0x229   :  { %2453 = vmatprep.subr.bf16.mxu1 %v6343_v44  ;;  %2494 = vmatprep.subr.bf16.mxu0 %v6471_v45  ;;  %v6550_v44 = vcombine.low %v1018_v33, %v1022_v34  ;;  %v6415_v45 = vcombine.high %v882_v39, %v886_v40  ;;  %v6543_v46 = vcombine.high %v1010_v41, %v1014_v42  ;;  %v858_v1 = vld [vmem:[#allocation9 + $0x248] sm:$0xff]  ;;  %v839_v33 = vld [vmem:[#allocation9 + $0x1b0] sm:$0xff] }
 0x22a   :  { %v862_v2 = vld [vmem:[#allocation9 + $0x268] sm:$0xff]  ;;  %v963_v34 = vld [vmem:[#allocation9 + $0x590] sm:$0xff] }
 0x22b   :  { %v986_v3 = vld [vmem:[#allocation9 + $0x648] sm:$0xff] }
 0x22c   :  { %2454 = vmatpush1.bf16.msra.mxu1 %v6342_v51  ;;  %2495 = vmatpush1.bf16.msra.mxu0 %v6470_v53  ;;  %v1006_v51 = vld [vmem:[#allocation9 + $0x6e8] sm:$0xff]  ;;  %v6414_v53 = vcombine.low %v882_v39, %v886_v40  ;;  %v827_v40 = vld [vmem:[#allocation9 + $0x150] sm:$0xff] }
 0x22d   :  { %2455 = vmatprep.subr.bf16.mxu1 %v6335_v54  ;;  %2496 = vmatprep.subr.bf16.mxu0 %v6463_v55  ;;  %v6542_v54 = vcombine.low %v1010_v41, %v1014_v42  ;;  %v6407_v55 = vcombine.high %v874_v47, %v878_v48  ;;  %v6535_v56 = vcombine.high %v1002_v49, %v1006_v51  ;;  %v850_v9 = vld [vmem:[#allocation9 + $0x208] sm:$0xff]  ;;  %v831_v41 = vld [vmem:[#allocation9 + $0x170] sm:$0xff] }
 0x22e   :  { %v854_v10 = vld [vmem:[#allocation9 + $0x228] sm:$0xff]  ;;  %v955_v42 = vld [vmem:[#allocation9 + $0x550] sm:$0xff] }
 0x22f   :  { %v978_v11 = vld [vmem:[#allocation9 + $0x608] sm:$0xff] }
 0x230   :  { %2456 = vmatpush1.bf16.msra.mxu1 %v6334_v60  ;;  %2497 = vmatpush1.bf16.msra.mxu0 %v6462_v61  ;;  %v998_v60 = vld [vmem:[#allocation9 + $0x6a8] sm:$0xff]  ;;  %v6406_v61 = vcombine.low %v874_v47, %v878_v48  ;;  %v819_v48 = vld [vmem:[#allocation9 + $0x110] sm:$0xff] }
 0x231   :  { %2457 = vmatprep.subr.bf16.mxu1 %v6327_v62  ;;  %2498 = vmatprep.subr.bf16.mxu0 %v6455_v63  ;;  %v6534_v62 = vcombine.low %v1002_v49, %v1006_v51  ;;  %v6399_v63 = vcombine.high %v866_v57, %v870_v58  ;;  %v6527_v0 = vcombine.high %v994_v59, %v998_v60  ;;  %v823_v49 = vld [vmem:[#allocation9 + $0x130] sm:$0xff] }
 0x232   :  { %v947_v51 = vld [vmem:[#allocation9 + $0x510] sm:$0xff] }
 0x234   :  { %2458 = vmatpush1.bf16.msra.mxu1 %v6326_v4  ;;  %2499 = vmatpush1.bf16.msra.mxu0 %v6454_v5  ;;  %v990_v4 = vld [vmem:[#allocation9 + $0x668] sm:$0xff]  ;;  %v6398_v5 = vcombine.low %v866_v57, %v870_v58  ;;  %v811_v58 = vld [vmem:[#allocation9 + $0xd0] sm:$0xff] }
 0x235   :  { %2459 = vmatprep.subr.bf16.mxu1 %v6319_v6  ;;  %2500 = vmatprep.subr.bf16.mxu0 %v6447_v7  ;;  %v6526_v6 = vcombine.low %v994_v59, %v998_v60  ;;  %v6391_v7 = vcombine.high %v858_v1, %v862_v2  ;;  %v6519_v8 = vcombine.high %v986_v3, %v990_v4  ;;  %v815_v59 = vld [vmem:[#allocation9 + $0xf0] sm:$0xff] }
 0x236   :  { %v939_v60 = vld [vmem:[#allocation9 + $0x4d0] sm:$0xff] }
 0x238   :  { %2460 = vmatpush1.bf16.msra.mxu1 %v6318_v12  ;;  %2501 = vmatpush1.bf16.msra.mxu0 %v6446_v17  ;;  %v982_v12 = vld [vmem:[#allocation9 + $0x628] sm:$0xff]  ;;  %v6390_v17 = vcombine.low %v858_v1, %v862_v2  ;;  %v803_v2 = vld [vmem:[#allocation9 + $0x90] sm:$0xff] }
 0x239   :  { %2461 = vmatprep.subr.bf16.mxu1 %v6439_v18  ;;  %2502 = vmatprep.subr.bf16.mxu0 %v6567_v19  ;;  %v6518_v18 = vcombine.low %v986_v3, %v990_v4  ;;  %v6383_v19 = vcombine.high %v850_v9, %v854_v10  ;;  %v6511_v20 = vcombine.high %v978_v11, %v982_v12  ;;  %v807_v3 = vld [vmem:[#allocation9 + $0xb0] sm:$0xff] }
 0x23a   :  { %v931_v4 = vld [vmem:[#allocation9 + $0x490] sm:$0xff] }
 0x23c   :  { %2462 = vmatpush2.bf16.msra.mxu1 %v6438_v24  ;;  %2503 = vmatpush2.bf16.msra.mxu0 %v6566_v25  ;;  %v975_v24 = vld [vmem:[#allocation9 + $0x5f0] sm:$0xff]  ;;  %v6382_v25 = vcombine.low %v850_v9, %v854_v10 }
 0x23d   :  { %2463 = vmatprep.subr.bf16.mxu1 %v6431_v26  ;;  %2504 = vmatprep.subr.bf16.mxu0 %v6559_v27  ;;  %v6510_v26 = vcombine.low %v978_v11, %v982_v12  ;;  %v6377_v27 = vcombine.high %v843_v21, %v847_v22  ;;  %v6505_v29 = vcombine.high %v971_v23, %v975_v24  ;;  %v795_v10 = vld [vmem:[#allocation9 + $0x50] sm:$0xff] }
 0x23e   :  { %v799_v11 = vld [vmem:[#allocation9 + $0x70] sm:$0xff] }
 0x23f   :  { %v923_v12 = vld [vmem:[#allocation9 + $0x450] sm:$0xff] }
 0x240   :  { %2464 = vmatpush2.bf16.msra.mxu1 %v6430_v35  ;;  %2505 = vmatpush2.bf16.msra.mxu0 %v6558_v36  ;;  %v967_v35 = vld [vmem:[#allocation9 + $0x5b0] sm:$0xff]  ;;  %v6376_v36 = vcombine.low %v843_v21, %v847_v22 }
 0x241   :  { %2465 = vmatprep.subr.bf16.mxu1 %v6423_v37  ;;  %2506 = vmatprep.subr.bf16.mxu0 %v6551_v38  ;;  %v6504_v37 = vcombine.low %v971_v23, %v975_v24  ;;  %v6369_v38 = vcombine.high %v835_v32, %v839_v33  ;;  %v6497_v39 = vcombine.high %v963_v34, %v967_v35  ;;  %v787_v22 = vld [vmem:[#allocation9 + $0x10] sm:$0xff] }
 0x242   :  { %v791_v23 = vld [vmem:[#allocation9 + $0x30] sm:$0xff] }
 0x243   :  { %v915_v24 = vld [vmem:[#allocation9 + $0x410] sm:$0xff] }
 0x244   :  { %2466 = vmatpush2.bf16.msra.mxu1 %v6422_v43  ;;  %2507 = vmatpush2.bf16.msra.mxu0 %v6550_v44  ;;  %v959_v43 = vld [vmem:[#allocation9 + $0x570] sm:$0xff]  ;;  %v6368_v44 = vcombine.low %v835_v32, %v839_v33 }
 0x245   :  { %2467 = vmatprep.subr.bf16.mxu1 %v6415_v45  ;;  %2508 = vmatprep.subr.bf16.mxu0 %v6543_v46  ;;  %v6496_v45 = vcombine.low %v963_v34, %v967_v35  ;;  %v6361_v46 = vcombine.high %v827_v40, %v831_v41  ;;  %v6489_v47 = vcombine.high %v955_v42, %v959_v43  ;;  %v907_v33 = vld [vmem:[#allocation9 + $0x3d0] sm:$0xff] }
 0x246   :  { %v911_v34 = vld [vmem:[#allocation9 + $0x3f0] sm:$0xff] }
 0x247   :  { %v1035_v35 = vld [vmem:[#allocation9 + $0x7d0] sm:$0xff] }
 0x248   :  { %2468 = vmatpush2.bf16.msra.mxu1 %v6414_v53  ;;  %2509 = vmatpush2.bf16.msra.mxu0 %v6542_v54  ;;  %v951_v53 = vld [vmem:[#allocation9 + $0x530] sm:$0xff]  ;;  %v6360_v54 = vcombine.low %v827_v40, %v831_v41 }
 0x249   :  { %2469 = vmatprep.subr.bf16.mxu1 %v6407_v55  ;;  %2510 = vmatprep.subr.bf16.mxu0 %v6535_v56  ;;  %v6488_v55 = vcombine.low %v955_v42, %v959_v43  ;;  %v6353_v56 = vcombine.high %v819_v48, %v823_v49  ;;  %v6481_v57 = vcombine.high %v947_v51, %v951_v53  ;;  %v899_v41 = vld [vmem:[#allocation9 + $0x390] sm:$0xff] }
 0x24a   :  { %v903_v42 = vld [vmem:[#allocation9 + $0x3b0] sm:$0xff] }
 0x24b   :  { %v1027_v43 = vld [vmem:[#allocation9 + $0x790] sm:$0xff] }
 0x24c   :  { %2470 = vmatpush2.bf16.msra.mxu1 %v6406_v61  ;;  %2511 = vmatpush2.bf16.msra.mxu0 %v6534_v62  ;;  %v943_v61 = vld [vmem:[#allocation9 + $0x4f0] sm:$0xff]  ;;  %v6352_v62 = vcombine.low %v819_v48, %v823_v49 }
 0x24d   :  { %2471 = vmatprep.subr.bf16.mxu1 %v6399_v63  ;;  %2512 = vmatprep.subr.bf16.mxu0 %v6527_v0  ;;  %v6480_v63 = vcombine.low %v947_v51, %v951_v53  ;;  %v6345_v0 = vcombine.high %v811_v58, %v815_v59  ;;  %v6473_v1 = vcombine.high %v939_v60, %v943_v61  ;;  %v891_v49 = vld [vmem:[#allocation9 + $0x350] sm:$0xff] }
 0x24e   :  { %v895_v51 = vld [vmem:[#allocation9 + $0x370] sm:$0xff] }
 0x24f   :  { %v1019_v53 = vld [vmem:[#allocation9 + $0x750] sm:$0xff] }
 0x250   :  { %2472 = vmatpush2.bf16.msra.mxu1 %v6398_v5  ;;  %2513 = vmatpush2.bf16.msra.mxu0 %v6526_v6  ;;  %v935_v5 = vld [vmem:[#allocation9 + $0x4b0] sm:$0xff]  ;;  %v6344_v6 = vcombine.low %v811_v58, %v815_v59 }
 0x251   :  { %2473 = vmatprep.subr.bf16.mxu1 %v6391_v7  ;;  %2514 = vmatprep.subr.bf16.mxu0 %v6519_v8  ;;  %v6472_v7 = vcombine.low %v939_v60, %v943_v61  ;;  %v6337_v8 = vcombine.high %v803_v2, %v807_v3  ;;  %v6465_v9 = vcombine.high %v931_v4, %v935_v5  ;;  %v883_v59 = vld [vmem:[#allocation9 + $0x310] sm:$0xff] }
 0x252   :  { %v887_v60 = vld [vmem:[#allocation9 + $0x330] sm:$0xff] }
 0x253   :  { %v1011_v61 = vld [vmem:[#allocation9 + $0x710] sm:$0xff] }
 0x254   :  { %2474 = vmatpush2.bf16.msra.mxu1 %v6390_v17  ;;  %2515 = vmatpush2.bf16.msra.mxu0 %v6518_v18  ;;  %v927_v17 = vld [vmem:[#allocation9 + $0x470] sm:$0xff]  ;;  %v6336_v18 = vcombine.low %v803_v2, %v807_v3 }
 0x255   :  { %2475 = vmatprep.subr.bf16.mxu1 %v6383_v19  ;;  %2516 = vmatprep.subr.bf16.mxu0 %v6511_v20  ;;  %v6464_v19 = vcombine.low %v931_v4, %v935_v5  ;;  %v6329_v20 = vcombine.high %v795_v10, %v799_v11  ;;  %v6457_v21 = vcombine.high %v923_v12, %v927_v17  ;;  %v875_v3 = vld [vmem:[#allocation9 + $0x2d0] sm:$0xff] }
 0x256   :  { %v879_v4 = vld [vmem:[#allocation9 + $0x2f0] sm:$0xff] }
 0x257   :  { %v1003_v5 = vld [vmem:[#allocation9 + $0x6d0] sm:$0xff] }
 0x258   :  { %2476 = vmatpush2.bf16.msra.mxu1 %v6382_v25  ;;  %2517 = vmatpush2.bf16.msra.mxu0 %v6510_v26  ;;  %v919_v25 = vld [vmem:[#allocation9 + $0x430] sm:$0xff]  ;;  %v6328_v26 = vcombine.low %v795_v10, %v799_v11 }
 0x259   :  { %2527 = vmatprep.subr.bf16.mxu1 %v6377_v27  ;;  %2568 = vmatprep.subr.bf16.mxu0 %v6505_v29  ;;  %v6456_v27 = vcombine.low %v923_v12, %v927_v17  ;;  %v6321_v29 = vcombine.high %v787_v22, %v791_v23  ;;  %v6449_v32 = vcombine.high %v915_v24, %v919_v25  ;;  %v867_v11 = vld [vmem:[#allocation9 + $0x290] sm:$0xff] }
 0x25a   :  { %v871_v12 = vld [vmem:[#allocation9 + $0x2b0] sm:$0xff] }
 0x25b   :  { %2478 = vmatmul.mubr.bf16.vlgmr.msra.gmra.mxu1 %v8188_v15  ;;  %2519 = vmatmul.mubr.bf16.vlgmr.msra.gmra.mxu0 %v8190_v16  ;;  %v995_v17 = vld [vmem:[#allocation9 + $0x690] sm:$0xff] }
 0x25c   :  { %2528 = vmatpush1.bf16.msra.mxu1 %v6376_v36  ;;  %2559 = vmatprep.mubr.bf16.mxu1 %v8184_v13  ;;  %v1039_v36 = vld [vmem:[#allocation9 + $0x7f0] sm:$0xff] }
 0x25d   :  { %2569 = vmatpush1.bf16.msra.mxu0 %v6504_v37  ;;  %2600 = vmatprep.mubr.bf16.mxu0 %v8186_v14  ;;  %v6320_v37 = vcombine.low %v787_v22, %v791_v23  ;;  %v6569_v40 = vcombine.high %v1035_v35, %v1039_v36  ;;  %v859_v23 = vld [vmem:[#allocation9 + $0x250] sm:$0xff] }
 0x25e   :  { %2529 = vmatprep.subr.bf16.mxu1 %v6369_v38  ;;  %2570 = vmatprep.subr.bf16.mxu0 %v6497_v39  ;;  %v6448_v38 = vcombine.low %v915_v24, %v919_v25  ;;  %v6441_v39 = vcombine.high %v907_v33, %v911_v34  ;;  %v863_v24 = vld [vmem:[#allocation9 + $0x270] sm:$0xff] }
 0x25f   :  { %v987_v25 = vld [vmem:[#allocation9 + $0x650] sm:$0xff] }
 0x260   :  { %2530 = vmatpush1.bf16.msra.mxu1 %v6368_v44  ;;  %v1031_v44 = vld [vmem:[#allocation9 + $0x7b0] sm:$0xff] }
 0x261   :  { %2571 = vmatpush1.bf16.msra.mxu0 %v6496_v45  ;;  %2531 = vmatprep.subr.bf16.mxu1 %v6361_v46  ;;  %v6440_v45 = vcombine.low %v907_v33, %v911_v34  ;;  %v6568_v46 = vcombine.low %v1035_v35, %v1039_v36  ;;  %v6561_v48 = vcombine.high %v1027_v43, %v1031_v44  ;;  %v851_v34 = vld [vmem:[#allocation9 + $0x210] sm:$0xff] }
 0x262   :  { %2572 = vmatprep.subr.bf16.mxu0 %v6489_v47  ;;  %v6433_v47 = vcombine.high %v899_v41, %v903_v42  ;;  %v855_v35 = vld [vmem:[#allocation9 + $0x230] sm:$0xff] }
 0x263   :  { %v979_v36 = vld [vmem:[#allocation9 + $0x610] sm:$0xff] }
 0x264   :  { %2532 = vmatpush1.bf16.msra.mxu1 %v6360_v54  ;;  %v1023_v54 = vld [vmem:[#allocation9 + $0x770] sm:$0xff] }
 0x265   :  { %2573 = vmatpush1.bf16.msra.mxu0 %v6488_v55  ;;  %2533 = vmatprep.subr.bf16.mxu1 %v6353_v56  ;;  %v6432_v55 = vcombine.low %v899_v41, %v903_v42  ;;  %v6560_v56 = vcombine.low %v1027_v43, %v1031_v44  ;;  %v6553_v58 = vcombine.high %v1019_v53, %v1023_v54  ;;  %v844_v42 = vld [vmem:[#allocation9 + $0x1d8] sm:$0xff] }
 0x266   :  { %2574 = vmatprep.subr.bf16.mxu0 %v6481_v57  ;;  %v6425_v57 = vcombine.high %v891_v49, %v895_v51  ;;  %v848_v43 = vld [vmem:[#allocation9 + $0x1f8] sm:$0xff] }
 0x267   :  { %v972_v44 = vld [vmem:[#allocation9 + $0x5d8] sm:$0xff] }
 0x268   :  { %2534 = vmatpush1.bf16.msra.mxu1 %v6352_v62  ;;  %v1015_v62 = vld [vmem:[#allocation9 + $0x730] sm:$0xff] }
 0x269   :  { %2575 = vmatpush1.bf16.msra.mxu0 %v6480_v63  ;;  %2535 = vmatprep.subr.bf16.mxu1 %v6345_v0  ;;  %v6424_v63 = vcombine.low %v891_v49, %v895_v51  ;;  %v6552_v0 = vcombine.low %v1019_v53, %v1023_v54  ;;  %v6545_v2 = vcombine.high %v1011_v61, %v1015_v62  ;;  %v836_v51 = vld [vmem:[#allocation9 + $0x198] sm:$0xff] }
 0x26a   :  { %2576 = vmatprep.subr.bf16.mxu0 %v6473_v1  ;;  %v6417_v1 = vcombine.high %v883_v59, %v887_v60  ;;  %v840_v53 = vld [vmem:[#allocation9 + $0x1b8] sm:$0xff]  ;;  %v6378_v54 = vcombine.low %v844_v42, %v848_v43 }
 0x26c   :  { %2536 = vmatpush1.bf16.msra.mxu1 %v6344_v6  ;;  %v1007_v6 = vld [vmem:[#allocation9 + $0x6f0] sm:$0xff] }
 0x26d   :  { %2577 = vmatpush1.bf16.msra.mxu0 %v6472_v7  ;;  %2537 = vmatprep.subr.bf16.mxu1 %v6337_v8  ;;  %v6416_v7 = vcombine.low %v883_v59, %v887_v60  ;;  %v6544_v8 = vcombine.low %v1011_v61, %v1015_v62  ;;  %v6537_v10 = vcombine.high %v1003_v5, %v1007_v6  ;;  %v828_v59 = vld [vmem:[#allocation9 + $0x158] sm:$0xff] }
 0x26e   :  { %2578 = vmatprep.subr.bf16.mxu0 %v6465_v9  ;;  %v6409_v9 = vcombine.high %v875_v3, %v879_v4  ;;  %v832_v60 = vld [vmem:[#allocation9 + $0x178] sm:$0xff] }
 0x26f   :  { %v956_v62 = vld [vmem:[#allocation9 + $0x558] sm:$0xff] }
 0x270   :  { %2538 = vmatpush1.bf16.msra.mxu1 %v6336_v18  ;;  %v999_v18 = vld [vmem:[#allocation9 + $0x6b0] sm:$0xff] }
 0x271   :  { %2579 = vmatpush1.bf16.msra.mxu0 %v6464_v19  ;;  %2539 = vmatprep.subr.bf16.mxu1 %v6329_v20  ;;  %v6408_v19 = vcombine.low %v875_v3, %v879_v4  ;;  %v6536_v20 = vcombine.low %v1003_v5, %v1007_v6  ;;  %v6529_v22 = vcombine.high %v995_v17, %v999_v18  ;;  %v820_v4 = vld [vmem:[#allocation9 + $0x118] sm:$0xff] }
 0x272   :  { %2580 = vmatprep.subr.bf16.mxu0 %v6457_v21  ;;  %v6401_v21 = vcombine.high %v867_v11, %v871_v12  ;;  %v824_v5 = vld [vmem:[#allocation9 + $0x138] sm:$0xff] }
 0x273   :  { %v948_v6 = vld [vmem:[#allocation9 + $0x518] sm:$0xff] }
 0x274   :  { %2540 = vmatpush1.bf16.msra.mxu1 %v6328_v26  ;;  %v991_v26 = vld [vmem:[#allocation9 + $0x670] sm:$0xff] }
 0x275   :  { %2581 = vmatpush1.bf16.msra.mxu0 %v6456_v27  ;;  %2541 = vmatprep.subr.bf16.mxu1 %v6321_v29  ;;  %v6400_v27 = vcombine.low %v867_v11, %v871_v12  ;;  %v6528_v29 = vcombine.low %v995_v17, %v999_v18  ;;  %v6521_v33 = vcombine.high %v987_v25, %v991_v26  ;;  %v812_v11 = vld [vmem:[#allocation9 + $0xd8] sm:$0xff] }
 0x276   :  { %2582 = vmatprep.subr.bf16.mxu0 %v6449_v32  ;;  %v6393_v32 = vcombine.high %v859_v23, %v863_v24  ;;  %v816_v12 = vld [vmem:[#allocation9 + $0xf8] sm:$0xff] }
 0x277   :  { %v940_v17 = vld [vmem:[#allocation9 + $0x4d8] sm:$0xff] }
 0x278   :  { %2542 = vmatpush1.bf16.msra.mxu1 %v6320_v37  ;;  %v983_v37 = vld [vmem:[#allocation9 + $0x630] sm:$0xff]  ;;  %v944_v18 = vld [vmem:[#allocation9 + $0x4f8] sm:$0xff] }
 0x279   :  { %2583 = vmatpush1.bf16.msra.mxu0 %v6448_v38  ;;  %2543 = vmatprep.subr.bf16.mxu1 %v6441_v39  ;;  %v6392_v38 = vcombine.low %v859_v23, %v863_v24  ;;  %v6520_v39 = vcombine.low %v987_v25, %v991_v26  ;;  %v6513_v41 = vcombine.high %v979_v36, %v983_v37  ;;  %v808_v23 = vld [vmem:[#allocation9 + $0xb8] sm:$0xff] }
 0x27a   :  { %2584 = vmatprep.subr.bf16.mxu0 %v6569_v40  ;;  %v6385_v40 = vcombine.high %v851_v34, %v855_v35  ;;  %v932_v24 = vld [vmem:[#allocation9 + $0x498] sm:$0xff]  ;;  %v6346_v26 = vcombine.low %v812_v11, %v816_v12 }
 0x27b   :  { %v936_v25 = vld [vmem:[#allocation9 + $0x4b8] sm:$0xff] }
 0x27c   :  { %2544 = vmatpush2.bf16.msra.mxu1 %v6440_v45  ;;  %v976_v45 = vld [vmem:[#allocation9 + $0x5f8] sm:$0xff] }
 0x27d   :  { %2585 = vmatpush2.bf16.msra.mxu0 %v6568_v46  ;;  %2545 = vmatprep.subr.bf16.mxu1 %v6433_v47  ;;  %v6384_v46 = vcombine.low %v851_v34, %v855_v35  ;;  %v6512_v47 = vcombine.low %v979_v36, %v983_v37  ;;  %v6507_v49 = vcombine.high %v972_v44, %v976_v45  ;;  %v800_v34 = vld [vmem:[#allocation9 + $0x78] sm:$0xff] }
 0x27e   :  { %2586 = vmatprep.subr.bf16.mxu0 %v6561_v48  ;;  %v6379_v48 = vcombine.high %v844_v42, %v848_v43  ;;  %v924_v35 = vld [vmem:[#allocation9 + $0x458] sm:$0xff] }
 0x27f   :  { %v928_v36 = vld [vmem:[#allocation9 + $0x478] sm:$0xff] }
 0x280   :  { %2546 = vmatpush2.bf16.msra.mxu1 %v6432_v55  ;;  %v964_v55 = vld [vmem:[#allocation9 + $0x598] sm:$0xff] }
 0x281   :  { %2587 = vmatpush2.bf16.msra.mxu0 %v6560_v56  ;;  %2547 = vmatprep.subr.bf16.mxu1 %v6425_v57  ;;  %v968_v56 = vld [vmem:[#allocation9 + $0x5b8] sm:$0xff]  ;;  %v6506_v57 = vcombine.low %v972_v44, %v976_v45 }
 0x282   :  { %2588 = vmatprep.subr.bf16.mxu0 %v6553_v58  ;;  %v6371_v58 = vcombine.high %v836_v51, %v840_v53  ;;  %v6499_v61 = vcombine.high %v964_v55, %v968_v56  ;;  %v792_v42 = vld [vmem:[#allocation9 + $0x38] sm:$0xff] }
 0x283   :  { %v916_v43 = vld [vmem:[#allocation9 + $0x418] sm:$0xff] }
 0x284   :  { %2548 = vmatpush2.bf16.msra.mxu1 %v6424_v63  ;;  %v960_v63 = vld [vmem:[#allocation9 + $0x578] sm:$0xff] }
 0x285   :  { %2589 = vmatpush2.bf16.msra.mxu0 %v6552_v0  ;;  %2549 = vmatprep.subr.bf16.mxu1 %v6417_v1  ;;  %v6370_v0 = vcombine.low %v836_v51, %v840_v53  ;;  %v6498_v1 = vcombine.low %v964_v55, %v968_v56  ;;  %v6491_v3 = vcombine.high %v956_v62, %v960_v63  ;;  %v920_v44 = vld [vmem:[#allocation9 + $0x438] sm:$0xff] }
 0x286   :  { %2590 = vmatprep.subr.bf16.mxu0 %v6545_v2  ;;  %v6363_v2 = vcombine.high %v828_v59, %v832_v60  ;;  %v912_v51 = vld [vmem:[#allocation9 + $0x3f8] sm:$0xff]  ;;  %v6450_v56 = vcombine.low %v916_v43, %v920_v44 }
 0x287   :  { %v1036_v53 = vld [vmem:[#allocation9 + $0x7d8] sm:$0xff] }
 0x288   :  { %2550 = vmatpush2.bf16.msra.mxu1 %v6416_v7  ;;  %v952_v7 = vld [vmem:[#allocation9 + $0x538] sm:$0xff] }
 0x289   :  { %2591 = vmatpush2.bf16.msra.mxu0 %v6544_v8  ;;  %2551 = vmatprep.subr.bf16.mxu1 %v6409_v9  ;;  %v6362_v8 = vcombine.low %v828_v59, %v832_v60  ;;  %v6490_v9 = vcombine.low %v956_v62, %v960_v63  ;;  %v900_v59 = vld [vmem:[#allocation9 + $0x398] sm:$0xff] }
 0x28a   :  { %2592 = vmatprep.subr.bf16.mxu0 %v6537_v10  ;;  %v6355_v10 = vcombine.high %v820_v4, %v824_v5  ;;  %v904_v60 = vld [vmem:[#allocation9 + $0x3b8] sm:$0xff] }
 0x28b   :  { %v1032_v62 = vld [vmem:[#allocation9 + $0x7b8] sm:$0xff] }
 0x28c   :  { %2552 = vmatpush2.bf16.msra.mxu1 %v6408_v19  ;;  %v6482_v19 = vcombine.low %v948_v6, %v952_v7 }
 0x28d   :  { %2593 = vmatpush2.bf16.msra.mxu0 %v6536_v20  ;;  %2553 = vmatprep.subr.bf16.mxu1 %v6401_v21  ;;  %v6347_v20 = vcombine.high %v812_v11, %v816_v12  ;;  %v6475_v21 = vcombine.high %v940_v17, %v944_v18  ;;  %v888_v11 = vld [vmem:[#allocation9 + $0x338] sm:$0xff] }
 0x28e   :  { %2594 = vmatprep.subr.bf16.mxu0 %v6529_v22  ;;  %v804_v22 = vld [vmem:[#allocation9 + $0x98] sm:$0xff] }
 0x28f   :  { %v6338_v37 = vcombine.low %v804_v22, %v808_v23  ;;  %v1012_v12 = vld [vmem:[#allocation9 + $0x718] sm:$0xff] }
 0x290   :  { %2554 = vmatpush2.bf16.msra.mxu1 %v6400_v27  ;;  %v6474_v27 = vcombine.low %v940_v17, %v944_v18  ;;  %v1016_v17 = vld [vmem:[#allocation9 + $0x738] sm:$0xff] }
 0x291   :  { %2595 = vmatpush2.bf16.msra.mxu0 %v6528_v29  ;;  %2555 = vmatprep.subr.bf16.mxu1 %v6393_v32  ;;  %v6339_v29 = vcombine.high %v804_v22, %v808_v23  ;;  %v6467_v32 = vcombine.high %v932_v24, %v936_v25  ;;  %v880_v22 = vld [vmem:[#allocation9 + $0x2f8] sm:$0xff] }
 0x292   :  { %2596 = vmatprep.subr.bf16.mxu0 %v6521_v33  ;;  %v796_v33 = vld [vmem:[#allocation9 + $0x58] sm:$0xff] }
 0x293   :  { %v6330_v45 = vcombine.low %v796_v33, %v800_v34  ;;  %v1004_v23 = vld [vmem:[#allocation9 + $0x6d8] sm:$0xff] }
 0x294   :  { %2556 = vmatpush2.bf16.msra.mxu1 %v6392_v38  ;;  %v6466_v38 = vcombine.low %v932_v24, %v936_v25  ;;  %v1008_v24 = vld [vmem:[#allocation9 + $0x6f8] sm:$0xff] }
 0x295   :  { %2597 = vmatpush2.bf16.msra.mxu0 %v6520_v39  ;;  %2557 = vmatprep.subr.bf16.mxu1 %v6385_v40  ;;  %v6331_v39 = vcombine.high %v796_v33, %v800_v34  ;;  %v6459_v40 = vcombine.high %v924_v35, %v928_v36  ;;  %v872_v33 = vld [vmem:[#allocation9 + $0x2b8] sm:$0xff] }
 0x296   :  { %2598 = vmatprep.subr.bf16.mxu0 %v6513_v41  ;;  %v788_v41 = vld [vmem:[#allocation9 + $0x18] sm:$0xff] }
 0x297   :  { %v6322_v55 = vcombine.low %v788_v41, %v792_v42  ;;  %v996_v34 = vld [vmem:[#allocation9 + $0x698] sm:$0xff] }
 0x298   :  { %2558 = vmatpush2.bf16.msra.mxu1 %v6384_v46  ;;  %v6458_v46 = vcombine.low %v924_v35, %v928_v36  ;;  %v1000_v35 = vld [vmem:[#allocation9 + $0x6b8] sm:$0xff] }
 0x299   :  { %2599 = vmatpush2.bf16.msra.mxu0 %v6512_v47  ;;  %2609 = vmatprep.subr.bf16.mxu1 %v6379_v48  ;;  %v6323_v47 = vcombine.high %v788_v41, %v792_v42  ;;  %v6451_v48 = vcombine.high %v916_v43, %v920_v44  ;;  %v864_v41 = vld [vmem:[#allocation9 + $0x278] sm:$0xff] }
 0x29a   :  { %2650 = vmatprep.subr.bf16.mxu0 %v6507_v49  ;;  %v908_v49 = vld [vmem:[#allocation9 + $0x3d8] sm:$0xff] }
 0x29b   :  { %2560 = vmatmul.mubr.bf16.vlgmr.msra.gmra.mxu1 %v8188_v15  ;;  %v6442_v63 = vcombine.low %v908_v49, %v912_v51  ;;  %v988_v42 = vld [vmem:[#allocation9 + $0x658] sm:$0xff] }
 0x29c   :  { %2601 = vmatmul.mubr.bf16.vlgmr.msra.gmra.mxu0 %v8190_v16  ;;  %2610 = vmatpush1.bf16.msra.mxu1 %v6378_v54  ;;  %v1040_v54 = vld [vmem:[#allocation9 + $0x7f8] sm:$0xff] }
 0x29d   :  { %2641 = vmatprep.mubr.bf16.mxu1 %v8184_v13  ;;  %2651 = vmatpush1.bf16.msra.mxu0 %v6506_v57  ;;  %v6483_v13 = vcombine.high %v948_v6, %v952_v7  ;;  %v6443_v57 = vcombine.high %v908_v49, %v912_v51  ;;  %v1024_v6 = vld [vmem:[#allocation9 + $0x778] sm:$0xff]  ;;  %v6434_v7 = vcombine.low %v900_v59, %v904_v60 }
 0x29e   :  { %2682 = vmatprep.mubr.bf16.mxu0 %v8186_v14  ;;  %2611 = vmatprep.subr.bf16.mxu1 %v6371_v58  ;;  %v6354_v14 = vcombine.low %v820_v4, %v824_v5  ;;  %v6571_v58 = vcombine.high %v1036_v53, %v1040_v54  ;;  %v896_v4 = vld [vmem:[#allocation9 + $0x378] sm:$0xff] }
 0x29f   :  { %2652 = vmatprep.subr.bf16.mxu0 %v6499_v61  ;;  %v1028_v61 = vld [vmem:[#allocation9 + $0x798] sm:$0xff] }
 0x2a0   :  { %2612 = vmatpush1.bf16.msra.mxu1 %v6370_v0  ;;  %v6570_v0 = vcombine.low %v1036_v53, %v1040_v54  ;;  %v1020_v5 = vld [vmem:[#allocation9 + $0x758] sm:$0xff] }
 0x2a1   :  { %2653 = vmatpush1.bf16.msra.mxu0 %v6498_v1  ;;  %2613 = vmatprep.subr.bf16.mxu1 %v6363_v2  ;;  %v6435_v1 = vcombine.high %v900_v59, %v904_v60  ;;  %v6563_v2 = vcombine.high %v1028_v61, %v1032_v62  ;;  %v992_v43 = vld [vmem:[#allocation9 + $0x678] sm:$0xff]  ;;  %v7247_v60 = vld [vmem:[#allocation12 + $0x18c] ss:$28 sps:$4 sm:$0xff]  }
 0x2a2   :  { %2654 = vmatprep.subr.bf16.mxu0 %v6491_v3  ;;  %v892_v3 = vld [vmem:[#allocation9 + $0x358] sm:$0xff] }
 0x2a3   :  { %v6426_v18 = vcombine.low %v892_v3, %v896_v4  ;;  %v856_v49 = vld [vmem:[#allocation9 + $0x238] sm:$0xff] }
 0x2a4   :  { %2614 = vmatpush1.bf16.msra.mxu1 %v6362_v8  ;;  %v6562_v8 = vcombine.low %v1028_v61, %v1032_v62  ;;  %v980_v51 = vld [vmem:[#allocation9 + $0x618] sm:$0xff]  ;;  %v7259_v61 = vld [vmem:[#allocation12 + $0x50c] ss:$28 sps:$4 sm:$0xff]  }
 0x2a5   :  { %2655 = vmatpush1.bf16.msra.mxu0 %v6490_v9  ;;  %2615 = vmatprep.subr.bf16.mxu1 %v6355_v10  ;;  %v6427_v9 = vcombine.high %v892_v3, %v896_v4  ;;  %v6555_v10 = vcombine.high %v1020_v5, %v1024_v6  ;;  %v984_v53 = vld [vmem:[#allocation9 + $0x638] sm:$0xff]  ;;  %v7245_v62 = vld [vmem:[#allocation12 + $0x188] ss:$28 sps:$4 sm:$0xff]  }
 0x2a6   :  { %2656 = vmatprep.subr.bf16.mxu0 %v6483_v13  ;;  %v884_v13 = vld [vmem:[#allocation9 + $0x318] sm:$0xff]  ;;  %v6514_v59 = vcombine.low %v980_v51, %v984_v53 }
 0x2a7   :  { %v6418_v25 = vcombine.low %v884_v13, %v888_v11  ;;  %v7265_v3 = vld [vmem:[#allocation12 + $0x4d4] ss:$28 sps:$4 sm:$0xff]  }
 0x2a8   :  { %2616 = vmatpush1.bf16.msra.mxu1 %v6354_v14  ;;  %v6554_v14 = vcombine.low %v1020_v5, %v1024_v6  ;;  %v7248_v6 = vld [vmem:[#allocation12 + $0x150] ss:$28 sps:$4 sm:$0xff]  }
 0x2a9   :  { %2657 = vmatpush1.bf16.msra.mxu0 %v6482_v19  ;;  %2617 = vmatprep.subr.bf16.mxu1 %v6347_v20  ;;  %v6419_v19 = vcombine.high %v884_v13, %v888_v11  ;;  %v6547_v20 = vcombine.high %v1012_v12, %v1016_v17  ;;  %v7271_v11 = vld [vmem:[#allocation12 + $0x49c] ss:$28 sps:$4 sm:$0xff]  }
 0x2aa   :  { %2658 = vmatprep.subr.bf16.mxu0 %v6475_v21  ;;  %v876_v21 = vld [vmem:[#allocation9 + $0x2d8] sm:$0xff] }
 0x2ab   :  { %v6410_v36 = vcombine.low %v876_v21, %v880_v22 }
 0x2ac   :  { %2618 = vmatpush1.bf16.msra.mxu1 %v6346_v26  ;;  %v6546_v26 = vcombine.low %v1012_v12, %v1016_v17 }
 0x2ad   :  { %2659 = vmatpush1.bf16.msra.mxu0 %v6474_v27  ;;  %2619 = vmatprep.subr.bf16.mxu1 %v6339_v29  ;;  %v6411_v27 = vcombine.high %v876_v21, %v880_v22  ;;  %v6539_v29 = vcombine.high %v1004_v23, %v1008_v24  ;;  %v7277_v22 = vld [vmem:[#allocation12 + $0x464] ss:$28 sps:$4 sm:$0xff]  }
 0x2ae   :  { %2660 = vmatprep.subr.bf16.mxu0 %v6467_v32  ;;  %v868_v32 = vld [vmem:[#allocation9 + $0x298] sm:$0xff] }
 0x2af   :  { %v6402_v44 = vcombine.low %v868_v32, %v872_v33 }
 0x2b0   :  { %2620 = vmatpush1.bf16.msra.mxu1 %v6338_v37  ;;  %v6538_v37 = vcombine.low %v1004_v23, %v1008_v24  ;;  %v7254_v24 = vld [vmem:[#allocation12 + $0xe0] ss:$28 sps:$4 sm:$0xff]  }
 0x2b1   :  { %2661 = vmatpush1.bf16.msra.mxu0 %v6466_v38  ;;  %2621 = vmatprep.subr.bf16.mxu1 %v6331_v39  ;;  %v6403_v38 = vcombine.high %v868_v32, %v872_v33  ;;  %v6531_v39 = vcombine.high %v996_v34, %v1000_v35  ;;  %v7268_v32 = vld [vmem:[#allocation12 + $0x74] ss:$28 sps:$4 sm:$0xff]   ;;  %v7281_v33 = vld [vmem:[#allocation12 + $0x428] ss:$28 sps:$4 sm:$0xff]  }
 0x2b2   :  { %2662 = vmatprep.subr.bf16.mxu0 %v6459_v40  ;;  %v860_v40 = vld [vmem:[#allocation9 + $0x258] sm:$0xff] }
 0x2b3   :  { %v6394_v54 = vcombine.low %v860_v40, %v864_v41 }
 0x2b4   :  { %2622 = vmatpush1.bf16.msra.mxu1 %v6330_v45  ;;  %v6530_v45 = vcombine.low %v996_v34, %v1000_v35  ;;  %v7289_v34 = vld [vmem:[#allocation12 + $0x3f4] ss:$28 sps:$4 sm:$0xff]  }
 0x2b5   :  { %2663 = vmatpush1.bf16.msra.mxu0 %v6458_v46  ;;  %2623 = vmatprep.subr.bf16.mxu1 %v6323_v47  ;;  %v6395_v46 = vcombine.high %v860_v40, %v864_v41  ;;  %v6523_v47 = vcombine.high %v988_v42, %v992_v43  ;;  %v7266_v35 = vld [vmem:[#allocation12 + $0x70] ss:$28 sps:$4 sm:$0xff]   ;;  %v7280_v40 = vld [vmem:[#allocation12 + $0x4] ss:$28 sps:$4 sm:$0xff]   ;;  %v7293_v41 = vld [vmem:[#allocation12 + $0x3b8] ss:$28 sps:$4 sm:$0xff]  }
 0x2b6   :  { %2664 = vmatprep.subr.bf16.mxu0 %v6451_v48  ;;  %v852_v48 = vld [vmem:[#allocation9 + $0x218] sm:$0xff] }
 0x2b8   :  { %2624 = vmatpush1.bf16.msra.mxu1 %v6322_v55  ;;  %v6522_v55 = vcombine.low %v988_v42, %v992_v43  ;;  %v7301_v42 = vld [vmem:[#allocation12 + $0x384] ss:$28 sps:$4 sm:$0xff]  }
 0x2b9   :  { %2665 = vmatpush1.bf16.msra.mxu0 %v6450_v56  ;;  %2625 = vmatprep.subr.bf16.mxu1 %v6443_v57  ;;  %v6387_v56 = vcombine.high %v852_v48, %v856_v49  ;;  %v6515_v57 = vcombine.high %v980_v51, %v984_v53  ;;  %v7278_v43 = vld [vmem:[#allocation12] ss:$28 sps:$4 sm:$0xff]   ;;  %v7313_v51 = vld [vmem:[#allocation12 + $0x694] ss:$28 sps:$4 sm:$0xff]  }
 0x2ba   :  { %2666 = vmatprep.subr.bf16.mxu0 %v6571_v58  ;;  %v6386_v58 = vcombine.low %v852_v48, %v856_v49  ;;  %v7292_v48 = vld [vmem:[#allocation12 + $0x314] ss:$28 sps:$4 sm:$0xff]   ;;  %v7305_v49 = vld [vmem:[#allocation12 + $0x6c8] ss:$28 sps:$4 sm:$0xff]  }
 0x2bb   :  { %v7290_v53 = vld [vmem:[#allocation12 + $0x310] ss:$28 sps:$4 sm:$0xff]  }
 0x2bc   :  { %2626 = vmatpush2.bf16.msra.mxu1 %v6442_v63  ;;  %v8206_v63 = vld [vmem:[#allocation10] sm:$0xff] }
 0x2bd   :  { %2667 = vmatpush2.bf16.msra.mxu0 %v6570_v0  ;;  %2627 = vmatprep.subr.bf16.mxu1 %v6435_v1  ;;  %v7250_v0 = vld [vmem:[#allocation12 + $0x154] ss:$28 sps:$4 sm:$0xff]   ;;  %v7257_v1 = vld [vmem:[#allocation12 + $0x508] ss:$28 sps:$4 sm:$0xff]  }
 0x2be   :  { %2668 = vmatprep.subr.bf16.mxu0 %v6563_v2  ;;  %v1050_v2 = vrot.slane %v8206_v63, %v8170_v31 }
 0x2c0   :  { %2628 = vmatpush2.bf16.msra.mxu1 %v6434_v7 }
 0x2c1   :  { %2669 = vmatpush2.bf16.msra.mxu0 %v6562_v8  ;;  %2629 = vmatprep.subr.bf16.mxu1 %v6427_v9  ;;  %v7253_v9 = vld [vmem:[#allocation12 + $0x11c] ss:$28 sps:$4 sm:$0xff]  }
 0x2c2   :  { %2670 = vmatprep.subr.bf16.mxu0 %v6555_v10  ;;  %v7263_v10 = vld [vmem:[#allocation12 + $0x4d0] ss:$28 sps:$4 sm:$0xff]  }
 0x2c4   :  { %2630 = vmatpush2.bf16.msra.mxu1 %v6426_v18  ;;  %v7251_v18 = vld [vmem:[#allocation12 + $0x118] ss:$28 sps:$4 sm:$0xff]  }
 0x2c5   :  { %2671 = vmatpush2.bf16.msra.mxu0 %v6554_v14  ;;  %2631 = vmatprep.subr.bf16.mxu1 %v6419_v19 }
 0x2c6   :  { %2672 = vmatprep.subr.bf16.mxu0 %v6547_v20  ;;  %v7269_v20 = vld [vmem:[#allocation12 + $0x498] ss:$28 sps:$4 sm:$0xff]  }
 0x2c8   :  { %2632 = vmatpush2.bf16.msra.mxu1 %v6418_v25  ;;  %v7262_v25 = vld [vmem:[#allocation12 + $0xac] ss:$28 sps:$4 sm:$0xff]  }
 0x2c9   :  { %2673 = vmatpush2.bf16.msra.mxu0 %v6546_v26  ;;  %2633 = vmatprep.subr.bf16.mxu1 %v6411_v27  ;;  %v7275_v26 = vld [vmem:[#allocation12 + $0x460] ss:$28 sps:$4 sm:$0xff]   ;;  %v7283_v27 = vld [vmem:[#allocation12 + $0x42c] ss:$28 sps:$4 sm:$0xff]  }
 0x2ca   :  { %2674 = vmatprep.subr.bf16.mxu0 %v6539_v29  ;;  %v7260_v29 = vld [vmem:[#allocation12 + $0xa8] ss:$28 sps:$4 sm:$0xff]  }
 0x2cc   :  { %2634 = vmatpush2.bf16.msra.mxu1 %v6410_v36  ;;  %v7274_v36 = vld [vmem:[#allocation12 + $0x3c] ss:$28 sps:$4 sm:$0xff]  }
 0x2cd   :  { %2675 = vmatpush2.bf16.msra.mxu0 %v6538_v37  ;;  %2635 = vmatprep.subr.bf16.mxu1 %v6403_v38  ;;  %v7287_v37 = vld [vmem:[#allocation12 + $0x3f0] ss:$28 sps:$4 sm:$0xff]   ;;  %v7295_v38 = vld [vmem:[#allocation12 + $0x3bc] ss:$28 sps:$4 sm:$0xff]  }
 0x2ce   :  { %2676 = vmatprep.subr.bf16.mxu0 %v6531_v39  ;;  %v7272_v39 = vld [vmem:[#allocation12 + $0x38] ss:$28 sps:$4 sm:$0xff]  }
 0x2d0   :  { %2636 = vmatpush2.bf16.msra.mxu1 %v6402_v44  ;;  %v7286_v44 = vld [vmem:[#allocation12 + $0x34c] ss:$28 sps:$4 sm:$0xff]  }
 0x2d1   :  { %2677 = vmatpush2.bf16.msra.mxu0 %v6530_v45  ;;  %2637 = vmatprep.subr.bf16.mxu1 %v6395_v46  ;;  %v7299_v45 = vld [vmem:[#allocation12 + $0x380] ss:$28 sps:$4 sm:$0xff]   ;;  %v7307_v46 = vld [vmem:[#allocation12 + $0x6cc] ss:$28 sps:$4 sm:$0xff]  }
 0x2d2   :  { %2678 = vmatprep.subr.bf16.mxu0 %v6523_v47  ;;  %v7284_v47 = vld [vmem:[#allocation12 + $0x348] ss:$28 sps:$4 sm:$0xff]  }
 0x2d4   :  { %2638 = vmatpush2.bf16.msra.mxu1 %v6394_v54  ;;  %v7298_v54 = vld [vmem:[#allocation12 + $0x2dc] ss:$28 sps:$4 sm:$0xff]  }
 0x2d5   :  { %2679 = vmatpush2.bf16.msra.mxu0 %v6522_v55  ;;  %2639 = vmatprep.subr.bf16.mxu1 %v6387_v56  ;;  %v7311_v55 = vld [vmem:[#allocation12 + $0x690] ss:$28 sps:$4 sm:$0xff]   ;;  %v7319_v56 = vld [vmem:[#allocation12 + $0x65c] ss:$28 sps:$4 sm:$0xff]  }
 0x2d6   :  { %2680 = vmatprep.subr.bf16.mxu0 %v6515_v57  ;;  %v7296_v57 = vld [vmem:[#allocation12 + $0x2d8] ss:$28 sps:$4 sm:$0xff]  }
 0x2d8   :  { %2640 = vmatpush2.bf16.msra.mxu1 %v6386_v58  ;;  %v7304_v58 = vld [vmem:[#allocation12 + $0x2a4] ss:$28 sps:$4 sm:$0xff]  }
 0x2d9   :  { %2681 = vmatpush2.bf16.msra.mxu0 %v6514_v59  ;;  %5560 = vmatprep.subr.bf16.mxu1 %v7247_v60  ;;  %v7317_v59 = vld [vmem:[#allocation12 + $0x658] ss:$28 sps:$4 sm:$0xff]   ;;  %v7325_v60 = vld [vmem:[#allocation12 + $0x624] ss:$28 sps:$4 sm:$0xff]  }
 0x2da   :  { %5601 = vmatprep.subr.bf16.mxu0 %v7259_v61  ;;  %v7302_v61 = vld [vmem:[#allocation12 + $0x2a0] ss:$28 sps:$4 sm:$0xff]  }
 0x2db   :  { %2642 = vmatmul.mubr.bf16.vlgmr.msra.gmra.mxu1 %v8188_v15  ;;  %v8211_v4 = vpop.f32.mrf.mxu1  ;;  %v8213_v5 = vpop.f32.mrf.mxu0 }
 0x2dc   :  { %2683 = vmatmul.mubr.bf16.vlgmr.msra.gmra.mxu0 %v8190_v16  ;;  %5561 = vmatpush1.bf16.msra.mxu1 %v7245_v62  ;;  %v7256_v16 = vld [vmem:[#allocation12 + $0xe4] ss:$28 sps:$4 sm:$0xff]   ;;  %v7310_v62 = vld [vmem:[#allocation12 + $0x26c] ss:$28 sps:$4 sm:$0xff]  }
 0x2dd   :  { %v2399_v7 = vpop.f32.mrf.mxu1  ;;  %v2440_v8 = vpop.f32.mrf.mxu0  ;;  %5562 = vmatprep.subr.bf16.mxu1 %v7250_v0  ;;  %5602 = vmatpush1.bf16.msra.mxu0 %v7257_v1  ;;  %v7323_v0 = vld [vmem:[#allocation12 + $0x620] ss:$28 sps:$4 sm:$0xff]   ;;  %v7331_v1 = vld [vmem:[#allocation12 + $0x5ec] ss:$28 sps:$4 sm:$0xff]  }
 0x2de   :  { %v2400_v13 = vadd.f32 %v2399_v7, %v1050_v2  ;;  %5603 = vmatprep.subr.bf16.mxu0 %v7265_v3  ;;  %v7308_v2 = vld [vmem:[#allocation12 + $0x268] ss:$28 sps:$4 sm:$0xff]   ;;  %v1046_v3 = vrot.slane %v8206_v63, %v8167_v30 }
 0x2df   :  { %v2401_v12 = vpop.f32.mrf.mxu1  ;;  %v2442_v17 = vpop.f32.mrf.mxu0  ;;  %v7329_v7 = vld [vmem:[#allocation12 + $0x5e8] ss:$28 sps:$4 sm:$0xff]  }
 0x2e0   :  { %v2441_v15 = vadd.f32 %v2440_v8, %v2400_v13  ;;  %5563 = vmatpush1.bf16.msra.mxu1 %v7248_v6  ;;  %v7316_v6 = vld [vmem:[#allocation12 + $0x234] ss:$28 sps:$4 sm:$0xff]   ;;  %v7322_v13 = vld [vmem:[#allocation12 + $0x1fc] ss:$28 sps:$4 sm:$0xff]  }
 0x2e1   :  { %v2402_v14 = vpop.f32.mrf.mxu1  ;;  %v2443_v19 = vpop.f32.mrf.mxu0  ;;  %5564 = vmatprep.subr.bf16.mxu1 %v7253_v9  ;;  %5604 = vmatpush1.bf16.msra.mxu0 %v7263_v10  ;;  %v7334_v8 = vld [vmem:[#allocation12 + $0x5b4] ss:$28 sps:$4 sm:$0xff]   ;;  %v2398_v10 = vadd.f32 %v8211_v4, %v1046_v3  ;;  %v7337_v12 = vld [vmem:[#allocation12 + $0x57c] ss:$28 sps:$4 sm:$0xff]  }
 0x2e2   :  { %v2692_v21 = vmax.f32 %v2441_v15, 0.0  ;;  %5605 = vmatprep.subr.bf16.mxu0 %v7271_v11  ;;  %v7314_v9 = vld [vmem:[#allocation12 + $0x230] ss:$28 sps:$4 sm:$0xff]   ;;  %v7320_v17 = vld [vmem:[#allocation12 + $0x1f8] ss:$28 sps:$4 sm:$0xff]  }
 0x2e3   :  { %v7332_v11 = vld [vmem:[#allocation12 + $0x5b0] ss:$28 sps:$4 sm:$0xff]   ;;  %v2439_v15 = vadd.f32 %v8213_v5, %v2398_v10  ;;  %v7335_v14 = vld [vmem:[#allocation12 + $0x578] ss:$28 sps:$4 sm:$0xff]   ;;  %v7340_v19 = vld [vmem:[#allocation12 + $0x544] ss:$28 sps:$4 sm:$0xff]  }
 0x2e4   :  { %v8216_v23 = vpack.c.bf16 %v2692_v21, %v2692_v21  ;;  %5565 = vmatpush1.bf16.msra.mxu1 %v7251_v18  ;;  %v7328_v18 = vld [vmem:[#allocation12 + $0x1c4] ss:$28 sps:$4 sm:$0xff]   ;;  %v7343_v21 = vld [vmem:[#allocation12 + $0x88c] ss:$28 sps:$4 sm:$0xff]  }
 0x2e5   :  { %5566 = vmatprep.subr.bf16.mxu1 %v7256_v16  ;;  %5606 = vmatpush1.bf16.msra.mxu0 %v7269_v20  ;;  %v7326_v16 = vld [vmem:[#allocation12 + $0x1c0] ss:$28 sps:$4 sm:$0xff]   ;;  %v2691_v20 = vmax.f32 %v2439_v15, 0.0  ;;  %v7341_v5 = vld [vmem:[#allocation12 + $0x888] ss:$28 sps:$4 sm:$0xff]  }
 0x2e6   :  { %5592 = vmatprep.mubr.bf16.mxu1 %v8216_v23  ;;  %5607 = vmatprep.subr.bf16.mxu0 %v7277_v22  ;;  %v7338_v4 = vld [vmem:[#allocation12 + $0x540] ss:$28 sps:$4 sm:$0xff]   ;;  %v7391_v22 = vld [vmem:[#allocation12 + $0xc0c] ss:$28 sps:$4 sm:$0xff]  }
 0x2e7   :  { %v7407_v3 = vld [vmem:[#allocation12 + $0xb60] ss:$28 sps:$4 sm:$0xff]   ;;  %v7367_v10 = vld [vmem:[#allocation12 + $0xa4c] ss:$28 sps:$4 sm:$0xff]  }
 0x2e8   :  { %5567 = vmatpush1.bf16.msra.mxu1 %v7254_v24  ;;  %v1054_v24 = vrot.slane %v8206_v63, %v8175_v50  ;;  %v7427_v15 = vld [vmem:[#allocation12 + $0xabc] ss:$28 sps:$4 sm:$0xff]  }
 0x2e9   :  { %5568 = vmatprep.subr.bf16.mxu1 %v7262_v25  ;;  %5608 = vmatpush1.bf16.msra.mxu0 %v7275_v26  ;;  %v8225_v25 = vpack.c.bf16 %v2691_v20, %v2691_v20  ;;  %v7346_v26 = vld [vmem:[#allocation12 + $0x854] ss:$28 sps:$4 sm:$0xff]  }
 0x2ea   :  { %5609 = vmatprep.subr.bf16.mxu0 %v7283_v27  ;;  %v1058_v27 = vrot.slane %v8206_v63, %v8178_v52  ;;  %v7371_v20 = vld [vmem:[#allocation12 + $0x9d8] ss:$28 sps:$4 sm:$0xff]  }
 0x2ec   :  { %5569 = vmatpush1.bf16.msra.mxu1 %v7260_v29 }
 0x2ed   :  { %5570 = vmatprep.subr.bf16.mxu1 %v7268_v32  ;;  %5610 = vmatpush1.bf16.msra.mxu0 %v7281_v33 }
 0x2ee   :  { %5611 = vmatprep.subr.bf16.mxu0 %v7289_v34  ;;  %v7344_v34 = vld [vmem:[#allocation12 + $0x850] ss:$28 sps:$4 sm:$0xff]  }
 0x2f0   :  { %5571 = vmatpush1.bf16.msra.mxu1 %v7266_v35 }
 0x2f1   :  { %5572 = vmatprep.subr.bf16.mxu1 %v7274_v36  ;;  %5612 = vmatpush1.bf16.msra.mxu0 %v7287_v37  ;;  %v7349_v37 = vld [vmem:[#allocation12 + $0x81c] ss:$28 sps:$4 sm:$0xff]  }
 0x2f2   :  { %5613 = vmatprep.subr.bf16.mxu0 %v7295_v38 }
 0x2f4   :  { %5573 = vmatpush1.bf16.msra.mxu1 %v7272_v39 }
 0x2f5   :  { %5574 = vmatprep.subr.bf16.mxu1 %v7280_v40  ;;  %5614 = vmatpush1.bf16.msra.mxu0 %v7293_v41 }
 0x2f6   :  { %5615 = vmatprep.subr.bf16.mxu0 %v7301_v42 }
 0x2f8   :  { %5575 = vmatpush1.bf16.msra.mxu1 %v7278_v43  ;;  %v7347_v43 = vld [vmem:[#allocation12 + $0x818] ss:$28 sps:$4 sm:$0xff]  }
 0x2f9   :  { %5576 = vmatprep.subr.bf16.mxu1 %v7286_v44  ;;  %5616 = vmatpush1.bf16.msra.mxu0 %v7299_v45 }
 0x2fa   :  { %5617 = vmatprep.subr.bf16.mxu0 %v7307_v46 }
 0x2fc   :  { %5577 = vmatpush2.bf16.msra.mxu1 %v7284_v47  ;;  %v7352_v47 = vld [vmem:[#allocation12 + $0x7e4] ss:$28 sps:$4 sm:$0xff]  }
 0x2fd   :  { %5578 = vmatprep.subr.bf16.mxu1 %v7292_v48  ;;  %5618 = vmatpush2.bf16.msra.mxu0 %v7305_v49 }
 0x2fe   :  { %5619 = vmatprep.subr.bf16.mxu0 %v7313_v51  ;;  %v7350_v51 = vld [vmem:[#allocation12 + $0x7e0] ss:$28 sps:$4 sm:$0xff]  }
 0x300   :  { %5579 = vmatpush2.bf16.msra.mxu1 %v7290_v53  ;;  %v7389_v53 = vld [vmem:[#allocation12 + $0xc08] ss:$28 sps:$4 sm:$0xff]  }
 0x301   :  { %5580 = vmatprep.subr.bf16.mxu1 %v7298_v54  ;;  %5620 = vmatpush2.bf16.msra.mxu0 %v7311_v55  ;;  %v7355_v55 = vld [vmem:[#allocation12 + $0x7ac] ss:$28 sps:$4 sm:$0xff]  }
 0x302   :  { %5621 = vmatprep.subr.bf16.mxu0 %v7319_v56  ;;  %v7397_v56 = vld [vmem:[#allocation12 + $0xbd4] ss:$28 sps:$4 sm:$0xff]  }
 0x304   :  { %5581 = vmatpush2.bf16.msra.mxu1 %v7296_v57  ;;  %v7353_v57 = vld [vmem:[#allocation12 + $0x7a8] ss:$28 sps:$4 sm:$0xff]  }
 0x305   :  { %5582 = vmatprep.subr.bf16.mxu1 %v7304_v58  ;;  %5622 = vmatpush2.bf16.msra.mxu0 %v7317_v59  ;;  %v7395_v58 = vld [vmem:[#allocation12 + $0xbd0] ss:$28 sps:$4 sm:$0xff]  }
 0x306   :  { %5623 = vmatprep.subr.bf16.mxu0 %v7325_v60  ;;  %v7358_v59 = vld [vmem:[#allocation12 + $0x774] ss:$28 sps:$4 sm:$0xff]   ;;  %v7403_v60 = vld [vmem:[#allocation12 + $0xb9c] ss:$28 sps:$4 sm:$0xff]  }
 0x308   :  { %5583 = vmatpush2.bf16.msra.mxu1 %v7302_v61  ;;  %v7356_v61 = vld [vmem:[#allocation12 + $0x770] ss:$28 sps:$4 sm:$0xff]  }
 0x309   :  { %5584 = vmatprep.subr.bf16.mxu1 %v7310_v62  ;;  %5624 = vmatpush2.bf16.msra.mxu0 %v7323_v0  ;;  %v7401_v62 = vld [vmem:[#allocation12 + $0xb98] ss:$28 sps:$4 sm:$0xff]  }
 0x30a   :  { %5625 = vmatprep.subr.bf16.mxu0 %v7331_v1  ;;  %v7361_v0 = vld [vmem:[#allocation12 + $0x73c] ss:$28 sps:$4 sm:$0xff]   ;;  %v7409_v1 = vld [vmem:[#allocation12 + $0xb64] ss:$28 sps:$4 sm:$0xff]  }
 0x30c   :  { %5585 = vmatpush2.bf16.msra.mxu1 %v7308_v2  ;;  %v7359_v2 = vld [vmem:[#allocation12 + $0x738] ss:$28 sps:$4 sm:$0xff]  }
 0x30d   :  { %5586 = vmatprep.subr.bf16.mxu1 %v7316_v6  ;;  %5626 = vmatpush2.bf16.msra.mxu0 %v7329_v7  ;;  %v7364_v6 = vld [vmem:[#allocation12 + $0x704] ss:$28 sps:$4 sm:$0xff]   ;;  %v7415_v7 = vld [vmem:[#allocation12 + $0xb2c] ss:$28 sps:$4 sm:$0xff]  }
 0x30e   :  { %5627 = vmatprep.subr.bf16.mxu0 %v7334_v8  ;;  %v7362_v8 = vld [vmem:[#allocation12 + $0x700] ss:$28 sps:$4 sm:$0xff]  }
 0x310   :  { %5587 = vmatpush2.bf16.msra.mxu1 %v7314_v9  ;;  %v7413_v9 = vld [vmem:[#allocation12 + $0xb28] ss:$28 sps:$4 sm:$0xff]  }
 0x311   :  { %5588 = vmatprep.subr.bf16.mxu1 %v7322_v13  ;;  %5628 = vmatpush2.bf16.msra.mxu0 %v7332_v11  ;;  %v7421_v13 = vld [vmem:[#allocation12 + $0xaf4] ss:$28 sps:$4 sm:$0xff]   ;;  %v7365_v11 = vld [vmem:[#allocation12 + $0xa48] ss:$28 sps:$4 sm:$0xff]  }
 0x312   :  { %5629 = vmatprep.subr.bf16.mxu0 %v7337_v12  ;;  %v7419_v12 = vld [vmem:[#allocation12 + $0xaf0] ss:$28 sps:$4 sm:$0xff]  }
 0x314   :  { %5589 = vmatpush2.bf16.msra.mxu1 %v7320_v17  ;;  %v7370_v17 = vld [vmem:[#allocation12 + $0xa14] ss:$28 sps:$4 sm:$0xff]  }
 0x315   :  { %5590 = vmatprep.subr.bf16.mxu1 %v7328_v18  ;;  %5630 = vmatpush2.bf16.msra.mxu0 %v7335_v14  ;;  %v7368_v18 = vld [vmem:[#allocation12 + $0xa10] ss:$28 sps:$4 sm:$0xff]   ;;  %v7425_v14 = vld [vmem:[#allocation12 + $0xab8] ss:$28 sps:$4 sm:$0xff]  }
 0x316   :  { %5631 = vmatprep.subr.bf16.mxu0 %v7340_v19  ;;  %v7373_v19 = vld [vmem:[#allocation12 + $0x9dc] ss:$28 sps:$4 sm:$0xff]  }
 0x318   :  { %5591 = vmatpush2.bf16.msra.mxu1 %v7326_v16  ;;  %v7433_v16 = vld [vmem:[#allocation12 + $0xa84] ss:$28 sps:$4 sm:$0xff]  }
 0x319   :  { %5632 = vmatpush2.bf16.msra.mxu0 %v7338_v4  ;;  %5642 = vmatprep.subr.bf16.mxu1 %v7343_v21  ;;  %v7431_v4 = vld [vmem:[#allocation12 + $0xa80] ss:$28 sps:$4 sm:$0xff]  }
 0x31a   :  { %5683 = vmatprep.subr.bf16.mxu0 %v7391_v22  ;;  %v7376_v21 = vld [vmem:[#allocation12 + $0x9a4] ss:$28 sps:$4 sm:$0xff]   ;;  %v7439_v22 = vld [vmem:[#allocation12 + $0xdcc] ss:$28 sps:$4 sm:$0xff]  }
 0x31b   :  { %v2479_v29 = vpop.f32.mrf.mxu1  ;;  %v2520_v32 = vpop.f32.mrf.mxu0  ;;  %5593 = vmatmul.mubr.bf16.vlgmr.msra.gmra.mxu1 %v8225_v25 }
 0x31c   :  { %v2480_v33 = vadd.f32 %v2479_v29, %v1054_v24  ;;  %5643 = vmatpush1.bf16.msra.mxu1 %v7341_v5  ;;  %v7374_v24 = vld [vmem:[#allocation12 + $0x9a0] ss:$28 sps:$4 sm:$0xff]   ;;  %v7437_v5 = vld [vmem:[#allocation12 + $0xdc8] ss:$28 sps:$4 sm:$0xff]  }
 0x31d   :  { %v2481_v35 = vpop.f32.mrf.mxu1  ;;  %v2522_v36 = vpop.f32.mrf.mxu0  ;;  %5644 = vmatprep.subr.bf16.mxu1 %v7346_v26  ;;  %v7379_v26 = vld [vmem:[#allocation12 + $0x96c] ss:$28 sps:$4 sm:$0xff]  }
 0x31e   :  { %v2521_v38 = vadd.f32 %v2520_v32, %v2480_v33  ;;  %v2482_v39 = vadd.f32 %v2481_v35, %v1058_v27  ;;  %v7445_v27 = vld [vmem:[#allocation12 + $0xd94] ss:$28 sps:$4 sm:$0xff]   ;;  %v7377_v29 = vld [vmem:[#allocation12 + $0x968] ss:$28 sps:$4 sm:$0xff]  }
 0x31f   :  { %v2483_v40 = vpop.f32.mrf.mxu1  ;;  %v2524_v41 = vpop.f32.mrf.mxu0  ;;  %v7443_v32 = vld [vmem:[#allocation12 + $0xd90] ss:$28 sps:$4 sm:$0xff]  }
 0x320   :  { %v2523_v42 = vadd.f32 %v2522_v36, %v2482_v39  ;;  %5645 = vmatpush1.bf16.msra.mxu1 %v7344_v34  ;;  %v2693_v44 = vmax.f32 %v2521_v38, 0.0  ;;  %v7382_v33 = vld [vmem:[#allocation12 + $0x934] ss:$28 sps:$4 sm:$0xff]   ;;  %v7451_v34 = vld [vmem:[#allocation12 + $0xd5c] ss:$28 sps:$4 sm:$0xff]  }
 0x321   :  { %v2484_v45 = vpop.f32.mrf.mxu1  ;;  %v2525_v46 = vpop.f32.mrf.mxu0  ;;  %5646 = vmatprep.subr.bf16.mxu1 %v7349_v37  ;;  %v7380_v35 = vld [vmem:[#allocation12 + $0x930] ss:$28 sps:$4 sm:$0xff]   ;;  %v7449_v36 = vld [vmem:[#allocation12 + $0xd58] ss:$28 sps:$4 sm:$0xff]   ;;  %v7457_v38 = vld [vmem:[#allocation12 + $0xd24] ss:$28 sps:$4 sm:$0xff]  }
 0x322   :  { %v2694_v48 = vmax.f32 %v2523_v42, 0.0  ;;  %v8232_v54 = vpack.c.bf16 %v2693_v44, %v2693_v44  ;;  %v7385_v37 = vld [vmem:[#allocation12 + $0x8fc] ss:$28 sps:$4 sm:$0xff]   ;;  %v7388_v41 = vld [vmem:[#allocation12 + $0x8c4] ss:$28 sps:$4 sm:$0xff]  }
 0x323   :  { %v7383_v39 = vld [vmem:[#allocation12 + $0x8f8] ss:$28 sps:$4 sm:$0xff]   ;;  %v7455_v40 = vld [vmem:[#allocation12 + $0xd20] ss:$28 sps:$4 sm:$0xff]   ;;  %v7463_v42 = vld [vmem:[#allocation12 + $0xcec] ss:$28 sps:$4 sm:$0xff]  }
 0x324   :  { %v8230_v49 = vpack.c.bf16 %v2694_v48, %v2694_v48  ;;  %5647 = vmatpush1.bf16.msra.mxu1 %v7347_v43  ;;  %v1061_v43 = vsub.s32 4, %v8164_v28  ;;  %v7386_v44 = vld [vmem:[#allocation12 + $0x8c0] ss:$28 sps:$4 sm:$0xff]   ;;  %v7461_v45 = vld [vmem:[#allocation12 + $0xce8] ss:$28 sps:$4 sm:$0xff]   ;;  %v1065_v48 = vsub.s32 5, %v8164_v28 }
 0x325   :  { %5648 = vmatprep.subr.bf16.mxu1 %v7352_v47  ;;  %v7394_v46 = vld [vmem:[#allocation12 + $0x194] ss:$28 sps:$4 sm:$0xff]  }
 0x326   :  { %5633 = vmatprep.mubr.bf16.mxu0 %v8230_v49  ;;  %v7469_v47 = vld [vmem:[#allocation12 + $0xcb4] ss:$28 sps:$4 sm:$0xff]  }
 0x327   :  { %5634 = vmatmul.mubr.bf16.vlgmr.msra.gmra.mxu0 %v8232_v54 }
 0x328   :  { %5649 = vmatpush1.bf16.msra.mxu1 %v7350_v51  ;;  %5684 = vmatpush1.bf16.msra.mxu0 %v7389_v53  ;;  %v1062_v51 = vrot.slane %v8206_v63, %v1061_v43  ;;  %v7467_v53 = vld [vmem:[#allocation12 + $0xcb0] ss:$28 sps:$4 sm:$0xff]  }
 0x329   :  { %5650 = vmatprep.subr.bf16.mxu1 %v7355_v55  ;;  %5685 = vmatprep.subr.bf16.mxu0 %v7397_v56  ;;  %v7475_v55 = vld [vmem:[#allocation12 + $0xc7c] ss:$28 sps:$4 sm:$0xff]   ;;  %v1066_v56 = vrot.slane %v8206_v63, %v1065_v48 }
 0x32c   :  { %5651 = vmatpush1.bf16.msra.mxu1 %v7353_v57  ;;  %5686 = vmatpush1.bf16.msra.mxu0 %v7395_v58 }
 0x32d   :  { %5652 = vmatprep.subr.bf16.mxu1 %v7358_v59  ;;  %5687 = vmatprep.subr.bf16.mxu0 %v7403_v60  ;;  %v7473_v60 = vld [vmem:[#allocation12 + $0xc78] ss:$28 sps:$4 sm:$0xff]  }
 0x330   :  { %5653 = vmatpush1.bf16.msra.mxu1 %v7356_v61  ;;  %5688 = vmatpush1.bf16.msra.mxu0 %v7401_v62  ;;  %v7481_v62 = vld [vmem:[#allocation12 + $0xc44] ss:$28 sps:$4 sm:$0xff]  }
 0x331   :  { %5654 = vmatprep.subr.bf16.mxu1 %v7361_v0  ;;  %5689 = vmatprep.subr.bf16.mxu0 %v7409_v1 }
 0x334   :  { %5655 = vmatpush1.bf16.msra.mxu1 %v7359_v2  ;;  %5690 = vmatpush1.bf16.msra.mxu0 %v7407_v3 }
 0x335   :  { %5656 = vmatprep.subr.bf16.mxu1 %v7364_v6  ;;  %5691 = vmatprep.subr.bf16.mxu0 %v7415_v7 }
 0x338   :  { %5657 = vmatpush1.bf16.msra.mxu1 %v7362_v8  ;;  %5692 = vmatpush1.bf16.msra.mxu0 %v7413_v9  ;;  %v7479_v8 = vld [vmem:[#allocation12 + $0xc40] ss:$28 sps:$4 sm:$0xff]  }
 0x339   :  { %5658 = vmatprep.subr.bf16.mxu1 %v7367_v10  ;;  %5693 = vmatprep.subr.bf16.mxu0 %v7421_v13  ;;  %v7487_v13 = vld [vmem:[#allocation12 + $0x514] ss:$28 sps:$4 sm:$0xff]  }
 0x33c   :  { %5659 = vmatpush2.bf16.msra.mxu1 %v7365_v11  ;;  %5694 = vmatpush1.bf16.msra.mxu0 %v7419_v12 }
 0x33d   :  { %5660 = vmatprep.subr.bf16.mxu1 %v7370_v17  ;;  %5695 = vmatprep.subr.bf16.mxu0 %v7427_v15  ;;  %v7392_v15 = vld [vmem:[#allocation12 + $0x190] ss:$28 sps:$4 sm:$0xff]  }
 0x340   :  { %5661 = vmatpush2.bf16.msra.mxu1 %v7368_v18  ;;  %5696 = vmatpush1.bf16.msra.mxu0 %v7425_v14  ;;  %v7400_v14 = vld [vmem:[#allocation12 + $0x15c] ss:$28 sps:$4 sm:$0xff]  }
 0x341   :  { %5662 = vmatprep.subr.bf16.mxu1 %v7373_v19  ;;  %5697 = vmatprep.subr.bf16.mxu0 %v7433_v16  ;;  %v7398_v19 = vld [vmem:[#allocation12 + $0x158] ss:$28 sps:$4 sm:$0xff]   ;;  %v7406_v16 = vld [vmem:[#allocation12 + $0x124] ss:$28 sps:$4 sm:$0xff]  }
 0x344   :  { %5663 = vmatpush2.bf16.msra.mxu1 %v7371_v20  ;;  %5698 = vmatpush1.bf16.msra.mxu0 %v7431_v4  ;;  %v7404_v20 = vld [vmem:[#allocation12 + $0x120] ss:$28 sps:$4 sm:$0xff]   ;;  %v7412_v4 = vld [vmem:[#allocation12 + $0xec] ss:$28 sps:$4 sm:$0xff]  }
 0x345   :  { %5664 = vmatprep.subr.bf16.mxu1 %v7376_v21  ;;  %5699 = vmatprep.subr.bf16.mxu0 %v7439_v22  ;;  %v7410_v21 = vld [vmem:[#allocation12 + $0xe8] ss:$28 sps:$4 sm:$0xff]   ;;  %v7418_v22 = vld [vmem:[#allocation12 + $0xb4] ss:$28 sps:$4 sm:$0xff]  }
 0x348   :  { %5665 = vmatpush2.bf16.msra.mxu1 %v7374_v24  ;;  %5700 = vmatpush2.bf16.msra.mxu0 %v7437_v5  ;;  %v7416_v24 = vld [vmem:[#allocation12 + $0xb0] ss:$28 sps:$4 sm:$0xff]   ;;  %v7424_v5 = vld [vmem:[#allocation12 + $0x7c] ss:$28 sps:$4 sm:$0xff]  }
 0x349   :  { %5666 = vmatprep.subr.bf16.mxu1 %v7379_v26  ;;  %5701 = vmatprep.subr.bf16.mxu0 %v7445_v27  ;;  %v7422_v26 = vld [vmem:[#allocation12 + $0x78] ss:$28 sps:$4 sm:$0xff]   ;;  %v7430_v27 = vld [vmem:[#allocation12 + $0x44] ss:$28 sps:$4 sm:$0xff]  }
 0x34c   :  { %5667 = vmatpush2.bf16.msra.mxu1 %v7377_v29  ;;  %5702 = vmatpush2.bf16.msra.mxu0 %v7443_v32  ;;  %v7428_v29 = vld [vmem:[#allocation12 + $0x40] ss:$28 sps:$4 sm:$0xff]   ;;  %v7436_v32 = vld [vmem:[#allocation12 + $0xc] ss:$28 sps:$4 sm:$0xff]  }
 0x34d   :  { %5668 = vmatprep.subr.bf16.mxu1 %v7382_v33  ;;  %5703 = vmatprep.subr.bf16.mxu0 %v7451_v34  ;;  %v7434_v33 = vld [vmem:[#allocation12 + $0x8] ss:$28 sps:$4 sm:$0xff]   ;;  %v7442_v34 = vld [vmem:[#allocation12 + $0x354] ss:$28 sps:$4 sm:$0xff]  }
 0x350   :  { %5669 = vmatpush2.bf16.msra.mxu1 %v7380_v35  ;;  %5704 = vmatpush2.bf16.msra.mxu0 %v7449_v36  ;;  %v7440_v35 = vld [vmem:[#allocation12 + $0x350] ss:$28 sps:$4 sm:$0xff]   ;;  %v7448_v36 = vld [vmem:[#allocation12 + $0x31c] ss:$28 sps:$4 sm:$0xff]  }
 0x351   :  { %5670 = vmatprep.subr.bf16.mxu1 %v7385_v37  ;;  %5705 = vmatprep.subr.bf16.mxu0 %v7457_v38  ;;  %v7446_v37 = vld [vmem:[#allocation12 + $0x318] ss:$28 sps:$4 sm:$0xff]   ;;  %v7454_v38 = vld [vmem:[#allocation12 + $0x2e4] ss:$28 sps:$4 sm:$0xff]  }
 0x354   :  { %5671 = vmatpush2.bf16.msra.mxu1 %v7383_v39  ;;  %5706 = vmatpush2.bf16.msra.mxu0 %v7455_v40  ;;  %v7452_v39 = vld [vmem:[#allocation12 + $0x2e0] ss:$28 sps:$4 sm:$0xff]   ;;  %v7460_v40 = vld [vmem:[#allocation12 + $0x2ac] ss:$28 sps:$4 sm:$0xff]  }
 0x355   :  { %5672 = vmatprep.subr.bf16.mxu1 %v7388_v41  ;;  %5707 = vmatprep.subr.bf16.mxu0 %v7463_v42  ;;  %v7458_v41 = vld [vmem:[#allocation12 + $0x2a8] ss:$28 sps:$4 sm:$0xff]   ;;  %v7466_v42 = vld [vmem:[#allocation12 + $0x274] ss:$28 sps:$4 sm:$0xff]  }
 0x358   :  { %5673 = vmatpush2.bf16.msra.mxu1 %v7386_v44  ;;  %5708 = vmatpush2.bf16.msra.mxu0 %v7461_v45  ;;  %v7464_v44 = vld [vmem:[#allocation12 + $0x270] ss:$28 sps:$4 sm:$0xff]   ;;  %v1069_v45 = vsub.s32 6, %v8164_v28 }
 0x359   :  { %5724 = vmatprep.subr.bf16.mxu1 %v7394_v46  ;;  %5709 = vmatprep.subr.bf16.mxu0 %v7469_v47  ;;  %v7472_v46 = vld [vmem:[#allocation12 + $0x23c] ss:$28 sps:$4 sm:$0xff]   ;;  %v1073_v47 = vsub.s32 7, %v8164_v28 }
 0x35b   :  { %v2561_v57 = vpop.f32.mrf.mxu1 }
 0x35c   :  { %v2562_v58 = vadd.f32 %v2561_v57, %v1062_v51  ;;  %v2602_v59 = vpop.f32.mrf.mxu0  ;;  %5710 = vmatpush2.bf16.msra.mxu0 %v7467_v53  ;;  %v7470_v51 = vld [vmem:[#allocation12 + $0x238] ss:$28 sps:$4 sm:$0xff]   ;;  %v1070_v53 = vrot.slane %v8206_v63, %v1069_v45 }
 0x35d   :  { %v2563_v61 = vpop.f32.mrf.mxu1  ;;  %5711 = vmatprep.subr.bf16.mxu0 %v7475_v55  ;;  %v7478_v55 = vld [vmem:[#allocation12 + $0x204] ss:$28 sps:$4 sm:$0xff]  }
 0x35e   :  { %v2603_v0 = vadd.f32 %v2602_v59, %v2562_v58  ;;  %v2564_v1 = vadd.f32 %v2563_v61, %v1066_v56  ;;  %v2604_v2 = vpop.f32.mrf.mxu0  ;;  %v1074_v56 = vrot.slane %v8206_v63, %v1073_v47  ;;  %v7490_v63 = vld [vmem:[#allocation12 + $0x894] ss:$28 sps:$4 sm:$0xff]   ;;  %v7524_v47 = vld [vmem:[#allocation12 + $0x740] ss:$28 sps:$4 sm:$0xff]  }
 0x35f   :  { %v2565_v3 = vpop.f32.mrf.mxu1 }
 0x360   :  { %v2605_v6 = vadd.f32 %v2604_v2, %v2564_v1  ;;  %v2606_v7 = vpop.f32.mrf.mxu0  ;;  %5712 = vmatpush2.bf16.msra.mxu0 %v7473_v60  ;;  %v2695_v9 = vmax.f32 %v2603_v0, 0.0  ;;  %v7476_v60 = vld [vmem:[#allocation12 + $0x200] ss:$28 sps:$4 sm:$0xff]  }
 0x361   :  { %v2566_v10 = vpop.f32.mrf.mxu1  ;;  %5713 = vmatprep.subr.bf16.mxu0 %v7481_v62  ;;  %v7484_v62 = vld [vmem:[#allocation12 + $0x1cc] ss:$28 sps:$4 sm:$0xff]  }
 0x362   :  { %v2696_v11 = vmax.f32 %v2605_v6, 0.0  ;;  %v2607_v12 = vpop.f32.mrf.mxu0  ;;  %v8246_v18 = vpack.c.bf16 %v2695_v9, %v2695_v9 }
 0x364   :  { %v8244_v17 = vpack.c.bf16 %v2696_v11, %v2696_v11  ;;  %5714 = vmatpush2.bf16.msra.mxu0 %v7479_v8  ;;  %v7482_v8 = vld [vmem:[#allocation12 + $0x1c8] ss:$28 sps:$4 sm:$0xff]  }
 0x365   :  { %5765 = vmatprep.subr.bf16.mxu0 %v7487_v13 }
 0x366   :  { %5674 = vmatprep.mubr.bf16.mxu1 %v8244_v17 }
 0x367   :  { %5675 = vmatmul.mubr.bf16.vlgmr.msra.gmra.mxu1 %v8246_v18 }
 0x368   :  { %5725 = vmatpush1.bf16.msra.mxu1 %v7392_v15  ;;  %5756 = vmatprep.mubr.bf16.mxu1 %v8216_v23  ;;  %v7485_v15 = vld [vmem:[#allocation12 + $0x510] ss:$28 sps:$4 sm:$0xff]  }
 0x369   :  { %5726 = vmatprep.subr.bf16.mxu1 %v7400_v14  ;;  %v7488_v14 = vld [vmem:[#allocation12 + $0x890] ss:$28 sps:$4 sm:$0xff]  }
 0x36c   :  { %5727 = vmatpush1.bf16.msra.mxu1 %v7398_v19 }
 0x36d   :  { %5728 = vmatprep.subr.bf16.mxu1 %v7406_v16  ;;  %v7493_v16 = vld [vmem:[#allocation12 + $0x4dc] ss:$28 sps:$4 sm:$0xff]  }
 0x370   :  { %5729 = vmatpush1.bf16.msra.mxu1 %v7404_v20  ;;  %v7496_v20 = vld [vmem:[#allocation12 + $0x85c] ss:$28 sps:$4 sm:$0xff]  }
 0x371   :  { %5730 = vmatprep.subr.bf16.mxu1 %v7412_v4  ;;  %v7491_v4 = vld [vmem:[#allocation12 + $0x4d8] ss:$28 sps:$4 sm:$0xff]  }
 0x374   :  { %5731 = vmatpush1.bf16.msra.mxu1 %v7410_v21  ;;  %v7494_v21 = vld [vmem:[#allocation12 + $0x858] ss:$28 sps:$4 sm:$0xff]  }
 0x375   :  { %5732 = vmatprep.subr.bf16.mxu1 %v7418_v22  ;;  %v7499_v22 = vld [vmem:[#allocation12 + $0x4a4] ss:$28 sps:$4 sm:$0xff]  }
 0x378   :  { %5733 = vmatpush1.bf16.msra.mxu1 %v7416_v24  ;;  %v7502_v24 = vld [vmem:[#allocation12 + $0x824] ss:$28 sps:$4 sm:$0xff]  }
 0x379   :  { %5734 = vmatprep.subr.bf16.mxu1 %v7424_v5  ;;  %v7497_v5 = vld [vmem:[#allocation12 + $0x4a0] ss:$28 sps:$4 sm:$0xff]  }
 0x37c   :  { %5735 = vmatpush1.bf16.msra.mxu1 %v7422_v26  ;;  %v7500_v26 = vld [vmem:[#allocation12 + $0x820] ss:$28 sps:$4 sm:$0xff]  }
 0x37d   :  { %5736 = vmatprep.subr.bf16.mxu1 %v7430_v27  ;;  %v7505_v27 = vld [vmem:[#allocation12 + $0x46c] ss:$28 sps:$4 sm:$0xff]  }
 0x380   :  { %5737 = vmatpush1.bf16.msra.mxu1 %v7428_v29  ;;  %v7508_v29 = vld [vmem:[#allocation12 + $0x7ec] ss:$28 sps:$4 sm:$0xff]  }
 0x381   :  { %5738 = vmatprep.subr.bf16.mxu1 %v7436_v32  ;;  %v7503_v32 = vld [vmem:[#allocation12 + $0x468] ss:$28 sps:$4 sm:$0xff]  }
 0x384   :  { %5739 = vmatpush1.bf16.msra.mxu1 %v7434_v33  ;;  %v7506_v33 = vld [vmem:[#allocation12 + $0x7e8] ss:$28 sps:$4 sm:$0xff]  }
 0x385   :  { %5740 = vmatprep.subr.bf16.mxu1 %v7442_v34  ;;  %v7511_v34 = vld [vmem:[#allocation12 + $0x434] ss:$28 sps:$4 sm:$0xff]  }
 0x388   :  { %5741 = vmatpush2.bf16.msra.mxu1 %v7440_v35  ;;  %v7514_v35 = vld [vmem:[#allocation12 + $0x7b4] ss:$28 sps:$4 sm:$0xff]  }
 0x389   :  { %5742 = vmatprep.subr.bf16.mxu1 %v7448_v36  ;;  %v7509_v36 = vld [vmem:[#allocation12 + $0x430] ss:$28 sps:$4 sm:$0xff]  }
 0x38c   :  { %5743 = vmatpush2.bf16.msra.mxu1 %v7446_v37  ;;  %v7512_v37 = vld [vmem:[#allocation12 + $0x7b0] ss:$28 sps:$4 sm:$0xff]  }
 0x38d   :  { %5744 = vmatprep.subr.bf16.mxu1 %v7454_v38  ;;  %v7517_v38 = vld [vmem:[#allocation12 + $0x3fc] ss:$28 sps:$4 sm:$0xff]  }
 0x390   :  { %5745 = vmatpush2.bf16.msra.mxu1 %v7452_v39  ;;  %v7520_v39 = vld [vmem:[#allocation12 + $0x77c] ss:$28 sps:$4 sm:$0xff]  }
 0x391   :  { %5746 = vmatprep.subr.bf16.mxu1 %v7460_v40  ;;  %v7515_v40 = vld [vmem:[#allocation12 + $0x3f8] ss:$28 sps:$4 sm:$0xff]  }
 0x394   :  { %5747 = vmatpush2.bf16.msra.mxu1 %v7458_v41  ;;  %v7518_v41 = vld [vmem:[#allocation12 + $0x778] ss:$28 sps:$4 sm:$0xff]  }
 0x395   :  { %5748 = vmatprep.subr.bf16.mxu1 %v7466_v42  ;;  %v7523_v42 = vld [vmem:[#allocation12 + $0x3c4] ss:$28 sps:$4 sm:$0xff]  }
 0x398   :  { %5749 = vmatpush2.bf16.msra.mxu1 %v7464_v44  ;;  %v7526_v44 = vld [vmem:[#allocation12 + $0x744] ss:$28 sps:$4 sm:$0xff]  }
 0x399   :  { %5750 = vmatprep.subr.bf16.mxu1 %v7472_v46  ;;  %v7521_v46 = vld [vmem:[#allocation12 + $0x3c0] ss:$28 sps:$4 sm:$0xff]  }
 0x39b   :  { %v2643_v57 = vpop.f32.mrf.mxu1 }
 0x39c   :  { %v2644_v58 = vadd.f32 %v2643_v57, %v1070_v53  ;;  %v2684_v59 = vpop.f32.mrf.mxu0  ;;  %5751 = vmatpush2.bf16.msra.mxu1 %v7470_v51  ;;  %v7529_v51 = vld [vmem:[#allocation12 + $0x38c] ss:$28 sps:$4 sm:$0xff]   ;;  %v7535_v57 = vld [vmem:[#allocation12 + $0x6d4] ss:$28 sps:$4 sm:$0xff]  }
 0x39d   :  { %v2645_v61 = vpop.f32.mrf.mxu1  ;;  %5752 = vmatprep.subr.bf16.mxu1 %v7478_v55  ;;  %v7532_v53 = vld [vmem:[#allocation12 + $0x70c] ss:$28 sps:$4 sm:$0xff]  }
 0x39e   :  { %v2685_v0 = vadd.f32 %v2684_v59, %v2644_v58  ;;  %v2646_v1 = vadd.f32 %v2645_v61, %v1074_v56  ;;  %v2686_v2 = vpop.f32.mrf.mxu0  ;;  %v7527_v55 = vld [vmem:[#allocation12 + $0x388] ss:$28 sps:$4 sm:$0xff]   ;;  %v7538_v58 = vld [vmem:[#allocation12 + $0xa54] ss:$28 sps:$4 sm:$0xff]   ;;  %v7541_v61 = vld [vmem:[#allocation12 + $0x69c] ss:$28 sps:$4 sm:$0xff]  }
 0x39f   :  { %v2647_v3 = vpop.f32.mrf.mxu1  ;;  %v7530_v56 = vld [vmem:[#allocation12 + $0x708] ss:$28 sps:$4 sm:$0xff]   ;;  %v7533_v59 = vld [vmem:[#allocation12 + $0x6d0] ss:$28 sps:$4 sm:$0xff]  }
 0x3a0   :  { %v2687_v6 = vadd.f32 %v2686_v2, %v2646_v1  ;;  %v2688_v7 = vpop.f32.mrf.mxu0  ;;  %5753 = vmatpush2.bf16.msra.mxu1 %v7476_v60  ;;  %v2697_v9 = vmax.f32 %v2685_v0, 0.0  ;;  %v7536_v60 = vld [vmem:[#allocation12 + $0xa50] ss:$28 sps:$4 sm:$0xff]   ;;  %v7539_v0 = vld [vmem:[#allocation12 + $0x698] ss:$28 sps:$4 sm:$0xff]  }
 0x3a1   :  { %v2648_v10 = vpop.f32.mrf.mxu1  ;;  %5754 = vmatprep.subr.bf16.mxu1 %v7484_v62  ;;  %v7544_v62 = vld [vmem:[#allocation12 + $0xa1c] ss:$28 sps:$4 sm:$0xff]   ;;  %v7547_v2 = vld [vmem:[#allocation12 + $0x664] ss:$28 sps:$4 sm:$0xff]  }
 0x3a2   :  { %v2698_v13 = vmax.f32 %v2687_v6, 0.0  ;;  %v2689_v11 = vpop.f32.mrf.mxu0  ;;  %v8259_v19 = vpack.c.bf16 %v2697_v9, %v2697_v9  ;;  %v7542_v1 = vld [vmem:[#allocation12 + $0xa18] ss:$28 sps:$4 sm:$0xff]   ;;  %v7550_v3 = vld [vmem:[#allocation12 + $0x9e4] ss:$28 sps:$4 sm:$0xff]  }
 0x3a3   :  { %v7545_v6 = vld [vmem:[#allocation12 + $0x660] ss:$28 sps:$4 sm:$0xff]   ;;  %v7556_v9 = vld [vmem:[#allocation12 + $0x9ac] ss:$28 sps:$4 sm:$0xff]   ;;  %v7562_v11 = vld [vmem:[#allocation12 + $0x974] ss:$28 sps:$4 sm:$0xff]  }
 0x3a4   :  { %v8257_v12 = vpack.c.bf16 %v2698_v13, %v2698_v13  ;;  %5755 = vmatpush2.bf16.msra.mxu1 %v7482_v8  ;;  %v7548_v7 = vld [vmem:[#allocation12 + $0x9e0] ss:$28 sps:$4 sm:$0xff]   ;;  %v7553_v8 = vld [vmem:[#allocation12 + $0x62c] ss:$28 sps:$4 sm:$0xff]   ;;  %v7559_v13 = vld [vmem:[#allocation12 + $0x5f4] ss:$28 sps:$4 sm:$0xff]  }
 0x3a5   :  { %5806 = vmatprep.subr.bf16.mxu1 %v7490_v63  ;;  %v7551_v10 = vld [vmem:[#allocation12 + $0x628] ss:$28 sps:$4 sm:$0xff]  }
 0x3a6   :  { %5715 = vmatprep.mubr.bf16.mxu0 %v8257_v12  ;;  %v7554_v63 = vld [vmem:[#allocation12 + $0x9a8] ss:$28 sps:$4 sm:$0xff]  }
 0x3a7   :  { %5757 = vmatmul.mubr.bf16.vlgmr.msra.gmra.mxu1 %v8225_v25  ;;  %5716 = vmatmul.mubr.bf16.vlgmr.msra.gmra.mxu0 %v8259_v19 }
 0x3a8   :  { %5766 = vmatpush1.bf16.msra.mxu0 %v7485_v15  ;;  %5807 = vmatpush1.bf16.msra.mxu1 %v7488_v14  ;;  %v7557_v15 = vld [vmem:[#allocation12 + $0x5f0] ss:$28 sps:$4 sm:$0xff]  }
 0x3a9   :  { %5838 = vmatprep.mubr.bf16.mxu1 %v8244_v17  ;;  %5797 = vmatprep.mubr.bf16.mxu0 %v8230_v49  ;;  %v7560_v14 = vld [vmem:[#allocation12 + $0x970] ss:$28 sps:$4 sm:$0xff]  }
 0x3aa   :  { %5767 = vmatprep.subr.bf16.mxu0 %v7493_v16  ;;  %5808 = vmatprep.subr.bf16.mxu1 %v7496_v20  ;;  %v7565_v16 = vld [vmem:[#allocation12 + $0x5bc] ss:$28 sps:$4 sm:$0xff]  }
 0x3ab   :  { %v7568_v20 = vld [vmem:[#allocation12 + $0x93c] ss:$28 sps:$4 sm:$0xff]  }
 0x3ac   :  { %5768 = vmatpush1.bf16.msra.mxu0 %v7491_v4  ;;  %5809 = vmatpush1.bf16.msra.mxu1 %v7494_v21  ;;  %v7563_v4 = vld [vmem:[#allocation12 + $0x5b8] ss:$28 sps:$4 sm:$0xff]  }
 0x3ad   :  { %5769 = vmatprep.subr.bf16.mxu0 %v7499_v22  ;;  %5810 = vmatprep.subr.bf16.mxu1 %v7502_v24  ;;  %v7566_v21 = vld [vmem:[#allocation12 + $0x938] ss:$28 sps:$4 sm:$0xff]   ;;  %v7571_v22 = vld [vmem:[#allocation12 + $0x584] ss:$28 sps:$4 sm:$0xff]  }
 0x3ae   :  { %v7574_v24 = vld [vmem:[#allocation12 + $0x904] ss:$28 sps:$4 sm:$0xff]  }
 0x3b0   :  { %5770 = vmatpush1.bf16.msra.mxu0 %v7497_v5  ;;  %5811 = vmatpush1.bf16.msra.mxu1 %v7500_v26  ;;  %v7569_v26 = vld [vmem:[#allocation12 + $0x580] ss:$28 sps:$4 sm:$0xff]  }
 0x3b1   :  { %5771 = vmatprep.subr.bf16.mxu0 %v7505_v27  ;;  %5812 = vmatprep.subr.bf16.mxu1 %v7508_v29  ;;  %v7572_v27 = vld [vmem:[#allocation12 + $0x900] ss:$28 sps:$4 sm:$0xff]  }
 0x3b4   :  { %5772 = vmatpush1.bf16.msra.mxu0 %v7503_v32  ;;  %5813 = vmatpush1.bf16.msra.mxu1 %v7506_v33  ;;  %v7577_v32 = vld [vmem:[#allocation12 + $0x54c] ss:$28 sps:$4 sm:$0xff]  }
 0x3b5   :  { %5773 = vmatprep.subr.bf16.mxu0 %v7511_v34  ;;  %5814 = vmatprep.subr.bf16.mxu1 %v7514_v35  ;;  %v7580_v33 = vld [vmem:[#allocation12 + $0x8cc] ss:$28 sps:$4 sm:$0xff]   ;;  %v8266_v34 = vld [vmem:[#allocation13] sm:$0xff] }
 0x3b8   :  { %5774 = vmatpush1.bf16.msra.mxu0 %v7509_v36  ;;  %5815 = vmatpush1.bf16.msra.mxu1 %v7512_v37  ;;  %v7575_v36 = vld [vmem:[#allocation12 + $0x548] ss:$28 sps:$4 sm:$0xff]  }
 0x3b9   :  { %5775 = vmatprep.subr.bf16.mxu0 %v7517_v38  ;;  %5816 = vmatprep.subr.bf16.mxu1 %v7520_v39  ;;  %v7578_v37 = vld [vmem:[#allocation12 + $0x8c8] ss:$28 sps:$4 sm:$0xff]   ;;  %v7583_v39 = vld [vmem:[#allocation12 + $0xc14] ss:$28 sps:$4 sm:$0xff]  }
 0x3bc   :  { %5776 = vmatpush1.bf16.msra.mxu0 %v7515_v40  ;;  %5817 = vmatpush1.bf16.msra.mxu1 %v7518_v41  ;;  %v7586_v40 = vld [vmem:[#allocation12 + $0x19c] ss:$28 sps:$4 sm:$0xff]   ;;  %v3224_v41 = vrot.slane %v8266_v34, %v8167_v30 }
 0x3bd   :  { %5777 = vmatprep.subr.bf16.mxu0 %v7523_v42  ;;  %5818 = vmatprep.subr.bf16.mxu1 %v7526_v44  ;;  %v3228_v42 = vrot.slane %v8266_v34, %v8170_v31  ;;  %v7581_v44 = vld [vmem:[#allocation12 + $0xc10] ss:$28 sps:$4 sm:$0xff]   ;;  %v7587_v30 = vld [vmem:[#allocation12 + $0xbd8] ss:$28 sps:$4 sm:$0xff]  }
 0x3c0   :  { %5778 = vmatpush1.bf16.msra.mxu0 %v7521_v46  ;;  %5819 = vmatpush1.bf16.msra.mxu1 %v7524_v47  ;;  %v7584_v46 = vld [vmem:[#allocation12 + $0x198] ss:$28 sps:$4 sm:$0xff]  }
 0x3c1   :  { %5779 = vmatprep.subr.bf16.mxu0 %v7529_v51  ;;  %5820 = vmatprep.subr.bf16.mxu1 %v7532_v53  ;;  %v7589_v51 = vld [vmem:[#allocation12 + $0xbdc] ss:$28 sps:$4 sm:$0xff]   ;;  %v7592_v53 = vld [vmem:[#allocation12 + $0x164] ss:$28 sps:$4 sm:$0xff]  }
 0x3c4   :  { %5780 = vmatpush1.bf16.msra.mxu0 %v7527_v55  ;;  %5821 = vmatpush1.bf16.msra.mxu1 %v7530_v56 }
 0x3c5   :  { %5781 = vmatprep.subr.bf16.mxu0 %v7535_v57  ;;  %5822 = vmatprep.subr.bf16.mxu1 %v7538_v58  ;;  %v7590_v58 = vld [vmem:[#allocation12 + $0x160] ss:$28 sps:$4 sm:$0xff]  }
 0x3c8   :  { %5782 = vmatpush2.bf16.msra.mxu0 %v7533_v59  ;;  %5823 = vmatpush2.bf16.msra.mxu1 %v7536_v60  ;;  %v7595_v59 = vld [vmem:[#allocation12 + $0xba4] ss:$28 sps:$4 sm:$0xff]  }
 0x3c9   :  { %5783 = vmatprep.subr.bf16.mxu0 %v7541_v61  ;;  %5824 = vmatprep.subr.bf16.mxu1 %v7544_v62  ;;  %v7598_v61 = vld [vmem:[#allocation12 + $0x12c] ss:$28 sps:$4 sm:$0xff]  }
 0x3cc   :  { %5784 = vmatpush2.bf16.msra.mxu0 %v7539_v0  ;;  %5825 = vmatpush2.bf16.msra.mxu1 %v7542_v1  ;;  %v7593_v0 = vld [vmem:[#allocation12 + $0xba0] ss:$28 sps:$4 sm:$0xff]  }
 0x3cd   :  { %5785 = vmatprep.subr.bf16.mxu0 %v7547_v2  ;;  %5826 = vmatprep.subr.bf16.mxu1 %v7550_v3  ;;  %v7596_v2 = vld [vmem:[#allocation12 + $0x128] ss:$28 sps:$4 sm:$0xff]  }
 0x3ce   :  { %v7601_v3 = vld [vmem:[#allocation12 + $0xb6c] ss:$28 sps:$4 sm:$0xff]  }
 0x3d0   :  { %5786 = vmatpush2.bf16.msra.mxu0 %v7545_v6  ;;  %5827 = vmatpush2.bf16.msra.mxu1 %v7548_v7  ;;  %v7604_v6 = vld [vmem:[#allocation12 + $0xf4] ss:$28 sps:$4 sm:$0xff]   ;;  %v7599_v7 = vld [vmem:[#allocation12 + $0xb68] ss:$28 sps:$4 sm:$0xff]  }
 0x3d1   :  { %5787 = vmatprep.subr.bf16.mxu0 %v7553_v8  ;;  %5828 = vmatprep.subr.bf16.mxu1 %v7556_v9  ;;  %v7602_v8 = vld [vmem:[#allocation12 + $0xf0] ss:$28 sps:$4 sm:$0xff]  }
 0x3d2   :  { %v7607_v9 = vld [vmem:[#allocation12 + $0xb34] ss:$28 sps:$4 sm:$0xff]  }
 0x3d4   :  { %5788 = vmatpush2.bf16.msra.mxu0 %v7551_v10  ;;  %5829 = vmatpush2.bf16.msra.mxu1 %v7554_v63  ;;  %v7610_v10 = vld [vmem:[#allocation12 + $0xbc] ss:$28 sps:$4 sm:$0xff]   ;;  %v7605_v63 = vld [vmem:[#allocation12 + $0xb30] ss:$28 sps:$4 sm:$0xff]  }
 0x3d5   :  { %5789 = vmatprep.subr.bf16.mxu0 %v7559_v13  ;;  %5830 = vmatprep.subr.bf16.mxu1 %v7562_v11  ;;  %v7608_v13 = vld [vmem:[#allocation12 + $0xb8] ss:$28 sps:$4 sm:$0xff]  }
 0x3d6   :  { %v7613_v11 = vld [vmem:[#allocation12 + $0xafc] ss:$28 sps:$4 sm:$0xff]  }
 0x3d8   :  { %5790 = vmatpush2.bf16.msra.mxu0 %v7557_v15  ;;  %5831 = vmatpush2.bf16.msra.mxu1 %v7560_v14  ;;  %v7616_v15 = vld [vmem:[#allocation12 + $0x84] ss:$28 sps:$4 sm:$0xff]   ;;  %v7611_v14 = vld [vmem:[#allocation12 + $0xaf8] ss:$28 sps:$4 sm:$0xff]  }
 0x3d9   :  { %5791 = vmatprep.subr.bf16.mxu0 %v7565_v16  ;;  %5832 = vmatprep.subr.bf16.mxu1 %v7568_v20  ;;  %v7614_v16 = vld [vmem:[#allocation12 + $0x80] ss:$28 sps:$4 sm:$0xff]  }
 0x3da   :  { %v7619_v20 = vld [vmem:[#allocation12 + $0xac4] ss:$28 sps:$4 sm:$0xff]  }
 0x3db   :  { %v5594_v5 = vpop.f32.mrf.mxu1 }
 0x3dc   :  { %5792 = vmatpush2.bf16.msra.mxu0 %v7563_v4  ;;  %5833 = vmatpush2.bf16.msra.mxu1 %v7566_v21  ;;  %v5595_v47 = vadd.f32 %v5594_v5, %v3224_v41  ;;  %v7622_v4 = vld [vmem:[#allocation12 + $0x4c] ss:$28 sps:$4 sm:$0xff]   ;;  %v7617_v21 = vld [vmem:[#allocation12 + $0xac0] ss:$28 sps:$4 sm:$0xff]   ;;  %v7628_v5 = vld [vmem:[#allocation12 + $0x14] ss:$28 sps:$4 sm:$0xff]  }
 0x3dd   :  { %v5596_v29 = vpop.f32.mrf.mxu1  ;;  %5793 = vmatprep.subr.bf16.mxu0 %v7571_v22  ;;  %5834 = vmatprep.subr.bf16.mxu1 %v7574_v24  ;;  %v7620_v22 = vld [vmem:[#allocation12 + $0x48] ss:$28 sps:$4 sm:$0xff]  }
 0x3de   :  { %v5597_v56 = vadd.f32 %v5596_v29, %v3228_v42  ;;  %v7625_v24 = vld [vmem:[#allocation12 + $0xa8c] ss:$28 sps:$4 sm:$0xff]   ;;  %v7631_v29 = vld [vmem:[#allocation12 + $0xdd4] ss:$28 sps:$4 sm:$0xff]   ;;  %v7641_v42 = vld [vmem:[#allocation12 + $0xd60] ss:$28 sps:$4 sm:$0xff]  }
 0x3df   :  { %v5598_v35 = vpop.f32.mrf.mxu1  ;;  %v7646_v41 = vld [vmem:[#allocation12 + $0x2ec] ss:$28 sps:$4 sm:$0xff]  }
 0x3e0   :  { %5794 = vmatpush2.bf16.msra.mxu0 %v7569_v26  ;;  %5835 = vmatpush2.bf16.msra.mxu1 %v7572_v27  ;;  %v7623_v26 = vld [vmem:[#allocation12 + $0xa88] ss:$28 sps:$4 sm:$0xff]   ;;  %v7626_v27 = vld [vmem:[#allocation12 + $0x10] ss:$28 sps:$4 sm:$0xff]   ;;  %v7632_v35 = vld [vmem:[#allocation12 + $0x358] ss:$28 sps:$4 sm:$0xff]  }
 0x3e1   :  { %v5599_v38 = vpop.f32.mrf.mxu1  ;;  %5795 = vmatprep.subr.bf16.mxu0 %v7577_v32  ;;  %5836 = vmatprep.subr.bf16.mxu1 %v7580_v33  ;;  %v7634_v32 = vld [vmem:[#allocation12 + $0x35c] ss:$28 sps:$4 sm:$0xff]   ;;  %v7629_v33 = vld [vmem:[#allocation12 + $0xdd0] ss:$28 sps:$4 sm:$0xff]  }
 0x3e2   :  { %v7635_v38 = vld [vmem:[#allocation12 + $0xd98] ss:$28 sps:$4 sm:$0xff]  }
 0x3e4   :  { %5796 = vmatpush2.bf16.msra.mxu0 %v7575_v36  ;;  %5837 = vmatpush2.bf16.msra.mxu1 %v7578_v37  ;;  %v7637_v36 = vld [vmem:[#allocation12 + $0xd9c] ss:$28 sps:$4 sm:$0xff]   ;;  %v7640_v37 = vld [vmem:[#allocation12 + $0x324] ss:$28 sps:$4 sm:$0xff]  }
 0x3e5   :  { %5847 = vmatprep.subr.bf16.mxu0 %v7583_v39  ;;  %5888 = vmatprep.subr.bf16.mxu1 %v7586_v40  ;;  %v7638_v39 = vld [vmem:[#allocation12 + $0x320] ss:$28 sps:$4 sm:$0xff]  }
 0x3e6   :  { %v7643_v40 = vld [vmem:[#allocation12 + $0xd64] ss:$28 sps:$4 sm:$0xff]  }
 0x3e7   :  { %5798 = vmatmul.mubr.bf16.vlgmr.msra.gmra.mxu0 %v8232_v54  ;;  %5839 = vmatmul.mubr.bf16.vlgmr.msra.gmra.mxu1 %v8246_v18  ;;  %v5635_v55 = vpop.f32.mrf.mxu0 }
 0x3e8   :  { %v8274_v57 = vadd.f32 %v5635_v55, %v5595_v47  ;;  %5848 = vmatpush1.bf16.msra.mxu0 %v7581_v44  ;;  %5879 = vmatprep.mubr.bf16.mxu0 %v8257_v12  ;;  %v7644_v44 = vld [vmem:[#allocation12 + $0x2e8] ss:$28 sps:$4 sm:$0xff]   ;;  %v7652_v47 = vld [vmem:[#allocation12 + $0x2b4] ss:$28 sps:$4 sm:$0xff]  }
 0x3e9   :  { %5889 = vmatpush1.bf16.msra.mxu1 %v7584_v46  ;;  %5920 = vmatprep.mubr.bf16.mxu1 %v8216_v23  ;;  %v5637_v31 = vpop.f32.mrf.mxu0  ;;  %v7649_v46 = vld [vmem:[#allocation12 + $0xd2c] ss:$28 sps:$4 sm:$0xff]   ;;  %v7655_v55 = vld [vmem:[#allocation12 + $0xcf4] ss:$28 sps:$4 sm:$0xff]  }
 0x3ea   :  { %v8278_v60 = vadd.f32 %v5637_v31, %v5597_v56  ;;  %5849 = vmatprep.subr.bf16.mxu0 %v7589_v51  ;;  %5890 = vmatprep.subr.bf16.mxu1 %v7592_v53  ;;  %v7647_v51 = vld [vmem:[#allocation12 + $0xd28] ss:$28 sps:$4 sm:$0xff]   ;;  %v7650_v53 = vld [vmem:[#allocation12 + $0x2b0] ss:$28 sps:$4 sm:$0xff]   ;;  %v7658_v56 = vld [vmem:[#allocation12 + $0x27c] ss:$28 sps:$4 sm:$0xff]  }
 0x3eb   :  { %v5639_v62 = vpop.f32.mrf.mxu0  ;;  %v7656_v31 = vld [vmem:[#allocation12 + $0x278] ss:$28 sps:$4 sm:$0xff]  }
 0x3ec   :  { %5850 = vmatpush1.bf16.msra.mxu0 %v7587_v30  ;;  %v7653_v30 = vld [vmem:[#allocation12 + $0xcf0] ss:$28 sps:$4 sm:$0xff]   ;;  %v7662_v62 = vld [vmem:[#allocation12 + $0x240] ss:$28 sps:$4 sm:$0xff]  }
 0x3ed   :  { %5891 = vmatpush1.bf16.msra.mxu1 %v7590_v58  ;;  %v5640_v1 = vpop.f32.mrf.mxu0  ;;  %5851 = vmatprep.subr.bf16.mxu0 %v7595_v59  ;;  %v7661_v58 = vld [vmem:[#allocation12 + $0xcbc] ss:$28 sps:$4 sm:$0xff]   ;;  %v7664_v59 = vld [vmem:[#allocation12 + $0x244] ss:$28 sps:$4 sm:$0xff]  }
 0x3ee   :  { %5892 = vmatprep.subr.bf16.mxu1 %v7598_v61  ;;  %v7659_v61 = vld [vmem:[#allocation12 + $0xcb8] ss:$28 sps:$4 sm:$0xff]   ;;  %v7670_v1 = vld [vmem:[#allocation12 + $0x20c] ss:$28 sps:$4 sm:$0xff]  }
 0x3f0   :  { %5852 = vmatpush1.bf16.msra.mxu0 %v7593_v0  ;;  %v7667_v0 = vld [vmem:[#allocation12 + $0xc84] ss:$28 sps:$4 sm:$0xff]  }
 0x3f1   :  { %5893 = vmatpush1.bf16.msra.mxu1 %v7596_v2  ;;  %5853 = vmatprep.subr.bf16.mxu0 %v7601_v3  ;;  %v7665_v2 = vld [vmem:[#allocation12 + $0xc80] ss:$28 sps:$4 sm:$0xff]   ;;  %v7668_v3 = vld [vmem:[#allocation12 + $0x208] ss:$28 sps:$4 sm:$0xff]  }
 0x3f2   :  { %5894 = vmatprep.subr.bf16.mxu1 %v7604_v6  ;;  %v7673_v6 = vld [vmem:[#allocation12 + $0xc4c] ss:$28 sps:$4 sm:$0xff]  }
 0x3f4   :  { %5854 = vmatpush1.bf16.msra.mxu0 %v7599_v7  ;;  %v7676_v7 = vld [vmem:[#allocation12 + $0x1d4] ss:$28 sps:$4 sm:$0xff]  }
 0x3f5   :  { %5895 = vmatpush1.bf16.msra.mxu1 %v7602_v8  ;;  %5855 = vmatprep.subr.bf16.mxu0 %v7607_v9  ;;  %v7671_v8 = vld [vmem:[#allocation12 + $0xc48] ss:$28 sps:$4 sm:$0xff]   ;;  %v7674_v9 = vld [vmem:[#allocation12 + $0x1d0] ss:$28 sps:$4 sm:$0xff]  }
 0x3f6   :  { %5896 = vmatprep.subr.bf16.mxu1 %v7610_v10  ;;  %v7679_v10 = vld [vmem:[#allocation12 + $0x51c] ss:$28 sps:$4 sm:$0xff]  }
 0x3f8   :  { %5856 = vmatpush1.bf16.msra.mxu0 %v7605_v63  ;;  %v7682_v63 = vld [vmem:[#allocation12 + $0x89c] ss:$28 sps:$4 sm:$0xff]  }
 0x3f9   :  { %5897 = vmatpush1.bf16.msra.mxu1 %v7608_v13  ;;  %5857 = vmatprep.subr.bf16.mxu0 %v7613_v11  ;;  %v7677_v13 = vld [vmem:[#allocation12 + $0x518] ss:$28 sps:$4 sm:$0xff]  }
 0x3fa   :  { %5898 = vmatprep.subr.bf16.mxu1 %v7616_v15  ;;  %v7680_v11 = vld [vmem:[#allocation12 + $0x898] ss:$28 sps:$4 sm:$0xff]   ;;  %v7685_v15 = vld [vmem:[#allocation12 + $0x4e4] ss:$28 sps:$4 sm:$0xff]  }
 0x3fc   :  { %5858 = vmatpush1.bf16.msra.mxu0 %v7611_v14 }
 0x3fd   :  { %5899 = vmatpush1.bf16.msra.mxu1 %v7614_v16  ;;  %5859 = vmatprep.subr.bf16.mxu0 %v7619_v20  ;;  %v7688_v16 = vld [vmem:[#allocation12 + $0x864] ss:$28 sps:$4 sm:$0xff]  }
 0x3fe   :  { %5900 = vmatprep.subr.bf16.mxu1 %v7622_v4  ;;  %v7683_v20 = vld [vmem:[#allocation12 + $0x4e0] ss:$28 sps:$4 sm:$0xff]  }
 0x400   :  { %5860 = vmatpush1.bf16.msra.mxu0 %v7617_v21  ;;  %v7686_v21 = vld [vmem:[#allocation12 + $0x860] ss:$28 sps:$4 sm:$0xff]  }
 0x401   :  { %5901 = vmatpush1.bf16.msra.mxu1 %v7620_v22  ;;  %5861 = vmatprep.subr.bf16.mxu0 %v7625_v24  ;;  %v7691_v22 = vld [vmem:[#allocation12 + $0x4ac] ss:$28 sps:$4 sm:$0xff]  }
 0x402   :  { %5902 = vmatprep.subr.bf16.mxu1 %v7628_v5  ;;  %v7694_v24 = vld [vmem:[#allocation12 + $0x82c] ss:$28 sps:$4 sm:$0xff]  }
 0x404   :  { %5862 = vmatpush1.bf16.msra.mxu0 %v7623_v26  ;;  %v7689_v26 = vld [vmem:[#allocation12 + $0x4a8] ss:$28 sps:$4 sm:$0xff]  }
 0x405   :  { %5903 = vmatpush1.bf16.msra.mxu1 %v7626_v27  ;;  %5863 = vmatprep.subr.bf16.mxu0 %v7631_v29  ;;  %v7692_v29 = vld [vmem:[#allocation12 + $0x828] ss:$28 sps:$4 sm:$0xff]  }
 0x406   :  { %5904 = vmatprep.subr.bf16.mxu1 %v7634_v32  ;;  %v7697_v32 = vld [vmem:[#allocation12 + $0x474] ss:$28 sps:$4 sm:$0xff]  }
 0x408   :  { %5864 = vmatpush2.bf16.msra.mxu0 %v7629_v33  ;;  %v7700_v33 = vld [vmem:[#allocation12 + $0x7f4] ss:$28 sps:$4 sm:$0xff]  }
 0x409   :  { %5905 = vmatpush2.bf16.msra.mxu1 %v7632_v35  ;;  %5865 = vmatprep.subr.bf16.mxu0 %v7637_v36  ;;  %v7695_v35 = vld [vmem:[#allocation12 + $0x470] ss:$28 sps:$4 sm:$0xff]  }
 0x40a   :  { %5906 = vmatprep.subr.bf16.mxu1 %v7640_v37  ;;  %v7698_v36 = vld [vmem:[#allocation12 + $0x7f0] ss:$28 sps:$4 sm:$0xff]   ;;  %v7703_v37 = vld [vmem:[#allocation12 + $0x43c] ss:$28 sps:$4 sm:$0xff]  }
 0x40c   :  { %5866 = vmatpush2.bf16.msra.mxu0 %v7635_v38  ;;  %v7706_v38 = vld [vmem:[#allocation12 + $0x7bc] ss:$28 sps:$4 sm:$0xff]  }
 0x40d   :  { %5907 = vmatpush2.bf16.msra.mxu1 %v7638_v39  ;;  %5867 = vmatprep.subr.bf16.mxu0 %v7643_v40  ;;  %v7701_v39 = vld [vmem:[#allocation12 + $0x438] ss:$28 sps:$4 sm:$0xff]  }
 0x40e   :  { %5908 = vmatprep.subr.bf16.mxu1 %v7646_v41  ;;  %v7704_v40 = vld [vmem:[#allocation12 + $0x7b8] ss:$28 sps:$4 sm:$0xff]   ;;  %v7709_v41 = vld [vmem:[#allocation12 + $0x404] ss:$28 sps:$4 sm:$0xff]  }
 0x410   :  { %5868 = vmatpush2.bf16.msra.mxu0 %v7641_v42  ;;  %v7712_v42 = vld [vmem:[#allocation12 + $0x784] ss:$28 sps:$4 sm:$0xff]  }
 0x411   :  { %5909 = vmatpush2.bf16.msra.mxu1 %v7644_v44  ;;  %5869 = vmatprep.subr.bf16.mxu0 %v7649_v46  ;;  %v7707_v44 = vld [vmem:[#allocation12 + $0x400] ss:$28 sps:$4 sm:$0xff]  }
 0x412   :  { %5910 = vmatprep.subr.bf16.mxu1 %v7652_v47  ;;  %v7710_v46 = vld [vmem:[#allocation12 + $0x780] ss:$28 sps:$4 sm:$0xff]   ;;  %v7715_v47 = vld [vmem:[#allocation12 + $0x3cc] ss:$28 sps:$4 sm:$0xff]  }
 0x414   :  { %5870 = vmatpush2.bf16.msra.mxu0 %v7647_v51  ;;  %v7718_v51 = vld [vmem:[#allocation12 + $0x74c] ss:$28 sps:$4 sm:$0xff]  }
 0x415   :  { %5911 = vmatpush2.bf16.msra.mxu1 %v7650_v53  ;;  %5871 = vmatprep.subr.bf16.mxu0 %v7655_v55  ;;  %v7713_v53 = vld [vmem:[#allocation12 + $0x3c8] ss:$28 sps:$4 sm:$0xff]  }
 0x416   :  { %5912 = vmatprep.subr.bf16.mxu1 %v7658_v56  ;;  %v7716_v55 = vld [vmem:[#allocation12 + $0x748] ss:$28 sps:$4 sm:$0xff]   ;;  %v7721_v56 = vld [vmem:[#allocation12 + $0x394] ss:$28 sps:$4 sm:$0xff]  }
 0x418   :  { %5872 = vmatpush2.bf16.msra.mxu0 %v7653_v30  ;;  %v7724_v30 = vld [vmem:[#allocation12 + $0x714] ss:$28 sps:$4 sm:$0xff]  }
 0x419   :  { %5913 = vmatpush2.bf16.msra.mxu1 %v7656_v31  ;;  %5873 = vmatprep.subr.bf16.mxu0 %v7661_v58  ;;  %v7719_v31 = vld [vmem:[#allocation12 + $0x390] ss:$28 sps:$4 sm:$0xff]  }
 0x41a   :  { %5914 = vmatprep.subr.bf16.mxu1 %v7664_v59  ;;  %v7722_v58 = vld [vmem:[#allocation12 + $0x710] ss:$28 sps:$4 sm:$0xff]   ;;  %v7727_v59 = vld [vmem:[#allocation12 + $0x6dc] ss:$28 sps:$4 sm:$0xff]  }
 0x41c   :  { %5874 = vmatpush2.bf16.msra.mxu0 %v7659_v61  ;;  %v7730_v61 = vld [vmem:[#allocation12 + $0xa5c] ss:$28 sps:$4 sm:$0xff]  }
 0x41d   :  { %5915 = vmatpush2.bf16.msra.mxu1 %v7662_v62  ;;  %5875 = vmatprep.subr.bf16.mxu0 %v7667_v0  ;;  %v7725_v62 = vld [vmem:[#allocation12 + $0x6d8] ss:$28 sps:$4 sm:$0xff]  }
 0x41e   :  { %5916 = vmatprep.subr.bf16.mxu1 %v7670_v1  ;;  %v7728_v0 = vld [vmem:[#allocation12 + $0xa58] ss:$28 sps:$4 sm:$0xff]   ;;  %v7733_v1 = vld [vmem:[#allocation12 + $0x6a4] ss:$28 sps:$4 sm:$0xff]  }
 0x420   :  { %5876 = vmatpush2.bf16.msra.mxu0 %v7665_v2  ;;  %v7736_v2 = vld [vmem:[#allocation12 + $0xa24] ss:$28 sps:$4 sm:$0xff]  }
 0x421   :  { %5917 = vmatpush2.bf16.msra.mxu1 %v7668_v3  ;;  %5877 = vmatprep.subr.bf16.mxu0 %v7673_v6  ;;  %v7731_v3 = vld [vmem:[#allocation12 + $0x6a0] ss:$28 sps:$4 sm:$0xff]  }
 0x422   :  { %5918 = vmatprep.subr.bf16.mxu1 %v7676_v7  ;;  %v7734_v6 = vld [vmem:[#allocation12 + $0xa20] ss:$28 sps:$4 sm:$0xff]   ;;  %v7739_v7 = vld [vmem:[#allocation12 + $0x66c] ss:$28 sps:$4 sm:$0xff]  }
 0x424   :  { %5878 = vmatpush2.bf16.msra.mxu0 %v7671_v8  ;;  %v7742_v8 = vld [vmem:[#allocation12 + $0x9ec] ss:$28 sps:$4 sm:$0xff]  }
 0x425   :  { %5919 = vmatpush2.bf16.msra.mxu1 %v7674_v9  ;;  %5929 = vmatprep.subr.bf16.mxu0 %v7679_v10  ;;  %v7737_v9 = vld [vmem:[#allocation12 + $0x668] ss:$28 sps:$4 sm:$0xff]  }
 0x426   :  { %5970 = vmatprep.subr.bf16.mxu1 %v7682_v63  ;;  %v7740_v10 = vld [vmem:[#allocation12 + $0x9e8] ss:$28 sps:$4 sm:$0xff]   ;;  %v7745_v63 = vld [vmem:[#allocation12 + $0x634] ss:$28 sps:$4 sm:$0xff]  }
 0x427   :  { %5880 = vmatmul.mubr.bf16.vlgmr.msra.gmra.mxu0 %v8259_v19  ;;  %v8281_v14 = vpop.f32.mrf.mxu1 }
 0x428   :  { %5921 = vmatmul.mubr.bf16.vlgmr.msra.gmra.mxu1 %v8225_v25  ;;  %5930 = vmatpush1.bf16.msra.mxu0 %v7677_v13  ;;  %v7748_v13 = vld [vmem:[#allocation12 + $0x9b4] ss:$28 sps:$4 sm:$0xff]  }
 0x429   :  { %5961 = vmatprep.mubr.bf16.mxu0 %v8230_v49  ;;  %5971 = vmatpush1.bf16.msra.mxu1 %v7680_v11  ;;  %v8285_v4 = vpop.f32.mrf.mxu1  ;;  %v7743_v11 = vld [vmem:[#allocation12 + $0x630] ss:$28 sps:$4 sm:$0xff]  }
 0x42a   :  { %6002 = vmatprep.mubr.bf16.mxu1 %v8244_v17  ;;  %5931 = vmatprep.subr.bf16.mxu0 %v7685_v15  ;;  %v7746_v15 = vld [vmem:[#allocation12 + $0x9b0] ss:$28 sps:$4 sm:$0xff]  }
 0x42b   :  { %5972 = vmatprep.subr.bf16.mxu1 %v7688_v16  ;;  %v5680_v5 = vpop.f32.mrf.mxu1  ;;  %v7751_v16 = vld [vmem:[#allocation12 + $0x5fc] ss:$28 sps:$4 sm:$0xff]  }
 0x42c   :  { %5932 = vmatpush1.bf16.msra.mxu0 %v7683_v20  ;;  %v7754_v20 = vld [vmem:[#allocation12 + $0x97c] ss:$28 sps:$4 sm:$0xff]   ;;  %v7760_v5 = vld [vmem:[#allocation12 + $0x944] ss:$28 sps:$4 sm:$0xff]  }
 0x42d   :  { %5973 = vmatpush1.bf16.msra.mxu1 %v7686_v21  ;;  %v5681_v27 = vpop.f32.mrf.mxu1  ;;  %5933 = vmatprep.subr.bf16.mxu0 %v7691_v22  ;;  %v7749_v21 = vld [vmem:[#allocation12 + $0x5f8] ss:$28 sps:$4 sm:$0xff]  }
 0x42e   :  { %5974 = vmatprep.subr.bf16.mxu1 %v7694_v24  ;;  %v7752_v22 = vld [vmem:[#allocation12 + $0x978] ss:$28 sps:$4 sm:$0xff]   ;;  %v7757_v24 = vld [vmem:[#allocation12 + $0x5c4] ss:$28 sps:$4 sm:$0xff]  }
 0x42f   :  { %v7758_v27 = vld [vmem:[#allocation12 + $0x940] ss:$28 sps:$4 sm:$0xff]  }
 0x430   :  { %5934 = vmatpush1.bf16.msra.mxu0 %v7689_v26  ;;  %v7755_v26 = vld [vmem:[#allocation12 + $0x5c0] ss:$28 sps:$4 sm:$0xff]  }
 0x431   :  { %5975 = vmatpush1.bf16.msra.mxu1 %v7692_v29  ;;  %5935 = vmatprep.subr.bf16.mxu0 %v7697_v32  ;;  %v7763_v29 = vld [vmem:[#allocation12 + $0x58c] ss:$28 sps:$4 sm:$0xff]  }
 0x432   :  { %5976 = vmatprep.subr.bf16.mxu1 %v7700_v33  ;;  %v7766_v32 = vld [vmem:[#allocation12 + $0x90c] ss:$28 sps:$4 sm:$0xff]  }
 0x433   :  { %v7761_v33 = vld [vmem:[#allocation12 + $0x588] ss:$28 sps:$4 sm:$0xff]  }
 0x434   :  { %5936 = vmatpush1.bf16.msra.mxu0 %v7695_v35  ;;  %v7764_v35 = vld [vmem:[#allocation12 + $0x908] ss:$28 sps:$4 sm:$0xff]  }
 0x435   :  { %5977 = vmatpush1.bf16.msra.mxu1 %v7698_v36  ;;  %5937 = vmatprep.subr.bf16.mxu0 %v7703_v37  ;;  %v7769_v36 = vld [vmem:[#allocation12 + $0x554] ss:$28 sps:$4 sm:$0xff]  }
 0x436   :  { %5978 = vmatprep.subr.bf16.mxu1 %v7706_v38  ;;  %v7772_v37 = vld [vmem:[#allocation12 + $0x8d4] ss:$28 sps:$4 sm:$0xff]  }
 0x437   :  { %v7767_v38 = vld [vmem:[#allocation12 + $0x550] ss:$28 sps:$4 sm:$0xff]  }
 0x438   :  { %5938 = vmatpush1.bf16.msra.mxu0 %v7701_v39  ;;  %v7770_v39 = vld [vmem:[#allocation12 + $0x8d0] ss:$28 sps:$4 sm:$0xff]  }
 0x439   :  { %5979 = vmatpush1.bf16.msra.mxu1 %v7704_v40  ;;  %5939 = vmatprep.subr.bf16.mxu0 %v7709_v41  ;;  %v7775_v40 = vld [vmem:[#allocation12 + $0xc1c] ss:$28 sps:$4 sm:$0xff]  }
 0x43a   :  { %5980 = vmatprep.subr.bf16.mxu1 %v7712_v42  ;;  %v7776_v41 = vld [vmem:[#allocation12 + $0x360] ss:$28 sps:$4 sm:$0xff]   ;;  %v7773_v42 = vld [vmem:[#allocation12 + $0xc18] ss:$28 sps:$4 sm:$0xff]  }
 0x43c   :  { %5940 = vmatpush1.bf16.msra.mxu0 %v7707_v44  ;;  %v7777_v44 = vld [vmem:[#allocation12 + $0x1a0] ss:$28 sps:$4 sm:$0xff]  }
 0x43d   :  { %5981 = vmatpush1.bf16.msra.mxu1 %v7710_v46  ;;  %5941 = vmatprep.subr.bf16.mxu0 %v7715_v47  ;;  %v5677_v46 = vadd.f32 %v8281_v14, %v8274_v57  ;;  %v7780_v47 = vld [vmem:[#allocation12 + $0xbe4] ss:$28 sps:$4 sm:$0xff]  }
 0x43e   :  { %5982 = vmatprep.subr.bf16.mxu1 %v7718_v51 }
 0x440   :  { %5942 = vmatpush1.bf16.msra.mxu0 %v7713_v53 }
 0x441   :  { %5983 = vmatpush1.bf16.msra.mxu1 %v7716_v55  ;;  %5943 = vmatprep.subr.bf16.mxu0 %v7721_v56  ;;  %v7781_v55 = vld [vmem:[#allocation12 + $0x328] ss:$28 sps:$4 sm:$0xff]   ;;  %v5679_v56 = vadd.f32 %v8285_v4, %v8278_v60 }
 0x442   :  { %5984 = vmatprep.subr.bf16.mxu1 %v7724_v30 }
 0x444   :  { %5944 = vmatpush1.bf16.msra.mxu0 %v7719_v31  ;;  %v7778_v31 = vld [vmem:[#allocation12 + $0xbe0] ss:$28 sps:$4 sm:$0xff]  }
 0x445   :  { %5985 = vmatpush1.bf16.msra.mxu1 %v7722_v58  ;;  %5945 = vmatprep.subr.bf16.mxu0 %v7727_v59  ;;  %v7782_v58 = vld [vmem:[#allocation12 + $0x168] ss:$28 sps:$4 sm:$0xff]  }
 0x446   :  { %5986 = vmatprep.subr.bf16.mxu1 %v7730_v61  ;;  %v7785_v59 = vld [vmem:[#allocation12 + $0xbac] ss:$28 sps:$4 sm:$0xff]  }
 0x448   :  { %5946 = vmatpush2.bf16.msra.mxu0 %v7725_v62  ;;  %v7786_v62 = vld [vmem:[#allocation12 + $0x2f0] ss:$28 sps:$4 sm:$0xff]  }
 0x449   :  { %5987 = vmatpush2.bf16.msra.mxu1 %v7728_v0  ;;  %5947 = vmatprep.subr.bf16.mxu0 %v7733_v1  ;;  %v7783_v0 = vld [vmem:[#allocation12 + $0xba8] ss:$28 sps:$4 sm:$0xff]  }
 0x44a   :  { %5988 = vmatprep.subr.bf16.mxu1 %v7736_v2 }
 0x44c   :  { %5948 = vmatpush2.bf16.msra.mxu0 %v7731_v3  ;;  %v7787_v3 = vld [vmem:[#allocation12 + $0x130] ss:$28 sps:$4 sm:$0xff]  }
 0x44d   :  { %5989 = vmatpush2.bf16.msra.mxu1 %v7734_v6  ;;  %5949 = vmatprep.subr.bf16.mxu0 %v7739_v7  ;;  %v7790_v6 = vld [vmem:[#allocation12 + $0xb74] ss:$28 sps:$4 sm:$0xff]  }
 0x44e   :  { %5990 = vmatprep.subr.bf16.mxu1 %v7742_v8  ;;  %v7791_v7 = vld [vmem:[#allocation12 + $0x2b8] ss:$28 sps:$4 sm:$0xff]   ;;  %v7788_v8 = vld [vmem:[#allocation12 + $0xb70] ss:$28 sps:$4 sm:$0xff]  }
 0x450   :  { %5950 = vmatpush2.bf16.msra.mxu0 %v7737_v9  ;;  %v7795_v9 = vld [vmem:[#allocation12 + $0xb3c] ss:$28 sps:$4 sm:$0xff]  }
 0x451   :  { %5991 = vmatpush2.bf16.msra.mxu1 %v7740_v10  ;;  %5951 = vmatprep.subr.bf16.mxu0 %v7745_v63  ;;  %v7796_v10 = vld [vmem:[#allocation12 + $0x280] ss:$28 sps:$4 sm:$0xff]   ;;  %v7793_v63 = vld [vmem:[#allocation12 + $0xb38] ss:$28 sps:$4 sm:$0xff]  }
 0x452   :  { %5992 = vmatprep.subr.bf16.mxu1 %v7748_v13  ;;  %v7797_v13 = vld [vmem:[#allocation12 + $0xc0] ss:$28 sps:$4 sm:$0xff]  }
 0x454   :  { %5952 = vmatpush2.bf16.msra.mxu0 %v7743_v11  ;;  %v7800_v11 = vld [vmem:[#allocation12 + $0xb04] ss:$28 sps:$4 sm:$0xff]  }
 0x455   :  { %5993 = vmatpush2.bf16.msra.mxu1 %v7746_v15  ;;  %5953 = vmatprep.subr.bf16.mxu0 %v7751_v16  ;;  %v7801_v15 = vld [vmem:[#allocation12 + $0x248] ss:$28 sps:$4 sm:$0xff]  }
 0x456   :  { %5994 = vmatprep.subr.bf16.mxu1 %v7754_v20  ;;  %v7798_v20 = vld [vmem:[#allocation12 + $0xb00] ss:$28 sps:$4 sm:$0xff]  }
 0x458   :  { %5954 = vmatpush2.bf16.msra.mxu0 %v7749_v21 }
 0x459   :  { %5995 = vmatpush2.bf16.msra.mxu1 %v7752_v22  ;;  %5955 = vmatprep.subr.bf16.mxu0 %v7757_v24  ;;  %v7802_v22 = vld [vmem:[#allocation12 + $0x88] ss:$28 sps:$4 sm:$0xff]  }
 0x45a   :  { %5996 = vmatprep.subr.bf16.mxu1 %v7760_v5  ;;  %v7805_v24 = vld [vmem:[#allocation12 + $0xacc] ss:$28 sps:$4 sm:$0xff]  }
 0x45b   :  { %v7806_v5 = vld [vmem:[#allocation12 + $0x210] ss:$28 sps:$4 sm:$0xff]  }
 0x45c   :  { %5956 = vmatpush2.bf16.msra.mxu0 %v7755_v26  ;;  %v7803_v26 = vld [vmem:[#allocation12 + $0xac8] ss:$28 sps:$4 sm:$0xff]  }
 0x45d   :  { %5997 = vmatpush2.bf16.msra.mxu1 %v7758_v27  ;;  %5957 = vmatprep.subr.bf16.mxu0 %v7763_v29  ;;  %v7807_v27 = vld [vmem:[#allocation12 + $0x50] ss:$28 sps:$4 sm:$0xff]  }
 0x45e   :  { %5998 = vmatprep.subr.bf16.mxu1 %v7766_v32  ;;  %v7810_v29 = vld [vmem:[#allocation12 + $0xa94] ss:$28 sps:$4 sm:$0xff]  }
 0x45f   :  { %v7811_v32 = vld [vmem:[#allocation12 + $0x1d8] ss:$28 sps:$4 sm:$0xff]  }
 0x460   :  { %5958 = vmatpush2.bf16.msra.mxu0 %v7761_v33  ;;  %v7808_v33 = vld [vmem:[#allocation12 + $0xa90] ss:$28 sps:$4 sm:$0xff]  }
 0x461   :  { %5999 = vmatpush2.bf16.msra.mxu1 %v7764_v35  ;;  %5959 = vmatprep.subr.bf16.mxu0 %v7769_v36  ;;  %v7812_v35 = vld [vmem:[#allocation12 + $0x18] ss:$28 sps:$4 sm:$0xff]  }
 0x462   :  { %6000 = vmatprep.subr.bf16.mxu1 %v7772_v37  ;;  %v7815_v36 = vld [vmem:[#allocation12 + $0xddc] ss:$28 sps:$4 sm:$0xff]  }
 0x463   :  { %v7816_v37 = vld [vmem:[#allocation12 + $0xa60] ss:$28 sps:$4 sm:$0xff]  }
 0x464   :  { %5960 = vmatpush2.bf16.msra.mxu0 %v7767_v38  ;;  %v7813_v38 = vld [vmem:[#allocation12 + $0xdd8] ss:$28 sps:$4 sm:$0xff]  }
 0x465   :  { %6001 = vmatpush2.bf16.msra.mxu1 %v7770_v39  ;;  %6011 = vmatprep.subr.bf16.mxu0 %v7775_v40  ;;  %v7817_v39 = vld [vmem:[#allocation12 + $0x8a0] ss:$28 sps:$4 sm:$0xff]  }
 0x466   :  { %7020 = vmatprep.subr.bf16.mxu1 %v7776_v41  ;;  %v7820_v40 = vld [vmem:[#allocation12 + $0xda4] ss:$28 sps:$4 sm:$0xff]  }
 0x467   :  { %v8290_v51 = vpop.f32.mrf.mxu1  ;;  %5962 = vmatmul.mubr.bf16.vlgmr.msra.gmra.mxu0 %v8232_v54  ;;  %v5717_v53 = vpop.f32.mrf.mxu0  ;;  %v7821_v41 = vld [vmem:[#allocation12 + $0xa28] ss:$28 sps:$4 sm:$0xff]  }
 0x468   :  { %6003 = vmatmul.mubr.bf16.vlgmr.msra.gmra.mxu1 %v8246_v18  ;;  %v5718_v30 = vadd.f32 %v5717_v53, %v5677_v46  ;;  %6012 = vmatpush1.bf16.msra.mxu0 %v7773_v42  ;;  %v7818_v42 = vld [vmem:[#allocation12 + $0xda0] ss:$28 sps:$4 sm:$0xff]   ;;  %v7825_v46 = vld [vmem:[#allocation12 + $0xd6c] ss:$28 sps:$4 sm:$0xff]  }
 0x469   :  { %6043 = vmatprep.mubr.bf16.mxu0 %v8257_v12  ;;  %7021 = vmatpush3.bf16.msra.mxu1 %v7777_v44  ;;  %v8297_v57 = vpop.f32.mrf.mxu1  ;;  %v5719_v14 = vpop.f32.mrf.mxu0  ;;  %v7822_v44 = vld [vmem:[#allocation12 + $0x868] ss:$28 sps:$4 sm:$0xff]  }
 0x46a   :  { %7885 = vtanh.f32 %v5718_v30  ;;  %6084 = vmatprep.mubr.bf16.mxu1 %v8216_v23  ;;  %v5720_v61 = vadd.f32 %v5719_v14, %v5679_v56  ;;  %6013 = vmatprep.subr.bf16.mxu0 %v7780_v47  ;;  %v7792_v23 = vld [vmem:[#allocation12 + $0xf8] ss:$28 sps:$4 sm:$0xff]   ;;  %v7826_v47 = vld [vmem:[#allocation12 + $0x9f0] ss:$28 sps:$4 sm:$0xff]   ;;  %v7823_v53 = vld [vmem:[#allocation12 + $0xd68] ss:$28 sps:$4 sm:$0xff]  }
 0x46b   :  { %v5762_v60 = vpop.f32.mrf.mxu1  ;;  %7022 = vmatprep.subr.bf16.mxu1 %v7781_v55  ;;  %v5721_v4 = vpop.f32.mrf.mxu0  ;;  %v7827_v55 = vld [vmem:[#allocation12 + $0x830] ss:$28 sps:$4 sm:$0xff]   ;;  %v7831_v30 = vld [vmem:[#allocation12 + $0x9b8] ss:$28 sps:$4 sm:$0xff]  }
 0x46c   :  { %7887 = vtanh.f32 %v5720_v61  ;;  %6014 = vmatpush1.bf16.msra.mxu0 %v7778_v31  ;;  %v7830_v56 = vld [vmem:[#allocation12 + $0xd34] ss:$28 sps:$4 sm:$0xff]   ;;  %v7835_v14 = vld [vmem:[#allocation12 + $0xcfc] ss:$28 sps:$4 sm:$0xff]   ;;  %v7840_v61 = vld [vmem:[#allocation12 + $0xcc4] ss:$28 sps:$4 sm:$0xff]  }
 0x46d   :  { %7023 = vmatpush3.bf16.msra.mxu1 %v7782_v58  ;;  %v5763_v1 = vpop.f32.mrf.mxu1  ;;  %v5722_v2 = vpop.f32.mrf.mxu0  ;;  %6015 = vmatprep.subr.bf16.mxu0 %v7785_v59  ;;  %v7832_v31 = vld [vmem:[#allocation12 + $0x7f8] ss:$28 sps:$4 sm:$0xff]   ;;  %v7837_v59 = vld [vmem:[#allocation12 + $0x7c0] ss:$28 sps:$4 sm:$0xff]   ;;  %v7842_v4 = vld [vmem:[#allocation12 + $0x788] ss:$28 sps:$4 sm:$0xff]  }
 0x46e   :  { %7024 = vmatprep.subr.bf16.mxu1 %v7786_v62  ;;  %v7833_v58 = vld [vmem:[#allocation12 + $0xcf8] ss:$28 sps:$4 sm:$0xff]   ;;  %v7841_v62 = vld [vmem:[#allocation12 + $0x948] ss:$28 sps:$4 sm:$0xff]   ;;  %v7838_v60 = vld [vmem:[#allocation12 + $0xcc0] ss:$28 sps:$4 sm:$0xff]  }
 0x46f   :  { %v7846_v1 = vld [vmem:[#allocation12 + $0x910] ss:$28 sps:$4 sm:$0xff]   ;;  %v7843_v2 = vld [vmem:[#allocation12 + $0xc88] ss:$28 sps:$4 sm:$0xff]  }
 0x470   :  { %6016 = vmatpush1.bf16.msra.mxu0 %v7783_v0  ;;  %v7845_v0 = vld [vmem:[#allocation12 + $0xc8c] ss:$28 sps:$4 sm:$0xff]  }
 0x471   :  { %7025 = vmatpush3.bf16.msra.mxu1 %v7787_v3  ;;  %6017 = vmatprep.subr.bf16.mxu0 %v7790_v6  ;;  %v7847_v3 = vld [vmem:[#allocation12 + $0x750] ss:$28 sps:$4 sm:$0xff]  }
 0x472   :  { %7026 = vmatprep.subr.bf16.mxu1 %v7791_v7  ;;  %v7850_v6 = vld [vmem:[#allocation12 + $0xc54] ss:$28 sps:$4 sm:$0xff]  }
 0x473   :  { %v7851_v7 = vld [vmem:[#allocation12 + $0x8d8] ss:$28 sps:$4 sm:$0xff]  }
 0x474   :  { %6018 = vmatpush1.bf16.msra.mxu0 %v7788_v8  ;;  %v7848_v8 = vld [vmem:[#allocation12 + $0xc50] ss:$28 sps:$4 sm:$0xff]  }
 0x475   :  { %7027 = vmatpush3.bf16.msra.mxu1 %v7792_v23  ;;  %6019 = vmatprep.subr.bf16.mxu0 %v7795_v9  ;;  %v7852_v23 = vld [vmem:[#allocation12 + $0x718] ss:$28 sps:$4 sm:$0xff]   ;;  %v7853_v9 = vld [vmem:[#allocation12 + $0x6e0] ss:$28 sps:$4 sm:$0xff]  }
 0x476   :  { %7028 = vmatprep.subr.bf16.mxu1 %v7796_v10  ;;  %v7854_v10 = vld [vmem:[#allocation12 + $0x520] ss:$28 sps:$4 sm:$0xff]  }
 0x477   :  { %v7886_v16 = vpop.eup %7885 }
 0x478   :  { %6219 = vst [vmem:[%s8367_s9] sm:$0xff] %v7886_v16  ;;  %6020 = vmatpush1.bf16.msra.mxu0 %v7793_v63  ;;  %v7855_v63 = vld [vmem:[#allocation12 + $0x6a8] ss:$28 sps:$4 sm:$0xff]  }
 0x479   :  { %v7888_v21 = vpop.eup %7887  ;;  %7029 = vmatpush3.bf16.msra.mxu1 %v7797_v13  ;;  %6021 = vmatprep.subr.bf16.mxu0 %v7800_v11 }
 0x47a   :  { %6220 = vst [vmem:[%s8367_s9 + $0x8] sm:$0xff] %v7888_v21  ;;  %7030 = vmatprep.subr.bf16.mxu1 %v7801_v15  ;;  %v7856_v15 = vld [vmem:[#allocation12 + $0x4e8] ss:$28 sps:$4 sm:$0xff]   ;;  %v7857_v21 = vld [vmem:[#allocation12 + $0x670] ss:$28 sps:$4 sm:$0xff]  }
 0x47c   :  { %6022 = vmatpush1.bf16.msra.mxu0 %v7798_v20 }
 0x47d   :  { %7031 = vmatpush3.bf16.msra.mxu1 %v7802_v22  ;;  %6023 = vmatprep.subr.bf16.mxu0 %v7805_v24 }
 0x47e   :  { %7032 = vmatprep.subr.bf16.mxu1 %v7806_v5  ;;  %v7858_v5 = vld [vmem:[#allocation12 + $0x4b0] ss:$28 sps:$4 sm:$0xff]  }
 0x480   :  { %6024 = vmatpush1.bf16.msra.mxu0 %v7803_v26 }
 0x481   :  { %7033 = vmatpush3.bf16.msra.mxu1 %v7807_v27  ;;  %6025 = vmatprep.subr.bf16.mxu0 %v7810_v29  ;;  %v7859_v29 = vld [vmem:[#allocation12 + $0x638] ss:$28 sps:$4 sm:$0xff]  }
 0x482   :  { %7034 = vmatprep.subr.bf16.mxu1 %v7811_v32  ;;  %v7861_v32 = vld [vmem:[#allocation12 + $0x600] ss:$28 sps:$4 sm:$0xff]  }
 0x484   :  { %6026 = vmatpush1.bf16.msra.mxu0 %v7808_v33  ;;  %v7863_v33 = vld [vmem:[#allocation12 + $0x5c8] ss:$28 sps:$4 sm:$0xff]  }
 0x485   :  { %7035 = vmatpush3.bf16.msra.mxu1 %v7812_v35  ;;  %6027 = vmatprep.subr.bf16.mxu0 %v7815_v36  ;;  %v7864_v35 = vld [vmem:[#allocation12 + $0x408] ss:$28 sps:$4 sm:$0xff]   ;;  %v7865_v36 = vld [vmem:[#allocation12 + $0x590] ss:$28 sps:$4 sm:$0xff]  }
 0x486   :  { %7064 = vmatprep.subr.bf16.mxu1 %v7816_v37  ;;  %v7866_v37 = vld [vmem:[#allocation12 + $0x3d0] ss:$28 sps:$4 sm:$0xff]  }
 0x488   :  { %6085 = vmatmul.mubr.bf16.vlgmr.msra.gmra.mxu1 %v8225_v25  ;;  %6028 = vmatpush2.bf16.msra.mxu0 %v7813_v38  ;;  %v7828_v25 = vld [vmem:[#allocation12 + $0xd30] ss:$28 sps:$4 sm:$0xff]   ;;  %v7867_v38 = vld [vmem:[#allocation12 + $0x558] ss:$28 sps:$4 sm:$0xff]  }
 0x489   :  { %7065 = vmatpush3.bf16.msra.mxu1 %v7817_v39  ;;  %6164 = vmatprep.mubr.bf16.mxu1 %v8244_v17  ;;  %v7836_v17 = vld [vmem:[#allocation12 + $0x980] ss:$28 sps:$4 sm:$0xff]   ;;  %v7868_v39 = vld [vmem:[#allocation12 + $0x398] ss:$28 sps:$4 sm:$0xff]  }
 0x48a   :  { %6029 = vmatprep.subr.bf16.mxu0 %v7820_v40  ;;  %7066 = vmatprep.subr.bf16.mxu1 %v7821_v41  ;;  %v7869_v40 = vld [vmem:[#allocation12 + $0xde0] ss:$28 sps:$4 sm:$0xff]  }
 0x48b   :  { %v7870_v41 = vld [vmem:[#allocation12 + $0xc20] ss:$28 sps:$4 sm:$0xff]  }
 0x48c   :  { %6030 = vmatpush2.bf16.msra.mxu0 %v7818_v42  ;;  %v7871_v42 = vld [vmem:[#allocation12 + $0xda8] ss:$28 sps:$4 sm:$0xff]  }
 0x48d   :  { %7067 = vmatpush3.bf16.msra.mxu1 %v7822_v44  ;;  %6031 = vmatprep.subr.bf16.mxu0 %v7825_v46  ;;  %v7872_v44 = vld [vmem:[#allocation12 + $0xbe8] ss:$28 sps:$4 sm:$0xff]   ;;  %v7873_v46 = vld [vmem:[#allocation12 + $0xd70] ss:$28 sps:$4 sm:$0xff]  }
 0x48e   :  { %7068 = vmatprep.subr.bf16.mxu1 %v7826_v47  ;;  %v7874_v47 = vld [vmem:[#allocation12 + $0xbb0] ss:$28 sps:$4 sm:$0xff]  }
 0x490   :  { %6032 = vmatpush2.bf16.msra.mxu0 %v7823_v53  ;;  %v7875_v53 = vld [vmem:[#allocation12 + $0xd38] ss:$28 sps:$4 sm:$0xff]  }
 0x491   :  { %7069 = vmatpush3.bf16.msra.mxu1 %v7827_v55  ;;  %6033 = vmatprep.subr.bf16.mxu0 %v7830_v56  ;;  %v7876_v55 = vld [vmem:[#allocation12 + $0xb78] ss:$28 sps:$4 sm:$0xff]   ;;  %v7877_v56 = vld [vmem:[#allocation12 + $0xd00] ss:$28 sps:$4 sm:$0xff]  }
 0x492   :  { %7070 = vmatprep.subr.bf16.mxu1 %v7831_v30  ;;  %v7878_v30 = vld [vmem:[#allocation12 + $0xb40] ss:$28 sps:$4 sm:$0xff]  }
 0x494   :  { %6034 = vmatpush2.bf16.msra.mxu0 %v7828_v25  ;;  %v7879_v25 = vld [vmem:[#allocation12 + $0xcc8] ss:$28 sps:$4 sm:$0xff]  }
 0x495   :  { %7071 = vmatpush3.bf16.msra.mxu1 %v7832_v31  ;;  %6035 = vmatprep.subr.bf16.mxu0 %v7835_v14  ;;  %v7881_v31 = vld [vmem:[#allocation12 + $0xc90] ss:$28 sps:$4 sm:$0xff]  }
 0x496   :  { %7072 = vmatprep.subr.bf16.mxu1 %v7836_v17  ;;  %v7882_v14 = vld [vmem:[#allocation12 + $0xad0] ss:$28 sps:$4 sm:$0xff]   ;;  %v7883_v17 = vld [vmem:[#allocation12 + $0xc58] ss:$28 sps:$4 sm:$0xff]  }
 0x498   :  { %6036 = vmatpush2.bf16.msra.mxu0 %v7833_v58  ;;  %v8323_v58 = vld [vmem:[#allocation13] sm:$0xff] }
 0x499   :  { %7073 = vmatpush3.bf16.msra.mxu1 %v7837_v59  ;;  %6037 = vmatprep.subr.bf16.mxu0 %v7840_v61  ;;  %v3236_v59 = vrot.slane %v8323_v58, %v8178_v52 }
 0x49a   :  { %7074 = vmatprep.subr.bf16.mxu1 %v7841_v62  ;;  %v7884_v62 = vld [vmem:[#allocation12 + $0xa98] ss:$28 sps:$4 sm:$0xff]  }
 0x49c   :  { %6038 = vmatpush2.bf16.msra.mxu0 %v7838_v60  ;;  %v5761_v60 = vadd.f32 %v8297_v57, %v3236_v59 }
 0x49d   :  { %7075 = vmatpush3.bf16.msra.mxu1 %v7842_v4  ;;  %6039 = vmatprep.subr.bf16.mxu0 %v7845_v0 }
 0x49e   :  { %7076 = vmatprep.subr.bf16.mxu1 %v7846_v1 }
 0x4a0   :  { %6040 = vmatpush2.bf16.msra.mxu0 %v7843_v2 }
 0x4a1   :  { %7077 = vmatpush3.bf16.msra.mxu1 %v7847_v3  ;;  %6041 = vmatprep.subr.bf16.mxu0 %v7850_v6 }
 0x4a2   :  { %7078 = vmatprep.subr.bf16.mxu1 %v7851_v7 }
 0x4a4   :  { %6042 = vmatpush2.bf16.msra.mxu0 %v7848_v8 }
 0x4a5   :  { %7079 = vmatpush3.bf16.msra.mxu1 %v7852_v23  ;;  %7042 = vmatprep.subr.bf16.mxu0 %v7853_v9 }
 0x4a7   :  { %v8308_v13 = vpop.f32.mrf.mxu0  ;;  %v8310_v11 = vpop.f32.mrf.mxu1  ;;  %6044 = vmatmul.mubr.bf16.vlgmr.msra.gmra.mxu0 %v8259_v19 }
 0x4a8   :  { %6165 = vmatmul.mubr.bf16.vlgmr.msra.gmra.mxu1 %v8246_v18  ;;  %7043 = vmatpush3.bf16.msra.mxu0 %v7854_v10  ;;  %v7860_v18 = vld [vmem:[#allocation12 + $0x478] ss:$28 sps:$4 sm:$0xff]  }
 0x4a9   :  { %6124 = vmatprep.mubr.bf16.mxu0 %v8230_v49  ;;  %v8315_v16 = vpop.f32.mrf.mxu0  ;;  %v8317_v20 = vpop.f32.mrf.mxu1  ;;  %7044 = vmatprep.subr.bf16.mxu0 %v7855_v63  ;;  %v7862_v49 = vld [vmem:[#allocation12 + $0x440] ss:$28 sps:$4 sm:$0xff]  }
 0x4ab   :  { %v5803_v22 = vpop.f32.mrf.mxu0  ;;  %v5844_v24 = vpop.f32.mrf.mxu1 }
 0x4ac   :  { %7045 = vmatpush3.bf16.msra.mxu0 %v7856_v15 }
 0x4ad   :  { %v5804_v26 = vpop.f32.mrf.mxu0  ;;  %v5845_v27 = vpop.f32.mrf.mxu1  ;;  %7046 = vmatprep.subr.bf16.mxu0 %v7857_v21 }
 0x4b0   :  { %7047 = vmatpush3.bf16.msra.mxu0 %v7858_v5 }
 0x4b1   :  { %7048 = vmatprep.subr.bf16.mxu0 %v7859_v29  ;;  %v3240_v29 = vrot.slane %v8323_v58, %v1061_v43 }
 0x4b4   :  { %7049 = vmatpush3.bf16.msra.mxu0 %v7860_v18  ;;  %v3244_v18 = vrot.slane %v8323_v58, %v1065_v48 }
 0x4b5   :  { %7050 = vmatprep.subr.bf16.mxu0 %v7861_v32 }
 0x4b8   :  { %7051 = vmatpush3.bf16.msra.mxu0 %v7862_v49 }
 0x4b9   :  { %7052 = vmatprep.subr.bf16.mxu0 %v7863_v33 }
 0x4bc   :  { %7053 = vmatpush3.bf16.msra.mxu0 %v7864_v35 }
 0x4bd   :  { %7054 = vmatprep.subr.bf16.mxu0 %v7865_v36 }
 0x4c0   :  { %7055 = vmatpush3.bf16.msra.mxu0 %v7866_v37 }
 0x4c1   :  { %7056 = vmatprep.subr.bf16.mxu0 %v7867_v38 }
 0x4c4   :  { %7057 = vmatpush3.bf16.msra.mxu0 %v7868_v39 }
 0x4c5   :  { %7086 = vmatprep.subr.bf16.mxu0 %v7869_v40 }
 0x4c7   :  { %6125 = vmatmul.mubr.bf16.vlgmr.msra.gmra.mxu0 %v8232_v54  ;;  %v7880_v54 = vld [vmem:[#allocation12 + $0xb08] ss:$28 sps:$4 sm:$0xff]  }
 0x4c8   :  { %7087 = vmatpush3.bf16.msra.mxu0 %v7870_v41  ;;  %6204 = vmatprep.mubr.bf16.mxu0 %v8257_v12  ;;  %v3232_v12 = vrot.slane %v8266_v34, %v8175_v50  ;;  %v5802_v50 = vadd.f32 %v8315_v16, %v5761_v60 }
 0x4c9   :  { %7088 = vmatprep.subr.bf16.mxu0 %v7871_v42 }
 0x4ca   :  { %v5759_v61 = vadd.f32 %v8290_v51, %v3232_v12  ;;  %v5843_v1 = vadd.f32 %v8317_v20, %v5802_v50 }
 0x4cc   :  { %7089 = vmatpush3.bf16.msra.mxu0 %v7872_v44  ;;  %v5800_v4 = vadd.f32 %v8308_v13, %v5759_v61 }
 0x4cd   :  { %7090 = vmatprep.subr.bf16.mxu0 %v7873_v46 }
 0x4ce   :  { %v5841_v34 = vadd.f32 %v8310_v11, %v5800_v4 }
 0x4d0   :  { %7091 = vmatpush3.bf16.msra.mxu0 %v7874_v47 }
 0x4d1   :  { %7092 = vmatprep.subr.bf16.mxu0 %v7875_v53 }
 0x4d4   :  { %7093 = vmatpush3.bf16.msra.mxu0 %v7876_v55 }
 0x4d5   :  { %7094 = vmatprep.subr.bf16.mxu0 %v7877_v56 }
 0x4d8   :  { %7095 = vmatpush3.bf16.msra.mxu0 %v7878_v30 }
 0x4d9   :  { %7096 = vmatprep.subr.bf16.mxu0 %v7879_v25 }
 0x4dc   :  { %7097 = vmatpush3.bf16.msra.mxu0 %v7880_v54 }
 0x4dd   :  { %7098 = vmatprep.subr.bf16.mxu0 %v7881_v31  ;;  %v3248_v31 = vrot.slane %v8323_v58, %v1069_v45 }
 0x4e0   :  { %7099 = vmatpush3.bf16.msra.mxu0 %v7882_v14 }
 0x4e1   :  { %7100 = vmatprep.subr.bf16.mxu0 %v7883_v17 }
 0x4e4   :  { %7101 = vmatpush3.bf16.msra.mxu0 %v7884_v62 }
 0x4e7   :  { %v5881_v0 = vpop.f32.mrf.mxu0  ;;  %6205 = vmatmul.mubr.bf16.vlgmr.msra.gmra.mxu0 %v8259_v19 }
 0x4e8   :  { %v5882_v52 = vadd.f32 %v5881_v0, %v5841_v34  ;;  %v5922_v2 = vpop.f32.mrf.mxu1 }
 0x4e9   :  { %v5883_v51 = vpop.f32.mrf.mxu0  ;;  %v5923_v32 = vadd.f32 %v5922_v2, %v3240_v29 }
 0x4ea   :  { %7889 = vtanh.f32 %v5882_v52  ;;  %v5884_v3 = vadd.f32 %v5883_v51, %v5843_v1  ;;  %v5924_v6 = vpop.f32.mrf.mxu1 }
 0x4eb   :  { %v5885_v7 = vpop.f32.mrf.mxu0  ;;  %v5925_v49 = vadd.f32 %v5924_v6, %v3244_v18 }
 0x4ec   :  { %7891 = vtanh.f32 %v5884_v3  ;;  %v5926_v57 = vpop.f32.mrf.mxu1 }
 0x4ed   :  { %v5886_v8 = vpop.f32.mrf.mxu0 }
 0x4ee   :  { %v5927_v23 = vpop.f32.mrf.mxu1 }
 0x4f7   :  { %v7890_v9 = vpop.eup %7889 }
 0x4f8   :  { %6221 = vst [vmem:[%s8367_s9 + $0x10] sm:$0xff] %v7890_v9 }
 0x4f9   :  { %v7892_v10 = vpop.eup %7891 }
 0x4fa   :  { %6222 = vst [vmem:[%s8367_s9 + $0x18] sm:$0xff] %v7892_v10 }
 0x527   :  { %v5963_v19 = vpop.f32.mrf.mxu0 }
 0x528   :  { %v6004_v63 = vpop.f32.mrf.mxu1  ;;  %v5964_v33 = vadd.f32 %v5963_v19, %v5923_v32 }
 0x529   :  { %v5965_v13 = vpop.f32.mrf.mxu0 }
 0x52a   :  { %v6006_v11 = vpop.f32.mrf.mxu1  ;;  %v5966_v35 = vadd.f32 %v5965_v13, %v5925_v49  ;;  %v6005_v36 = vadd.f32 %v6004_v63, %v5964_v33 }
 0x52b   :  { %v5967_v15 = vpop.f32.mrf.mxu0 }
 0x52c   :  { %v6008_v16 = vpop.f32.mrf.mxu1  ;;  %v6007_v38 = vadd.f32 %v6006_v11, %v5966_v35 }
 0x52d   :  { %v5968_v20 = vpop.f32.mrf.mxu0 }
 0x52e   :  { %v6009_v21 = vpop.f32.mrf.mxu1 }
 0x548   :  { %v7036_v22 = vpop.f32.mrf.mxu1 }
 0x54a   :  { %v7037_v24 = vpop.f32.mrf.mxu1 }
 0x54b   :  { %v7038_v5 = vadd.f32 %v7037_v24, %v7036_v22 }
 0x54c   :  { %v7039_v26 = vpop.f32.mrf.mxu1 }
 0x54d   :  { %v6087_v14 = vadd.f32 %v7038_v5, %v3248_v31 }
 0x54e   :  { %v7040_v27 = vpop.f32.mrf.mxu1 }
 0x567   :  { %v6045_v37 = vpop.f32.mrf.mxu0 }
 0x568   :  { %v6046_v39 = vadd.f32 %v6045_v37, %v6005_v36  ;;  %v7080_v40 = vpop.f32.mrf.mxu1 }
 0x569   :  { %v6047_v41 = vpop.f32.mrf.mxu0 }
 0x56a   :  { %7893 = vtanh.f32 %v6046_v39  ;;  %v6048_v42 = vadd.f32 %v6047_v41, %v6007_v38  ;;  %v7081_v44 = vpop.f32.mrf.mxu1 }
 0x56b   :  { %v6049_v46 = vpop.f32.mrf.mxu0  ;;  %v7082_v61 = vadd.f32 %v7081_v44, %v7080_v40 }
 0x56c   :  { %7895 = vtanh.f32 %v6048_v42  ;;  %v7083_v43 = vpop.f32.mrf.mxu1 }
 0x56d   :  { %v6050_v47 = vpop.f32.mrf.mxu0 }
 0x56e   :  { %v7084_v53 = vpop.f32.mrf.mxu1 }
 0x577   :  { %v7894_v55 = vpop.eup %7893 }
 0x578   :  { %6223 = vst [vmem:[%s8367_s9 + $0x20] sm:$0xff] %v7894_v55 }
 0x579   :  { %v7896_v48 = vpop.eup %7895 }
 0x57a   :  { %6224 = vst [vmem:[%s8367_s9 + $0x28] sm:$0xff] %v7896_v48 }
 0x587   :  { %v7058_v56 = vpop.f32.mrf.mxu0 }
 0x589   :  { %v7059_v30 = vpop.f32.mrf.mxu0 }
 0x58a   :  { %v7060_v12 = vadd.f32 %v7059_v30, %v7058_v56 }
 0x58b   :  { %v7061_v25 = vpop.f32.mrf.mxu0 }
 0x58c   :  { %v6127_v17 = vadd.f32 %v7060_v12, %v6087_v14 }
 0x58d   :  { %v7062_v54 = vpop.f32.mrf.mxu0 }
 0x58e   :  { %v6167_v60 = vadd.f32 %v7082_v61, %v6127_v17 }
 0x5a7   :  { %v7102_v59 = vpop.f32.mrf.mxu0 }
 0x5a9   :  { %v7103_v62 = vpop.f32.mrf.mxu0 }
 0x5aa   :  { %v7104_v4 = vadd.f32 %v7103_v62, %v7102_v59 }
 0x5ab   :  { %v7105_v50 = vpop.f32.mrf.mxu0 }
 0x5ac   :  { %v6207_v34 = vadd.f32 %v7104_v4, %v6167_v60 }
 0x5ad   :  { %v7106_v0 = vpop.f32.mrf.mxu0 }
 0x5ae   :  { %7897 = vtanh.f32 %v6207_v34 }
 0x5bb   :  { %v7898_v1 = vpop.eup %7897 }
 0x5bc   :  { %6226 = vst.msk [vmem:[%s8367_s9 + $0x30] sm:$0xff] %vm6225_vm0, %v7898_v1 }
 0x5bd   :  { %6231 = vsyncpa [#allocation3], 1 }
 0x5be   :  { %6232 = vsyncpa [#allocation5], 1 }
 0x5bf   :  { %6233 = vsyncpa [#allocation8], 1 }
 0x5c0   :  { %6234 = vsyncpa [#allocation11], 1 }
 0x5c1   :  { %6235 = vsyncpa [#allocation14], 1 }

// kernel: generator_forward.1
= control target key start
LH: loop header
LB: loop body
LE: loop exit
PB: predicated region body
PF: predicated region fallthrough
CT: control target
= control target key end

     0   :  { %14 = vsyncpa [#allocation3], 0  ;;  %s8358_s0 = inlined_call_operand.vmem [shape: f32[8,128], index: 0, kind: input, shape index: {}]   ;;  %s8359_s1 = inlined_call_operand.hbm [shape: bf16[128,256], index: 1, kind: input, shape index: {}]   ;;  %s8360_s2 = inlined_call_operand.hbm [shape: f32[1,256], index: 2, kind: input, shape index: {}]   ;;  %s8361_s3 = inlined_call_operand.hbm [shape: bf16[256,512], index: 3, kind: input, shape index: {}]   ;;  %s8362_s4 = inlined_call_operand.hbm [shape: f32[1,512], index: 4, kind: input, shape index: {}]   ;;  %s8363_s5 = inlined_call_operand.hbm [shape: bf16[512,1024], index: 5, kind: input, shape index: {}]   ;;  %s8364_s6 = inlined_call_operand.hbm [shape: f32[1,1024], index: 6, kind: input, shape index: {}]   ;;  %s8365_s7 = inlined_call_operand.hbm [shape: bf16[1024,896], index: 7, kind: input, shape index: {}]   ;;  %s8366_s8 = inlined_call_operand.hbm [shape: f32[1,896], index: 8, kind: input, shape index: {}]   ;;  %s8367_s9 = inlined_call_operand.vmem [shape: f32[8,784], index: 9, kind: output, shape index: {}]  }
   0x1   :  { %15 = vsyncpa [#allocation5], 0 }
   0x2   :  { %16 = vsyncpa [#allocation8], 0 }
   0x3   :  { %17 = vsyncpa [#allocation11], 0 }
   0x4   :  { %18 = vsyncpa [#allocation14], 0  ;;  %s8070_s30 = smov [#allocation4]   ;;  %s8071_s11 = smov [#allocation7]  }
   0x5   :  { %s39_s10 = sshll.u32 %s8070_s30, 4  ;;  %s61_s12 = sshll.u32 %s8071_s11, 4  ;;  %s40_s10 = int_to_ptr.vmem [resolvable:$true] %s39_s10  ;;  %s62_s12 = int_to_ptr.vmem [resolvable:$true] %s61_s12 }
   0x6   :  { %s7908_s13 = scalar_lea.vmem %s40_s10, 32  ;;  %p7913_p1 = scmp.lt.s32.totalorder %s40_s10, %s40_s10 }
   0x7   :  { %p7909_p0 = scmp.ne.s32.totalorder %s40_s10, %s7908_s13  ;;  %p7914_p2 = scmp.lt.s32.totalorder %s7908_s13, %s7908_s13 }
   0x9   :  { %p7915_p3 = por %p7914_p2, %p7913_p1 }
   0xb   :  { %p7916_p4 = pnand %p7915_p3, %p7909_p0 }
   0xd   :  { %7919 = shalt.err (!%p7916_p4)
}
   0xe   :  { %42 = dma.hbm_to_vmem [thread:$0]  %s8360_s2, 32, %s40_s10, [#allocation5]  }
   0xf   :  { %s7928_s16 = scalar_lea.vmem %s62_s12, 64  ;;  %p7933_p6 = scmp.lt.s32.totalorder %s62_s12, %s62_s12 }
  0x10   :  { %p7929_p5 = scmp.ne.s32.totalorder %s62_s12, %s7928_s16  ;;  %p7934_p7 = scmp.lt.s32.totalorder %s7928_s16, %s7928_s16 }
  0x12   :  { %p7935_p8 = por %p7934_p7, %p7933_p6 }
  0x14   :  { %p7936_p9 = pnand %p7935_p8, %p7929_p5 }
  0x16   :  { %7939 = shalt.err (!%p7936_p9)
}
  0x17   :  { %64 = dma.hbm_to_vmem [thread:$0]  %s8362_s4, 64, %s62_s12, [#allocation8]  }
  0x18   :  { %s8072_s19 = smov [#allocation10]   ;;  %s8073_s21 = smov [#allocation2]  }
  0x19   :  { %s83_s20 = sshll.u32 %s8072_s19, 4  ;;  %s26_s22 = sshll.u32 %s8073_s21, 4  ;;  %s84_s20 = int_to_ptr.vmem [resolvable:$true] %s83_s20  ;;  %s27_s22 = int_to_ptr.vmem [resolvable:$true] %s26_s22 }
  0x1a   :  { %s7948_s23 = scalar_lea.vmem %s84_s20, 128  ;;  %p7953_p11 = scmp.lt.s32.totalorder %s84_s20, %s84_s20 }
  0x1b   :  { %p7949_p10 = scmp.ne.s32.totalorder %s84_s20, %s7948_s23  ;;  %p7954_p12 = scmp.lt.s32.totalorder %s7948_s23, %s7948_s23 }
  0x1d   :  { %p7955_p13 = por %p7954_p12, %p7953_p11 }
  0x1f   :  { %p7956_p0 = pnand %p7955_p13, %p7949_p10 }
  0x21   :  { %7959 = shalt.err (!%p7956_p0)
}
  0x22   :  { %86 = dma.hbm_to_vmem [thread:$0]  %s8364_s6, 128, %s84_s20, [#allocation11]  }
  0x23   :  { %s7968_s25 = scalar_lea.vmem %s27_s22, 2048  ;;  %p7973_p2 = scmp.lt.s32.totalorder %s27_s22, %s27_s22 }
  0x24   :  { %p7969_p1 = scmp.ne.s32.totalorder %s27_s22, %s7968_s25  ;;  %p7974_p3 = scmp.lt.s32.totalorder %s7968_s25, %s7968_s25 }
  0x26   :  { %p7975_p4 = por %p7974_p3, %p7973_p2 }
  0x28   :  { %p7976_p5 = pnand %p7975_p4, %p7969_p1 }
  0x2a   :  { %7979 = shalt.err (!%p7976_p5)
}
  0x2b   :  { %s8074_s4 = smov 128   ;;  %s8075_s26 = smov 8  }
  0x2c   :  { %32 = dma.hbm_to_vmem [thread:$0]  %s8359_s1, 2048, %s27_s22, [#allocation3], %s8074_s4, %s8074_s4, %s8075_s26  }
  0x2d   :  { %s8076_s29 = smov [#allocation6]  }
  0x2e   :  { %s48_s30 = sshll.u32 %s8076_s29, 4  ;;  %s49_s30 = int_to_ptr.vmem [resolvable:$true] %s48_s30 }
  0x2f   :  { %s7988_s10 = scalar_lea.vmem %s49_s30, 8192  ;;  %p7993_p7 = scmp.lt.s32.totalorder %s49_s30, %s49_s30 }
  0x30   :  { %p7989_p6 = scmp.ne.s32.totalorder %s49_s30, %s7988_s10  ;;  %p7994_p8 = scmp.lt.s32.totalorder %s7988_s10, %s7988_s10 }
  0x32   :  { %p7995_p9 = por %p7994_p8, %p7993_p7 }
  0x34   :  { %p7996_p10 = pnand %p7995_p9, %p7989_p6 }
  0x36   :  { %7999 = shalt.err (!%p7996_p10)
}
  0x37   :  { %s8077_s6 = smov 256   ;;  %s8078_s11 = smov 16  }
  0x38   :  { %54 = dma.hbm_to_vmem [thread:$0]  %s8361_s3, 8192, %s49_s30, [#allocation5], %s8077_s6, %s8077_s6, %s8078_s11  }
  0x39   :  { %s8079_s14 = smov [#allocation9]  }
  0x3a   :  { %s70_s15 = sshll.u32 %s8079_s14, 4  ;;  %s71_s15 = int_to_ptr.vmem [resolvable:$true] %s70_s15 }
  0x3b   :  { %s8008_s1 = scalar_lea.vmem %s71_s15, 32768  ;;  %p8013_p12 = scmp.lt.s32.totalorder %s71_s15, %s71_s15 }
  0x3c   :  { %p8009_p11 = scmp.ne.s32.totalorder %s71_s15, %s8008_s1  ;;  %p8014_p13 = scmp.lt.s32.totalorder %s8008_s1, %s8008_s1 }
  0x3e   :  { %p8015_p0 = por %p8014_p13, %p8013_p12 }
  0x40   :  { %p8016_p1 = pnand %p8015_p0, %p8009_p11 }
  0x42   :  { %8019 = shalt.err (!%p8016_p1)
}
  0x43   :  { %s8080_s16 = smov 512   ;;  %s8081_s17 = smov 32  }
  0x44   :  { %76 = dma.hbm_to_vmem [thread:$0]  %s8363_s5, 32768, %s71_s15, [#allocation8], %s8080_s16, %s8080_s16, %s8081_s17  }
  0x45   :  { %s8082_s20 = smov [#allocation12]  }
  0x46   :  { %s92_s21 = sshll.u32 %s8082_s20, 4  ;;  %s93_s21 = int_to_ptr.vmem [resolvable:$true] %s92_s21 }
  0x47   :  { %s8028_s3 = scalar_lea.vmem %s93_s21, 57344  ;;  %p8033_p3 = scmp.lt.s32.totalorder %s93_s21, %s93_s21 }
  0x48   :  { %p8029_p2 = scmp.ne.s32.totalorder %s93_s21, %s8028_s3  ;;  %p8034_p4 = scmp.lt.s32.totalorder %s8028_s3, %s8028_s3 }
  0x4a   :  { %p8035_p5 = por %p8034_p4, %p8033_p3 }
  0x4c   :  { %p8036_p6 = pnand %p8035_p5, %p8029_p2 }
  0x4e   :  { %8039 = shalt.err (!%p8036_p6)
}
  0x4f   :  { %s8083_s22 = smov 448   ;;  %s8084_s23 = smov 28  }
  0x50   :  { %98 = dma.hbm_to_vmem [thread:$0]  %s8365_s7, 57344, %s93_s21, [#allocation11], %s8083_s22, %s8083_s22, %s8084_s23  }
  0x51   :  { %s8085_s25 = smov [#allocation13]  }
  0x52   :  { %s105_s4 = sshll.u32 %s8085_s25, 4  ;;  %s106_s4 = int_to_ptr.vmem [resolvable:$true] %s105_s4 }
  0x53   :  { %s8048_s5 = scalar_lea.vmem %s106_s4, 112  ;;  %s8052_s26 = scalar_lea.vmem %s106_s4, 128 }
  0x54   :  { %p8049_p7 = scmp.ne.s32.totalorder %s106_s4, %s8048_s5  ;;  %p8053_p8 = scmp.lt.s32.totalorder %s106_s4, %s106_s4 }
  0x55   :  { %p8054_p9 = scmp.lt.s32.totalorder %s8052_s26, %s8048_s5 }
  0x57   :  { %p8055_p10 = por %p8054_p9, %p8053_p8 }
  0x59   :  { %p8056_p11 = pnand %p8055_p10, %p8049_p7 }
  0x5b   :  { %8059 = shalt.err (!%p8056_p11)
}
  0x5c   :  { %108 = dma.hbm_to_vmem [thread:$0]  %s8366_s8, 112, %s106_s4, [#allocation14]  }
  0x5d   :  { %8060 = dma.done.wait [#allocation3], 2048  }
  0x5e   :  { %8061 = vsyncadd [#allocation3], 4294965248 }
  0x5f   :  { %8062 = dma.done.wait [#allocation5], 8224  }
  0x60   :  { %8063 = vsyncadd [#allocation5], 4294959072 }
  0x61   :  { %8064 = dma.done.wait [#allocation8], 32832  }
  0x62   :  { %8065 = vsyncadd [#allocation8], 4294934464 }
  0x63   :  { %8066 = dma.done.wait [#allocation11], 57472  }
  0x64   :  { %8067 = vsyncadd [#allocation11], 4294909824 }
  0x65   :  { %8068 = dma.done.wait [#allocation14], 112  }
  0x66   :  { %8069 = vsyncadd [#allocation14], 4294967184  ;;  %v8086_v0 = vmov 0   ;;  %v7125_v1 = vld [vmem:[#allocation2 + $0x74] ss:$8 sps:$4 sm:$0xff]   ;;  %v134_v26 = vld [vmem:[%s8358_s0] sm:$0xff] }
  0x67   :  { %276 = vmatprep.mubr.bf16.mxu0 %v8086_v0  ;;  %v7127_v2 = vld [vmem:[#allocation2 + $0x70] ss:$8 sps:$4 sm:$0xff]   ;;  %244 = vmatprep.subr.bf16.mxu0 %v7125_v1  ;;  %v7128_v3 = vld [vmem:[#allocation2 + $0x64] ss:$8 sps:$4 sm:$0xff]   ;;  %v7130_v4 = vld [vmem:[#allocation2 + $0x60] ss:$8 sps:$4 sm:$0xff]   ;;  %v135_v30 = vpack.c.bf16 %v134_v26, %v134_v26 }
  0x68   :  { %245 = vmatpush1.bf16.msra.mxu0 %v7127_v2  ;;  %v7131_v5 = vld [vmem:[#allocation2 + $0x54] ss:$8 sps:$4 sm:$0xff]   ;;  %v7133_v6 = vld [vmem:[#allocation2 + $0x50] ss:$8 sps:$4 sm:$0xff]   ;;  %v7134_v7 = vld [vmem:[#allocation2 + $0x44] ss:$8 sps:$4 sm:$0xff]  }
  0x69   :  { %246 = vmatprep.subr.bf16.mxu0 %v7128_v3  ;;  %v7136_v8 = vld [vmem:[#allocation2 + $0x40] ss:$8 sps:$4 sm:$0xff]   ;;  %v7137_v10 = vld [vmem:[#allocation2 + $0x34] ss:$8 sps:$4 sm:$0xff]   ;;  %v7139_v13 = vld [vmem:[#allocation2 + $0x30] ss:$8 sps:$4 sm:$0xff]  }
  0x6a   :  { %v7149_v9 = vld [vmem:[#allocation6 + $0xe4] ss:$16 sps:$4 sm:$0xff]   ;;  %v7154_v11 = vld [vmem:[#allocation6 + $0xe0] ss:$16 sps:$4 sm:$0xff]   ;;  %v7153_v27 = vld [vmem:[#allocation6 + $0xec] ss:$16 sps:$4 sm:$0xff]  }
  0x6b   :  { %695 = vmatprep.subr.bf16.mxu1 %v7149_v9  ;;  %v7155_v12 = vld [vmem:[#allocation6 + $0xc4] ss:$16 sps:$4 sm:$0xff]   ;;  %v7160_v15 = vld [vmem:[#allocation6 + $0xc0] ss:$16 sps:$4 sm:$0xff]   ;;  %v7151_v31 = vld [vmem:[#allocation6 + $0xe8] ss:$16 sps:$4 sm:$0xff]  }
  0x6c   :  { %247 = vmatpush1.bf16.msra.mxu0 %v7130_v4  ;;  %v7140_v14 = vld [vmem:[#allocation2 + $0x24] ss:$8 sps:$4 sm:$0xff]   ;;  %696 = vmatpush1.bf16.msra.mxu1 %v7154_v11  ;;  %v7142_v17 = vld [vmem:[#allocation2 + $0x20] ss:$8 sps:$4 sm:$0xff]   ;;  %v7143_v18 = vld [vmem:[#allocation2 + $0x14] ss:$8 sps:$4 sm:$0xff]  }
  0x6d   :  { %248 = vmatprep.subr.bf16.mxu0 %v7131_v5  ;;  %697 = vmatprep.subr.bf16.mxu1 %v7155_v12  ;;  %v7161_v16 = vld [vmem:[#allocation6 + $0xa4] ss:$16 sps:$4 sm:$0xff]   ;;  %v7166_v19 = vld [vmem:[#allocation6 + $0xa0] ss:$16 sps:$4 sm:$0xff]   ;;  %v7159_v32 = vld [vmem:[#allocation6 + $0xcc] ss:$16 sps:$4 sm:$0xff]  }
  0x6e   :  { %v7167_v20 = vld [vmem:[#allocation6 + $0x84] ss:$16 sps:$4 sm:$0xff]   ;;  %v7172_v23 = vld [vmem:[#allocation6 + $0x80] ss:$16 sps:$4 sm:$0xff]   ;;  %v7157_v35 = vld [vmem:[#allocation6 + $0xc8] ss:$16 sps:$4 sm:$0xff]  }
  0x6f   :  { %v7145_v21 = vld [vmem:[#allocation2 + $0x10] ss:$8 sps:$4 sm:$0xff]   ;;  %v7146_v22 = vld [vmem:[#allocation2 + $0x4] ss:$8 sps:$4 sm:$0xff]   ;;  %v7148_v25 = vld [vmem:[#allocation2] ss:$8 sps:$4 sm:$0xff]  }
  0x70   :  { %249 = vmatpush1.bf16.msra.mxu0 %v7133_v6  ;;  %698 = vmatpush1.bf16.msra.mxu1 %v7160_v15  ;;  %v7173_v24 = vld [vmem:[#allocation6 + $0x64] ss:$16 sps:$4 sm:$0xff]   ;;  %v7178_v28 = vld [vmem:[#allocation6 + $0x60] ss:$16 sps:$4 sm:$0xff]   ;;  %v7165_v36 = vld [vmem:[#allocation6 + $0xac] ss:$16 sps:$4 sm:$0xff]  }
  0x71   :  { %250 = vmatprep.subr.bf16.mxu0 %v7134_v7  ;;  %699 = vmatprep.subr.bf16.mxu1 %v7161_v16  ;;  %v7179_v29 = vld [vmem:[#allocation6 + $0x44] ss:$16 sps:$4 sm:$0xff]   ;;  %v7184_v33 = vld [vmem:[#allocation6 + $0x40] ss:$16 sps:$4 sm:$0xff]   ;;  %v7163_v39 = vld [vmem:[#allocation6 + $0xa8] ss:$16 sps:$4 sm:$0xff]  }
  0x72   :  { %v7185_v34 = vld [vmem:[#allocation6 + $0x24] ss:$16 sps:$4 sm:$0xff]   ;;  %v7190_v37 = vld [vmem:[#allocation6 + $0x20] ss:$16 sps:$4 sm:$0xff]   ;;  %v7171_v40 = vld [vmem:[#allocation6 + $0x8c] ss:$16 sps:$4 sm:$0xff]  }
  0x73   :  { %v7191_v38 = vld [vmem:[#allocation6 + $0x4] ss:$16 sps:$4 sm:$0xff]   ;;  %v7196_v41 = vld [vmem:[#allocation6] ss:$16 sps:$4 sm:$0xff]   ;;  %v7169_v43 = vld [vmem:[#allocation6 + $0x88] ss:$16 sps:$4 sm:$0xff]  }
  0x74   :  { %251 = vmatpush1.bf16.msra.mxu0 %v7136_v8  ;;  %700 = vmatpush1.bf16.msra.mxu1 %v7166_v19  ;;  %v7197_v42 = vld [vmem:[#allocation6 + $0x1e4] ss:$16 sps:$4 sm:$0xff]   ;;  %v7177_v44 = vld [vmem:[#allocation6 + $0x6c] ss:$16 sps:$4 sm:$0xff]   ;;  %v7202_v45 = vld [vmem:[#allocation6 + $0x1e0] ss:$16 sps:$4 sm:$0xff]  }
  0x75   :  { %252 = vmatprep.subr.bf16.mxu0 %v7137_v10  ;;  %701 = vmatprep.subr.bf16.mxu1 %v7167_v20  ;;  %v7203_v46 = vld [vmem:[#allocation6 + $0x1c4] ss:$16 sps:$4 sm:$0xff]   ;;  %v7175_v47 = vld [vmem:[#allocation6 + $0x68] ss:$16 sps:$4 sm:$0xff]   ;;  %v7208_v48 = vld [vmem:[#allocation6 + $0x1c0] ss:$16 sps:$4 sm:$0xff]  }
  0x76   :  { %v7183_v49 = vld [vmem:[#allocation6 + $0x4c] ss:$16 sps:$4 sm:$0xff]   ;;  %v7209_v50 = vld [vmem:[#allocation6 + $0x1a4] ss:$16 sps:$4 sm:$0xff]   ;;  %v7181_v51 = vld [vmem:[#allocation6 + $0x48] ss:$16 sps:$4 sm:$0xff]  }
  0x77   :  { %v7214_v52 = vld [vmem:[#allocation6 + $0x1a0] ss:$16 sps:$4 sm:$0xff]   ;;  %v7189_v53 = vld [vmem:[#allocation6 + $0x2c] ss:$16 sps:$4 sm:$0xff]   ;;  %v7215_v54 = vld [vmem:[#allocation6 + $0x184] ss:$16 sps:$4 sm:$0xff]  }
  0x78   :  { %253 = vmatpush1.bf16.msra.mxu0 %v7139_v13  ;;  %702 = vmatpush1.bf16.msra.mxu1 %v7172_v23  ;;  %v7187_v55 = vld [vmem:[#allocation6 + $0x28] ss:$16 sps:$4 sm:$0xff]   ;;  %v7220_v56 = vld [vmem:[#allocation6 + $0x180] ss:$16 sps:$4 sm:$0xff]   ;;  %v7195_v57 = vld [vmem:[#allocation6 + $0xc] ss:$16 sps:$4 sm:$0xff]  }
  0x79   :  { %254 = vmatprep.subr.bf16.mxu0 %v7140_v14  ;;  %703 = vmatprep.subr.bf16.mxu1 %v7173_v24  ;;  %v7221_v58 = vld [vmem:[#allocation6 + $0x164] ss:$16 sps:$4 sm:$0xff]   ;;  %v7193_v59 = vld [vmem:[#allocation6 + $0x8] ss:$16 sps:$4 sm:$0xff]   ;;  %v7226_v60 = vld [vmem:[#allocation6 + $0x160] ss:$16 sps:$4 sm:$0xff]  }
  0x7a   :  { %v7201_v61 = vld [vmem:[#allocation6 + $0x1ec] ss:$16 sps:$4 sm:$0xff]   ;;  %v7227_v62 = vld [vmem:[#allocation6 + $0x144] ss:$16 sps:$4 sm:$0xff]   ;;  %v7199_v63 = vld [vmem:[#allocation6 + $0x1e8] ss:$16 sps:$4 sm:$0xff]  }
  0x7b   :  { %v7232_v0 = vld [vmem:[#allocation6 + $0x140] ss:$16 sps:$4 sm:$0xff]   ;;  %v7207_v1 = vld [vmem:[#allocation6 + $0x1cc] ss:$16 sps:$4 sm:$0xff]   ;;  %v7205_v2 = vld [vmem:[#allocation6 + $0x1c8] ss:$16 sps:$4 sm:$0xff]  }
  0x7c   :  { %255 = vmatpush1.bf16.msra.mxu0 %v7142_v17  ;;  %704 = vmatpush1.bf16.msra.mxu1 %v7178_v28  ;;  %v7213_v3 = vld [vmem:[#allocation6 + $0x1ac] ss:$16 sps:$4 sm:$0xff]   ;;  %v7211_v4 = vld [vmem:[#allocation6 + $0x1a8] ss:$16 sps:$4 sm:$0xff]   ;;  %v7233_v11 = vld [vmem:[#allocation6 + $0x124] ss:$16 sps:$4 sm:$0xff]  }
  0x7d   :  { %256 = vmatprep.subr.bf16.mxu0 %v7143_v18  ;;  %705 = vmatprep.subr.bf16.mxu1 %v7179_v29  ;;  %v7219_v5 = vld [vmem:[#allocation6 + $0x18c] ss:$16 sps:$4 sm:$0xff]   ;;  %v7217_v6 = vld [vmem:[#allocation6 + $0x188] ss:$16 sps:$4 sm:$0xff]   ;;  %v7238_v14 = vld [vmem:[#allocation6 + $0x120] ss:$16 sps:$4 sm:$0xff]  }
  0x7e   :  { %v7225_v7 = vld [vmem:[#allocation6 + $0x16c] ss:$16 sps:$4 sm:$0xff]   ;;  %v7223_v8 = vld [vmem:[#allocation6 + $0x168] ss:$16 sps:$4 sm:$0xff]   ;;  %v7239_v15 = vld [vmem:[#allocation6 + $0x104] ss:$16 sps:$4 sm:$0xff]  }
  0x7f   :  { %v7231_v9 = vld [vmem:[#allocation6 + $0x14c] ss:$16 sps:$4 sm:$0xff]   ;;  %v7229_v10 = vld [vmem:[#allocation6 + $0x148] ss:$16 sps:$4 sm:$0xff]   ;;  %v7244_v18 = vld [vmem:[#allocation6 + $0x100] ss:$16 sps:$4 sm:$0xff]  }
  0x80   :  { %257 = vmatpush1.bf16.msra.mxu0 %v7145_v21  ;;  %706 = vmatpush1.bf16.msra.mxu1 %v7184_v33  ;;  %v7237_v12 = vld [vmem:[#allocation6 + $0x12c] ss:$16 sps:$4 sm:$0xff]   ;;  %v7235_v13 = vld [vmem:[#allocation6 + $0x128] ss:$16 sps:$4 sm:$0xff]   ;;  %vm6225_vm0 = vcmask 130048  }
  0x81   :  { %258 = vmatprep.subr.bf16.mxu0 %v7146_v22  ;;  %707 = vmatprep.subr.bf16.mxu1 %v7185_v34  ;;  %v7243_v16 = vld [vmem:[#allocation6 + $0x10c] ss:$16 sps:$4 sm:$0xff]   ;;  %v7241_v17 = vld [vmem:[#allocation6 + $0x108] ss:$16 sps:$4 sm:$0xff]  }
  0x82   :  { %v841_v19 = vld [vmem:[#allocation9 + $0x1c0] sm:$0xff]  ;;  %v152_v29 = vld [vmem:[#allocation4] sm:$0x3] }
  0x83   :  { %v845_v20 = vld [vmem:[#allocation9 + $0x1e0] sm:$0xff] }
  0x84   :  { %259 = vmatpush1.bf16.msra.mxu0 %v7148_v25  ;;  %708 = vmatpush1.bf16.msra.mxu1 %v7190_v37  ;;  %v969_v21 = vld [vmem:[#allocation9 + $0x5c0] sm:$0xff]  ;;  %v6372_v22 = vcombine.low %v841_v19, %v845_v20  ;;  %v6373_v23 = vcombine.high %v841_v19, %v845_v20 }
  0x85   :  { %736 = vmatprep.subr.bf16.mxu0 %v7153_v27  ;;  %709 = vmatprep.subr.bf16.mxu1 %v7191_v38  ;;  %v973_v24 = vld [vmem:[#allocation9 + $0x5e0] sm:$0xff]  ;;  %v154_v27 = vlaneseq }
  0x86   :  { %v6500_v25 = vcombine.low %v969_v21, %v973_v24  ;;  %v6501_v26 = vcombine.high %v969_v21, %v973_v24  ;;  %v797_v19 = vld [vmem:[#allocation9 + $0x60] sm:$0xff] }
  0x87   :  { %277 = vmatmul.mubr.bf16.vlgmr.msra.gmra.mxu0 %v135_v30  ;;  %v8164_v28 = vshrl.u32 %v154_v27, 7  ;;  %v921_v20 = vld [vmem:[#allocation9 + $0x440] sm:$0xff] }
  0x88   :  { %737 = vmatpush1.bf16.msra.mxu0 %v7151_v31  ;;  %710 = vmatpush1.bf16.msra.mxu1 %v7196_v41  ;;  %v961_v41 = vld [vmem:[#allocation9 + $0x580] sm:$0xff] }
  0x89   :  { %738 = vmatprep.subr.bf16.mxu0 %v7159_v32  ;;  %711 = vmatprep.subr.bf16.mxu1 %v7197_v42  ;;  %v8167_v30 = vsub.s32 0, %v8164_v28  ;;  %v8170_v31 = vsub.s32 1, %v8164_v28  ;;  %v925_v21 = vld [vmem:[#allocation9 + $0x460] sm:$0xff] }
  0x8a   :  { %v789_v27 = vld [vmem:[#allocation9 + $0x20] sm:$0xff] }
  0x8b   :  { %v157_v32 = vrot.slane %v152_v29, %v8167_v30  ;;  %v161_v33 = vrot.slane %v152_v29, %v8170_v31  ;;  %v913_v29 = vld [vmem:[#allocation9 + $0x400] sm:$0xff] }
  0x8c   :  { %739 = vmatpush1.bf16.msra.mxu0 %v7157_v35  ;;  %712 = vmatpush2.bf16.msra.mxu1 %v7202_v45 }
  0x8d   :  { %740 = vmatprep.subr.bf16.mxu0 %v7165_v36  ;;  %713 = vmatprep.subr.bf16.mxu1 %v7203_v46 }
  0x90   :  { %741 = vmatpush1.bf16.msra.mxu0 %v7163_v39  ;;  %714 = vmatpush2.bf16.msra.mxu1 %v7208_v48  ;;  %v833_v39 = vld [vmem:[#allocation9 + $0x180] sm:$0xff] }
  0x91   :  { %742 = vmatprep.subr.bf16.mxu0 %v7171_v40  ;;  %715 = vmatprep.subr.bf16.mxu1 %v7209_v50  ;;  %v837_v40 = vld [vmem:[#allocation9 + $0x1a0] sm:$0xff] }
  0x92   :  { %v829_v48 = vld [vmem:[#allocation9 + $0x160] sm:$0xff] }
  0x93   :  { %v957_v50 = vld [vmem:[#allocation9 + $0x560] sm:$0xff] }
  0x94   :  { %743 = vmatpush1.bf16.msra.mxu0 %v7169_v43  ;;  %716 = vmatpush2.bf16.msra.mxu1 %v7214_v52  ;;  %v6365_v52 = vcombine.high %v833_v39, %v837_v40 }
  0x95   :  { %744 = vmatprep.subr.bf16.mxu0 %v7177_v44  ;;  %717 = vmatprep.subr.bf16.mxu1 %v7215_v54  ;;  %v965_v44 = vld [vmem:[#allocation9 + $0x5a0] sm:$0xff]  ;;  %v6364_v54 = vcombine.low %v833_v39, %v837_v40 }
  0x96   :  { %v1033_v39 = vld [vmem:[#allocation9 + $0x7c0] sm:$0xff] }
  0x97   :  { %v1037_v40 = vld [vmem:[#allocation9 + $0x7e0] sm:$0xff] }
  0x98   :  { %745 = vmatpush1.bf16.msra.mxu0 %v7175_v47  ;;  %718 = vmatpush2.bf16.msra.mxu1 %v7220_v56  ;;  %v825_v47 = vld [vmem:[#allocation9 + $0x140] sm:$0xff] }
  0x99   :  { %746 = vmatprep.subr.bf16.mxu0 %v7183_v49  ;;  %719 = vmatprep.subr.bf16.mxu1 %v7221_v58  ;;  %v953_v49 = vld [vmem:[#allocation9 + $0x540] sm:$0xff] }
  0x9a   :  { %v817_v56 = vld [vmem:[#allocation9 + $0x100] sm:$0xff] }
  0x9b   :  { %v945_v58 = vld [vmem:[#allocation9 + $0x500] sm:$0xff] }
  0x9c   :  { %747 = vmatpush1.bf16.msra.mxu0 %v7181_v51  ;;  %720 = vmatpush2.bf16.msra.mxu1 %v7226_v60  ;;  %v6357_v60 = vcombine.high %v825_v47, %v829_v48 }
  0x9d   :  { %748 = vmatprep.subr.bf16.mxu0 %v7189_v53  ;;  %721 = vmatprep.subr.bf16.mxu1 %v7227_v62  ;;  %v6493_v53 = vcombine.high %v961_v41, %v965_v44  ;;  %v6356_v62 = vcombine.low %v825_v47, %v829_v48  ;;  %v1025_v47 = vld [vmem:[#allocation9 + $0x780] sm:$0xff] }
  0x9e   :  { %v1029_v48 = vld [vmem:[#allocation9 + $0x7a0] sm:$0xff] }
  0xa0   :  { %749 = vmatpush1.bf16.msra.mxu0 %v7187_v55  ;;  %722 = vmatpush2.bf16.msra.mxu1 %v7232_v0  ;;  %v6492_v55 = vcombine.low %v961_v41, %v965_v44  ;;  %v809_v0 = vld [vmem:[#allocation9 + $0xc0] sm:$0xff]  ;;  %v6565_v44 = vcombine.high %v1033_v39, %v1037_v40 }
  0xa1   :  { %750 = vmatprep.subr.bf16.mxu0 %v7195_v57  ;;  %723 = vmatprep.subr.bf16.mxu1 %v7233_v11  ;;  %v821_v57 = vld [vmem:[#allocation9 + $0x120] sm:$0xff] }
  0xa2   :  { %v805_v11 = vld [vmem:[#allocation9 + $0xa0] sm:$0xff] }
  0xa4   :  { %751 = vmatpush1.bf16.msra.mxu0 %v7193_v59  ;;  %724 = vmatpush2.bf16.msra.mxu1 %v7238_v14  ;;  %v949_v59 = vld [vmem:[#allocation9 + $0x520] sm:$0xff] }
  0xa5   :  { %752 = vmatprep.subr.bf16.mxu0 %v7201_v61  ;;  %725 = vmatprep.subr.bf16.mxu1 %v7239_v15  ;;  %v6485_v61 = vcombine.high %v953_v49, %v957_v50 }
  0xa8   :  { %753 = vmatpush2.bf16.msra.mxu0 %v7199_v63  ;;  %726 = vmatpush2.bf16.msra.mxu1 %v7244_v18  ;;  %v6484_v63 = vcombine.low %v953_v49, %v957_v50  ;;  %v793_v18 = vld [vmem:[#allocation9 + $0x40] sm:$0xff]  ;;  %v6564_v50 = vcombine.low %v1033_v39, %v1037_v40 }
  0xa9   :  { %754 = vmatprep.subr.bf16.mxu0 %v7207_v1  ;;  %2363 = vmatprep.subr.bf16.mxu1 %v6373_v23  ;;  %v813_v1 = vld [vmem:[#allocation9 + $0xe0] sm:$0xff]  ;;  %v6325_v24 = vcombine.high %v793_v18, %v797_v19 }
  0xaa   :  { %v6340_v14 = vcombine.low %v809_v0, %v813_v1 }
  0xac   :  { %755 = vmatpush2.bf16.msra.mxu0 %v7205_v2  ;;  %v937_v2 = vld [vmem:[#allocation9 + $0x4c0] sm:$0xff] }
  0xad   :  { %756 = vmatprep.subr.bf16.mxu0 %v7213_v3  ;;  %v941_v3 = vld [vmem:[#allocation9 + $0x4e0] sm:$0xff] }
  0xae   :  { %v6468_v15 = vcombine.low %v937_v2, %v941_v3 }
  0xb0   :  { %757 = vmatpush2.bf16.msra.mxu0 %v7211_v4  ;;  %v6349_v4 = vcombine.high %v817_v56, %v821_v57 }
  0xb1   :  { %758 = vmatprep.subr.bf16.mxu0 %v7219_v5  ;;  %v6477_v5 = vcombine.high %v945_v58, %v949_v59 }
  0xb4   :  { %759 = vmatpush2.bf16.msra.mxu0 %v7217_v6  ;;  %v6348_v6 = vcombine.low %v817_v56, %v821_v57  ;;  %v1021_v56 = vld [vmem:[#allocation9 + $0x760] sm:$0xff] }
  0xb5   :  { %760 = vmatprep.subr.bf16.mxu0 %v7225_v7  ;;  %v6476_v7 = vcombine.low %v945_v58, %v949_v59  ;;  %v6556_v58 = vcombine.low %v1025_v47, %v1029_v48 }
  0xb8   :  { %761 = vmatpush2.bf16.msra.mxu0 %v7223_v8  ;;  %v6341_v8 = vcombine.high %v809_v0, %v813_v1  ;;  %v1013_v0 = vld [vmem:[#allocation9 + $0x720] sm:$0xff] }
  0xb9   :  { %762 = vmatprep.subr.bf16.mxu0 %v7231_v9  ;;  %v6469_v9 = vcombine.high %v937_v2, %v941_v3 }
  0xbc   :  { %763 = vmatpush2.bf16.msra.mxu0 %v7229_v10  ;;  %v801_v10 = vld [vmem:[#allocation9 + $0x80] sm:$0xff] }
  0xbd   :  { %764 = vmatprep.subr.bf16.mxu0 %v7237_v12  ;;  %v929_v12 = vld [vmem:[#allocation9 + $0x480] sm:$0xff] }
  0xc0   :  { %765 = vmatpush2.bf16.msra.mxu0 %v7235_v13  ;;  %v933_v13 = vld [vmem:[#allocation9 + $0x4a0] sm:$0xff] }
  0xc1   :  { %766 = vmatprep.subr.bf16.mxu0 %v7243_v16  ;;  %v6333_v16 = vcombine.high %v801_v10, %v805_v11  ;;  %v6460_v23 = vcombine.low %v929_v12, %v933_v13 }
  0xc4   :  { %767 = vmatpush2.bf16.msra.mxu0 %v7241_v17  ;;  %v6461_v17 = vcombine.high %v929_v12, %v933_v13  ;;  %v865_v13 = vld [vmem:[#allocation9 + $0x280] sm:$0xff] }
  0xc5   :  { %2404 = vmatprep.subr.bf16.mxu0 %v6501_v26  ;;  %v785_v26 = vld [vmem:[#allocation9] sm:$0xff] }
  0xc6   :  { %v6316_v41 = vcombine.low %v785_v26, %v789_v27 }
 0x147   :  { %v278_v34 = vpop.f32.mrf.mxu0 }
 0x148   :  { %v279_v35 = vadd.f32 %v278_v34, %v157_v32  ;;  %v917_v32 = vld [vmem:[#allocation9 + $0x420] sm:$0xff]  ;;  %v6452_v34 = vcombine.low %v921_v20, %v925_v21 }
 0x149   :  { %v280_v36 = vpop.f32.mrf.mxu0 }
 0x14a   :  { %v285_v37 = vmax.f32 %v279_v35, 0.0  ;;  %v281_v38 = vadd.f32 %v280_v36, %v161_v33  ;;  %v6324_v33 = vcombine.low %v793_v18, %v797_v19  ;;  %v6317_v35 = vcombine.high %v785_v26, %v789_v27  ;;  %v989_v27 = vld [vmem:[#allocation9 + $0x660] sm:$0xff] }
 0x14b   :  { %v282_v42 = vpop.f32.mrf.mxu0  ;;  %v6445_v36 = vcombine.high %v913_v29, %v917_v32 }
 0x14c   :  { %v286_v43 = vmax.f32 %v281_v38, 0.0  ;;  %v287_v51 = vpack.c.bf16 %v285_v37, %v285_v37  ;;  %v905_v37 = vld [vmem:[#allocation9 + $0x3c0] sm:$0xff]  ;;  %v6444_v42 = vcombine.low %v913_v29, %v917_v32 }
 0x14d   :  { %v283_v45 = vpop.f32.mrf.mxu0  ;;  %v909_v38 = vld [vmem:[#allocation9 + $0x3e0] sm:$0xff] }
 0x14e   :  { %v288_v46 = vpack.c.bf16 %v286_v43, %v286_v43  ;;  %v6437_v43 = vcombine.high %v905_v37, %v909_v38  ;;  %v897_v45 = vld [vmem:[#allocation9 + $0x380] sm:$0xff]  ;;  %v6436_v49 = vcombine.low %v905_v37, %v909_v38 }
 0x14f   :  { %v981_v38 = vld [vmem:[#allocation9 + $0x620] sm:$0xff] }
 0x150   :  { %727 = vmatprep.mubr.bf16.mxu1 %v288_v46  ;;  %768 = vmatprep.mubr.bf16.mxu0 %v288_v46  ;;  %v901_v46 = vld [vmem:[#allocation9 + $0x3a0] sm:$0xff] }
 0x151   :  { %728 = vmatmul.mubr.bf16.vlgmr.msra.gmra.mxu1 %v287_v51  ;;  %769 = vmatmul.mubr.bf16.vlgmr.msra.gmra.mxu0 %v287_v51  ;;  %v6429_v51 = vcombine.high %v897_v45, %v901_v46  ;;  %v6428_v57 = vcombine.low %v897_v45, %v901_v46  ;;  %v974_v46 = vld [vmem:[#allocation9 + $0x5e8] sm:$0xff] }
 0x152   :  { %2364 = vmatpush1.bf16.msra.mxu1 %v6372_v22  ;;  %2405 = vmatpush1.bf16.msra.mxu0 %v6500_v25  ;;  %v6332_v22 = vcombine.low %v801_v10, %v805_v11  ;;  %v6453_v25 = vcombine.high %v921_v20, %v925_v21 }
 0x153   :  { %2365 = vmatprep.subr.bf16.mxu1 %v6365_v52  ;;  %2406 = vmatprep.subr.bf16.mxu0 %v6493_v53  ;;  %v6557_v52 = vcombine.high %v1025_v47, %v1029_v48  ;;  %v889_v53 = vld [vmem:[#allocation9 + $0x340] sm:$0xff] }
 0x156   :  { %2366 = vmatpush1.bf16.msra.mxu1 %v6364_v54  ;;  %2407 = vmatpush1.bf16.msra.mxu0 %v6492_v55  ;;  %v893_v54 = vld [vmem:[#allocation9 + $0x360] sm:$0xff] }
 0x157   :  { %2367 = vmatprep.subr.bf16.mxu1 %v6357_v60  ;;  %2408 = vmatprep.subr.bf16.mxu0 %v6485_v61  ;;  %v1017_v55 = vld [vmem:[#allocation9 + $0x740] sm:$0xff]  ;;  %v6421_v59 = vcombine.high %v889_v53, %v893_v54  ;;  %v6420_v1 = vcombine.low %v889_v53, %v893_v54 }
 0x158   :  { %v6549_v60 = vcombine.high %v1017_v55, %v1021_v56  ;;  %v881_v61 = vld [vmem:[#allocation9 + $0x300] sm:$0xff]  ;;  %v6548_v2 = vcombine.low %v1017_v55, %v1021_v56 }
 0x15a   :  { %2368 = vmatpush1.bf16.msra.mxu1 %v6356_v62  ;;  %2409 = vmatpush1.bf16.msra.mxu0 %v6484_v63  ;;  %v885_v62 = vld [vmem:[#allocation9 + $0x320] sm:$0xff] }
 0x15b   :  { %2369 = vmatprep.subr.bf16.mxu1 %v6349_v4  ;;  %2410 = vmatprep.subr.bf16.mxu0 %v6477_v5  ;;  %v1009_v63 = vld [vmem:[#allocation9 + $0x700] sm:$0xff]  ;;  %v6413_v3 = vcombine.high %v881_v61, %v885_v62 }
 0x15c   :  { %v6541_v4 = vcombine.high %v1009_v63, %v1013_v0  ;;  %v873_v5 = vld [vmem:[#allocation9 + $0x2c0] sm:$0xff]  ;;  %v6540_v10 = vcombine.low %v1009_v63, %v1013_v0 }
 0x15e   :  { %2370 = vmatpush1.bf16.msra.mxu1 %v6348_v6  ;;  %2411 = vmatpush1.bf16.msra.mxu0 %v6476_v7  ;;  %v877_v6 = vld [vmem:[#allocation9 + $0x2e0] sm:$0xff] }
 0x15f   :  { %2371 = vmatprep.subr.bf16.mxu1 %v6341_v8  ;;  %2412 = vmatprep.subr.bf16.mxu0 %v6469_v9  ;;  %v1001_v7 = vld [vmem:[#allocation9 + $0x6c0] sm:$0xff]  ;;  %v6412_v9 = vcombine.low %v881_v61, %v885_v62  ;;  %v6405_v11 = vcombine.high %v873_v5, %v877_v6 }
 0x160   :  { %v1005_v8 = vld [vmem:[#allocation9 + $0x6e0] sm:$0xff] }
 0x161   :  { %v6533_v12 = vcombine.high %v1001_v7, %v1005_v8  ;;  %v6532_v18 = vcombine.low %v1001_v7, %v1005_v8  ;;  %v834_v7 = vld [vmem:[#allocation9 + $0x188] sm:$0xff] }
 0x162   :  { %2372 = vmatpush1.bf16.msra.mxu1 %v6340_v14  ;;  %2413 = vmatpush1.bf16.msra.mxu0 %v6468_v15  ;;  %v869_v14 = vld [vmem:[#allocation9 + $0x2a0] sm:$0xff] }
 0x163   :  { %2373 = vmatprep.subr.bf16.mxu1 %v6333_v16  ;;  %2414 = vmatprep.subr.bf16.mxu0 %v6461_v17  ;;  %v993_v15 = vld [vmem:[#allocation9 + $0x680] sm:$0xff]  ;;  %v6404_v17 = vcombine.low %v873_v5, %v877_v6  ;;  %v6397_v19 = vcombine.high %v865_v13, %v869_v14  ;;  %v6396_v21 = vcombine.low %v865_v13, %v869_v14 }
 0x164   :  { %v997_v16 = vld [vmem:[#allocation9 + $0x6a0] sm:$0xff] }
 0x165   :  { %v6525_v20 = vcombine.high %v993_v15, %v997_v16 }
 0x166   :  { %2374 = vmatpush1.bf16.msra.mxu1 %v6332_v22  ;;  %2415 = vmatpush1.bf16.msra.mxu0 %v6460_v23  ;;  %v6524_v22 = vcombine.low %v993_v15, %v997_v16  ;;  %v857_v23 = vld [vmem:[#allocation9 + $0x240] sm:$0xff] }
 0x167   :  { %2375 = vmatprep.subr.bf16.mxu1 %v6325_v24  ;;  %2416 = vmatprep.subr.bf16.mxu0 %v6453_v25  ;;  %v861_v24 = vld [vmem:[#allocation9 + $0x260] sm:$0xff] }
 0x168   :  { %v985_v25 = vld [vmem:[#allocation9 + $0x640] sm:$0xff]  ;;  %v6389_v26 = vcombine.high %v857_v23, %v861_v24  ;;  %v6388_v29 = vcombine.low %v857_v23, %v861_v24 }
 0x169   :  { %v6516_v32 = vcombine.low %v985_v25, %v989_v27 }
 0x16a   :  { %2376 = vmatpush1.bf16.msra.mxu1 %v6324_v33  ;;  %2417 = vmatpush1.bf16.msra.mxu0 %v6452_v34  ;;  %v6517_v33 = vcombine.high %v985_v25, %v989_v27  ;;  %v849_v34 = vld [vmem:[#allocation9 + $0x200] sm:$0xff]  ;;  %v818_v27 = vld [vmem:[#allocation9 + $0x108] sm:$0xff] }
 0x16b   :  { %2377 = vmatprep.subr.bf16.mxu1 %v6317_v35  ;;  %2418 = vmatprep.subr.bf16.mxu0 %v6445_v36  ;;  %v853_v35 = vld [vmem:[#allocation9 + $0x220] sm:$0xff] }
 0x16c   :  { %v977_v36 = vld [vmem:[#allocation9 + $0x600] sm:$0xff]  ;;  %v6381_v37 = vcombine.high %v849_v34, %v853_v35  ;;  %v6380_v39 = vcombine.low %v849_v34, %v853_v35 }
 0x16d   :  { %v6508_v40 = vcombine.low %v977_v36, %v981_v38 }
 0x16e   :  { %2378 = vmatpush1.bf16.msra.mxu1 %v6316_v41  ;;  %2419 = vmatpush1.bf16.msra.mxu0 %v6444_v42  ;;  %v6509_v41 = vcombine.high %v977_v36, %v981_v38  ;;  %v842_v42 = vld [vmem:[#allocation9 + $0x1c8] sm:$0xff] }
 0x16f   :  { %2379 = vmatprep.subr.bf16.mxu1 %v6437_v43  ;;  %2420 = vmatprep.subr.bf16.mxu0 %v6565_v44  ;;  %v846_v43 = vld [vmem:[#allocation9 + $0x1e8] sm:$0xff] }
 0x170   :  { %v970_v44 = vld [vmem:[#allocation9 + $0x5c8] sm:$0xff]  ;;  %v6375_v45 = vcombine.high %v842_v42, %v846_v43  ;;  %v6374_v47 = vcombine.low %v842_v42, %v846_v43 }
 0x171   :  { %v6502_v48 = vcombine.low %v970_v44, %v974_v46  ;;  %v810_v38 = vld [vmem:[#allocation9 + $0xc8] sm:$0xff] }
 0x172   :  { %2380 = vmatpush2.bf16.msra.mxu1 %v6436_v49  ;;  %2421 = vmatpush2.bf16.msra.mxu0 %v6564_v50  ;;  %v6503_v49 = vcombine.high %v970_v44, %v974_v46  ;;  %v8175_v50 = vsub.s32 2, %v8164_v28  ;;  %v802_v46 = vld [vmem:[#allocation9 + $0x88] sm:$0xff] }
 0x173   :  { %2381 = vmatprep.subr.bf16.mxu1 %v6429_v51  ;;  %2422 = vmatprep.subr.bf16.mxu0 %v6557_v52  ;;  %v353_v51 = vld [vmem:[#allocation7] sm:$0xf]  ;;  %v8178_v52 = vsub.s32 3, %v8164_v28 }
 0x174   :  { %v358_v53 = vrot.slane %v353_v51, %v8167_v30  ;;  %v366_v54 = vrot.slane %v353_v51, %v8175_v50  ;;  %v362_v55 = vrot.slane %v353_v51, %v8170_v31 }
 0x175   :  { %v370_v56 = vrot.slane %v353_v51, %v8178_v52 }
 0x176   :  { %2382 = vmatpush2.bf16.msra.mxu1 %v6428_v57  ;;  %2423 = vmatpush2.bf16.msra.mxu0 %v6556_v58 }
 0x177   :  { %2383 = vmatprep.subr.bf16.mxu1 %v6421_v59  ;;  %2424 = vmatprep.subr.bf16.mxu0 %v6549_v60 }
 0x17a   :  { %2384 = vmatpush2.bf16.msra.mxu1 %v6420_v1  ;;  %2425 = vmatpush2.bf16.msra.mxu0 %v6548_v2 }
 0x17b   :  { %2385 = vmatprep.subr.bf16.mxu1 %v6413_v3  ;;  %2426 = vmatprep.subr.bf16.mxu0 %v6541_v4 }
 0x17e   :  { %2386 = vmatpush2.bf16.msra.mxu1 %v6412_v9  ;;  %2427 = vmatpush2.bf16.msra.mxu0 %v6540_v10  ;;  %v838_v10 = vld [vmem:[#allocation9 + $0x1a8] sm:$0xff] }
 0x17f   :  { %2387 = vmatprep.subr.bf16.mxu1 %v6405_v11  ;;  %2428 = vmatprep.subr.bf16.mxu0 %v6533_v12  ;;  %v962_v11 = vld [vmem:[#allocation9 + $0x588] sm:$0xff]  ;;  %v6366_v23 = vcombine.low %v834_v7, %v838_v10 }
 0x180   :  { %v966_v12 = vld [vmem:[#allocation9 + $0x5a8] sm:$0xff] }
 0x181   :  { %v6494_v24 = vcombine.low %v962_v11, %v966_v12 }
 0x182   :  { %2388 = vmatpush2.bf16.msra.mxu1 %v6404_v17  ;;  %2429 = vmatpush2.bf16.msra.mxu0 %v6532_v18  ;;  %v826_v17 = vld [vmem:[#allocation9 + $0x148] sm:$0xff]  ;;  %v6367_v18 = vcombine.high %v834_v7, %v838_v10 }
 0x183   :  { %2389 = vmatprep.subr.bf16.mxu1 %v6397_v19  ;;  %2430 = vmatprep.subr.bf16.mxu0 %v6525_v20  ;;  %v6495_v19 = vcombine.high %v962_v11, %v966_v12  ;;  %v830_v20 = vld [vmem:[#allocation9 + $0x168] sm:$0xff] }
 0x184   :  { %v6359_v25 = vcombine.high %v826_v17, %v830_v20  ;;  %v6358_v34 = vcombine.low %v826_v17, %v830_v20  ;;  %v1034_v10 = vld [vmem:[#allocation9 + $0x7c8] sm:$0xff] }
 0x185   :  { %v1038_v11 = vld [vmem:[#allocation9 + $0x7e8] sm:$0xff] }
 0x186   :  { %2390 = vmatpush2.bf16.msra.mxu1 %v6396_v21  ;;  %2431 = vmatpush2.bf16.msra.mxu0 %v6524_v22  ;;  %v954_v21 = vld [vmem:[#allocation9 + $0x548] sm:$0xff] }
 0x187   :  { %2391 = vmatprep.subr.bf16.mxu1 %v6389_v26  ;;  %2432 = vmatprep.subr.bf16.mxu0 %v6517_v33  ;;  %v958_v22 = vld [vmem:[#allocation9 + $0x568] sm:$0xff] }
 0x188   :  { %v6487_v26 = vcombine.high %v954_v21, %v958_v22  ;;  %v950_v33 = vld [vmem:[#allocation9 + $0x528] sm:$0xff]  ;;  %v6486_v35 = vcombine.low %v954_v21, %v958_v22 }
 0x189   :  { %v898_v20 = vld [vmem:[#allocation9 + $0x388] sm:$0xff] }
 0x18a   :  { %2392 = vmatpush2.bf16.msra.mxu1 %v6388_v29  ;;  %2433 = vmatpush2.bf16.msra.mxu0 %v6516_v32  ;;  %v822_v29 = vld [vmem:[#allocation9 + $0x128] sm:$0xff] }
 0x18b   :  { %2393 = vmatprep.subr.bf16.mxu1 %v6381_v37  ;;  %2434 = vmatprep.subr.bf16.mxu0 %v6509_v41  ;;  %v946_v32 = vld [vmem:[#allocation9 + $0x508] sm:$0xff]  ;;  %v6351_v36 = vcombine.high %v818_v27, %v822_v29  ;;  %v6350_v42 = vcombine.low %v818_v27, %v822_v29 }
 0x18c   :  { %v6479_v37 = vcombine.high %v946_v32, %v950_v33  ;;  %v942_v41 = vld [vmem:[#allocation9 + $0x4e8] sm:$0xff]  ;;  %v6478_v43 = vcombine.low %v946_v32, %v950_v33 }
 0x18d   :  { %v902_v21 = vld [vmem:[#allocation9 + $0x3a8] sm:$0xff] }
 0x18e   :  { %2394 = vmatpush2.bf16.msra.mxu1 %v6380_v39  ;;  %2435 = vmatpush2.bf16.msra.mxu0 %v6508_v40  ;;  %v814_v39 = vld [vmem:[#allocation9 + $0xe8] sm:$0xff] }
 0x18f   :  { %2445 = vmatprep.subr.bf16.mxu1 %v6375_v45  ;;  %2486 = vmatprep.subr.bf16.mxu0 %v6503_v49  ;;  %v938_v40 = vld [vmem:[#allocation9 + $0x4c8] sm:$0xff]  ;;  %v6343_v44 = vcombine.high %v810_v38, %v814_v39  ;;  %v6342_v51 = vcombine.low %v810_v38, %v814_v39 }
 0x190   :  { %v6471_v45 = vcombine.high %v938_v40, %v942_v41  ;;  %v934_v49 = vld [vmem:[#allocation9 + $0x4a8] sm:$0xff] }
 0x191   :  { %v1026_v22 = vld [vmem:[#allocation9 + $0x788] sm:$0xff] }
 0x192   :  { %v890_v29 = vld [vmem:[#allocation9 + $0x348] sm:$0xff] }
 0x193   :  { %v894_v32 = vld [vmem:[#allocation9 + $0x368] sm:$0xff] }
 0x194   :  { %v1018_v33 = vld [vmem:[#allocation9 + $0x748] sm:$0xff] }
 0x195   :  { %v882_v39 = vld [vmem:[#allocation9 + $0x308] sm:$0xff] }
 0x211   :  { %v729_v57 = vpop.f32.mrf.mxu1  ;;  %v770_v58 = vpop.f32.mrf.mxu0 }
 0x212   :  { %v730_v59 = vadd.f32 %v729_v57, %v358_v53  ;;  %v771_v60 = vadd.f32 %v770_v58, %v366_v54  ;;  %v6470_v53 = vcombine.low %v938_v40, %v942_v41  ;;  %v798_v57 = vld [vmem:[#allocation9 + $0x68] sm:$0xff] }
 0x213   :  { %v731_v61 = vpop.f32.mrf.mxu1  ;;  %v772_v62 = vpop.f32.mrf.mxu0  ;;  %v922_v58 = vld [vmem:[#allocation9 + $0x448] sm:$0xff] }
 0x214   :  { %v732_v63 = vadd.f32 %v731_v61, %v362_v55  ;;  %v773_v0 = vadd.f32 %v772_v62, %v370_v56  ;;  %v777_v1 = vmax.f32 %v730_v59, 0.0  ;;  %v779_v2 = vmax.f32 %v771_v60, 0.0  ;;  %v794_v56 = vld [vmem:[#allocation9 + $0x48] sm:$0xff] }
 0x215   :  { %v733_v3 = vpop.f32.mrf.mxu1  ;;  %v774_v4 = vpop.f32.mrf.mxu0  ;;  %v926_v59 = vld [vmem:[#allocation9 + $0x468] sm:$0xff]  ;;  %v6327_v62 = vcombine.high %v794_v56, %v798_v57 }
 0x216   :  { %v778_v5 = vmax.f32 %v732_v63, 0.0  ;;  %v780_v6 = vmax.f32 %v773_v0, 0.0  ;;  %v8188_v15 = vpack.c.bf16 %v777_v1, %v777_v1  ;;  %v8190_v16 = vpack.c.bf16 %v779_v2, %v779_v2  ;;  %v786_v0 = vld [vmem:[#allocation9 + $0x8] sm:$0xff] }
 0x217   :  { %v734_v8 = vpop.f32.mrf.mxu1  ;;  %v775_v9 = vpop.f32.mrf.mxu0  ;;  %v6455_v63 = vcombine.high %v922_v58, %v926_v59  ;;  %v790_v1 = vld [vmem:[#allocation9 + $0x28] sm:$0xff]  ;;  %v6326_v4 = vcombine.low %v794_v56, %v798_v57 }
 0x218   :  { %v8184_v13 = vpack.c.bf16 %v778_v5, %v778_v5  ;;  %v8186_v14 = vpack.c.bf16 %v780_v6, %v780_v6  ;;  %v914_v2 = vld [vmem:[#allocation9 + $0x408] sm:$0xff]  ;;  %v6454_v5 = vcombine.low %v922_v58, %v926_v59  ;;  %v6319_v6 = vcombine.high %v786_v0, %v790_v1 }
 0x219   :  { %v918_v3 = vld [vmem:[#allocation9 + $0x428] sm:$0xff]  ;;  %v6318_v12 = vcombine.low %v786_v0, %v790_v1 }
 0x21a   :  { %2395 = vmatprep.mubr.bf16.mxu1 %v8184_v13  ;;  %2436 = vmatprep.mubr.bf16.mxu0 %v8186_v14  ;;  %v6447_v7 = vcombine.high %v914_v2, %v918_v3  ;;  %v906_v8 = vld [vmem:[#allocation9 + $0x3c8] sm:$0xff]  ;;  %v6446_v17 = vcombine.low %v914_v2, %v918_v3 }
 0x21b   :  { %2396 = vmatmul.mubr.bf16.vlgmr.msra.gmra.mxu1 %v8188_v15  ;;  %2437 = vmatmul.mubr.bf16.vlgmr.msra.gmra.mxu0 %v8190_v16  ;;  %v910_v9 = vld [vmem:[#allocation9 + $0x3e8] sm:$0xff] }
 0x21c   :  { %2446 = vmatpush1.bf16.msra.mxu1 %v6374_v47  ;;  %2487 = vmatpush1.bf16.msra.mxu0 %v6502_v48  ;;  %v806_v47 = vld [vmem:[#allocation9 + $0xa8] sm:$0xff] }
 0x21d   :  { %2477 = vmatprep.mubr.bf16.mxu1 %v8184_v13  ;;  %2518 = vmatprep.mubr.bf16.mxu0 %v8186_v14  ;;  %v930_v48 = vld [vmem:[#allocation9 + $0x488] sm:$0xff]  ;;  %v6335_v54 = vcombine.high %v802_v46, %v806_v47  ;;  %v6334_v60 = vcombine.low %v802_v46, %v806_v47 }
 0x21e   :  { %2447 = vmatprep.subr.bf16.mxu1 %v6367_v18  ;;  %2488 = vmatprep.subr.bf16.mxu0 %v6495_v19  ;;  %v6463_v55 = vcombine.high %v930_v48, %v934_v49  ;;  %v6462_v61 = vcombine.low %v930_v48, %v934_v49  ;;  %v6439_v18 = vcombine.high %v906_v8, %v910_v9  ;;  %v886_v40 = vld [vmem:[#allocation9 + $0x328] sm:$0xff] }
 0x21f   :  { %v6567_v19 = vcombine.high %v1034_v10, %v1038_v11  ;;  %v1010_v41 = vld [vmem:[#allocation9 + $0x708] sm:$0xff] }
 0x220   :  { %2448 = vmatpush1.bf16.msra.mxu1 %v6366_v23  ;;  %2489 = vmatpush1.bf16.msra.mxu0 %v6494_v24  ;;  %v1030_v23 = vld [vmem:[#allocation9 + $0x7a8] sm:$0xff]  ;;  %v6438_v24 = vcombine.low %v906_v8, %v910_v9 }
 0x221   :  { %2449 = vmatprep.subr.bf16.mxu1 %v6359_v25  ;;  %2490 = vmatprep.subr.bf16.mxu0 %v6487_v26  ;;  %v6566_v25 = vcombine.low %v1034_v10, %v1038_v11  ;;  %v6431_v26 = vcombine.high %v898_v20, %v902_v21  ;;  %v6559_v27 = vcombine.high %v1026_v22, %v1030_v23  ;;  %v874_v47 = vld [vmem:[#allocation9 + $0x2c8] sm:$0xff] }
 0x222   :  { %v878_v48 = vld [vmem:[#allocation9 + $0x2e8] sm:$0xff] }
 0x223   :  { %v1002_v49 = vld [vmem:[#allocation9 + $0x6c8] sm:$0xff] }
 0x224   :  { %2450 = vmatpush1.bf16.msra.mxu1 %v6358_v34  ;;  %2491 = vmatpush1.bf16.msra.mxu0 %v6486_v35  ;;  %v1022_v34 = vld [vmem:[#allocation9 + $0x768] sm:$0xff]  ;;  %v6430_v35 = vcombine.low %v898_v20, %v902_v21  ;;  %v843_v21 = vld [vmem:[#allocation9 + $0x1d0] sm:$0xff] }
 0x225   :  { %2451 = vmatprep.subr.bf16.mxu1 %v6351_v36  ;;  %2492 = vmatprep.subr.bf16.mxu0 %v6479_v37  ;;  %v6558_v36 = vcombine.low %v1026_v22, %v1030_v23  ;;  %v6423_v37 = vcombine.high %v890_v29, %v894_v32  ;;  %v6551_v38 = vcombine.high %v1018_v33, %v1022_v34  ;;  %v866_v57 = vld [vmem:[#allocation9 + $0x288] sm:$0xff]  ;;  %v847_v22 = vld [vmem:[#allocation9 + $0x1f0] sm:$0xff] }
 0x226   :  { %v870_v58 = vld [vmem:[#allocation9 + $0x2a8] sm:$0xff]  ;;  %v971_v23 = vld [vmem:[#allocation9 + $0x5d0] sm:$0xff] }
 0x227   :  { %v994_v59 = vld [vmem:[#allocation9 + $0x688] sm:$0xff] }
 0x228   :  { %2452 = vmatpush1.bf16.msra.mxu1 %v6350_v42  ;;  %2493 = vmatpush1.bf16.msra.mxu0 %v6478_v43  ;;  %v1014_v42 = vld [vmem:[#allocation9 + $0x728] sm:$0xff]  ;;  %v6422_v43 = vcombine.low %v890_v29, %v894_v32  ;;  %v835_v32 = vld [vmem:[#allocation9 + $0x190] sm:$0xff] }
 0x229   :  { %2453 = vmatprep.subr.bf16.mxu1 %v6343_v44  ;;  %2494 = vmatprep.subr.bf16.mxu0 %v6471_v45  ;;  %v6550_v44 = vcombine.low %v1018_v33, %v1022_v34  ;;  %v6415_v45 = vcombine.high %v882_v39, %v886_v40  ;;  %v6543_v46 = vcombine.high %v1010_v41, %v1014_v42  ;;  %v858_v1 = vld [vmem:[#allocation9 + $0x248] sm:$0xff]  ;;  %v839_v33 = vld [vmem:[#allocation9 + $0x1b0] sm:$0xff] }
 0x22a   :  { %v862_v2 = vld [vmem:[#allocation9 + $0x268] sm:$0xff]  ;;  %v963_v34 = vld [vmem:[#allocation9 + $0x590] sm:$0xff] }
 0x22b   :  { %v986_v3 = vld [vmem:[#allocation9 + $0x648] sm:$0xff] }
 0x22c   :  { %2454 = vmatpush1.bf16.msra.mxu1 %v6342_v51  ;;  %2495 = vmatpush1.bf16.msra.mxu0 %v6470_v53  ;;  %v1006_v51 = vld [vmem:[#allocation9 + $0x6e8] sm:$0xff]  ;;  %v6414_v53 = vcombine.low %v882_v39, %v886_v40  ;;  %v827_v40 = vld [vmem:[#allocation9 + $0x150] sm:$0xff] }
 0x22d   :  { %2455 = vmatprep.subr.bf16.mxu1 %v6335_v54  ;;  %2496 = vmatprep.subr.bf16.mxu0 %v6463_v55  ;;  %v6542_v54 = vcombine.low %v1010_v41, %v1014_v42  ;;  %v6407_v55 = vcombine.high %v874_v47, %v878_v48  ;;  %v6535_v56 = vcombine.high %v1002_v49, %v1006_v51  ;;  %v850_v9 = vld [vmem:[#allocation9 + $0x208] sm:$0xff]  ;;  %v831_v41 = vld [vmem:[#allocation9 + $0x170] sm:$0xff] }
 0x22e   :  { %v854_v10 = vld [vmem:[#allocation9 + $0x228] sm:$0xff]  ;;  %v955_v42 = vld [vmem:[#allocation9 + $0x550] sm:$0xff] }
 0x22f   :  { %v978_v11 = vld [vmem:[#allocation9 + $0x608] sm:$0xff] }
 0x230   :  { %2456 = vmatpush1.bf16.msra.mxu1 %v6334_v60  ;;  %2497 = vmatpush1.bf16.msra.mxu0 %v6462_v61  ;;  %v998_v60 = vld [vmem:[#allocation9 + $0x6a8] sm:$0xff]  ;;  %v6406_v61 = vcombine.low %v874_v47, %v878_v48  ;;  %v819_v48 = vld [vmem:[#allocation9 + $0x110] sm:$0xff] }
 0x231   :  { %2457 = vmatprep.subr.bf16.mxu1 %v6327_v62  ;;  %2498 = vmatprep.subr.bf16.mxu0 %v6455_v63  ;;  %v6534_v62 = vcombine.low %v1002_v49, %v1006_v51  ;;  %v6399_v63 = vcombine.high %v866_v57, %v870_v58  ;;  %v6527_v0 = vcombine.high %v994_v59, %v998_v60  ;;  %v823_v49 = vld [vmem:[#allocation9 + $0x130] sm:$0xff] }
 0x232   :  { %v947_v51 = vld [vmem:[#allocation9 + $0x510] sm:$0xff] }
 0x234   :  { %2458 = vmatpush1.bf16.msra.mxu1 %v6326_v4  ;;  %2499 = vmatpush1.bf16.msra.mxu0 %v6454_v5  ;;  %v990_v4 = vld [vmem:[#allocation9 + $0x668] sm:$0xff]  ;;  %v6398_v5 = vcombine.low %v866_v57, %v870_v58  ;;  %v811_v58 = vld [vmem:[#allocation9 + $0xd0] sm:$0xff] }
 0x235   :  { %2459 = vmatprep.subr.bf16.mxu1 %v6319_v6  ;;  %2500 = vmatprep.subr.bf16.mxu0 %v6447_v7  ;;  %v6526_v6 = vcombine.low %v994_v59, %v998_v60  ;;  %v6391_v7 = vcombine.high %v858_v1, %v862_v2  ;;  %v6519_v8 = vcombine.high %v986_v3, %v990_v4  ;;  %v815_v59 = vld [vmem:[#allocation9 + $0xf0] sm:$0xff] }
 0x236   :  { %v939_v60 = vld [vmem:[#allocation9 + $0x4d0] sm:$0xff] }
 0x238   :  { %2460 = vmatpush1.bf16.msra.mxu1 %v6318_v12  ;;  %2501 = vmatpush1.bf16.msra.mxu0 %v6446_v17  ;;  %v982_v12 = vld [vmem:[#allocation9 + $0x628] sm:$0xff]  ;;  %v6390_v17 = vcombine.low %v858_v1, %v862_v2  ;;  %v803_v2 = vld [vmem:[#allocation9 + $0x90] sm:$0xff] }
 0x239   :  { %2461 = vmatprep.subr.bf16.mxu1 %v6439_v18  ;;  %2502 = vmatprep.subr.bf16.mxu0 %v6567_v19  ;;  %v6518_v18 = vcombine.low %v986_v3, %v990_v4  ;;  %v6383_v19 = vcombine.high %v850_v9, %v854_v10  ;;  %v6511_v20 = vcombine.high %v978_v11, %v982_v12  ;;  %v807_v3 = vld [vmem:[#allocation9 + $0xb0] sm:$0xff] }
 0x23a   :  { %v931_v4 = vld [vmem:[#allocation9 + $0x490] sm:$0xff] }
 0x23c   :  { %2462 = vmatpush2.bf16.msra.mxu1 %v6438_v24  ;;  %2503 = vmatpush2.bf16.msra.mxu0 %v6566_v25  ;;  %v975_v24 = vld [vmem:[#allocation9 + $0x5f0] sm:$0xff]  ;;  %v6382_v25 = vcombine.low %v850_v9, %v854_v10 }
 0x23d   :  { %2463 = vmatprep.subr.bf16.mxu1 %v6431_v26  ;;  %2504 = vmatprep.subr.bf16.mxu0 %v6559_v27  ;;  %v6510_v26 = vcombine.low %v978_v11, %v982_v12  ;;  %v6377_v27 = vcombine.high %v843_v21, %v847_v22  ;;  %v6505_v29 = vcombine.high %v971_v23, %v975_v24  ;;  %v795_v10 = vld [vmem:[#allocation9 + $0x50] sm:$0xff] }
 0x23e   :  { %v799_v11 = vld [vmem:[#allocation9 + $0x70] sm:$0xff] }
 0x23f   :  { %v923_v12 = vld [vmem:[#allocation9 + $0x450] sm:$0xff] }
 0x240   :  { %2464 = vmatpush2.bf16.msra.mxu1 %v6430_v35  ;;  %2505 = vmatpush2.bf16.msra.mxu0 %v6558_v36  ;;  %v967_v35 = vld [vmem:[#allocation9 + $0x5b0] sm:$0xff]  ;;  %v6376_v36 = vcombine.low %v843_v21, %v847_v22 }
 0x241   :  { %2465 = vmatprep.subr.bf16.mxu1 %v6423_v37  ;;  %2506 = vmatprep.subr.bf16.mxu0 %v6551_v38  ;;  %v6504_v37 = vcombine.low %v971_v23, %v975_v24  ;;  %v6369_v38 = vcombine.high %v835_v32, %v839_v33  ;;  %v6497_v39 = vcombine.high %v963_v34, %v967_v35  ;;  %v787_v22 = vld [vmem:[#allocation9 + $0x10] sm:$0xff] }
 0x242   :  { %v791_v23 = vld [vmem:[#allocation9 + $0x30] sm:$0xff] }
 0x243   :  { %v915_v24 = vld [vmem:[#allocation9 + $0x410] sm:$0xff] }
 0x244   :  { %2466 = vmatpush2.bf16.msra.mxu1 %v6422_v43  ;;  %2507 = vmatpush2.bf16.msra.mxu0 %v6550_v44  ;;  %v959_v43 = vld [vmem:[#allocation9 + $0x570] sm:$0xff]  ;;  %v6368_v44 = vcombine.low %v835_v32, %v839_v33 }
 0x245   :  { %2467 = vmatprep.subr.bf16.mxu1 %v6415_v45  ;;  %2508 = vmatprep.subr.bf16.mxu0 %v6543_v46  ;;  %v6496_v45 = vcombine.low %v963_v34, %v967_v35  ;;  %v6361_v46 = vcombine.high %v827_v40, %v831_v41  ;;  %v6489_v47 = vcombine.high %v955_v42, %v959_v43  ;;  %v907_v33 = vld [vmem:[#allocation9 + $0x3d0] sm:$0xff] }
 0x246   :  { %v911_v34 = vld [vmem:[#allocation9 + $0x3f0] sm:$0xff] }
 0x247   :  { %v1035_v35 = vld [vmem:[#allocation9 + $0x7d0] sm:$0xff] }
 0x248   :  { %2468 = vmatpush2.bf16.msra.mxu1 %v6414_v53  ;;  %2509 = vmatpush2.bf16.msra.mxu0 %v6542_v54  ;;  %v951_v53 = vld [vmem:[#allocation9 + $0x530] sm:$0xff]  ;;  %v6360_v54 = vcombine.low %v827_v40, %v831_v41 }
 0x249   :  { %2469 = vmatprep.subr.bf16.mxu1 %v6407_v55  ;;  %2510 = vmatprep.subr.bf16.mxu0 %v6535_v56  ;;  %v6488_v55 = vcombine.low %v955_v42, %v959_v43  ;;  %v6353_v56 = vcombine.high %v819_v48, %v823_v49  ;;  %v6481_v57 = vcombine.high %v947_v51, %v951_v53  ;;  %v899_v41 = vld [vmem:[#allocation9 + $0x390] sm:$0xff] }
 0x24a   :  { %v903_v42 = vld [vmem:[#allocation9 + $0x3b0] sm:$0xff] }
 0x24b   :  { %v1027_v43 = vld [vmem:[#allocation9 + $0x790] sm:$0xff] }
 0x24c   :  { %2470 = vmatpush2.bf16.msra.mxu1 %v6406_v61  ;;  %2511 = vmatpush2.bf16.msra.mxu0 %v6534_v62  ;;  %v943_v61 = vld [vmem:[#allocation9 + $0x4f0] sm:$0xff]  ;;  %v6352_v62 = vcombine.low %v819_v48, %v823_v49 }
 0x24d   :  { %2471 = vmatprep.subr.bf16.mxu1 %v6399_v63  ;;  %2512 = vmatprep.subr.bf16.mxu0 %v6527_v0  ;;  %v6480_v63 = vcombine.low %v947_v51, %v951_v53  ;;  %v6345_v0 = vcombine.high %v811_v58, %v815_v59  ;;  %v6473_v1 = vcombine.high %v939_v60, %v943_v61  ;;  %v891_v49 = vld [vmem:[#allocation9 + $0x350] sm:$0xff] }
 0x24e   :  { %v895_v51 = vld [vmem:[#allocation9 + $0x370] sm:$0xff] }
 0x24f   :  { %v1019_v53 = vld [vmem:[#allocation9 + $0x750] sm:$0xff] }
 0x250   :  { %2472 = vmatpush2.bf16.msra.mxu1 %v6398_v5  ;;  %2513 = vmatpush2.bf16.msra.mxu0 %v6526_v6  ;;  %v935_v5 = vld [vmem:[#allocation9 + $0x4b0] sm:$0xff]  ;;  %v6344_v6 = vcombine.low %v811_v58, %v815_v59 }
 0x251   :  { %2473 = vmatprep.subr.bf16.mxu1 %v6391_v7  ;;  %2514 = vmatprep.subr.bf16.mxu0 %v6519_v8  ;;  %v6472_v7 = vcombine.low %v939_v60, %v943_v61  ;;  %v6337_v8 = vcombine.high %v803_v2, %v807_v3  ;;  %v6465_v9 = vcombine.high %v931_v4, %v935_v5  ;;  %v883_v59 = vld [vmem:[#allocation9 + $0x310] sm:$0xff] }
 0x252   :  { %v887_v60 = vld [vmem:[#allocation9 + $0x330] sm:$0xff] }
 0x253   :  { %v1011_v61 = vld [vmem:[#allocation9 + $0x710] sm:$0xff] }
 0x254   :  { %2474 = vmatpush2.bf16.msra.mxu1 %v6390_v17  ;;  %2515 = vmatpush2.bf16.msra.mxu0 %v6518_v18  ;;  %v927_v17 = vld [vmem:[#allocation9 + $0x470] sm:$0xff]  ;;  %v6336_v18 = vcombine.low %v803_v2, %v807_v3 }
 0x255   :  { %2475 = vmatprep.subr.bf16.mxu1 %v6383_v19  ;;  %2516 = vmatprep.subr.bf16.mxu0 %v6511_v20  ;;  %v6464_v19 = vcombine.low %v931_v4, %v935_v5  ;;  %v6329_v20 = vcombine.high %v795_v10, %v799_v11  ;;  %v6457_v21 = vcombine.high %v923_v12, %v927_v17  ;;  %v875_v3 = vld [vmem:[#allocation9 + $0x2d0] sm:$0xff] }
 0x256   :  { %v879_v4 = vld [vmem:[#allocation9 + $0x2f0] sm:$0xff] }
 0x257   :  { %v1003_v5 = vld [vmem:[#allocation9 + $0x6d0] sm:$0xff] }
 0x258   :  { %2476 = vmatpush2.bf16.msra.mxu1 %v6382_v25  ;;  %2517 = vmatpush2.bf16.msra.mxu0 %v6510_v26  ;;  %v919_v25 = vld [vmem:[#allocation9 + $0x430] sm:$0xff]  ;;  %v6328_v26 = vcombine.low %v795_v10, %v799_v11 }
 0x259   :  { %2527 = vmatprep.subr.bf16.mxu1 %v6377_v27  ;;  %2568 = vmatprep.subr.bf16.mxu0 %v6505_v29  ;;  %v6456_v27 = vcombine.low %v923_v12, %v927_v17  ;;  %v6321_v29 = vcombine.high %v787_v22, %v791_v23  ;;  %v6449_v32 = vcombine.high %v915_v24, %v919_v25  ;;  %v867_v11 = vld [vmem:[#allocation9 + $0x290] sm:$0xff] }
 0x25a   :  { %v871_v12 = vld [vmem:[#allocation9 + $0x2b0] sm:$0xff] }
 0x25b   :  { %2478 = vmatmul.mubr.bf16.vlgmr.msra.gmra.mxu1 %v8188_v15  ;;  %2519 = vmatmul.mubr.bf16.vlgmr.msra.gmra.mxu0 %v8190_v16  ;;  %v995_v17 = vld [vmem:[#allocation9 + $0x690] sm:$0xff] }
 0x25c   :  { %2528 = vmatpush1.bf16.msra.mxu1 %v6376_v36  ;;  %2559 = vmatprep.mubr.bf16.mxu1 %v8184_v13  ;;  %v1039_v36 = vld [vmem:[#allocation9 + $0x7f0] sm:$0xff] }
 0x25d   :  { %2569 = vmatpush1.bf16.msra.mxu0 %v6504_v37  ;;  %2600 = vmatprep.mubr.bf16.mxu0 %v8186_v14  ;;  %v6320_v37 = vcombine.low %v787_v22, %v791_v23  ;;  %v6569_v40 = vcombine.high %v1035_v35, %v1039_v36  ;;  %v859_v23 = vld [vmem:[#allocation9 + $0x250] sm:$0xff] }
 0x25e   :  { %2529 = vmatprep.subr.bf16.mxu1 %v6369_v38  ;;  %2570 = vmatprep.subr.bf16.mxu0 %v6497_v39  ;;  %v6448_v38 = vcombine.low %v915_v24, %v919_v25  ;;  %v6441_v39 = vcombine.high %v907_v33, %v911_v34  ;;  %v863_v24 = vld [vmem:[#allocation9 + $0x270] sm:$0xff] }
 0x25f   :  { %v987_v25 = vld [vmem:[#allocation9 + $0x650] sm:$0xff] }
 0x260   :  { %2530 = vmatpush1.bf16.msra.mxu1 %v6368_v44  ;;  %v1031_v44 = vld [vmem:[#allocation9 + $0x7b0] sm:$0xff] }
 0x261   :  { %2571 = vmatpush1.bf16.msra.mxu0 %v6496_v45  ;;  %2531 = vmatprep.subr.bf16.mxu1 %v6361_v46  ;;  %v6440_v45 = vcombine.low %v907_v33, %v911_v34  ;;  %v6568_v46 = vcombine.low %v1035_v35, %v1039_v36  ;;  %v6561_v48 = vcombine.high %v1027_v43, %v1031_v44  ;;  %v851_v34 = vld [vmem:[#allocation9 + $0x210] sm:$0xff] }
 0x262   :  { %2572 = vmatprep.subr.bf16.mxu0 %v6489_v47  ;;  %v6433_v47 = vcombine.high %v899_v41, %v903_v42  ;;  %v855_v35 = vld [vmem:[#allocation9 + $0x230] sm:$0xff] }
 0x263   :  { %v979_v36 = vld [vmem:[#allocation9 + $0x610] sm:$0xff] }
 0x264   :  { %2532 = vmatpush1.bf16.msra.mxu1 %v6360_v54  ;;  %v1023_v54 = vld [vmem:[#allocation9 + $0x770] sm:$0xff] }
 0x265   :  { %2573 = vmatpush1.bf16.msra.mxu0 %v6488_v55  ;;  %2533 = vmatprep.subr.bf16.mxu1 %v6353_v56  ;;  %v6432_v55 = vcombine.low %v899_v41, %v903_v42  ;;  %v6560_v56 = vcombine.low %v1027_v43, %v1031_v44  ;;  %v6553_v58 = vcombine.high %v1019_v53, %v1023_v54  ;;  %v844_v42 = vld [vmem:[#allocation9 + $0x1d8] sm:$0xff] }
 0x266   :  { %2574 = vmatprep.subr.bf16.mxu0 %v6481_v57  ;;  %v6425_v57 = vcombine.high %v891_v49, %v895_v51  ;;  %v848_v43 = vld [vmem:[#allocation9 + $0x1f8] sm:$0xff] }
 0x267   :  { %v972_v44 = vld [vmem:[#allocation9 + $0x5d8] sm:$0xff] }
 0x268   :  { %2534 = vmatpush1.bf16.msra.mxu1 %v6352_v62  ;;  %v1015_v62 = vld [vmem:[#allocation9 + $0x730] sm:$0xff] }
 0x269   :  { %2575 = vmatpush1.bf16.msra.mxu0 %v6480_v63  ;;  %2535 = vmatprep.subr.bf16.mxu1 %v6345_v0  ;;  %v6424_v63 = vcombine.low %v891_v49, %v895_v51  ;;  %v6552_v0 = vcombine.low %v1019_v53, %v1023_v54  ;;  %v6545_v2 = vcombine.high %v1011_v61, %v1015_v62  ;;  %v836_v51 = vld [vmem:[#allocation9 + $0x198] sm:$0xff] }
 0x26a   :  { %2576 = vmatprep.subr.bf16.mxu0 %v6473_v1  ;;  %v6417_v1 = vcombine.high %v883_v59, %v887_v60  ;;  %v840_v53 = vld [vmem:[#allocation9 + $0x1b8] sm:$0xff]  ;;  %v6378_v54 = vcombine.low %v844_v42, %v848_v43 }
 0x26c   :  { %2536 = vmatpush1.bf16.msra.mxu1 %v6344_v6  ;;  %v1007_v6 = vld [vmem:[#allocation9 + $0x6f0] sm:$0xff] }
 0x26d   :  { %2577 = vmatpush1.bf16.msra.mxu0 %v6472_v7  ;;  %2537 = vmatprep.subr.bf16.mxu1 %v6337_v8  ;;  %v6416_v7 = vcombine.low %v883_v59, %v887_v60  ;;  %v6544_v8 = vcombine.low %v1011_v61, %v1015_v62  ;;  %v6537_v10 = vcombine.high %v1003_v5, %v1007_v6  ;;  %v828_v59 = vld [vmem:[#allocation9 + $0x158] sm:$0xff] }
 0x26e   :  { %2578 = vmatprep.subr.bf16.mxu0 %v6465_v9  ;;  %v6409_v9 = vcombine.high %v875_v3, %v879_v4  ;;  %v832_v60 = vld [vmem:[#allocation9 + $0x178] sm:$0xff] }
 0x26f   :  { %v956_v62 = vld [vmem:[#allocation9 + $0x558] sm:$0xff] }
 0x270   :  { %2538 = vmatpush1.bf16.msra.mxu1 %v6336_v18  ;;  %v999_v18 = vld [vmem:[#allocation9 + $0x6b0] sm:$0xff] }
 0x271   :  { %2579 = vmatpush1.bf16.msra.mxu0 %v6464_v19  ;;  %2539 = vmatprep.subr.bf16.mxu1 %v6329_v20  ;;  %v6408_v19 = vcombine.low %v875_v3, %v879_v4  ;;  %v6536_v20 = vcombine.low %v1003_v5, %v1007_v6  ;;  %v6529_v22 = vcombine.high %v995_v17, %v999_v18  ;;  %v820_v4 = vld [vmem:[#allocation9 + $0x118] sm:$0xff] }
 0x272   :  { %2580 = vmatprep.subr.bf16.mxu0 %v6457_v21  ;;  %v6401_v21 = vcombine.high %v867_v11, %v871_v12  ;;  %v824_v5 = vld [vmem:[#allocation9 + $0x138] sm:$0xff] }
 0x273   :  { %v948_v6 = vld [vmem:[#allocation9 + $0x518] sm:$0xff] }
 0x274   :  { %2540 = vmatpush1.bf16.msra.mxu1 %v6328_v26  ;;  %v991_v26 = vld [vmem:[#allocation9 + $0x670] sm:$0xff] }
 0x275   :  { %2581 = vmatpush1.bf16.msra.mxu0 %v6456_v27  ;;  %2541 = vmatprep.subr.bf16.mxu1 %v6321_v29  ;;  %v6400_v27 = vcombine.low %v867_v11, %v871_v12  ;;  %v6528_v29 = vcombine.low %v995_v17, %v999_v18  ;;  %v6521_v33 = vcombine.high %v987_v25, %v991_v26  ;;  %v812_v11 = vld [vmem:[#allocation9 + $0xd8] sm:$0xff] }
 0x276   :  { %2582 = vmatprep.subr.bf16.mxu0 %v6449_v32  ;;  %v6393_v32 = vcombine.high %v859_v23, %v863_v24  ;;  %v816_v12 = vld [vmem:[#allocation9 + $0xf8] sm:$0xff] }
 0x277   :  { %v940_v17 = vld [vmem:[#allocation9 + $0x4d8] sm:$0xff] }
 0x278   :  { %2542 = vmatpush1.bf16.msra.mxu1 %v6320_v37  ;;  %v983_v37 = vld [vmem:[#allocation9 + $0x630] sm:$0xff]  ;;  %v944_v18 = vld [vmem:[#allocation9 + $0x4f8] sm:$0xff] }
 0x279   :  { %2583 = vmatpush1.bf16.msra.mxu0 %v6448_v38  ;;  %2543 = vmatprep.subr.bf16.mxu1 %v6441_v39  ;;  %v6392_v38 = vcombine.low %v859_v23, %v863_v24  ;;  %v6520_v39 = vcombine.low %v987_v25, %v991_v26  ;;  %v6513_v41 = vcombine.high %v979_v36, %v983_v37  ;;  %v808_v23 = vld [vmem:[#allocation9 + $0xb8] sm:$0xff] }
 0x27a   :  { %2584 = vmatprep.subr.bf16.mxu0 %v6569_v40  ;;  %v6385_v40 = vcombine.high %v851_v34, %v855_v35  ;;  %v932_v24 = vld [vmem:[#allocation9 + $0x498] sm:$0xff]  ;;  %v6346_v26 = vcombine.low %v812_v11, %v816_v12 }
 0x27b   :  { %v936_v25 = vld [vmem:[#allocation9 + $0x4b8] sm:$0xff] }
 0x27c   :  { %2544 = vmatpush2.bf16.msra.mxu1 %v6440_v45  ;;  %v976_v45 = vld [vmem:[#allocation9 + $0x5f8] sm:$0xff] }
 0x27d   :  { %2585 = vmatpush2.bf16.msra.mxu0 %v6568_v46  ;;  %2545 = vmatprep.subr.bf16.mxu1 %v6433_v47  ;;  %v6384_v46 = vcombine.low %v851_v34, %v855_v35  ;;  %v6512_v47 = vcombine.low %v979_v36, %v983_v37  ;;  %v6507_v49 = vcombine.high %v972_v44, %v976_v45  ;;  %v800_v34 = vld [vmem:[#allocation9 + $0x78] sm:$0xff] }
 0x27e   :  { %2586 = vmatprep.subr.bf16.mxu0 %v6561_v48  ;;  %v6379_v48 = vcombine.high %v844_v42, %v848_v43  ;;  %v924_v35 = vld [vmem:[#allocation9 + $0x458] sm:$0xff] }
 0x27f   :  { %v928_v36 = vld [vmem:[#allocation9 + $0x478] sm:$0xff] }
 0x280   :  { %2546 = vmatpush2.bf16.msra.mxu1 %v6432_v55  ;;  %v964_v55 = vld [vmem:[#allocation9 + $0x598] sm:$0xff] }
 0x281   :  { %2587 = vmatpush2.bf16.msra.mxu0 %v6560_v56  ;;  %2547 = vmatprep.subr.bf16.mxu1 %v6425_v57  ;;  %v968_v56 = vld [vmem:[#allocation9 + $0x5b8] sm:$0xff]  ;;  %v6506_v57 = vcombine.low %v972_v44, %v976_v45 }
 0x282   :  { %2588 = vmatprep.subr.bf16.mxu0 %v6553_v58  ;;  %v6371_v58 = vcombine.high %v836_v51, %v840_v53  ;;  %v6499_v61 = vcombine.high %v964_v55, %v968_v56  ;;  %v792_v42 = vld [vmem:[#allocation9 + $0x38] sm:$0xff] }
 0x283   :  { %v916_v43 = vld [vmem:[#allocation9 + $0x418] sm:$0xff] }
 0x284   :  { %2548 = vmatpush2.bf16.msra.mxu1 %v6424_v63  ;;  %v960_v63 = vld [vmem:[#allocation9 + $0x578] sm:$0xff] }
 0x285   :  { %2589 = vmatpush2.bf16.msra.mxu0 %v6552_v0  ;;  %2549 = vmatprep.subr.bf16.mxu1 %v6417_v1  ;;  %v6370_v0 = vcombine.low %v836_v51, %v840_v53  ;;  %v6498_v1 = vcombine.low %v964_v55, %v968_v56  ;;  %v6491_v3 = vcombine.high %v956_v62, %v960_v63  ;;  %v920_v44 = vld [vmem:[#allocation9 + $0x438] sm:$0xff] }
 0x286   :  { %2590 = vmatprep.subr.bf16.mxu0 %v6545_v2  ;;  %v6363_v2 = vcombine.high %v828_v59, %v832_v60  ;;  %v912_v51 = vld [vmem:[#allocation9 + $0x3f8] sm:$0xff]  ;;  %v6450_v56 = vcombine.low %v916_v43, %v920_v44 }
 0x287   :  { %v1036_v53 = vld [vmem:[#allocation9 + $0x7d8] sm:$0xff] }
 0x288   :  { %2550 = vmatpush2.bf16.msra.mxu1 %v6416_v7  ;;  %v952_v7 = vld [vmem:[#allocation9 + $0x538] sm:$0xff] }
 0x289   :  { %2591 = vmatpush2.bf16.msra.mxu0 %v6544_v8  ;;  %2551 = vmatprep.subr.bf16.mxu1 %v6409_v9  ;;  %v6362_v8 = vcombine.low %v828_v59, %v832_v60  ;;  %v6490_v9 = vcombine.low %v956_v62, %v960_v63  ;;  %v900_v59 = vld [vmem:[#allocation9 + $0x398] sm:$0xff] }
 0x28a   :  { %2592 = vmatprep.subr.bf16.mxu0 %v6537_v10  ;;  %v6355_v10 = vcombine.high %v820_v4, %v824_v5  ;;  %v904_v60 = vld [vmem:[#allocation9 + $0x3b8] sm:$0xff] }
 0x28b   :  { %v1032_v62 = vld [vmem:[#allocation9 + $0x7b8] sm:$0xff] }
 0x28c   :  { %2552 = vmatpush2.bf16.msra.mxu1 %v6408_v19  ;;  %v6482_v19 = vcombine.low %v948_v6, %v952_v7 }
 0x28d   :  { %2593 = vmatpush2.bf16.msra.mxu0 %v6536_v20  ;;  %2553 = vmatprep.subr.bf16.mxu1 %v6401_v21  ;;  %v6347_v20 = vcombine.high %v812_v11, %v816_v12  ;;  %v6475_v21 = vcombine.high %v940_v17, %v944_v18  ;;  %v888_v11 = vld [vmem:[#allocation9 + $0x338] sm:$0xff] }
 0x28e   :  { %2594 = vmatprep.subr.bf16.mxu0 %v6529_v22  ;;  %v804_v22 = vld [vmem:[#allocation9 + $0x98] sm:$0xff] }
 0x28f   :  { %v6338_v37 = vcombine.low %v804_v22, %v808_v23  ;;  %v1012_v12 = vld [vmem:[#allocation9 + $0x718] sm:$0xff] }
 0x290   :  { %2554 = vmatpush2.bf16.msra.mxu1 %v6400_v27  ;;  %v6474_v27 = vcombine.low %v940_v17, %v944_v18  ;;  %v1016_v17 = vld [vmem:[#allocation9 + $0x738] sm:$0xff] }
 0x291   :  { %2595 = vmatpush2.bf16.msra.mxu0 %v6528_v29  ;;  %2555 = vmatprep.subr.bf16.mxu1 %v6393_v32  ;;  %v6339_v29 = vcombine.high %v804_v22, %v808_v23  ;;  %v6467_v32 = vcombine.high %v932_v24, %v936_v25  ;;  %v880_v22 = vld [vmem:[#allocation9 + $0x2f8] sm:$0xff] }
 0x292   :  { %2596 = vmatprep.subr.bf16.mxu0 %v6521_v33  ;;  %v796_v33 = vld [vmem:[#allocation9 + $0x58] sm:$0xff] }
 0x293   :  { %v6330_v45 = vcombine.low %v796_v33, %v800_v34  ;;  %v1004_v23 = vld [vmem:[#allocation9 + $0x6d8] sm:$0xff] }
 0x294   :  { %2556 = vmatpush2.bf16.msra.mxu1 %v6392_v38  ;;  %v6466_v38 = vcombine.low %v932_v24, %v936_v25  ;;  %v1008_v24 = vld [vmem:[#allocation9 + $0x6f8] sm:$0xff] }
 0x295   :  { %2597 = vmatpush2.bf16.msra.mxu0 %v6520_v39  ;;  %2557 = vmatprep.subr.bf16.mxu1 %v6385_v40  ;;  %v6331_v39 = vcombine.high %v796_v33, %v800_v34  ;;  %v6459_v40 = vcombine.high %v924_v35, %v928_v36  ;;  %v872_v33 = vld [vmem:[#allocation9 + $0x2b8] sm:$0xff] }
 0x296   :  { %2598 = vmatprep.subr.bf16.mxu0 %v6513_v41  ;;  %v788_v41 = vld [vmem:[#allocation9 + $0x18] sm:$0xff] }
 0x297   :  { %v6322_v55 = vcombine.low %v788_v41, %v792_v42  ;;  %v996_v34 = vld [vmem:[#allocation9 + $0x698] sm:$0xff] }
 0x298   :  { %2558 = vmatpush2.bf16.msra.mxu1 %v6384_v46  ;;  %v6458_v46 = vcombine.low %v924_v35, %v928_v36  ;;  %v1000_v35 = vld [vmem:[#allocation9 + $0x6b8] sm:$0xff] }
 0x299   :  { %2599 = vmatpush2.bf16.msra.mxu0 %v6512_v47  ;;  %2609 = vmatprep.subr.bf16.mxu1 %v6379_v48  ;;  %v6323_v47 = vcombine.high %v788_v41, %v792_v42  ;;  %v6451_v48 = vcombine.high %v916_v43, %v920_v44  ;;  %v864_v41 = vld [vmem:[#allocation9 + $0x278] sm:$0xff] }
 0x29a   :  { %2650 = vmatprep.subr.bf16.mxu0 %v6507_v49  ;;  %v908_v49 = vld [vmem:[#allocation9 + $0x3d8] sm:$0xff] }
 0x29b   :  { %2560 = vmatmul.mubr.bf16.vlgmr.msra.gmra.mxu1 %v8188_v15  ;;  %v6442_v63 = vcombine.low %v908_v49, %v912_v51  ;;  %v988_v42 = vld [vmem:[#allocation9 + $0x658] sm:$0xff] }
 0x29c   :  { %2601 = vmatmul.mubr.bf16.vlgmr.msra.gmra.mxu0 %v8190_v16  ;;  %2610 = vmatpush1.bf16.msra.mxu1 %v6378_v54  ;;  %v1040_v54 = vld [vmem:[#allocation9 + $0x7f8] sm:$0xff] }
 0x29d   :  { %2641 = vmatprep.mubr.bf16.mxu1 %v8184_v13  ;;  %2651 = vmatpush1.bf16.msra.mxu0 %v6506_v57  ;;  %v6483_v13 = vcombine.high %v948_v6, %v952_v7  ;;  %v6443_v57 = vcombine.high %v908_v49, %v912_v51  ;;  %v1024_v6 = vld [vmem:[#allocation9 + $0x778] sm:$0xff]  ;;  %v6434_v7 = vcombine.low %v900_v59, %v904_v60 }
 0x29e   :  { %2682 = vmatprep.mubr.bf16.mxu0 %v8186_v14  ;;  %2611 = vmatprep.subr.bf16.mxu1 %v6371_v58  ;;  %v6354_v14 = vcombine.low %v820_v4, %v824_v5  ;;  %v6571_v58 = vcombine.high %v1036_v53, %v1040_v54  ;;  %v896_v4 = vld [vmem:[#allocation9 + $0x378] sm:$0xff] }
 0x29f   :  { %2652 = vmatprep.subr.bf16.mxu0 %v6499_v61  ;;  %v1028_v61 = vld [vmem:[#allocation9 + $0x798] sm:$0xff] }
 0x2a0   :  { %2612 = vmatpush1.bf16.msra.mxu1 %v6370_v0  ;;  %v6570_v0 = vcombine.low %v1036_v53, %v1040_v54  ;;  %v1020_v5 = vld [vmem:[#allocation9 + $0x758] sm:$0xff] }
 0x2a1   :  { %2653 = vmatpush1.bf16.msra.mxu0 %v6498_v1  ;;  %2613 = vmatprep.subr.bf16.mxu1 %v6363_v2  ;;  %v6435_v1 = vcombine.high %v900_v59, %v904_v60  ;;  %v6563_v2 = vcombine.high %v1028_v61, %v1032_v62  ;;  %v992_v43 = vld [vmem:[#allocation9 + $0x678] sm:$0xff]  ;;  %v7247_v60 = vld [vmem:[#allocation12 + $0x18c] ss:$28 sps:$4 sm:$0xff]  }
 0x2a2   :  { %2654 = vmatprep.subr.bf16.mxu0 %v6491_v3  ;;  %v892_v3 = vld [vmem:[#allocation9 + $0x358] sm:$0xff] }
 0x2a3   :  { %v6426_v18 = vcombine.low %v892_v3, %v896_v4  ;;  %v856_v49 = vld [vmem:[#allocation9 + $0x238] sm:$0xff] }
 0x2a4   :  { %2614 = vmatpush1.bf16.msra.mxu1 %v6362_v8  ;;  %v6562_v8 = vcombine.low %v1028_v61, %v1032_v62  ;;  %v980_v51 = vld [vmem:[#allocation9 + $0x618] sm:$0xff]  ;;  %v7259_v61 = vld [vmem:[#allocation12 + $0x50c] ss:$28 sps:$4 sm:$0xff]  }
 0x2a5   :  { %2655 = vmatpush1.bf16.msra.mxu0 %v6490_v9  ;;  %2615 = vmatprep.subr.bf16.mxu1 %v6355_v10  ;;  %v6427_v9 = vcombine.high %v892_v3, %v896_v4  ;;  %v6555_v10 = vcombine.high %v1020_v5, %v1024_v6  ;;  %v984_v53 = vld [vmem:[#allocation9 + $0x638] sm:$0xff]  ;;  %v7245_v62 = vld [vmem:[#allocation12 + $0x188] ss:$28 sps:$4 sm:$0xff]  }
 0x2a6   :  { %2656 = vmatprep.subr.bf16.mxu0 %v6483_v13  ;;  %v884_v13 = vld [vmem:[#allocation9 + $0x318] sm:$0xff]  ;;  %v6514_v59 = vcombine.low %v980_v51, %v984_v53 }
 0x2a7   :  { %v6418_v25 = vcombine.low %v884_v13, %v888_v11  ;;  %v7265_v3 = vld [vmem:[#allocation12 + $0x4d4] ss:$28 sps:$4 sm:$0xff]  }
 0x2a8   :  { %2616 = vmatpush1.bf16.msra.mxu1 %v6354_v14  ;;  %v6554_v14 = vcombine.low %v1020_v5, %v1024_v6  ;;  %v7248_v6 = vld [vmem:[#allocation12 + $0x150] ss:$28 sps:$4 sm:$0xff]  }
 0x2a9   :  { %2657 = vmatpush1.bf16.msra.mxu0 %v6482_v19  ;;  %2617 = vmatprep.subr.bf16.mxu1 %v6347_v20  ;;  %v6419_v19 = vcombine.high %v884_v13, %v888_v11  ;;  %v6547_v20 = vcombine.high %v1012_v12, %v1016_v17  ;;  %v7271_v11 = vld [vmem:[#allocation12 + $0x49c] ss:$28 sps:$4 sm:$0xff]  }
 0x2aa   :  { %2658 = vmatprep.subr.bf16.mxu0 %v6475_v21  ;;  %v876_v21 = vld [vmem:[#allocation9 + $0x2d8] sm:$0xff] }
 0x2ab   :  { %v6410_v36 = vcombine.low %v876_v21, %v880_v22 }
 0x2ac   :  { %2618 = vmatpush1.bf16.msra.mxu1 %v6346_v26  ;;  %v6546_v26 = vcombine.low %v1012_v12, %v1016_v17 }
 0x2ad   :  { %2659 = vmatpush1.bf16.msra.mxu0 %v6474_v27  ;;  %2619 = vmatprep.subr.bf16.mxu1 %v6339_v29  ;;  %v6411_v27 = vcombine.high %v876_v21, %v880_v22  ;;  %v6539_v29 = vcombine.high %v1004_v23, %v1008_v24  ;;  %v7277_v22 = vld [vmem:[#allocation12 + $0x464] ss:$28 sps:$4 sm:$0xff]  }
 0x2ae   :  { %2660 = vmatprep.subr.bf16.mxu0 %v6467_v32  ;;  %v868_v32 = vld [vmem:[#allocation9 + $0x298] sm:$0xff] }
 0x2af   :  { %v6402_v44 = vcombine.low %v868_v32, %v872_v33 }
 0x2b0   :  { %2620 = vmatpush1.bf16.msra.mxu1 %v6338_v37  ;;  %v6538_v37 = vcombine.low %v1004_v23, %v1008_v24  ;;  %v7254_v24 = vld [vmem:[#allocation12 + $0xe0] ss:$28 sps:$4 sm:$0xff]  }
 0x2b1   :  { %2661 = vmatpush1.bf16.msra.mxu0 %v6466_v38  ;;  %2621 = vmatprep.subr.bf16.mxu1 %v6331_v39  ;;  %v6403_v38 = vcombine.high %v868_v32, %v872_v33  ;;  %v6531_v39 = vcombine.high %v996_v34, %v1000_v35  ;;  %v7268_v32 = vld [vmem:[#allocation12 + $0x74] ss:$28 sps:$4 sm:$0xff]   ;;  %v7281_v33 = vld [vmem:[#allocation12 + $0x428] ss:$28 sps:$4 sm:$0xff]  }
 0x2b2   :  { %2662 = vmatprep.subr.bf16.mxu0 %v6459_v40  ;;  %v860_v40 = vld [vmem:[#allocation9 + $0x258] sm:$0xff] }
 0x2b3   :  { %v6394_v54 = vcombine.low %v860_v40, %v864_v41 }
 0x2b4   :  { %2622 = vmatpush1.bf16.msra.mxu1 %v6330_v45  ;;  %v6530_v45 = vcombine.low %v996_v34, %v1000_v35  ;;  %v7289_v34 = vld [vmem:[#allocation12 + $0x3f4] ss:$28 sps:$4 sm:$0xff]  }
 0x2b5   :  { %2663 = vmatpush1.bf16.msra.mxu0 %v6458_v46  ;;  %2623 = vmatprep.subr.bf16.mxu1 %v6323_v47  ;;  %v6395_v46 = vcombine.high %v860_v40, %v864_v41  ;;  %v6523_v47 = vcombine.high %v988_v42, %v992_v43  ;;  %v7266_v35 = vld [vmem:[#allocation12 + $0x70] ss:$28 sps:$4 sm:$0xff]   ;;  %v7280_v40 = vld [vmem:[#allocation12 + $0x4] ss:$28 sps:$4 sm:$0xff]   ;;  %v7293_v41 = vld [vmem:[#allocation12 + $0x3b8] ss:$28 sps:$4 sm:$0xff]  }
 0x2b6   :  { %2664 = vmatprep.subr.bf16.mxu0 %v6451_v48  ;;  %v852_v48 = vld [vmem:[#allocation9 + $0x218] sm:$0xff] }
 0x2b8   :  { %2624 = vmatpush1.bf16.msra.mxu1 %v6322_v55  ;;  %v6522_v55 = vcombine.low %v988_v42, %v992_v43  ;;  %v7301_v42 = vld [vmem:[#allocation12 + $0x384] ss:$28 sps:$4 sm:$0xff]  }
 0x2b9   :  { %2665 = vmatpush1.bf16.msra.mxu0 %v6450_v56  ;;  %2625 = vmatprep.subr.bf16.mxu1 %v6443_v57  ;;  %v6387_v56 = vcombine.high %v852_v48, %v856_v49  ;;  %v6515_v57 = vcombine.high %v980_v51, %v984_v53  ;;  %v7278_v43 = vld [vmem:[#allocation12] ss:$28 sps:$4 sm:$0xff]   ;;  %v7313_v51 = vld [vmem:[#allocation12 + $0x694] ss:$28 sps:$4 sm:$0xff]  }
 0x2ba   :  { %2666 = vmatprep.subr.bf16.mxu0 %v6571_v58  ;;  %v6386_v58 = vcombine.low %v852_v48, %v856_v49  ;;  %v7292_v48 = vld [vmem:[#allocation12 + $0x314] ss:$28 sps:$4 sm:$0xff]   ;;  %v7305_v49 = vld [vmem:[#allocation12 + $0x6c8] ss:$28 sps:$4 sm:$0xff]  }
 0x2bb   :  { %v7290_v53 = vld [vmem:[#allocation12 + $0x310] ss:$28 sps:$4 sm:$0xff]  }
 0x2bc   :  { %2626 = vmatpush2.bf16.msra.mxu1 %v6442_v63  ;;  %v8206_v63 = vld [vmem:[#allocation10] sm:$0xff] }
 0x2bd   :  { %2667 = vmatpush2.bf16.msra.mxu0 %v6570_v0  ;;  %2627 = vmatprep.subr.bf16.mxu1 %v6435_v1  ;;  %v7250_v0 = vld [vmem:[#allocation12 + $0x154] ss:$28 sps:$4 sm:$0xff]   ;;  %v7257_v1 = vld [vmem:[#allocation12 + $0x508] ss:$28 sps:$4 sm:$0xff]  }
 0x2be   :  { %2668 = vmatprep.subr.bf16.mxu0 %v6563_v2  ;;  %v1050_v2 = vrot.slane %v8206_v63, %v8170_v31 }
 0x2c0   :  { %2628 = vmatpush2.bf16.msra.mxu1 %v6434_v7 }
 0x2c1   :  { %2669 = vmatpush2.bf16.msra.mxu0 %v6562_v8  ;;  %2629 = vmatprep.subr.bf16.mxu1 %v6427_v9  ;;  %v7253_v9 = vld [vmem:[#allocation12 + $0x11c] ss:$28 sps:$4 sm:$0xff]  }
 0x2c2   :  { %2670 = vmatprep.subr.bf16.mxu0 %v6555_v10  ;;  %v7263_v10 = vld [vmem:[#allocation12 + $0x4d0] ss:$28 sps:$4 sm:$0xff]  }
 0x2c4   :  { %2630 = vmatpush2.bf16.msra.mxu1 %v6426_v18  ;;  %v7251_v18 = vld [vmem:[#allocation12 + $0x118] ss:$28 sps:$4 sm:$0xff]  }
 0x2c5   :  { %2671 = vmatpush2.bf16.msra.mxu0 %v6554_v14  ;;  %2631 = vmatprep.subr.bf16.mxu1 %v6419_v19 }
 0x2c6   :  { %2672 = vmatprep.subr.bf16.mxu0 %v6547_v20  ;;  %v7269_v20 = vld [vmem:[#allocation12 + $0x498] ss:$28 sps:$4 sm:$0xff]  }
 0x2c8   :  { %2632 = vmatpush2.bf16.msra.mxu1 %v6418_v25  ;;  %v7262_v25 = vld [vmem:[#allocation12 + $0xac] ss:$28 sps:$4 sm:$0xff]  }
 0x2c9   :  { %2673 = vmatpush2.bf16.msra.mxu0 %v6546_v26  ;;  %2633 = vmatprep.subr.bf16.mxu1 %v6411_v27  ;;  %v7275_v26 = vld [vmem:[#allocation12 + $0x460] ss:$28 sps:$4 sm:$0xff]   ;;  %v7283_v27 = vld [vmem:[#allocation12 + $0x42c] ss:$28 sps:$4 sm:$0xff]  }
 0x2ca   :  { %2674 = vmatprep.subr.bf16.mxu0 %v6539_v29  ;;  %v7260_v29 = vld [vmem:[#allocation12 + $0xa8] ss:$28 sps:$4 sm:$0xff]  }
 0x2cc   :  { %2634 = vmatpush2.bf16.msra.mxu1 %v6410_v36  ;;  %v7274_v36 = vld [vmem:[#allocation12 + $0x3c] ss:$28 sps:$4 sm:$0xff]  }
 0x2cd   :  { %2675 = vmatpush2.bf16.msra.mxu0 %v6538_v37  ;;  %2635 = vmatprep.subr.bf16.mxu1 %v6403_v38  ;;  %v7287_v37 = vld [vmem:[#allocation12 + $0x3f0] ss:$28 sps:$4 sm:$0xff]   ;;  %v7295_v38 = vld [vmem:[#allocation12 + $0x3bc] ss:$28 sps:$4 sm:$0xff]  }
 0x2ce   :  { %2676 = vmatprep.subr.bf16.mxu0 %v6531_v39  ;;  %v7272_v39 = vld [vmem:[#allocation12 + $0x38] ss:$28 sps:$4 sm:$0xff]  }
 0x2d0   :  { %2636 = vmatpush2.bf16.msra.mxu1 %v6402_v44  ;;  %v7286_v44 = vld [vmem:[#allocation12 + $0x34c] ss:$28 sps:$4 sm:$0xff]  }
 0x2d1   :  { %2677 = vmatpush2.bf16.msra.mxu0 %v6530_v45  ;;  %2637 = vmatprep.subr.bf16.mxu1 %v6395_v46  ;;  %v7299_v45 = vld [vmem:[#allocation12 + $0x380] ss:$28 sps:$4 sm:$0xff]   ;;  %v7307_v46 = vld [vmem:[#allocation12 + $0x6cc] ss:$28 sps:$4 sm:$0xff]  }
 0x2d2   :  { %2678 = vmatprep.subr.bf16.mxu0 %v6523_v47  ;;  %v7284_v47 = vld [vmem:[#allocation12 + $0x348] ss:$28 sps:$4 sm:$0xff]  }
 0x2d4   :  { %2638 = vmatpush2.bf16.msra.mxu1 %v6394_v54  ;;  %v7298_v54 = vld [vmem:[#allocation12 + $0x2dc] ss:$28 sps:$4 sm:$0xff]  }
 0x2d5   :  { %2679 = vmatpush2.bf16.msra.mxu0 %v6522_v55  ;;  %2639 = vmatprep.subr.bf16.mxu1 %v6387_v56  ;;  %v7311_v55 = vld [vmem:[#allocation12 + $0x690] ss:$28 sps:$4 sm:$0xff]   ;;  %v7319_v56 = vld [vmem:[#allocation12 + $0x65c] ss:$28 sps:$4 sm:$0xff]  }
 0x2d6   :  { %2680 = vmatprep.subr.bf16.mxu0 %v6515_v57  ;;  %v7296_v57 = vld [vmem:[#allocation12 + $0x2d8] ss:$28 sps:$4 sm:$0xff]  }
 0x2d8   :  { %2640 = vmatpush2.bf16.msra.mxu1 %v6386_v58  ;;  %v7304_v58 = vld [vmem:[#allocation12 + $0x2a4] ss:$28 sps:$4 sm:$0xff]  }
 0x2d9   :  { %2681 = vmatpush2.bf16.msra.mxu0 %v6514_v59  ;;  %5560 = vmatprep.subr.bf16.mxu1 %v7247_v60  ;;  %v7317_v59 = vld [vmem:[#allocation12 + $0x658] ss:$28 sps:$4 sm:$0xff]   ;;  %v7325_v60 = vld [vmem:[#allocation12 + $0x624] ss:$28 sps:$4 sm:$0xff]  }
 0x2da   :  { %5601 = vmatprep.subr.bf16.mxu0 %v7259_v61  ;;  %v7302_v61 = vld [vmem:[#allocation12 + $0x2a0] ss:$28 sps:$4 sm:$0xff]  }
 0x2db   :  { %2642 = vmatmul.mubr.bf16.vlgmr.msra.gmra.mxu1 %v8188_v15  ;;  %v8211_v4 = vpop.f32.mrf.mxu1  ;;  %v8213_v5 = vpop.f32.mrf.mxu0 }
 0x2dc   :  { %2683 = vmatmul.mubr.bf16.vlgmr.msra.gmra.mxu0 %v8190_v16  ;;  %5561 = vmatpush1.bf16.msra.mxu1 %v7245_v62  ;;  %v7256_v16 = vld [vmem:[#allocation12 + $0xe4] ss:$28 sps:$4 sm:$0xff]   ;;  %v7310_v62 = vld [vmem:[#allocation12 + $0x26c] ss:$28 sps:$4 sm:$0xff]  }
 0x2dd   :  { %v2399_v7 = vpop.f32.mrf.mxu1  ;;  %v2440_v8 = vpop.f32.mrf.mxu0  ;;  %5562 = vmatprep.subr.bf16.mxu1 %v7250_v0  ;;  %5602 = vmatpush1.bf16.msra.mxu0 %v7257_v1  ;;  %v7323_v0 = vld [vmem:[#allocation12 + $0x620] ss:$28 sps:$4 sm:$0xff]   ;;  %v7331_v1 = vld [vmem:[#allocation12 + $0x5ec] ss:$28 sps:$4 sm:$0xff]  }
 0x2de   :  { %v2400_v13 = vadd.f32 %v2399_v7, %v1050_v2  ;;  %5603 = vmatprep.subr.bf16.mxu0 %v7265_v3  ;;  %v7308_v2 = vld [vmem:[#allocation12 + $0x268] ss:$28 sps:$4 sm:$0xff]   ;;  %v1046_v3 = vrot.slane %v8206_v63, %v8167_v30 }
 0x2df   :  { %v2401_v12 = vpop.f32.mrf.mxu1  ;;  %v2442_v17 = vpop.f32.mrf.mxu0  ;;  %v7329_v7 = vld [vmem:[#allocation12 + $0x5e8] ss:$28 sps:$4 sm:$0xff]  }
 0x2e0   :  { %v2441_v15 = vadd.f32 %v2440_v8, %v2400_v13  ;;  %5563 = vmatpush1.bf16.msra.mxu1 %v7248_v6  ;;  %v7316_v6 = vld [vmem:[#allocation12 + $0x234] ss:$28 sps:$4 sm:$0xff]   ;;  %v7322_v13 = vld [vmem:[#allocation12 + $0x1fc] ss:$28 sps:$4 sm:$0xff]  }
 0x2e1   :  { %v2402_v14 = vpop.f32.mrf.mxu1  ;;  %v2443_v19 = vpop.f32.mrf.mxu0  ;;  %5564 = vmatprep.subr.bf16.mxu1 %v7253_v9  ;;  %5604 = vmatpush1.bf16.msra.mxu0 %v7263_v10  ;;  %v7334_v8 = vld [vmem:[#allocation12 + $0x5b4] ss:$28 sps:$4 sm:$0xff]   ;;  %v2398_v10 = vadd.f32 %v8211_v4, %v1046_v3  ;;  %v7337_v12 = vld [vmem:[#allocation12 + $0x57c] ss:$28 sps:$4 sm:$0xff]  }
 0x2e2   :  { %v2692_v21 = vmax.f32 %v2441_v15, 0.0  ;;  %5605 = vmatprep.subr.bf16.mxu0 %v7271_v11  ;;  %v7314_v9 = vld [vmem:[#allocation12 + $0x230] ss:$28 sps:$4 sm:$0xff]   ;;  %v7320_v17 = vld [vmem:[#allocation12 + $0x1f8] ss:$28 sps:$4 sm:$0xff]  }
 0x2e3   :  { %v7332_v11 = vld [vmem:[#allocation12 + $0x5b0] ss:$28 sps:$4 sm:$0xff]   ;;  %v2439_v15 = vadd.f32 %v8213_v5, %v2398_v10  ;;  %v7335_v14 = vld [vmem:[#allocation12 + $0x578] ss:$28 sps:$4 sm:$0xff]   ;;  %v7340_v19 = vld [vmem:[#allocation12 + $0x544] ss:$28 sps:$4 sm:$0xff]  }
 0x2e4   :  { %v8216_v23 = vpack.c.bf16 %v2692_v21, %v2692_v21  ;;  %5565 = vmatpush1.bf16.msra.mxu1 %v7251_v18  ;;  %v7328_v18 = vld [vmem:[#allocation12 + $0x1c4] ss:$28 sps:$4 sm:$0xff]   ;;  %v7343_v21 = vld [vmem:[#allocation12 + $0x88c] ss:$28 sps:$4 sm:$0xff]  }
 0x2e5   :  { %5566 = vmatprep.subr.bf16.mxu1 %v7256_v16  ;;  %5606 = vmatpush1.bf16.msra.mxu0 %v7269_v20  ;;  %v7326_v16 = vld [vmem:[#allocation12 + $0x1c0] ss:$28 sps:$4 sm:$0xff]   ;;  %v2691_v20 = vmax.f32 %v2439_v15, 0.0  ;;  %v7341_v5 = vld [vmem:[#allocation12 + $0x888] ss:$28 sps:$4 sm:$0xff]  }
 0x2e6   :  { %5592 = vmatprep.mubr.bf16.mxu1 %v8216_v23  ;;  %5607 = vmatprep.subr.bf16.mxu0 %v7277_v22  ;;  %v7338_v4 = vld [vmem:[#allocation12 + $0x540] ss:$28 sps:$4 sm:$0xff]   ;;  %v7391_v22 = vld [vmem:[#allocation12 + $0xc0c] ss:$28 sps:$4 sm:$0xff]  }
 0x2e7   :  { %v7407_v3 = vld [vmem:[#allocation12 + $0xb60] ss:$28 sps:$4 sm:$0xff]   ;;  %v7367_v10 = vld [vmem:[#allocation12 + $0xa4c] ss:$28 sps:$4 sm:$0xff]  }
 0x2e8   :  { %5567 = vmatpush1.bf16.msra.mxu1 %v7254_v24  ;;  %v1054_v24 = vrot.slane %v8206_v63, %v8175_v50  ;;  %v7427_v15 = vld [vmem:[#allocation12 + $0xabc] ss:$28 sps:$4 sm:$0xff]  }
 0x2e9   :  { %5568 = vmatprep.subr.bf16.mxu1 %v7262_v25  ;;  %5608 = vmatpush1.bf16.msra.mxu0 %v7275_v26  ;;  %v8225_v25 = vpack.c.bf16 %v2691_v20, %v2691_v20  ;;  %v7346_v26 = vld [vmem:[#allocation12 + $0x854] ss:$28 sps:$4 sm:$0xff]  }
 0x2ea   :  { %5609 = vmatprep.subr.bf16.mxu0 %v7283_v27  ;;  %v1058_v27 = vrot.slane %v8206_v63, %v8178_v52  ;;  %v7371_v20 = vld [vmem:[#allocation12 + $0x9d8] ss:$28 sps:$4 sm:$0xff]  }
 0x2ec   :  { %5569 = vmatpush1.bf16.msra.mxu1 %v7260_v29 }
 0x2ed   :  { %5570 = vmatprep.subr.bf16.mxu1 %v7268_v32  ;;  %5610 = vmatpush1.bf16.msra.mxu0 %v7281_v33 }
 0x2ee   :  { %5611 = vmatprep.subr.bf16.mxu0 %v7289_v34  ;;  %v7344_v34 = vld [vmem:[#allocation12 + $0x850] ss:$28 sps:$4 sm:$0xff]  }
 0x2f0   :  { %5571 = vmatpush1.bf16.msra.mxu1 %v7266_v35 }
 0x2f1   :  { %5572 = vmatprep.subr.bf16.mxu1 %v7274_v36  ;;  %5612 = vmatpush1.bf16.msra.mxu0 %v7287_v37  ;;  %v7349_v37 = vld [vmem:[#allocation12 + $0x81c] ss:$28 sps:$4 sm:$0xff]  }
 0x2f2   :  { %5613 = vmatprep.subr.bf16.mxu0 %v7295_v38 }
 0x2f4   :  { %5573 = vmatpush1.bf16.msra.mxu1 %v7272_v39 }
 0x2f5   :  { %5574 = vmatprep.subr.bf16.mxu1 %v7280_v40  ;;  %5614 = vmatpush1.bf16.msra.mxu0 %v7293_v41 }
 0x2f6   :  { %5615 = vmatprep.subr.bf16.mxu0 %v7301_v42 }
 0x2f8   :  { %5575 = vmatpush1.bf16.msra.mxu1 %v7278_v43  ;;  %v7347_v43 = vld [vmem:[#allocation12 + $0x818] ss:$28 sps:$4 sm:$0xff]  }
 0x2f9   :  { %5576 = vmatprep.subr.bf16.mxu1 %v7286_v44  ;;  %5616 = vmatpush1.bf16.msra.mxu0 %v7299_v45 }
 0x2fa   :  { %5617 = vmatprep.subr.bf16.mxu0 %v7307_v46 }
 0x2fc   :  { %5577 = vmatpush2.bf16.msra.mxu1 %v7284_v47  ;;  %v7352_v47 = vld [vmem:[#allocation12 + $0x7e4] ss:$28 sps:$4 sm:$0xff]  }
 0x2fd   :  { %5578 = vmatprep.subr.bf16.mxu1 %v7292_v48  ;;  %5618 = vmatpush2.bf16.msra.mxu0 %v7305_v49 }
 0x2fe   :  { %5619 = vmatprep.subr.bf16.mxu0 %v7313_v51  ;;  %v7350_v51 = vld [vmem:[#allocation12 + $0x7e0] ss:$28 sps:$4 sm:$0xff]  }
 0x300   :  { %5579 = vmatpush2.bf16.msra.mxu1 %v7290_v53  ;;  %v7389_v53 = vld [vmem:[#allocation12 + $0xc08] ss:$28 sps:$4 sm:$0xff]  }
 0x301   :  { %5580 = vmatprep.subr.bf16.mxu1 %v7298_v54  ;;  %5620 = vmatpush2.bf16.msra.mxu0 %v7311_v55  ;;  %v7355_v55 = vld [vmem:[#allocation12 + $0x7ac] ss:$28 sps:$4 sm:$0xff]  }
 0x302   :  { %5621 = vmatprep.subr.bf16.mxu0 %v7319_v56  ;;  %v7397_v56 = vld [vmem:[#allocation12 + $0xbd4] ss:$28 sps:$4 sm:$0xff]  }
 0x304   :  { %5581 = vmatpush2.bf16.msra.mxu1 %v7296_v57  ;;  %v7353_v57 = vld [vmem:[#allocation12 + $0x7a8] ss:$28 sps:$4 sm:$0xff]  }
 0x305   :  { %5582 = vmatprep.subr.bf16.mxu1 %v7304_v58  ;;  %5622 = vmatpush2.bf16.msra.mxu0 %v7317_v59  ;;  %v7395_v58 = vld [vmem:[#allocation12 + $0xbd0] ss:$28 sps:$4 sm:$0xff]  }
 0x306   :  { %5623 = vmatprep.subr.bf16.mxu0 %v7325_v60  ;;  %v7358_v59 = vld [vmem:[#allocation12 + $0x774] ss:$28 sps:$4 sm:$0xff]   ;;  %v7403_v60 = vld [vmem:[#allocation12 + $0xb9c] ss:$28 sps:$4 sm:$0xff]  }
 0x308   :  { %5583 = vmatpush2.bf16.msra.mxu1 %v7302_v61  ;;  %v7356_v61 = vld [vmem:[#allocation12 + $0x770] ss:$28 sps:$4 sm:$0xff]  }
 0x309   :  { %5584 = vmatprep.subr.bf16.mxu1 %v7310_v62  ;;  %5624 = vmatpush2.bf16.msra.mxu0 %v7323_v0  ;;  %v7401_v62 = vld [vmem:[#allocation12 + $0xb98] ss:$28 sps:$4 sm:$0xff]  }
 0x30a   :  { %5625 = vmatprep.subr.bf16.mxu0 %v7331_v1  ;;  %v7361_v0 = vld [vmem:[#allocation12 + $0x73c] ss:$28 sps:$4 sm:$0xff]   ;;  %v7409_v1 = vld [vmem:[#allocation12 + $0xb64] ss:$28 sps:$4 sm:$0xff]  }
 0x30c   :  { %5585 = vmatpush2.bf16.msra.mxu1 %v7308_v2  ;;  %v7359_v2 = vld [vmem:[#allocation12 + $0x738] ss:$28 sps:$4 sm:$0xff]  }
 0x30d   :  { %5586 = vmatprep.subr.bf16.mxu1 %v7316_v6  ;;  %5626 = vmatpush2.bf16.msra.mxu0 %v7329_v7  ;;  %v7364_v6 = vld [vmem:[#allocation12 + $0x704] ss:$28 sps:$4 sm:$0xff]   ;;  %v7415_v7 = vld [vmem:[#allocation12 + $0xb2c] ss:$28 sps:$4 sm:$0xff]  }
 0x30e   :  { %5627 = vmatprep.subr.bf16.mxu0 %v7334_v8  ;;  %v7362_v8 = vld [vmem:[#allocation12 + $0x700] ss:$28 sps:$4 sm:$0xff]  }
 0x310   :  { %5587 = vmatpush2.bf16.msra.mxu1 %v7314_v9  ;;  %v7413_v9 = vld [vmem:[#allocation12 + $0xb28] ss:$28 sps:$4 sm:$0xff]  }
 0x311   :  { %5588 = vmatprep.subr.bf16.mxu1 %v7322_v13  ;;  %5628 = vmatpush2.bf16.msra.mxu0 %v7332_v11  ;;  %v7421_v13 = vld [vmem:[#allocation12 + $0xaf4] ss:$28 sps:$4 sm:$0xff]   ;;  %v7365_v11 = vld [vmem:[#allocation12 + $0xa48] ss:$28 sps:$4 sm:$0xff]  }
 0x312   :  { %5629 = vmatprep.subr.bf16.mxu0 %v7337_v12  ;;  %v7419_v12 = vld [vmem:[#allocation12 + $0xaf0] ss:$28 sps:$4 sm:$0xff]  }
 0x314   :  { %5589 = vmatpush2.bf16.msra.mxu1 %v7320_v17  ;;  %v7370_v17 = vld [vmem:[#allocation12 + $0xa14] ss:$28 sps:$4 sm:$0xff]  }
 0x315   :  { %5590 = vmatprep.subr.bf16.mxu1 %v7328_v18  ;;  %5630 = vmatpush2.bf16.msra.mxu0 %v7335_v14  ;;  %v7368_v18 = vld [vmem:[#allocation12 + $0xa10] ss:$28 sps:$4 sm:$0xff]   ;;  %v7425_v14 = vld [vmem:[#allocation12 + $0xab8] ss:$28 sps:$4 sm:$0xff]  }
 0x316   :  { %5631 = vmatprep.subr.bf16.mxu0 %v7340_v19  ;;  %v7373_v19 = vld [vmem:[#allocation12 + $0x9dc] ss:$28 sps:$4 sm:$0xff]  }
 0x318   :  { %5591 = vmatpush2.bf16.msra.mxu1 %v7326_v16  ;;  %v7433_v16 = vld [vmem:[#allocation12 + $0xa84] ss:$28 sps:$4 sm:$0xff]  }
 0x319   :  { %5632 = vmatpush2.bf16.msra.mxu0 %v7338_v4  ;;  %5642 = vmatprep.subr.bf16.mxu1 %v7343_v21  ;;  %v7431_v4 = vld [vmem:[#allocation12 + $0xa80] ss:$28 sps:$4 sm:$0xff]  }
 0x31a   :  { %5683 = vmatprep.subr.bf16.mxu0 %v7391_v22  ;;  %v7376_v21 = vld [vmem:[#allocation12 + $0x9a4] ss:$28 sps:$4 sm:$0xff]   ;;  %v7439_v22 = vld [vmem:[#allocation12 + $0xdcc] ss:$28 sps:$4 sm:$0xff]  }
 0x31b   :  { %v2479_v29 = vpop.f32.mrf.mxu1  ;;  %v2520_v32 = vpop.f32.mrf.mxu0  ;;  %5593 = vmatmul.mubr.bf16.vlgmr.msra.gmra.mxu1 %v8225_v25 }
 0x31c   :  { %v2480_v33 = vadd.f32 %v2479_v29, %v1054_v24  ;;  %5643 = vmatpush1.bf16.msra.mxu1 %v7341_v5  ;;  %v7374_v24 = vld [vmem:[#allocation12 + $0x9a0] ss:$28 sps:$4 sm:$0xff]   ;;  %v7437_v5 = vld [vmem:[#allocation12 + $0xdc8] ss:$28 sps:$4 sm:$0xff]  }
 0x31d   :  { %v2481_v35 = vpop.f32.mrf.mxu1  ;;  %v2522_v36 = vpop.f32.mrf.mxu0  ;;  %5644 = vmatprep.subr.bf16.mxu1 %v7346_v26  ;;  %v7379_v26 = vld [vmem:[#allocation12 + $0x96c] ss:$28 sps:$4 sm:$0xff]  }
 0x31e   :  { %v2521_v38 = vadd.f32 %v2520_v32, %v2480_v33  ;;  %v2482_v39 = vadd.f32 %v2481_v35, %v1058_v27  ;;  %v7445_v27 = vld [vmem:[#allocation12 + $0xd94] ss:$28 sps:$4 sm:$0xff]   ;;  %v7377_v29 = vld [vmem:[#allocation12 + $0x968] ss:$28 sps:$4 sm:$0xff]  }
 0x31f   :  { %v2483_v40 = vpop.f32.mrf.mxu1  ;;  %v2524_v41 = vpop.f32.mrf.mxu0  ;;  %v7443_v32 = vld [vmem:[#allocation12 + $0xd90] ss:$28 sps:$4 sm:$0xff]  }
 0x320   :  { %v2523_v42 = vadd.f32 %v2522_v36, %v2482_v39  ;;  %5645 = vmatpush1.bf16.msra.mxu1 %v7344_v34  ;;  %v2693_v44 = vmax.f32 %v2521_v38, 0.0  ;;  %v7382_v33 = vld [vmem:[#allocation12 + $0x934] ss:$28 sps:$4 sm:$0xff]   ;;  %v7451_v34 = vld [vmem:[#allocation12 + $0xd5c] ss:$28 sps:$4 sm:$0xff]  }
 0x321   :  { %v2484_v45 = vpop.f32.mrf.mxu1  ;;  %v2525_v46 = vpop.f32.mrf.mxu0  ;;  %5646 = vmatprep.subr.bf16.mxu1 %v7349_v37  ;;  %v7380_v35 = vld [vmem:[#allocation12 + $0x930] ss:$28 sps:$4 sm:$0xff]   ;;  %v7449_v36 = vld [vmem:[#allocation12 + $0xd58] ss:$28 sps:$4 sm:$0xff]   ;;  %v7457_v38 = vld [vmem:[#allocation12 + $0xd24] ss:$28 sps:$4 sm:$0xff]  }
 0x322   :  { %v2694_v48 = vmax.f32 %v2523_v42, 0.0  ;;  %v8232_v54 = vpack.c.bf16 %v2693_v44, %v2693_v44  ;;  %v7385_v37 = vld [vmem:[#allocation12 + $0x8fc] ss:$28 sps:$4 sm:$0xff]   ;;  %v7388_v41 = vld [vmem:[#allocation12 + $0x8c4] ss:$28 sps:$4 sm:$0xff]  }
 0x323   :  { %v7383_v39 = vld [vmem:[#allocation12 + $0x8f8] ss:$28 sps:$4 sm:$0xff]   ;;  %v7455_v40 = vld [vmem:[#allocation12 + $0xd20] ss:$28 sps:$4 sm:$0xff]   ;;  %v7463_v42 = vld [vmem:[#allocation12 + $0xcec] ss:$28 sps:$4 sm:$0xff]  }
 0x324   :  { %v8230_v49 = vpack.c.bf16 %v2694_v48, %v2694_v48  ;;  %5647 = vmatpush1.bf16.msra.mxu1 %v7347_v43  ;;  %v1061_v43 = vsub.s32 4, %v8164_v28  ;;  %v7386_v44 = vld [vmem:[#allocation12 + $0x8c0] ss:$28 sps:$4 sm:$0xff]   ;;  %v7461_v45 = vld [vmem:[#allocation12 + $0xce8] ss:$28 sps:$4 sm:$0xff]   ;;  %v1065_v48 = vsub.s32 5, %v8164_v28 }
 0x325   :  { %5648 = vmatprep.subr.bf16.mxu1 %v7352_v47  ;;  %v7394_v46 = vld [vmem:[#allocation12 + $0x194] ss:$28 sps:$4 sm:$0xff]  }
 0x326   :  { %5633 = vmatprep.mubr.bf16.mxu0 %v8230_v49  ;;  %v7469_v47 = vld [vmem:[#allocation12 + $0xcb4] ss:$28 sps:$4 sm:$0xff]  }
 0x327   :  { %5634 = vmatmul.mubr.bf16.vlgmr.msra.gmra.mxu0 %v8232_v54 }
 0x328   :  { %5649 = vmatpush1.bf16.msra.mxu1 %v7350_v51  ;;  %5684 = vmatpush1.bf16.msra.mxu0 %v7389_v53  ;;  %v1062_v51 = vrot.slane %v8206_v63, %v1061_v43  ;;  %v7467_v53 = vld [vmem:[#allocation12 + $0xcb0] ss:$28 sps:$4 sm:$0xff]  }
 0x329   :  { %5650 = vmatprep.subr.bf16.mxu1 %v7355_v55  ;;  %5685 = vmatprep.subr.bf16.mxu0 %v7397_v56  ;;  %v7475_v55 = vld [vmem:[#allocation12 + $0xc7c] ss:$28 sps:$4 sm:$0xff]   ;;  %v1066_v56 = vrot.slane %v8206_v63, %v1065_v48 }
 0x32c   :  { %5651 = vmatpush1.bf16.msra.mxu1 %v7353_v57  ;;  %5686 = vmatpush1.bf16.msra.mxu0 %v7395_v58 }
 0x32d   :  { %5652 = vmatprep.subr.bf16.mxu1 %v7358_v59  ;;  %5687 = vmatprep.subr.bf16.mxu0 %v7403_v60  ;;  %v7473_v60 = vld [vmem:[#allocation12 + $0xc78] ss:$28 sps:$4 sm:$0xff]  }
 0x330   :  { %5653 = vmatpush1.bf16.msra.mxu1 %v7356_v61  ;;  %5688 = vmatpush1.bf16.msra.mxu0 %v7401_v62  ;;  %v7481_v62 = vld [vmem:[#allocation12 + $0xc44] ss:$28 sps:$4 sm:$0xff]  }
 0x331   :  { %5654 = vmatprep.subr.bf16.mxu1 %v7361_v0  ;;  %5689 = vmatprep.subr.bf16.mxu0 %v7409_v1 }
 0x334   :  { %5655 = vmatpush1.bf16.msra.mxu1 %v7359_v2  ;;  %5690 = vmatpush1.bf16.msra.mxu0 %v7407_v3 }
 0x335   :  { %5656 = vmatprep.subr.bf16.mxu1 %v7364_v6  ;;  %5691 = vmatprep.subr.bf16.mxu0 %v7415_v7 }
 0x338   :  { %5657 = vmatpush1.bf16.msra.mxu1 %v7362_v8  ;;  %5692 = vmatpush1.bf16.msra.mxu0 %v7413_v9  ;;  %v7479_v8 = vld [vmem:[#allocation12 + $0xc40] ss:$28 sps:$4 sm:$0xff]  }
 0x339   :  { %5658 = vmatprep.subr.bf16.mxu1 %v7367_v10  ;;  %5693 = vmatprep.subr.bf16.mxu0 %v7421_v13  ;;  %v7487_v13 = vld [vmem:[#allocation12 + $0x514] ss:$28 sps:$4 sm:$0xff]  }
 0x33c   :  { %5659 = vmatpush2.bf16.msra.mxu1 %v7365_v11  ;;  %5694 = vmatpush1.bf16.msra.mxu0 %v7419_v12 }
 0x33d   :  { %5660 = vmatprep.subr.bf16.mxu1 %v7370_v17  ;;  %5695 = vmatprep.subr.bf16.mxu0 %v7427_v15  ;;  %v7392_v15 = vld [vmem:[#allocation12 + $0x190] ss:$28 sps:$4 sm:$0xff]  }
 0x340   :  { %5661 = vmatpush2.bf16.msra.mxu1 %v7368_v18  ;;  %5696 = vmatpush1.bf16.msra.mxu0 %v7425_v14  ;;  %v7400_v14 = vld [vmem:[#allocation12 + $0x15c] ss:$28 sps:$4 sm:$0xff]  }
 0x341   :  { %5662 = vmatprep.subr.bf16.mxu1 %v7373_v19  ;;  %5697 = vmatprep.subr.bf16.mxu0 %v7433_v16  ;;  %v7398_v19 = vld [vmem:[#allocation12 + $0x158] ss:$28 sps:$4 sm:$0xff]   ;;  %v7406_v16 = vld [vmem:[#allocation12 + $0x124] ss:$28 sps:$4 sm:$0xff]  }
 0x344   :  { %5663 = vmatpush2.bf16.msra.mxu1 %v7371_v20  ;;  %5698 = vmatpush1.bf16.msra.mxu0 %v7431_v4  ;;  %v7404_v20 = vld [vmem:[#allocation12 + $0x120] ss:$28 sps:$4 sm:$0xff]   ;;  %v7412_v4 = vld [vmem:[#allocation12 + $0xec] ss:$28 sps:$4 sm:$0xff]  }
 0x345   :  { %5664 = vmatprep.subr.bf16.mxu1 %v7376_v21  ;;  %5699 = vmatprep.subr.bf16.mxu0 %v7439_v22  ;;  %v7410_v21 = vld [vmem:[#allocation12 + $0xe8] ss:$28 sps:$4 sm:$0xff]   ;;  %v7418_v22 = vld [vmem:[#allocation12 + $0xb4] ss:$28 sps:$4 sm:$0xff]  }
 0x348   :  { %5665 = vmatpush2.bf16.msra.mxu1 %v7374_v24  ;;  %5700 = vmatpush2.bf16.msra.mxu0 %v7437_v5  ;;  %v7416_v24 = vld [vmem:[#allocation12 + $0xb0] ss:$28 sps:$4 sm:$0xff]   ;;  %v7424_v5 = vld [vmem:[#allocation12 + $0x7c] ss:$28 sps:$4 sm:$0xff]  }
 0x349   :  { %5666 = vmatprep.subr.bf16.mxu1 %v7379_v26  ;;  %5701 = vmatprep.subr.bf16.mxu0 %v7445_v27  ;;  %v7422_v26 = vld [vmem:[#allocation12 + $0x78] ss:$28 sps:$4 sm:$0xff]   ;;  %v7430_v27 = vld [vmem:[#allocation12 + $0x44] ss:$28 sps:$4 sm:$0xff]  }
 0x34c   :  { %5667 = vmatpush2.bf16.msra.mxu1 %v7377_v29  ;;  %5702 = vmatpush2.bf16.msra.mxu0 %v7443_v32  ;;  %v7428_v29 = vld [vmem:[#allocation12 + $0x40] ss:$28 sps:$4 sm:$0xff]   ;;  %v7436_v32 = vld [vmem:[#allocation12 + $0xc] ss:$28 sps:$4 sm:$0xff]  }
 0x34d   :  { %5668 = vmatprep.subr.bf16.mxu1 %v7382_v33  ;;  %5703 = vmatprep.subr.bf16.mxu0 %v7451_v34  ;;  %v7434_v33 = vld [vmem:[#allocation12 + $0x8] ss:$28 sps:$4 sm:$0xff]   ;;  %v7442_v34 = vld [vmem:[#allocation12 + $0x354] ss:$28 sps:$4 sm:$0xff]  }
 0x350   :  { %5669 = vmatpush2.bf16.msra.mxu1 %v7380_v35  ;;  %5704 = vmatpush2.bf16.msra.mxu0 %v7449_v36  ;;  %v7440_v35 = vld [vmem:[#allocation12 + $0x350] ss:$28 sps:$4 sm:$0xff]   ;;  %v7448_v36 = vld [vmem:[#allocation12 + $0x31c] ss:$28 sps:$4 sm:$0xff]  }
 0x351   :  { %5670 = vmatprep.subr.bf16.mxu1 %v7385_v37  ;;  %5705 = vmatprep.subr.bf16.mxu0 %v7457_v38  ;;  %v7446_v37 = vld [vmem:[#allocation12 + $0x318] ss:$28 sps:$4 sm:$0xff]   ;;  %v7454_v38 = vld [vmem:[#allocation12 + $0x2e4] ss:$28 sps:$4 sm:$0xff]  }
 0x354   :  { %5671 = vmatpush2.bf16.msra.mxu1 %v7383_v39  ;;  %5706 = vmatpush2.bf16.msra.mxu0 %v7455_v40  ;;  %v7452_v39 = vld [vmem:[#allocation12 + $0x2e0] ss:$28 sps:$4 sm:$0xff]   ;;  %v7460_v40 = vld [vmem:[#allocation12 + $0x2ac] ss:$28 sps:$4 sm:$0xff]  }
 0x355   :  { %5672 = vmatprep.subr.bf16.mxu1 %v7388_v41  ;;  %5707 = vmatprep.subr.bf16.mxu0 %v7463_v42  ;;  %v7458_v41 = vld [vmem:[#allocation12 + $0x2a8] ss:$28 sps:$4 sm:$0xff]   ;;  %v7466_v42 = vld [vmem:[#allocation12 + $0x274] ss:$28 sps:$4 sm:$0xff]  }
 0x358   :  { %5673 = vmatpush2.bf16.msra.mxu1 %v7386_v44  ;;  %5708 = vmatpush2.bf16.msra.mxu0 %v7461_v45  ;;  %v7464_v44 = vld [vmem:[#allocation12 + $0x270] ss:$28 sps:$4 sm:$0xff]   ;;  %v1069_v45 = vsub.s32 6, %v8164_v28 }
 0x359   :  { %5724 = vmatprep.subr.bf16.mxu1 %v7394_v46  ;;  %5709 = vmatprep.subr.bf16.mxu0 %v7469_v47  ;;  %v7472_v46 = vld [vmem:[#allocation12 + $0x23c] ss:$28 sps:$4 sm:$0xff]   ;;  %v1073_v47 = vsub.s32 7, %v8164_v28 }
 0x35b   :  { %v2561_v57 = vpop.f32.mrf.mxu1 }
 0x35c   :  { %v2562_v58 = vadd.f32 %v2561_v57, %v1062_v51  ;;  %v2602_v59 = vpop.f32.mrf.mxu0  ;;  %5710 = vmatpush2.bf16.msra.mxu0 %v7467_v53  ;;  %v7470_v51 = vld [vmem:[#allocation12 + $0x238] ss:$28 sps:$4 sm:$0xff]   ;;  %v1070_v53 = vrot.slane %v8206_v63, %v1069_v45 }
 0x35d   :  { %v2563_v61 = vpop.f32.mrf.mxu1  ;;  %5711 = vmatprep.subr.bf16.mxu0 %v7475_v55  ;;  %v7478_v55 = vld [vmem:[#allocation12 + $0x204] ss:$28 sps:$4 sm:$0xff]  }
 0x35e   :  { %v2603_v0 = vadd.f32 %v2602_v59, %v2562_v58  ;;  %v2564_v1 = vadd.f32 %v2563_v61, %v1066_v56  ;;  %v2604_v2 = vpop.f32.mrf.mxu0  ;;  %v1074_v56 = vrot.slane %v8206_v63, %v1073_v47  ;;  %v7490_v63 = vld [vmem:[#allocation12 + $0x894] ss:$28 sps:$4 sm:$0xff]   ;;  %v7524_v47 = vld [vmem:[#allocation12 + $0x740] ss:$28 sps:$4 sm:$0xff]  }
 0x35f   :  { %v2565_v3 = vpop.f32.mrf.mxu1 }
 0x360   :  { %v2605_v6 = vadd.f32 %v2604_v2, %v2564_v1  ;;  %v2606_v7 = vpop.f32.mrf.mxu0  ;;  %5712 = vmatpush2.bf16.msra.mxu0 %v7473_v60  ;;  %v2695_v9 = vmax.f32 %v2603_v0, 0.0  ;;  %v7476_v60 = vld [vmem:[#allocation12 + $0x200] ss:$28 sps:$4 sm:$0xff]  }
 0x361   :  { %v2566_v10 = vpop.f32.mrf.mxu1  ;;  %5713 = vmatprep.subr.bf16.mxu0 %v7481_v62  ;;  %v7484_v62 = vld [vmem:[#allocation12 + $0x1cc] ss:$28 sps:$4 sm:$0xff]  }
 0x362   :  { %v2696_v11 = vmax.f32 %v2605_v6, 0.0  ;;  %v2607_v12 = vpop.f32.mrf.mxu0  ;;  %v8246_v18 = vpack.c.bf16 %v2695_v9, %v2695_v9 }
 0x364   :  { %v8244_v17 = vpack.c.bf16 %v2696_v11, %v2696_v11  ;;  %5714 = vmatpush2.bf16.msra.mxu0 %v7479_v8  ;;  %v7482_v8 = vld [vmem:[#allocation12 + $0x1c8] ss:$28 sps:$4 sm:$0xff]  }
 0x365   :  { %5765 = vmatprep.subr.bf16.mxu0 %v7487_v13 }
 0x366   :  { %5674 = vmatprep.mubr.bf16.mxu1 %v8244_v17 }
 0x367   :  { %5675 = vmatmul.mubr.bf16.vlgmr.msra.gmra.mxu1 %v8246_v18 }
 0x368   :  { %5725 = vmatpush1.bf16.msra.mxu1 %v7392_v15  ;;  %5756 = vmatprep.mubr.bf16.mxu1 %v8216_v23  ;;  %v7485_v15 = vld [vmem:[#allocation12 + $0x510] ss:$28 sps:$4 sm:$0xff]  }
 0x369   :  { %5726 = vmatprep.subr.bf16.mxu1 %v7400_v14  ;;  %v7488_v14 = vld [vmem:[#allocation12 + $0x890] ss:$28 sps:$4 sm:$0xff]  }
 0x36c   :  { %5727 = vmatpush1.bf16.msra.mxu1 %v7398_v19 }
 0x36d   :  { %5728 = vmatprep.subr.bf16.mxu1 %v7406_v16  ;;  %v7493_v16 = vld [vmem:[#allocation12 + $0x4dc] ss:$28 sps:$4 sm:$0xff]  }
 0x370   :  { %5729 = vmatpush1.bf16.msra.mxu1 %v7404_v20  ;;  %v7496_v20 = vld [vmem:[#allocation12 + $0x85c] ss:$28 sps:$4 sm:$0xff]  }
 0x371   :  { %5730 = vmatprep.subr.bf16.mxu1 %v7412_v4  ;;  %v7491_v4 = vld [vmem:[#allocation12 + $0x4d8] ss:$28 sps:$4 sm:$0xff]  }
 0x374   :  { %5731 = vmatpush1.bf16.msra.mxu1 %v7410_v21  ;;  %v7494_v21 = vld [vmem:[#allocation12 + $0x858] ss:$28 sps:$4 sm:$0xff]  }
 0x375   :  { %5732 = vmatprep.subr.bf16.mxu1 %v7418_v22  ;;  %v7499_v22 = vld [vmem:[#allocation12 + $0x4a4] ss:$28 sps:$4 sm:$0xff]  }
 0x378   :  { %5733 = vmatpush1.bf16.msra.mxu1 %v7416_v24  ;;  %v7502_v24 = vld [vmem:[#allocation12 + $0x824] ss:$28 sps:$4 sm:$0xff]  }
 0x379   :  { %5734 = vmatprep.subr.bf16.mxu1 %v7424_v5  ;;  %v7497_v5 = vld [vmem:[#allocation12 + $0x4a0] ss:$28 sps:$4 sm:$0xff]  }
 0x37c   :  { %5735 = vmatpush1.bf16.msra.mxu1 %v7422_v26  ;;  %v7500_v26 = vld [vmem:[#allocation12 + $0x820] ss:$28 sps:$4 sm:$0xff]  }
 0x37d   :  { %5736 = vmatprep.subr.bf16.mxu1 %v7430_v27  ;;  %v7505_v27 = vld [vmem:[#allocation12 + $0x46c] ss:$28 sps:$4 sm:$0xff]  }
 0x380   :  { %5737 = vmatpush1.bf16.msra.mxu1 %v7428_v29  ;;  %v7508_v29 = vld [vmem:[#allocation12 + $0x7ec] ss:$28 sps:$4 sm:$0xff]  }
 0x381   :  { %5738 = vmatprep.subr.bf16.mxu1 %v7436_v32  ;;  %v7503_v32 = vld [vmem:[#allocation12 + $0x468] ss:$28 sps:$4 sm:$0xff]  }
 0x384   :  { %5739 = vmatpush1.bf16.msra.mxu1 %v7434_v33  ;;  %v7506_v33 = vld [vmem:[#allocation12 + $0x7e8] ss:$28 sps:$4 sm:$0xff]  }
 0x385   :  { %5740 = vmatprep.subr.bf16.mxu1 %v7442_v34  ;;  %v7511_v34 = vld [vmem:[#allocation12 + $0x434] ss:$28 sps:$4 sm:$0xff]  }
 0x388   :  { %5741 = vmatpush2.bf16.msra.mxu1 %v7440_v35  ;;  %v7514_v35 = vld [vmem:[#allocation12 + $0x7b4] ss:$28 sps:$4 sm:$0xff]  }
 0x389   :  { %5742 = vmatprep.subr.bf16.mxu1 %v7448_v36  ;;  %v7509_v36 = vld [vmem:[#allocation12 + $0x430] ss:$28 sps:$4 sm:$0xff]  }
 0x38c   :  { %5743 = vmatpush2.bf16.msra.mxu1 %v7446_v37  ;;  %v7512_v37 = vld [vmem:[#allocation12 + $0x7b0] ss:$28 sps:$4 sm:$0xff]  }
 0x38d   :  { %5744 = vmatprep.subr.bf16.mxu1 %v7454_v38  ;;  %v7517_v38 = vld [vmem:[#allocation12 + $0x3fc] ss:$28 sps:$4 sm:$0xff]  }
 0x390   :  { %5745 = vmatpush2.bf16.msra.mxu1 %v7452_v39  ;;  %v7520_v39 = vld [vmem:[#allocation12 + $0x77c] ss:$28 sps:$4 sm:$0xff]  }
 0x391   :  { %5746 = vmatprep.subr.bf16.mxu1 %v7460_v40  ;;  %v7515_v40 = vld [vmem:[#allocation12 + $0x3f8] ss:$28 sps:$4 sm:$0xff]  }
 0x394   :  { %5747 = vmatpush2.bf16.msra.mxu1 %v7458_v41  ;;  %v7518_v41 = vld [vmem:[#allocation12 + $0x778] ss:$28 sps:$4 sm:$0xff]  }
 0x395   :  { %5748 = vmatprep.subr.bf16.mxu1 %v7466_v42  ;;  %v7523_v42 = vld [vmem:[#allocation12 + $0x3c4] ss:$28 sps:$4 sm:$0xff]  }
 0x398   :  { %5749 = vmatpush2.bf16.msra.mxu1 %v7464_v44  ;;  %v7526_v44 = vld [vmem:[#allocation12 + $0x744] ss:$28 sps:$4 sm:$0xff]  }
 0x399   :  { %5750 = vmatprep.subr.bf16.mxu1 %v7472_v46  ;;  %v7521_v46 = vld [vmem:[#allocation12 + $0x3c0] ss:$28 sps:$4 sm:$0xff]  }
 0x39b   :  { %v2643_v57 = vpop.f32.mrf.mxu1 }
 0x39c   :  { %v2644_v58 = vadd.f32 %v2643_v57, %v1070_v53  ;;  %v2684_v59 = vpop.f32.mrf.mxu0  ;;  %5751 = vmatpush2.bf16.msra.mxu1 %v7470_v51  ;;  %v7529_v51 = vld [vmem:[#allocation12 + $0x38c] ss:$28 sps:$4 sm:$0xff]   ;;  %v7535_v57 = vld [vmem:[#allocation12 + $0x6d4] ss:$28 sps:$4 sm:$0xff]  }
 0x39d   :  { %v2645_v61 = vpop.f32.mrf.mxu1  ;;  %5752 = vmatprep.subr.bf16.mxu1 %v7478_v55  ;;  %v7532_v53 = vld [vmem:[#allocation12 + $0x70c] ss:$28 sps:$4 sm:$0xff]  }
 0x39e   :  { %v2685_v0 = vadd.f32 %v2684_v59, %v2644_v58  ;;  %v2646_v1 = vadd.f32 %v2645_v61, %v1074_v56  ;;  %v2686_v2 = vpop.f32.mrf.mxu0  ;;  %v7527_v55 = vld [vmem:[#allocation12 + $0x388] ss:$28 sps:$4 sm:$0xff]   ;;  %v7538_v58 = vld [vmem:[#allocation12 + $0xa54] ss:$28 sps:$4 sm:$0xff]   ;;  %v7541_v61 = vld [vmem:[#allocation12 + $0x69c] ss:$28 sps:$4 sm:$0xff]  }
 0x39f   :  { %v2647_v3 = vpop.f32.mrf.mxu1  ;;  %v7530_v56 = vld [vmem:[#allocation12 + $0x708] ss:$28 sps:$4 sm:$0xff]   ;;  %v7533_v59 = vld [vmem:[#allocation12 + $0x6d0] ss:$28 sps:$4 sm:$0xff]  }
 0x3a0   :  { %v2687_v6 = vadd.f32 %v2686_v2, %v2646_v1  ;;  %v2688_v7 = vpop.f32.mrf.mxu0  ;;  %5753 = vmatpush2.bf16.msra.mxu1 %v7476_v60  ;;  %v2697_v9 = vmax.f32 %v2685_v0, 0.0  ;;  %v7536_v60 = vld [vmem:[#allocation12 + $0xa50] ss:$28 sps:$4 sm:$0xff]   ;;  %v7539_v0 = vld [vmem:[#allocation12 + $0x698] ss:$28 sps:$4 sm:$0xff]  }
 0x3a1   :  { %v2648_v10 = vpop.f32.mrf.mxu1  ;;  %5754 = vmatprep.subr.bf16.mxu1 %v7484_v62  ;;  %v7544_v62 = vld [vmem:[#allocation12 + $0xa1c] ss:$28 sps:$4 sm:$0xff]   ;;  %v7547_v2 = vld [vmem:[#allocation12 + $0x664] ss:$28 sps:$4 sm:$0xff]  }
 0x3a2   :  { %v2698_v13 = vmax.f32 %v2687_v6, 0.0  ;;  %v2689_v11 = vpop.f32.mrf.mxu0  ;;  %v8259_v19 = vpack.c.bf16 %v2697_v9, %v2697_v9  ;;  %v7542_v1 = vld [vmem:[#allocation12 + $0xa18] ss:$28 sps:$4 sm:$0xff]   ;;  %v7550_v3 = vld [vmem:[#allocation12 + $0x9e4] ss:$28 sps:$4 sm:$0xff]  }
 0x3a3   :  { %v7545_v6 = vld [vmem:[#allocation12 + $0x660] ss:$28 sps:$4 sm:$0xff]   ;;  %v7556_v9 = vld [vmem:[#allocation12 + $0x9ac] ss:$28 sps:$4 sm:$0xff]   ;;  %v7562_v11 = vld [vmem:[#allocation12 + $0x974] ss:$28 sps:$4 sm:$0xff]  }
 0x3a4   :  { %v8257_v12 = vpack.c.bf16 %v2698_v13, %v2698_v13  ;;  %5755 = vmatpush2.bf16.msra.mxu1 %v7482_v8  ;;  %v7548_v7 = vld [vmem:[#allocation12 + $0x9e0] ss:$28 sps:$4 sm:$0xff]   ;;  %v7553_v8 = vld [vmem:[#allocation12 + $0x62c] ss:$28 sps:$4 sm:$0xff]   ;;  %v7559_v13 = vld [vmem:[#allocation12 + $0x5f4] ss:$28 sps:$4 sm:$0xff]  }
 0x3a5   :  { %5806 = vmatprep.subr.bf16.mxu1 %v7490_v63  ;;  %v7551_v10 = vld [vmem:[#allocation12 + $0x628] ss:$28 sps:$4 sm:$0xff]  }
 0x3a6   :  { %5715 = vmatprep.mubr.bf16.mxu0 %v8257_v12  ;;  %v7554_v63 = vld [vmem:[#allocation12 + $0x9a8] ss:$28 sps:$4 sm:$0xff]  }
 0x3a7   :  { %5757 = vmatmul.mubr.bf16.vlgmr.msra.gmra.mxu1 %v8225_v25  ;;  %5716 = vmatmul.mubr.bf16.vlgmr.msra.gmra.mxu0 %v8259_v19 }
 0x3a8   :  { %5766 = vmatpush1.bf16.msra.mxu0 %v7485_v15  ;;  %5807 = vmatpush1.bf16.msra.mxu1 %v7488_v14  ;;  %v7557_v15 = vld [vmem:[#allocation12 + $0x5f0] ss:$28 sps:$4 sm:$0xff]  }
 0x3a9   :  { %5838 = vmatprep.mubr.bf16.mxu1 %v8244_v17  ;;  %5797 = vmatprep.mubr.bf16.mxu0 %v8230_v49  ;;  %v7560_v14 = vld [vmem:[#allocation12 + $0x970] ss:$28 sps:$4 sm:$0xff]  }
 0x3aa   :  { %5767 = vmatprep.subr.bf16.mxu0 %v7493_v16  ;;  %5808 = vmatprep.subr.bf16.mxu1 %v7496_v20  ;;  %v7565_v16 = vld [vmem:[#allocation12 + $0x5bc] ss:$28 sps:$4 sm:$0xff]  }
 0x3ab   :  { %v7568_v20 = vld [vmem:[#allocation12 + $0x93c] ss:$28 sps:$4 sm:$0xff]  }
 0x3ac   :  { %5768 = vmatpush1.bf16.msra.mxu0 %v7491_v4  ;;  %5809 = vmatpush1.bf16.msra.mxu1 %v7494_v21  ;;  %v7563_v4 = vld [vmem:[#allocation12 + $0x5b8] ss:$28 sps:$4 sm:$0xff]  }
 0x3ad   :  { %5769 = vmatprep.subr.bf16.mxu0 %v7499_v22  ;;  %5810 = vmatprep.subr.bf16.mxu1 %v7502_v24  ;;  %v7566_v21 = vld [vmem:[#allocation12 + $0x938] ss:$28 sps:$4 sm:$0xff]   ;;  %v7571_v22 = vld [vmem:[#allocation12 + $0x584] ss:$28 sps:$4 sm:$0xff]  }
 0x3ae   :  { %v7574_v24 = vld [vmem:[#allocation12 + $0x904] ss:$28 sps:$4 sm:$0xff]  }
 0x3b0   :  { %5770 = vmatpush1.bf16.msra.mxu0 %v7497_v5  ;;  %5811 = vmatpush1.bf16.msra.mxu1 %v7500_v26  ;;  %v7569_v26 = vld [vmem:[#allocation12 + $0x580] ss:$28 sps:$4 sm:$0xff]  }
 0x3b1   :  { %5771 = vmatprep.subr.bf16.mxu0 %v7505_v27  ;;  %5812 = vmatprep.subr.bf16.mxu1 %v7508_v29  ;;  %v7572_v27 = vld [vmem:[#allocation12 + $0x900] ss:$28 sps:$4 sm:$0xff]  }
 0x3b4   :  { %5772 = vmatpush1.bf16.msra.mxu0 %v7503_v32  ;;  %5813 = vmatpush1.bf16.msra.mxu1 %v7506_v33  ;;  %v7577_v32 = vld [vmem:[#allocation12 + $0x54c] ss:$28 sps:$4 sm:$0xff]  }
 0x3b5   :  { %5773 = vmatprep.subr.bf16.mxu0 %v7511_v34  ;;  %5814 = vmatprep.subr.bf16.mxu1 %v7514_v35  ;;  %v7580_v33 = vld [vmem:[#allocation12 + $0x8cc] ss:$28 sps:$4 sm:$0xff]   ;;  %v8266_v34 = vld [vmem:[#allocation13] sm:$0xff] }
 0x3b8   :  { %5774 = vmatpush1.bf16.msra.mxu0 %v7509_v36  ;;  %5815 = vmatpush1.bf16.msra.mxu1 %v7512_v37  ;;  %v7575_v36 = vld [vmem:[#allocation12 + $0x548] ss:$28 sps:$4 sm:$0xff]  }
 0x3b9   :  { %5775 = vmatprep.subr.bf16.mxu0 %v7517_v38  ;;  %5816 = vmatprep.subr.bf16.mxu1 %v7520_v39  ;;  %v7578_v37 = vld [vmem:[#allocation12 + $0x8c8] ss:$28 sps:$4 sm:$0xff]   ;;  %v7583_v39 = vld [vmem:[#allocation12 + $0xc14] ss:$28 sps:$4 sm:$0xff]  }
 0x3bc   :  { %5776 = vmatpush1.bf16.msra.mxu0 %v7515_v40  ;;  %5817 = vmatpush1.bf16.msra.mxu1 %v7518_v41  ;;  %v7586_v40 = vld [vmem:[#allocation12 + $0x19c] ss:$28 sps:$4 sm:$0xff]   ;;  %v3224_v41 = vrot.slane %v8266_v34, %v8167_v30 }
 0x3bd   :  { %5777 = vmatprep.subr.bf16.mxu0 %v7523_v42  ;;  %5818 = vmatprep.subr.bf16.mxu1 %v7526_v44  ;;  %v3228_v42 = vrot.slane %v8266_v34, %v8170_v31  ;;  %v7581_v44 = vld [vmem:[#allocation12 + $0xc10] ss:$28 sps:$4 sm:$0xff]   ;;  %v7587_v30 = vld [vmem:[#allocation12 + $0xbd8] ss:$28 sps:$4 sm:$0xff]  }
 0x3c0   :  { %5778 = vmatpush1.bf16.msra.mxu0 %v7521_v46  ;;  %5819 = vmatpush1.bf16.msra.mxu1 %v7524_v47  ;;  %v7584_v46 = vld [vmem:[#allocation12 + $0x198] ss:$28 sps:$4 sm:$0xff]  }
 0x3c1   :  { %5779 = vmatprep.subr.bf16.mxu0 %v7529_v51  ;;  %5820 = vmatprep.subr.bf16.mxu1 %v7532_v53  ;;  %v7589_v51 = vld [vmem:[#allocation12 + $0xbdc] ss:$28 sps:$4 sm:$0xff]   ;;  %v7592_v53 = vld [vmem:[#allocation12 + $0x164] ss:$28 sps:$4 sm:$0xff]  }
 0x3c4   :  { %5780 = vmatpush1.bf16.msra.mxu0 %v7527_v55  ;;  %5821 = vmatpush1.bf16.msra.mxu1 %v7530_v56 }
 0x3c5   :  { %5781 = vmatprep.subr.bf16.mxu0 %v7535_v57  ;;  %5822 = vmatprep.subr.bf16.mxu1 %v7538_v58  ;;  %v7590_v58 = vld [vmem:[#allocation12 + $0x160] ss:$28 sps:$4 sm:$0xff]  }
 0x3c8   :  { %5782 = vmatpush2.bf16.msra.mxu0 %v7533_v59  ;;  %5823 = vmatpush2.bf16.msra.mxu1 %v7536_v60  ;;  %v7595_v59 = vld [vmem:[#allocation12 + $0xba4] ss:$28 sps:$4 sm:$0xff]  }
 0x3c9   :  { %5783 = vmatprep.subr.bf16.mxu0 %v7541_v61  ;;  %5824 = vmatprep.subr.bf16.mxu1 %v7544_v62  ;;  %v7598_v61 = vld [vmem:[#allocation12 + $0x12c] ss:$28 sps:$4 sm:$0xff]  }
 0x3cc   :  { %5784 = vmatpush2.bf16.msra.mxu0 %v7539_v0  ;;  %5825 = vmatpush2.bf16.msra.mxu1 %v7542_v1  ;;  %v7593_v0 = vld [vmem:[#allocation12 + $0xba0] ss:$28 sps:$4 sm:$0xff]  }
 0x3cd   :  { %5785 = vmatprep.subr.bf16.mxu0 %v7547_v2  ;;  %5826 = vmatprep.subr.bf16.mxu1 %v7550_v3  ;;  %v7596_v2 = vld [vmem:[#allocation12 + $0x128] ss:$28 sps:$4 sm:$0xff]  }
 0x3ce   :  { %v7601_v3 = vld [vmem:[#allocation12 + $0xb6c] ss:$28 sps:$4 sm:$0xff]  }
 0x3d0   :  { %5786 = vmatpush2.bf16.msra.mxu0 %v7545_v6  ;;  %5827 = vmatpush2.bf16.msra.mxu1 %v7548_v7  ;;  %v7604_v6 = vld [vmem:[#allocation12 + $0xf4] ss:$28 sps:$4 sm:$0xff]   ;;  %v7599_v7 = vld [vmem:[#allocation12 + $0xb68] ss:$28 sps:$4 sm:$0xff]  }
 0x3d1   :  { %5787 = vmatprep.subr.bf16.mxu0 %v7553_v8  ;;  %5828 = vmatprep.subr.bf16.mxu1 %v7556_v9  ;;  %v7602_v8 = vld [vmem:[#allocation12 + $0xf0] ss:$28 sps:$4 sm:$0xff]  }
 0x3d2   :  { %v7607_v9 = vld [vmem:[#allocation12 + $0xb34] ss:$28 sps:$4 sm:$0xff]  }
 0x3d4   :  { %5788 = vmatpush2.bf16.msra.mxu0 %v7551_v10  ;;  %5829 = vmatpush2.bf16.msra.mxu1 %v7554_v63  ;;  %v7610_v10 = vld [vmem:[#allocation12 + $0xbc] ss:$28 sps:$4 sm:$0xff]   ;;  %v7605_v63 = vld [vmem:[#allocation12 + $0xb30] ss:$28 sps:$4 sm:$0xff]  }
 0x3d5   :  { %5789 = vmatprep.subr.bf16.mxu0 %v7559_v13  ;;  %5830 = vmatprep.subr.bf16.mxu1 %v7562_v11  ;;  %v7608_v13 = vld [vmem:[#allocation12 + $0xb8] ss:$28 sps:$4 sm:$0xff]  }
 0x3d6   :  { %v7613_v11 = vld [vmem:[#allocation12 + $0xafc] ss:$28 sps:$4 sm:$0xff]  }
 0x3d8   :  { %5790 = vmatpush2.bf16.msra.mxu0 %v7557_v15  ;;  %5831 = vmatpush2.bf16.msra.mxu1 %v7560_v14  ;;  %v7616_v15 = vld [vmem:[#allocation12 + $0x84] ss:$28 sps:$4 sm:$0xff]   ;;  %v7611_v14 = vld [vmem:[#allocation12 + $0xaf8] ss:$28 sps:$4 sm:$0xff]  }
 0x3d9   :  { %5791 = vmatprep.subr.bf16.mxu0 %v7565_v16  ;;  %5832 = vmatprep.subr.bf16.mxu1 %v7568_v20  ;;  %v7614_v16 = vld [vmem:[#allocation12 + $0x80] ss:$28 sps:$4 sm:$0xff]  }
 0x3da   :  { %v7619_v20 = vld [vmem:[#allocation12 + $0xac4] ss:$28 sps:$4 sm:$0xff]  }
 0x3db   :  { %v5594_v5 = vpop.f32.mrf.mxu1 }
 0x3dc   :  { %5792 = vmatpush2.bf16.msra.mxu0 %v7563_v4  ;;  %5833 = vmatpush2.bf16.msra.mxu1 %v7566_v21  ;;  %v5595_v47 = vadd.f32 %v5594_v5, %v3224_v41  ;;  %v7622_v4 = vld [vmem:[#allocation12 + $0x4c] ss:$28 sps:$4 sm:$0xff]   ;;  %v7617_v21 = vld [vmem:[#allocation12 + $0xac0] ss:$28 sps:$4 sm:$0xff]   ;;  %v7628_v5 = vld [vmem:[#allocation12 + $0x14] ss:$28 sps:$4 sm:$0xff]  }
 0x3dd   :  { %v5596_v29 = vpop.f32.mrf.mxu1  ;;  %5793 = vmatprep.subr.bf16.mxu0 %v7571_v22  ;;  %5834 = vmatprep.subr.bf16.mxu1 %v7574_v24  ;;  %v7620_v22 = vld [vmem:[#allocation12 + $0x48] ss:$28 sps:$4 sm:$0xff]  }
 0x3de   :  { %v5597_v56 = vadd.f32 %v5596_v29, %v3228_v42  ;;  %v7625_v24 = vld [vmem:[#allocation12 + $0xa8c] ss:$28 sps:$4 sm:$0xff]   ;;  %v7631_v29 = vld [vmem:[#allocation12 + $0xdd4] ss:$28 sps:$4 sm:$0xff]   ;;  %v7641_v42 = vld [vmem:[#allocation12 + $0xd60] ss:$28 sps:$4 sm:$0xff]  }
 0x3df   :  { %v5598_v35 = vpop.f32.mrf.mxu1  ;;  %v7646_v41 = vld [vmem:[#allocation12 + $0x2ec] ss:$28 sps:$4 sm:$0xff]  }
 0x3e0   :  { %5794 = vmatpush2.bf16.msra.mxu0 %v7569_v26  ;;  %5835 = vmatpush2.bf16.msra.mxu1 %v7572_v27  ;;  %v7623_v26 = vld [vmem:[#allocation12 + $0xa88] ss:$28 sps:$4 sm:$0xff]   ;;  %v7626_v27 = vld [vmem:[#allocation12 + $0x10] ss:$28 sps:$4 sm:$0xff]   ;;  %v7632_v35 = vld [vmem:[#allocation12 + $0x358] ss:$28 sps:$4 sm:$0xff]  }
 0x3e1   :  { %v5599_v38 = vpop.f32.mrf.mxu1  ;;  %5795 = vmatprep.subr.bf16.mxu0 %v7577_v32  ;;  %5836 = vmatprep.subr.bf16.mxu1 %v7580_v33  ;;  %v7634_v32 = vld [vmem:[#allocation12 + $0x35c] ss:$28 sps:$4 sm:$0xff]   ;;  %v7629_v33 = vld [vmem:[#allocation12 + $0xdd0] ss:$28 sps:$4 sm:$0xff]  }
 0x3e2   :  { %v7635_v38 = vld [vmem:[#allocation12 + $0xd98] ss:$28 sps:$4 sm:$0xff]  }
 0x3e4   :  { %5796 = vmatpush2.bf16.msra.mxu0 %v7575_v36  ;;  %5837 = vmatpush2.bf16.msra.mxu1 %v7578_v37  ;;  %v7637_v36 = vld [vmem:[#allocation12 + $0xd9c] ss:$28 sps:$4 sm:$0xff]   ;;  %v7640_v37 = vld [vmem:[#allocation12 + $0x324] ss:$28 sps:$4 sm:$0xff]  }
 0x3e5   :  { %5847 = vmatprep.subr.bf16.mxu0 %v7583_v39  ;;  %5888 = vmatprep.subr.bf16.mxu1 %v7586_v40  ;;  %v7638_v39 = vld [vmem:[#allocation12 + $0x320] ss:$28 sps:$4 sm:$0xff]  }
 0x3e6   :  { %v7643_v40 = vld [vmem:[#allocation12 + $0xd64] ss:$28 sps:$4 sm:$0xff]  }
 0x3e7   :  { %5798 = vmatmul.mubr.bf16.vlgmr.msra.gmra.mxu0 %v8232_v54  ;;  %5839 = vmatmul.mubr.bf16.vlgmr.msra.gmra.mxu1 %v8246_v18  ;;  %v5635_v55 = vpop.f32.mrf.mxu0 }
 0x3e8   :  { %v8274_v57 = vadd.f32 %v5635_v55, %v5595_v47  ;;  %5848 = vmatpush1.bf16.msra.mxu0 %v7581_v44  ;;  %5879 = vmatprep.mubr.bf16.mxu0 %v8257_v12  ;;  %v7644_v44 = vld [vmem:[#allocation12 + $0x2e8] ss:$28 sps:$4 sm:$0xff]   ;;  %v7652_v47 = vld [vmem:[#allocation12 + $0x2b4] ss:$28 sps:$4 sm:$0xff]  }
 0x3e9   :  { %5889 = vmatpush1.bf16.msra.mxu1 %v7584_v46  ;;  %5920 = vmatprep.mubr.bf16.mxu1 %v8216_v23  ;;  %v5637_v31 = vpop.f32.mrf.mxu0  ;;  %v7649_v46 = vld [vmem:[#allocation12 + $0xd2c] ss:$28 sps:$4 sm:$0xff]   ;;  %v7655_v55 = vld [vmem:[#allocation12 + $0xcf4] ss:$28 sps:$4 sm:$0xff]  }
 0x3ea   :  { %v8278_v60 = vadd.f32 %v5637_v31, %v5597_v56  ;;  %5849 = vmatprep.subr.bf16.mxu0 %v7589_v51  ;;  %5890 = vmatprep.subr.bf16.mxu1 %v7592_v53  ;;  %v7647_v51 = vld [vmem:[#allocation12 + $0xd28] ss:$28 sps:$4 sm:$0xff]   ;;  %v7650_v53 = vld [vmem:[#allocation12 + $0x2b0] ss:$28 sps:$4 sm:$0xff]   ;;  %v7658_v56 = vld [vmem:[#allocation12 + $0x27c] ss:$28 sps:$4 sm:$0xff]  }
 0x3eb   :  { %v5639_v62 = vpop.f32.mrf.mxu0  ;;  %v7656_v31 = vld [vmem:[#allocation12 + $0x278] ss:$28 sps:$4 sm:$0xff]  }
 0x3ec   :  { %5850 = vmatpush1.bf16.msra.mxu0 %v7587_v30  ;;  %v7653_v30 = vld [vmem:[#allocation12 + $0xcf0] ss:$28 sps:$4 sm:$0xff]   ;;  %v7662_v62 = vld [vmem:[#allocation12 + $0x240] ss:$28 sps:$4 sm:$0xff]  }
 0x3ed   :  { %5891 = vmatpush1.bf16.msra.mxu1 %v7590_v58  ;;  %v5640_v1 = vpop.f32.mrf.mxu0  ;;  %5851 = vmatprep.subr.bf16.mxu0 %v7595_v59  ;;  %v7661_v58 = vld [vmem:[#allocation12 + $0xcbc] ss:$28 sps:$4 sm:$0xff]   ;;  %v7664_v59 = vld [vmem:[#allocation12 + $0x244] ss:$28 sps:$4 sm:$0xff]  }
 0x3ee   :  { %5892 = vmatprep.subr.bf16.mxu1 %v7598_v61  ;;  %v7659_v61 = vld [vmem:[#allocation12 + $0xcb8] ss:$28 sps:$4 sm:$0xff]   ;;  %v7670_v1 = vld [vmem:[#allocation12 + $0x20c] ss:$28 sps:$4 sm:$0xff]  }
 0x3f0   :  { %5852 = vmatpush1.bf16.msra.mxu0 %v7593_v0  ;;  %v7667_v0 = vld [vmem:[#allocation12 + $0xc84] ss:$28 sps:$4 sm:$0xff]  }
 0x3f1   :  { %5893 = vmatpush1.bf16.msra.mxu1 %v7596_v2  ;;  %5853 = vmatprep.subr.bf16.mxu0 %v7601_v3  ;;  %v7665_v2 = vld [vmem:[#allocation12 + $0xc80] ss:$28 sps:$4 sm:$0xff]   ;;  %v7668_v3 = vld [vmem:[#allocation12 + $0x208] ss:$28 sps:$4 sm:$0xff]  }
 0x3f2   :  { %5894 = vmatprep.subr.bf16.mxu1 %v7604_v6  ;;  %v7673_v6 = vld [vmem:[#allocation12 + $0xc4c] ss:$28 sps:$4 sm:$0xff]  }
 0x3f4   :  { %5854 = vmatpush1.bf16.msra.mxu0 %v7599_v7  ;;  %v7676_v7 = vld [vmem:[#allocation12 + $0x1d4] ss:$28 sps:$4 sm:$0xff]  }
 0x3f5   :  { %5895 = vmatpush1.bf16.msra.mxu1 %v7602_v8  ;;  %5855 = vmatprep.subr.bf16.mxu0 %v7607_v9  ;;  %v7671_v8 = vld [vmem:[#allocation12 + $0xc48] ss:$28 sps:$4 sm:$0xff]   ;;  %v7674_v9 = vld [vmem:[#allocation12 + $0x1d0] ss:$28 sps:$4 sm:$0xff]  }
 0x3f6   :  { %5896 = vmatprep.subr.bf16.mxu1 %v7610_v10  ;;  %v7679_v10 = vld [vmem:[#allocation12 + $0x51c] ss:$28 sps:$4 sm:$0xff]  }
 0x3f8   :  { %5856 = vmatpush1.bf16.msra.mxu0 %v7605_v63  ;;  %v7682_v63 = vld [vmem:[#allocation12 + $0x89c] ss:$28 sps:$4 sm:$0xff]  }
 0x3f9   :  { %5897 = vmatpush1.bf16.msra.mxu1 %v7608_v13  ;;  %5857 = vmatprep.subr.bf16.mxu0 %v7613_v11  ;;  %v7677_v13 = vld [vmem:[#allocation12 + $0x518] ss:$28 sps:$4 sm:$0xff]  }
 0x3fa   :  { %5898 = vmatprep.subr.bf16.mxu1 %v7616_v15  ;;  %v7680_v11 = vld [vmem:[#allocation12 + $0x898] ss:$28 sps:$4 sm:$0xff]   ;;  %v7685_v15 = vld [vmem:[#allocation12 + $0x4e4] ss:$28 sps:$4 sm:$0xff]  }
 0x3fc   :  { %5858 = vmatpush1.bf16.msra.mxu0 %v7611_v14 }
 0x3fd   :  { %5899 = vmatpush1.bf16.msra.mxu1 %v7614_v16  ;;  %5859 = vmatprep.subr.bf16.mxu0 %v7619_v20  ;;  %v7688_v16 = vld [vmem:[#allocation12 + $0x864] ss:$28 sps:$4 sm:$0xff]  }
 0x3fe   :  { %5900 = vmatprep.subr.bf16.mxu1 %v7622_v4  ;;  %v7683_v20 = vld [vmem:[#allocation12 + $0x4e0] ss:$28 sps:$4 sm:$0xff]  }
 0x400   :  { %5860 = vmatpush1.bf16.msra.mxu0 %v7617_v21  ;;  %v7686_v21 = vld [vmem:[#allocation12 + $0x860] ss:$28 sps:$4 sm:$0xff]  }
 0x401   :  { %5901 = vmatpush1.bf16.msra.mxu1 %v7620_v22  ;;  %5861 = vmatprep.subr.bf16.mxu0 %v7625_v24  ;;  %v7691_v22 = vld [vmem:[#allocation12 + $0x4ac] ss:$28 sps:$4 sm:$0xff]  }
 0x402   :  { %5902 = vmatprep.subr.bf16.mxu1 %v7628_v5  ;;  %v7694_v24 = vld [vmem:[#allocation12 + $0x82c] ss:$28 sps:$4 sm:$0xff]  }
 0x404   :  { %5862 = vmatpush1.bf16.msra.mxu0 %v7623_v26  ;;  %v7689_v26 = vld [vmem:[#allocation12 + $0x4a8] ss:$28 sps:$4 sm:$0xff]  }
 0x405   :  { %5903 = vmatpush1.bf16.msra.mxu1 %v7626_v27  ;;  %5863 = vmatprep.subr.bf16.mxu0 %v7631_v29  ;;  %v7692_v29 = vld [vmem:[#allocation12 + $0x828] ss:$28 sps:$4 sm:$0xff]  }
 0x406   :  { %5904 = vmatprep.subr.bf16.mxu1 %v7634_v32  ;;  %v7697_v32 = vld [vmem:[#allocation12 + $0x474] ss:$28 sps:$4 sm:$0xff]  }
 0x408   :  { %5864 = vmatpush2.bf16.msra.mxu0 %v7629_v33  ;;  %v7700_v33 = vld [vmem:[#allocation12 + $0x7f4] ss:$28 sps:$4 sm:$0xff]  }
 0x409   :  { %5905 = vmatpush2.bf16.msra.mxu1 %v7632_v35  ;;  %5865 = vmatprep.subr.bf16.mxu0 %v7637_v36  ;;  %v7695_v35 = vld [vmem:[#allocation12 + $0x470] ss:$28 sps:$4 sm:$0xff]  }
 0x40a   :  { %5906 = vmatprep.subr.bf16.mxu1 %v7640_v37  ;;  %v7698_v36 = vld [vmem:[#allocation12 + $0x7f0] ss:$28 sps:$4 sm:$0xff]   ;;  %v7703_v37 = vld [vmem:[#allocation12 + $0x43c] ss:$28 sps:$4 sm:$0xff]  }
 0x40c   :  { %5866 = vmatpush2.bf16.msra.mxu0 %v7635_v38  ;;  %v7706_v38 = vld [vmem:[#allocation12 + $0x7bc] ss:$28 sps:$4 sm:$0xff]  }
 0x40d   :  { %5907 = vmatpush2.bf16.msra.mxu1 %v7638_v39  ;;  %5867 = vmatprep.subr.bf16.mxu0 %v7643_v40  ;;  %v7701_v39 = vld [vmem:[#allocation12 + $0x438] ss:$28 sps:$4 sm:$0xff]  }
 0x40e   :  { %5908 = vmatprep.subr.bf16.mxu1 %v7646_v41  ;;  %v7704_v40 = vld [vmem:[#allocation12 + $0x7b8] ss:$28 sps:$4 sm:$0xff]   ;;  %v7709_v41 = vld [vmem:[#allocation12 + $0x404] ss:$28 sps:$4 sm:$0xff]  }
 0x410   :  { %5868 = vmatpush2.bf16.msra.mxu0 %v7641_v42  ;;  %v7712_v42 = vld [vmem:[#allocation12 + $0x784] ss:$28 sps:$4 sm:$0xff]  }
 0x411   :  { %5909 = vmatpush2.bf16.msra.mxu1 %v7644_v44  ;;  %5869 = vmatprep.subr.bf16.mxu0 %v7649_v46  ;;  %v7707_v44 = vld [vmem:[#allocation12 + $0x400] ss:$28 sps:$4 sm:$0xff]  }
 0x412   :  { %5910 = vmatprep.subr.bf16.mxu1 %v7652_v47  ;;  %v7710_v46 = vld [vmem:[#allocation12 + $0x780] ss:$28 sps:$4 sm:$0xff]   ;;  %v7715_v47 = vld [vmem:[#allocation12 + $0x3cc] ss:$28 sps:$4 sm:$0xff]  }
 0x414   :  { %5870 = vmatpush2.bf16.msra.mxu0 %v7647_v51  ;;  %v7718_v51 = vld [vmem:[#allocation12 + $0x74c] ss:$28 sps:$4 sm:$0xff]  }
 0x415   :  { %5911 = vmatpush2.bf16.msra.mxu1 %v7650_v53  ;;  %5871 = vmatprep.subr.bf16.mxu0 %v7655_v55  ;;  %v7713_v53 = vld [vmem:[#allocation12 + $0x3c8] ss:$28 sps:$4 sm:$0xff]  }
 0x416   :  { %5912 = vmatprep.subr.bf16.mxu1 %v7658_v56  ;;  %v7716_v55 = vld [vmem:[#allocation12 + $0x748] ss:$28 sps:$4 sm:$0xff]   ;;  %v7721_v56 = vld [vmem:[#allocation12 + $0x394] ss:$28 sps:$4 sm:$0xff]  }
 0x418   :  { %5872 = vmatpush2.bf16.msra.mxu0 %v7653_v30  ;;  %v7724_v30 = vld [vmem:[#allocation12 + $0x714] ss:$28 sps:$4 sm:$0xff]  }
 0x419   :  { %5913 = vmatpush2.bf16.msra.mxu1 %v7656_v31  ;;  %5873 = vmatprep.subr.bf16.mxu0 %v7661_v58  ;;  %v7719_v31 = vld [vmem:[#allocation12 + $0x390] ss:$28 sps:$4 sm:$0xff]  }
 0x41a   :  { %5914 = vmatprep.subr.bf16.mxu1 %v7664_v59  ;;  %v7722_v58 = vld [vmem:[#allocation12 + $0x710] ss:$28 sps:$4 sm:$0xff]   ;;  %v7727_v59 = vld [vmem:[#allocation12 + $0x6dc] ss:$28 sps:$4 sm:$0xff]  }
 0x41c   :  { %5874 = vmatpush2.bf16.msra.mxu0 %v7659_v61  ;;  %v7730_v61 = vld [vmem:[#allocation12 + $0xa5c] ss:$28 sps:$4 sm:$0xff]  }
 0x41d   :  { %5915 = vmatpush2.bf16.msra.mxu1 %v7662_v62  ;;  %5875 = vmatprep.subr.bf16.mxu0 %v7667_v0  ;;  %v7725_v62 = vld [vmem:[#allocation12 + $0x6d8] ss:$28 sps:$4 sm:$0xff]  }
 0x41e   :  { %5916 = vmatprep.subr.bf16.mxu1 %v7670_v1  ;;  %v7728_v0 = vld [vmem:[#allocation12 + $0xa58] ss:$28 sps:$4 sm:$0xff]   ;;  %v7733_v1 = vld [vmem:[#allocation12 + $0x6a4] ss:$28 sps:$4 sm:$0xff]  }
 0x420   :  { %5876 = vmatpush2.bf16.msra.mxu0 %v7665_v2  ;;  %v7736_v2 = vld [vmem:[#allocation12 + $0xa24] ss:$28 sps:$4 sm:$0xff]  }
 0x421   :  { %5917 = vmatpush2.bf16.msra.mxu1 %v7668_v3  ;;  %5877 = vmatprep.subr.bf16.mxu0 %v7673_v6  ;;  %v7731_v3 = vld [vmem:[#allocation12 + $0x6a0] ss:$28 sps:$4 sm:$0xff]  }
 0x422   :  { %5918 = vmatprep.subr.bf16.mxu1 %v7676_v7  ;;  %v7734_v6 = vld [vmem:[#allocation12 + $0xa20] ss:$28 sps:$4 sm:$0xff]   ;;  %v7739_v7 = vld [vmem:[#allocation12 + $0x66c] ss:$28 sps:$4 sm:$0xff]  }
 0x424   :  { %5878 = vmatpush2.bf16.msra.mxu0 %v7671_v8  ;;  %v7742_v8 = vld [vmem:[#allocation12 + $0x9ec] ss:$28 sps:$4 sm:$0xff]  }
 0x425   :  { %5919 = vmatpush2.bf16.msra.mxu1 %v7674_v9  ;;  %5929 = vmatprep.subr.bf16.mxu0 %v7679_v10  ;;  %v7737_v9 = vld [vmem:[#allocation12 + $0x668] ss:$28 sps:$4 sm:$0xff]  }
 0x426   :  { %5970 = vmatprep.subr.bf16.mxu1 %v7682_v63  ;;  %v7740_v10 = vld [vmem:[#allocation12 + $0x9e8] ss:$28 sps:$4 sm:$0xff]   ;;  %v7745_v63 = vld [vmem:[#allocation12 + $0x634] ss:$28 sps:$4 sm:$0xff]  }
 0x427   :  { %5880 = vmatmul.mubr.bf16.vlgmr.msra.gmra.mxu0 %v8259_v19  ;;  %v8281_v14 = vpop.f32.mrf.mxu1 }
 0x428   :  { %5921 = vmatmul.mubr.bf16.vlgmr.msra.gmra.mxu1 %v8225_v25  ;;  %5930 = vmatpush1.bf16.msra.mxu0 %v7677_v13  ;;  %v7748_v13 = vld [vmem:[#allocation12 + $0x9b4] ss:$28 sps:$4 sm:$0xff]  }
 0x429   :  { %5961 = vmatprep.mubr.bf16.mxu0 %v8230_v49  ;;  %5971 = vmatpush1.bf16.msra.mxu1 %v7680_v11  ;;  %v8285_v4 = vpop.f32.mrf.mxu1  ;;  %v7743_v11 = vld [vmem:[#allocation12 + $0x630] ss:$28 sps:$4 sm:$0xff]  }
 0x42a   :  { %6002 = vmatprep.mubr.bf16.mxu1 %v8244_v17  ;;  %5931 = vmatprep.subr.bf16.mxu0 %v7685_v15  ;;  %v7746_v15 = vld [vmem:[#allocation12 + $0x9b0] ss:$28 sps:$4 sm:$0xff]  }
 0x42b   :  { %5972 = vmatprep.subr.bf16.mxu1 %v7688_v16  ;;  %v5680_v5 = vpop.f32.mrf.mxu1  ;;  %v7751_v16 = vld [vmem:[#allocation12 + $0x5fc] ss:$28 sps:$4 sm:$0xff]  }
 0x42c   :  { %5932 = vmatpush1.bf16.msra.mxu0 %v7683_v20  ;;  %v7754_v20 = vld [vmem:[#allocation12 + $0x97c] ss:$28 sps:$4 sm:$0xff]   ;;  %v7760_v5 = vld [vmem:[#allocation12 + $0x944] ss:$28 sps:$4 sm:$0xff]  }
 0x42d   :  { %5973 = vmatpush1.bf16.msra.mxu1 %v7686_v21  ;;  %v5681_v27 = vpop.f32.mrf.mxu1  ;;  %5933 = vmatprep.subr.bf16.mxu0 %v7691_v22  ;;  %v7749_v21 = vld [vmem:[#allocation12 + $0x5f8] ss:$28 sps:$4 sm:$0xff]  }
 0x42e   :  { %5974 = vmatprep.subr.bf16.mxu1 %v7694_v24  ;;  %v7752_v22 = vld [vmem:[#allocation12 + $0x978] ss:$28 sps:$4 sm:$0xff]   ;;  %v7757_v24 = vld [vmem:[#allocation12 + $0x5c4] ss:$28 sps:$4 sm:$0xff]  }
 0x42f   :  { %v7758_v27 = vld [vmem:[#allocation12 + $0x940] ss:$28 sps:$4 sm:$0xff]  }
 0x430   :  { %5934 = vmatpush1.bf16.msra.mxu0 %v7689_v26  ;;  %v7755_v26 = vld [vmem:[#allocation12 + $0x5c0] ss:$28 sps:$4 sm:$0xff]  }
 0x431   :  { %5975 = vmatpush1.bf16.msra.mxu1 %v7692_v29  ;;  %5935 = vmatprep.subr.bf16.mxu0 %v7697_v32  ;;  %v7763_v29 = vld [vmem:[#allocation12 + $0x58c] ss:$28 sps:$4 sm:$0xff]  }
 0x432   :  { %5976 = vmatprep.subr.bf16.mxu1 %v7700_v33  ;;  %v7766_v32 = vld [vmem:[#allocation12 + $0x90c] ss:$28 sps:$4 sm:$0xff]  }
 0x433   :  { %v7761_v33 = vld [vmem:[#allocation12 + $0x588] ss:$28 sps:$4 sm:$0xff]  }
 0x434   :  { %5936 = vmatpush1.bf16.msra.mxu0 %v7695_v35  ;;  %v7764_v35 = vld [vmem:[#allocation12 + $0x908] ss:$28 sps:$4 sm:$0xff]  }
 0x435   :  { %5977 = vmatpush1.bf16.msra.mxu1 %v7698_v36  ;;  %5937 = vmatprep.subr.bf16.mxu0 %v7703_v37  ;;  %v7769_v36 = vld [vmem:[#allocation12 + $0x554] ss:$28 sps:$4 sm:$0xff]  }
 0x436   :  { %5978 = vmatprep.subr.bf16.mxu1 %v7706_v38  ;;  %v7772_v37 = vld [vmem:[#allocation12 + $0x8d4] ss:$28 sps:$4 sm:$0xff]  }
 0x437   :  { %v7767_v38 = vld [vmem:[#allocation12 + $0x550] ss:$28 sps:$4 sm:$0xff]  }
 0x438   :  { %5938 = vmatpush1.bf16.msra.mxu0 %v7701_v39  ;;  %v7770_v39 = vld [vmem:[#allocation12 + $0x8d0] ss:$28 sps:$4 sm:$0xff]  }
 0x439   :  { %5979 = vmatpush1.bf16.msra.mxu1 %v7704_v40  ;;  %5939 = vmatprep.subr.bf16.mxu0 %v7709_v41  ;;  %v7775_v40 = vld [vmem:[#allocation12 + $0xc1c] ss:$28 sps:$4 sm:$0xff]  }
 0x43a   :  { %5980 = vmatprep.subr.bf16.mxu1 %v7712_v42  ;;  %v7776_v41 = vld [vmem:[#allocation12 + $0x360] ss:$28 sps:$4 sm:$0xff]   ;;  %v7773_v42 = vld [vmem:[#allocation12 + $0xc18] ss:$28 sps:$4 sm:$0xff]  }
 0x43c   :  { %5940 = vmatpush1.bf16.msra.mxu0 %v7707_v44  ;;  %v7777_v44 = vld [vmem:[#allocation12 + $0x1a0] ss:$28 sps:$4 sm:$0xff]  }
 0x43d   :  { %5981 = vmatpush1.bf16.msra.mxu1 %v7710_v46  ;;  %5941 = vmatprep.subr.bf16.mxu0 %v7715_v47  ;;  %v5677_v46 = vadd.f32 %v8281_v14, %v8274_v57  ;;  %v7780_v47 = vld [vmem:[#allocation12 + $0xbe4] ss:$28 sps:$4 sm:$0xff]  }
 0x43e   :  { %5982 = vmatprep.subr.bf16.mxu1 %v7718_v51 }
 0x440   :  { %5942 = vmatpush1.bf16.msra.mxu0 %v7713_v53 }
 0x441   :  { %5983 = vmatpush1.bf16.msra.mxu1 %v7716_v55  ;;  %5943 = vmatprep.subr.bf16.mxu0 %v7721_v56  ;;  %v7781_v55 = vld [vmem:[#allocation12 + $0x328] ss:$28 sps:$4 sm:$0xff]   ;;  %v5679_v56 = vadd.f32 %v8285_v4, %v8278_v60 }
 0x442   :  { %5984 = vmatprep.subr.bf16.mxu1 %v7724_v30 }
 0x444   :  { %5944 = vmatpush1.bf16.msra.mxu0 %v7719_v31  ;;  %v7778_v31 = vld [vmem:[#allocation12 + $0xbe0] ss:$28 sps:$4 sm:$0xff]  }
 0x445   :  { %5985 = vmatpush1.bf16.msra.mxu1 %v7722_v58  ;;  %5945 = vmatprep.subr.bf16.mxu0 %v7727_v59  ;;  %v7782_v58 = vld [vmem:[#allocation12 + $0x168] ss:$28 sps:$4 sm:$0xff]  }
 0x446   :  { %5986 = vmatprep.subr.bf16.mxu1 %v7730_v61  ;;  %v7785_v59 = vld [vmem:[#allocation12 + $0xbac] ss:$28 sps:$4 sm:$0xff]  }
 0x448   :  { %5946 = vmatpush2.bf16.msra.mxu0 %v7725_v62  ;;  %v7786_v62 = vld [vmem:[#allocation12 + $0x2f0] ss:$28 sps:$4 sm:$0xff]  }
 0x449   :  { %5987 = vmatpush2.bf16.msra.mxu1 %v7728_v0  ;;  %5947 = vmatprep.subr.bf16.mxu0 %v7733_v1  ;;  %v7783_v0 = vld [vmem:[#allocation12 + $0xba8] ss:$28 sps:$4 sm:$0xff]  }
 0x44a   :  { %5988 = vmatprep.subr.bf16.mxu1 %v7736_v2 }
 0x44c   :  { %5948 = vmatpush2.bf16.msra.mxu0 %v7731_v3  ;;  %v7787_v3 = vld [vmem:[#allocation12 + $0x130] ss:$28 sps:$4 sm:$0xff]  }
 0x44d   :  { %5989 = vmatpush2.bf16.msra.mxu1 %v7734_v6  ;;  %5949 = vmatprep.subr.bf16.mxu0 %v7739_v7  ;;  %v7790_v6 = vld [vmem:[#allocation12 + $0xb74] ss:$28 sps:$4 sm:$0xff]  }
 0x44e   :  { %5990 = vmatprep.subr.bf16.mxu1 %v7742_v8  ;;  %v7791_v7 = vld [vmem:[#allocation12 + $0x2b8] ss:$28 sps:$4 sm:$0xff]   ;;  %v7788_v8 = vld [vmem:[#allocation12 + $0xb70] ss:$28 sps:$4 sm:$0xff]  }
 0x450   :  { %5950 = vmatpush2.bf16.msra.mxu0 %v7737_v9  ;;  %v7795_v9 = vld [vmem:[#allocation12 + $0xb3c] ss:$28 sps:$4 sm:$0xff]  }
 0x451   :  { %5991 = vmatpush2.bf16.msra.mxu1 %v7740_v10  ;;  %5951 = vmatprep.subr.bf16.mxu0 %v7745_v63  ;;  %v7796_v10 = vld [vmem:[#allocation12 + $0x280] ss:$28 sps:$4 sm:$0xff]   ;;  %v7793_v63 = vld [vmem:[#allocation12 + $0xb38] ss:$28 sps:$4 sm:$0xff]  }
 0x452   :  { %5992 = vmatprep.subr.bf16.mxu1 %v7748_v13  ;;  %v7797_v13 = vld [vmem:[#allocation12 + $0xc0] ss:$28 sps:$4 sm:$0xff]  }
 0x454   :  { %5952 = vmatpush2.bf16.msra.mxu0 %v7743_v11  ;;  %v7800_v11 = vld [vmem:[#allocation12 + $0xb04] ss:$28 sps:$4 sm:$0xff]  }
 0x455   :  { %5993 = vmatpush2.bf16.msra.mxu1 %v7746_v15  ;;  %5953 = vmatprep.subr.bf16.mxu0 %v7751_v16  ;;  %v7801_v15 = vld [vmem:[#allocation12 + $0x248] ss:$28 sps:$4 sm:$0xff]  }
 0x456   :  { %5994 = vmatprep.subr.bf16.mxu1 %v7754_v20  ;;  %v7798_v20 = vld [vmem:[#allocation12 + $0xb00] ss:$28 sps:$4 sm:$0xff]  }
 0x458   :  { %5954 = vmatpush2.bf16.msra.mxu0 %v7749_v21 }
 0x459   :  { %5995 = vmatpush2.bf16.msra.mxu1 %v7752_v22  ;;  %5955 = vmatprep.subr.bf16.mxu0 %v7757_v24  ;;  %v7802_v22 = vld [vmem:[#allocation12 + $0x88] ss:$28 sps:$4 sm:$0xff]  }
 0x45a   :  { %5996 = vmatprep.subr.bf16.mxu1 %v7760_v5  ;;  %v7805_v24 = vld [vmem:[#allocation12 + $0xacc] ss:$28 sps:$4 sm:$0xff]  }
 0x45b   :  { %v7806_v5 = vld [vmem:[#allocation12 + $0x210] ss:$28 sps:$4 sm:$0xff]  }
 0x45c   :  { %5956 = vmatpush2.bf16.msra.mxu0 %v7755_v26  ;;  %v7803_v26 = vld [vmem:[#allocation12 + $0xac8] ss:$28 sps:$4 sm:$0xff]  }
 0x45d   :  { %5997 = vmatpush2.bf16.msra.mxu1 %v7758_v27  ;;  %5957 = vmatprep.subr.bf16.mxu0 %v7763_v29  ;;  %v7807_v27 = vld [vmem:[#allocation12 + $0x50] ss:$28 sps:$4 sm:$0xff]  }
 0x45e   :  { %5998 = vmatprep.subr.bf16.mxu1 %v7766_v32  ;;  %v7810_v29 = vld [vmem:[#allocation12 + $0xa94] ss:$28 sps:$4 sm:$0xff]  }
 0x45f   :  { %v7811_v32 = vld [vmem:[#allocation12 + $0x1d8] ss:$28 sps:$4 sm:$0xff]  }
 0x460   :  { %5958 = vmatpush2.bf16.msra.mxu0 %v7761_v33  ;;  %v7808_v33 = vld [vmem:[#allocation12 + $0xa90] ss:$28 sps:$4 sm:$0xff]  }
 0x461   :  { %5999 = vmatpush2.bf16.msra.mxu1 %v7764_v35  ;;  %5959 = vmatprep.subr.bf16.mxu0 %v7769_v36  ;;  %v7812_v35 = vld [vmem:[#allocation12 + $0x18] ss:$28 sps:$4 sm:$0xff]  }
 0x462   :  { %6000 = vmatprep.subr.bf16.mxu1 %v7772_v37  ;;  %v7815_v36 = vld [vmem:[#allocation12 + $0xddc] ss:$28 sps:$4 sm:$0xff]  }
 0x463   :  { %v7816_v37 = vld [vmem:[#allocation12 + $0xa60] ss:$28 sps:$4 sm:$0xff]  }
 0x464   :  { %5960 = vmatpush2.bf16.msra.mxu0 %v7767_v38  ;;  %v7813_v38 = vld [vmem:[#allocation12 + $0xdd8] ss:$28 sps:$4 sm:$0xff]  }
 0x465   :  { %6001 = vmatpush2.bf16.msra.mxu1 %v7770_v39  ;;  %6011 = vmatprep.subr.bf16.mxu0 %v7775_v40  ;;  %v7817_v39 = vld [vmem:[#allocation12 + $0x8a0] ss:$28 sps:$4 sm:$0xff]  }
 0x466   :  { %7020 = vmatprep.subr.bf16.mxu1 %v7776_v41  ;;  %v7820_v40 = vld [vmem:[#allocation12 + $0xda4] ss:$28 sps:$4 sm:$0xff]  }
 0x467   :  { %v8290_v51 = vpop.f32.mrf.mxu1  ;;  %5962 = vmatmul.mubr.bf16.vlgmr.msra.gmra.mxu0 %v8232_v54  ;;  %v5717_v53 = vpop.f32.mrf.mxu0  ;;  %v7821_v41 = vld [vmem:[#allocation12 + $0xa28] ss:$28 sps:$4 sm:$0xff]  }
 0x468   :  { %6003 = vmatmul.mubr.bf16.vlgmr.msra.gmra.mxu1 %v8246_v18  ;;  %v5718_v30 = vadd.f32 %v5717_v53, %v5677_v46  ;;  %6012 = vmatpush1.bf16.msra.mxu0 %v7773_v42  ;;  %v7818_v42 = vld [vmem:[#allocation12 + $0xda0] ss:$28 sps:$4 sm:$0xff]   ;;  %v7825_v46 = vld [vmem:[#allocation12 + $0xd6c] ss:$28 sps:$4 sm:$0xff]  }
 0x469   :  { %6043 = vmatprep.mubr.bf16.mxu0 %v8257_v12  ;;  %7021 = vmatpush3.bf16.msra.mxu1 %v7777_v44  ;;  %v8297_v57 = vpop.f32.mrf.mxu1  ;;  %v5719_v14 = vpop.f32.mrf.mxu0  ;;  %v7822_v44 = vld [vmem:[#allocation12 + $0x868] ss:$28 sps:$4 sm:$0xff]  }
 0x46a   :  { %7885 = vtanh.f32 %v5718_v30  ;;  %6084 = vmatprep.mubr.bf16.mxu1 %v8216_v23  ;;  %v5720_v61 = vadd.f32 %v5719_v14, %v5679_v56  ;;  %6013 = vmatprep.subr.bf16.mxu0 %v7780_v47  ;;  %v7792_v23 = vld [vmem:[#allocation12 + $0xf8] ss:$28 sps:$4 sm:$0xff]   ;;  %v7826_v47 = vld [vmem:[#allocation12 + $0x9f0] ss:$28 sps:$4 sm:$0xff]   ;;  %v7823_v53 = vld [vmem:[#allocation12 + $0xd68] ss:$28 sps:$4 sm:$0xff]  }
 0x46b   :  { %v5762_v60 = vpop.f32.mrf.mxu1  ;;  %7022 = vmatprep.subr.bf16.mxu1 %v7781_v55  ;;  %v5721_v4 = vpop.f32.mrf.mxu0  ;;  %v7827_v55 = vld [vmem:[#allocation12 + $0x830] ss:$28 sps:$4 sm:$0xff]   ;;  %v7831_v30 = vld [vmem:[#allocation12 + $0x9b8] ss:$28 sps:$4 sm:$0xff]  }
 0x46c   :  { %7887 = vtanh.f32 %v5720_v61  ;;  %6014 = vmatpush1.bf16.msra.mxu0 %v7778_v31  ;;  %v7830_v56 = vld [vmem:[#allocation12 + $0xd34] ss:$28 sps:$4 sm:$0xff]   ;;  %v7835_v14 = vld [vmem:[#allocation12 + $0xcfc] ss:$28 sps:$4 sm:$0xff]   ;;  %v7840_v61 = vld [vmem:[#allocation12 + $0xcc4] ss:$28 sps:$4 sm:$0xff]  }
 0x46d   :  { %7023 = vmatpush3.bf16.msra.mxu1 %v7782_v58  ;;  %v5763_v1 = vpop.f32.mrf.mxu1  ;;  %v5722_v2 = vpop.f32.mrf.mxu0  ;;  %6015 = vmatprep.subr.bf16.mxu0 %v7785_v59  ;;  %v7832_v31 = vld [vmem:[#allocation12 + $0x7f8] ss:$28 sps:$4 sm:$0xff]   ;;  %v7837_v59 = vld [vmem:[#allocation12 + $0x7c0] ss:$28 sps:$4 sm:$0xff]   ;;  %v7842_v4 = vld [vmem:[#allocation12 + $0x788] ss:$28 sps:$4 sm:$0xff]  }
 0x46e   :  { %7024 = vmatprep.subr.bf16.mxu1 %v7786_v62  ;;  %v7833_v58 = vld [vmem:[#allocation12 + $0xcf8] ss:$28 sps:$4 sm:$0xff]   ;;  %v7841_v62 = vld [vmem:[#allocation12 + $0x948] ss:$28 sps:$4 sm:$0xff]   ;;  %v7838_v60 = vld [vmem:[#allocation12 + $0xcc0] ss:$28 sps:$4 sm:$0xff]  }
 0x46f   :  { %v7846_v1 = vld [vmem:[#allocation12 + $0x910] ss:$28 sps:$4 sm:$0xff]   ;;  %v7843_v2 = vld [vmem:[#allocation12 + $0xc88] ss:$28 sps:$4 sm:$0xff]  }
 0x470   :  { %6016 = vmatpush1.bf16.msra.mxu0 %v7783_v0  ;;  %v7845_v0 = vld [vmem:[#allocation12 + $0xc8c] ss:$28 sps:$4 sm:$0xff]  }
 0x471   :  { %7025 = vmatpush3.bf16.msra.mxu1 %v7787_v3  ;;  %6017 = vmatprep.subr.bf16.mxu0 %v7790_v6  ;;  %v7847_v3 = vld [vmem:[#allocation12 + $0x750] ss:$28 sps:$4 sm:$0xff]  }
 0x472   :  { %7026 = vmatprep.subr.bf16.mxu1 %v7791_v7  ;;  %v7850_v6 = vld [vmem:[#allocation12 + $0xc54] ss:$28 sps:$4 sm:$0xff]  }
 0x473   :  { %v7851_v7 = vld [vmem:[#allocation12 + $0x8d8] ss:$28 sps:$4 sm:$0xff]  }
 0x474   :  { %6018 = vmatpush1.bf16.msra.mxu0 %v7788_v8  ;;  %v7848_v8 = vld [vmem:[#allocation12 + $0xc50] ss:$28 sps:$4 sm:$0xff]  }
 0x475   :  { %7027 = vmatpush3.bf16.msra.mxu1 %v7792_v23  ;;  %6019 = vmatprep.subr.bf16.mxu0 %v7795_v9  ;;  %v7852_v23 = vld [vmem:[#allocation12 + $0x718] ss:$28 sps:$4 sm:$0xff]   ;;  %v7853_v9 = vld [vmem:[#allocation12 + $0x6e0] ss:$28 sps:$4 sm:$0xff]  }
 0x476   :  { %7028 = vmatprep.subr.bf16.mxu1 %v7796_v10  ;;  %v7854_v10 = vld [vmem:[#allocation12 + $0x520] ss:$28 sps:$4 sm:$0xff]  }
 0x477   :  { %v7886_v16 = vpop.eup %7885 }
 0x478   :  { %6219 = vst [vmem:[%s8367_s9] sm:$0xff] %v7886_v16  ;;  %6020 = vmatpush1.bf16.msra.mxu0 %v7793_v63  ;;  %v7855_v63 = vld [vmem:[#allocation12 + $0x6a8] ss:$28 sps:$4 sm:$0xff]  }
 0x479   :  { %v7888_v21 = vpop.eup %7887  ;;  %7029 = vmatpush3.bf16.msra.mxu1 %v7797_v13  ;;  %6021 = vmatprep.subr.bf16.mxu0 %v7800_v11 }
 0x47a   :  { %6220 = vst [vmem:[%s8367_s9 + $0x8] sm:$0xff] %v7888_v21  ;;  %7030 = vmatprep.subr.bf16.mxu1 %v7801_v15  ;;  %v7856_v15 = vld [vmem:[#allocation12 + $0x4e8] ss:$28 sps:$4 sm:$0xff]   ;;  %v7857_v21 = vld [vmem:[#allocation12 + $0x670] ss:$28 sps:$4 sm:$0xff]  }
 0x47c   :  { %6022 = vmatpush1.bf16.msra.mxu0 %v7798_v20 }
 0x47d   :  { %7031 = vmatpush3.bf16.msra.mxu1 %v7802_v22  ;;  %6023 = vmatprep.subr.bf16.mxu0 %v7805_v24 }
 0x47e   :  { %7032 = vmatprep.subr.bf16.mxu1 %v7806_v5  ;;  %v7858_v5 = vld [vmem:[#allocation12 + $0x4b0] ss:$28 sps:$4 sm:$0xff]  }
 0x480   :  { %6024 = vmatpush1.bf16.msra.mxu0 %v7803_v26 }
 0x481   :  { %7033 = vmatpush3.bf16.msra.mxu1 %v7807_v27  ;;  %6025 = vmatprep.subr.bf16.mxu0 %v7810_v29  ;;  %v7859_v29 = vld [vmem:[#allocation12 + $0x638] ss:$28 sps:$4 sm:$0xff]  }
 0x482   :  { %7034 = vmatprep.subr.bf16.mxu1 %v7811_v32  ;;  %v7861_v32 = vld [vmem:[#allocation12 + $0x600] ss:$28 sps:$4 sm:$0xff]  }
 0x484   :  { %6026 = vmatpush1.bf16.msra.mxu0 %v7808_v33  ;;  %v7863_v33 = vld [vmem:[#allocation12 + $0x5c8] ss:$28 sps:$4 sm:$0xff]  }
 0x485   :  { %7035 = vmatpush3.bf16.msra.mxu1 %v7812_v35  ;;  %6027 = vmatprep.subr.bf16.mxu0 %v7815_v36  ;;  %v7864_v35 = vld [vmem:[#allocation12 + $0x408] ss:$28 sps:$4 sm:$0xff]   ;;  %v7865_v36 = vld [vmem:[#allocation12 + $0x590] ss:$28 sps:$4 sm:$0xff]  }
 0x486   :  { %7064 = vmatprep.subr.bf16.mxu1 %v7816_v37  ;;  %v7866_v37 = vld [vmem:[#allocation12 + $0x3d0] ss:$28 sps:$4 sm:$0xff]  }
 0x488   :  { %6085 = vmatmul.mubr.bf16.vlgmr.msra.gmra.mxu1 %v8225_v25  ;;  %6028 = vmatpush2.bf16.msra.mxu0 %v7813_v38  ;;  %v7828_v25 = vld [vmem:[#allocation12 + $0xd30] ss:$28 sps:$4 sm:$0xff]   ;;  %v7867_v38 = vld [vmem:[#allocation12 + $0x558] ss:$28 sps:$4 sm:$0xff]  }
 0x489   :  { %7065 = vmatpush3.bf16.msra.mxu1 %v7817_v39  ;;  %6164 = vmatprep.mubr.bf16.mxu1 %v8244_v17  ;;  %v7836_v17 = vld [vmem:[#allocation12 + $0x980] ss:$28 sps:$4 sm:$0xff]   ;;  %v7868_v39 = vld [vmem:[#allocation12 + $0x398] ss:$28 sps:$4 sm:$0xff]  }
 0x48a   :  { %6029 = vmatprep.subr.bf16.mxu0 %v7820_v40  ;;  %7066 = vmatprep.subr.bf16.mxu1 %v7821_v41  ;;  %v7869_v40 = vld [vmem:[#allocation12 + $0xde0] ss:$28 sps:$4 sm:$0xff]  }
 0x48b   :  { %v7870_v41 = vld [vmem:[#allocation12 + $0xc20] ss:$28 sps:$4 sm:$0xff]  }
 0x48c   :  { %6030 = vmatpush2.bf16.msra.mxu0 %v7818_v42  ;;  %v7871_v42 = vld [vmem:[#allocation12 + $0xda8] ss:$28 sps:$4 sm:$0xff]  }
 0x48d   :  { %7067 = vmatpush3.bf16.msra.mxu1 %v7822_v44  ;;  %6031 = vmatprep.subr.bf16.mxu0 %v7825_v46  ;;  %v7872_v44 = vld [vmem:[#allocation12 + $0xbe8] ss:$28 sps:$4 sm:$0xff]   ;;  %v7873_v46 = vld [vmem:[#allocation12 + $0xd70] ss:$28 sps:$4 sm:$0xff]  }
 0x48e   :  { %7068 = vmatprep.subr.bf16.mxu1 %v7826_v47  ;;  %v7874_v47 = vld [vmem:[#allocation12 + $0xbb0] ss:$28 sps:$4 sm:$0xff]  }
 0x490   :  { %6032 = vmatpush2.bf16.msra.mxu0 %v7823_v53  ;;  %v7875_v53 = vld [vmem:[#allocation12 + $0xd38] ss:$28 sps:$4 sm:$0xff]  }
 0x491   :  { %7069 = vmatpush3.bf16.msra.mxu1 %v7827_v55  ;;  %6033 = vmatprep.subr.bf16.mxu0 %v7830_v56  ;;  %v7876_v55 = vld [vmem:[#allocation12 + $0xb78] ss:$28 sps:$4 sm:$0xff]   ;;  %v7877_v56 = vld [vmem:[#allocation12 + $0xd00] ss:$28 sps:$4 sm:$0xff]  }
 0x492   :  { %7070 = vmatprep.subr.bf16.mxu1 %v7831_v30  ;;  %v7878_v30 = vld [vmem:[#allocation12 + $0xb40] ss:$28 sps:$4 sm:$0xff]  }
 0x494   :  { %6034 = vmatpush2.bf16.msra.mxu0 %v7828_v25  ;;  %v7879_v25 = vld [vmem:[#allocation12 + $0xcc8] ss:$28 sps:$4 sm:$0xff]  }
 0x495   :  { %7071 = vmatpush3.bf16.msra.mxu1 %v7832_v31  ;;  %6035 = vmatprep.subr.bf16.mxu0 %v7835_v14  ;;  %v7881_v31 = vld [vmem:[#allocation12 + $0xc90] ss:$28 sps:$4 sm:$0xff]  }
 0x496   :  { %7072 = vmatprep.subr.bf16.mxu1 %v7836_v17  ;;  %v7882_v14 = vld [vmem:[#allocation12 + $0xad0] ss:$28 sps:$4 sm:$0xff]   ;;  %v7883_v17 = vld [vmem:[#allocation12 + $0xc58] ss:$28 sps:$4 sm:$0xff]  }
 0x498   :  { %6036 = vmatpush2.bf16.msra.mxu0 %v7833_v58  ;;  %v8323_v58 = vld [vmem:[#allocation13] sm:$0xff] }
 0x499   :  { %7073 = vmatpush3.bf16.msra.mxu1 %v7837_v59  ;;  %6037 = vmatprep.subr.bf16.mxu0 %v7840_v61  ;;  %v3236_v59 = vrot.slane %v8323_v58, %v8178_v52 }
 0x49a   :  { %7074 = vmatprep.subr.bf16.mxu1 %v7841_v62  ;;  %v7884_v62 = vld [vmem:[#allocation12 + $0xa98] ss:$28 sps:$4 sm:$0xff]  }
 0x49c   :  { %6038 = vmatpush2.bf16.msra.mxu0 %v7838_v60  ;;  %v5761_v60 = vadd.f32 %v8297_v57, %v3236_v59 }
 0x49d   :  { %7075 = vmatpush3.bf16.msra.mxu1 %v7842_v4  ;;  %6039 = vmatprep.subr.bf16.mxu0 %v7845_v0 }
 0x49e   :  { %7076 = vmatprep.subr.bf16.mxu1 %v7846_v1 }
 0x4a0   :  { %6040 = vmatpush2.bf16.msra.mxu0 %v7843_v2 }
 0x4a1   :  { %7077 = vmatpush3.bf16.msra.mxu1 %v7847_v3  ;;  %6041 = vmatprep.subr.bf16.mxu0 %v7850_v6 }
 0x4a2   :  { %7078 = vmatprep.subr.bf16.mxu1 %v7851_v7 }
 0x4a4   :  { %6042 = vmatpush2.bf16.msra.mxu0 %v7848_v8 }
 0x4a5   :  { %7079 = vmatpush3.bf16.msra.mxu1 %v7852_v23  ;;  %7042 = vmatprep.subr.bf16.mxu0 %v7853_v9 }
 0x4a7   :  { %v8308_v13 = vpop.f32.mrf.mxu0  ;;  %v8310_v11 = vpop.f32.mrf.mxu1  ;;  %6044 = vmatmul.mubr.bf16.vlgmr.msra.gmra.mxu0 %v8259_v19 }
 0x4a8   :  { %6165 = vmatmul.mubr.bf16.vlgmr.msra.gmra.mxu1 %v8246_v18  ;;  %7043 = vmatpush3.bf16.msra.mxu0 %v7854_v10  ;;  %v7860_v18 = vld [vmem:[#allocation12 + $0x478] ss:$28 sps:$4 sm:$0xff]  }
 0x4a9   :  { %6124 = vmatprep.mubr.bf16.mxu0 %v8230_v49  ;;  %v8315_v16 = vpop.f32.mrf.mxu0  ;;  %v8317_v20 = vpop.f32.mrf.mxu1  ;;  %7044 = vmatprep.subr.bf16.mxu0 %v7855_v63  ;;  %v7862_v49 = vld [vmem:[#allocation12 + $0x440] ss:$28 sps:$4 sm:$0xff]  }
 0x4ab   :  { %v5803_v22 = vpop.f32.mrf.mxu0  ;;  %v5844_v24 = vpop.f32.mrf.mxu1 }
 0x4ac   :  { %7045 = vmatpush3.bf16.msra.mxu0 %v7856_v15 }
 0x4ad   :  { %v5804_v26 = vpop.f32.mrf.mxu0  ;;  %v5845_v27 = vpop.f32.mrf.mxu1  ;;  %7046 = vmatprep.subr.bf16.mxu0 %v7857_v21 }
 0x4b0   :  { %7047 = vmatpush3.bf16.msra.mxu0 %v7858_v5 }
 0x4b1   :  { %7048 = vmatprep.subr.bf16.mxu0 %v7859_v29  ;;  %v3240_v29 = vrot.slane %v8323_v58, %v1061_v43 }
 0x4b4   :  { %7049 = vmatpush3.bf16.msra.mxu0 %v7860_v18  ;;  %v3244_v18 = vrot.slane %v8323_v58, %v1065_v48 }
 0x4b5   :  { %7050 = vmatprep.subr.bf16.mxu0 %v7861_v32 }
 0x4b8   :  { %7051 = vmatpush3.bf16.msra.mxu0 %v7862_v49 }
 0x4b9   :  { %7052 = vmatprep.subr.bf16.mxu0 %v7863_v33 }
 0x4bc   :  { %7053 = vmatpush3.bf16.msra.mxu0 %v7864_v35 }
 0x4bd   :  { %7054 = vmatprep.subr.bf16.mxu0 %v7865_v36 }
 0x4c0   :  { %7055 = vmatpush3.bf16.msra.mxu0 %v7866_v37 }
 0x4c1   :  { %7056 = vmatprep.subr.bf16.mxu0 %v7867_v38 }
 0x4c4   :  { %7057 = vmatpush3.bf16.msra.mxu0 %v7868_v39 }
 0x4c5   :  { %7086 = vmatprep.subr.bf16.mxu0 %v7869_v40 }
 0x4c7   :  { %6125 = vmatmul.mubr.bf16.vlgmr.msra.gmra.mxu0 %v8232_v54  ;;  %v7880_v54 = vld [vmem:[#allocation12 + $0xb08] ss:$28 sps:$4 sm:$0xff]  }
 0x4c8   :  { %7087 = vmatpush3.bf16.msra.mxu0 %v7870_v41  ;;  %6204 = vmatprep.mubr.bf16.mxu0 %v8257_v12  ;;  %v3232_v12 = vrot.slane %v8266_v34, %v8175_v50  ;;  %v5802_v50 = vadd.f32 %v8315_v16, %v5761_v60 }
 0x4c9   :  { %7088 = vmatprep.subr.bf16.mxu0 %v7871_v42 }
 0x4ca   :  { %v5759_v61 = vadd.f32 %v8290_v51, %v3232_v12  ;;  %v5843_v1 = vadd.f32 %v8317_v20, %v5802_v50 }
 0x4cc   :  { %7089 = vmatpush3.bf16.msra.mxu0 %v7872_v44  ;;  %v5800_v4 = vadd.f32 %v8308_v13, %v5759_v61 }
 0x4cd   :  { %7090 = vmatprep.subr.bf16.mxu0 %v7873_v46 }
 0x4ce   :  { %v5841_v34 = vadd.f32 %v8310_v11, %v5800_v4 }
 0x4d0   :  { %7091 = vmatpush3.bf16.msra.mxu0 %v7874_v47 }
 0x4d1   :  { %7092 = vmatprep.subr.bf16.mxu0 %v7875_v53 }
 0x4d4   :  { %7093 = vmatpush3.bf16.msra.mxu0 %v7876_v55 }
 0x4d5   :  { %7094 = vmatprep.subr.bf16.mxu0 %v7877_v56 }
 0x4d8   :  { %7095 = vmatpush3.bf16.msra.mxu0 %v7878_v30 }
 0x4d9   :  { %7096 = vmatprep.subr.bf16.mxu0 %v7879_v25 }
 0x4dc   :  { %7097 = vmatpush3.bf16.msra.mxu0 %v7880_v54 }
 0x4dd   :  { %7098 = vmatprep.subr.bf16.mxu0 %v7881_v31  ;;  %v3248_v31 = vrot.slane %v8323_v58, %v1069_v45 }
 0x4e0   :  { %7099 = vmatpush3.bf16.msra.mxu0 %v7882_v14 }
 0x4e1   :  { %7100 = vmatprep.subr.bf16.mxu0 %v7883_v17 }
 0x4e4   :  { %7101 = vmatpush3.bf16.msra.mxu0 %v7884_v62 }
 0x4e7   :  { %v5881_v0 = vpop.f32.mrf.mxu0  ;;  %6205 = vmatmul.mubr.bf16.vlgmr.msra.gmra.mxu0 %v8259_v19 }
 0x4e8   :  { %v5882_v52 = vadd.f32 %v5881_v0, %v5841_v34  ;;  %v5922_v2 = vpop.f32.mrf.mxu1 }
 0x4e9   :  { %v5883_v51 = vpop.f32.mrf.mxu0  ;;  %v5923_v32 = vadd.f32 %v5922_v2, %v3240_v29 }
 0x4ea   :  { %7889 = vtanh.f32 %v5882_v52  ;;  %v5884_v3 = vadd.f32 %v5883_v51, %v5843_v1  ;;  %v5924_v6 = vpop.f32.mrf.mxu1 }
 0x4eb   :  { %v5885_v7 = vpop.f32.mrf.mxu0  ;;  %v5925_v49 = vadd.f32 %v5924_v6, %v3244_v18 }
 0x4ec   :  { %7891 = vtanh.f32 %v5884_v3  ;;  %v5926_v57 = vpop.f32.mrf.mxu1 }
 0x4ed   :  { %v5886_v8 = vpop.f32.mrf.mxu0 }
 0x4ee   :  { %v5927_v23 = vpop.f32.mrf.mxu1 }
 0x4f7   :  { %v7890_v9 = vpop.eup %7889 }
 0x4f8   :  { %6221 = vst [vmem:[%s8367_s9 + $0x10] sm:$0xff] %v7890_v9 }
 0x4f9   :  { %v7892_v10 = vpop.eup %7891 }
 0x4fa   :  { %6222 = vst [vmem:[%s8367_s9 + $0x18] sm:$0xff] %v7892_v10 }
 0x527   :  { %v5963_v19 = vpop.f32.mrf.mxu0 }
 0x528   :  { %v6004_v63 = vpop.f32.mrf.mxu1  ;;  %v5964_v33 = vadd.f32 %v5963_v19, %v5923_v32 }
 0x529   :  { %v5965_v13 = vpop.f32.mrf.mxu0 }
 0x52a   :  { %v6006_v11 = vpop.f32.mrf.mxu1  ;;  %v5966_v35 = vadd.f32 %v5965_v13, %v5925_v49  ;;  %v6005_v36 = vadd.f32 %v6004_v63, %v5964_v33 }
 0x52b   :  { %v5967_v15 = vpop.f32.mrf.mxu0 }
 0x52c   :  { %v6008_v16 = vpop.f32.mrf.mxu1  ;;  %v6007_v38 = vadd.f32 %v6006_v11, %v5966_v35 }
 0x52d   :  { %v5968_v20 = vpop.f32.mrf.mxu0 }
 0x52e   :  { %v6009_v21 = vpop.f32.mrf.mxu1 }
 0x548   :  { %v7036_v22 = vpop.f32.mrf.mxu1 }
 0x54a   :  { %v7037_v24 = vpop.f32.mrf.mxu1 }
 0x54b   :  { %v7038_v5 = vadd.f32 %v7037_v24, %v7036_v22 }
 0x54c   :  { %v7039_v26 = vpop.f32.mrf.mxu1 }
 0x54d   :  { %v6087_v14 = vadd.f32 %v7038_v5, %v3248_v31 }
 0x54e   :  { %v7040_v27 = vpop.f32.mrf.mxu1 }
 0x567   :  { %v6045_v37 = vpop.f32.mrf.mxu0 }
 0x568   :  { %v6046_v39 = vadd.f32 %v6045_v37, %v6005_v36  ;;  %v7080_v40 = vpop.f32.mrf.mxu1 }
 0x569   :  { %v6047_v41 = vpop.f32.mrf.mxu0 }
 0x56a   :  { %7893 = vtanh.f32 %v6046_v39  ;;  %v6048_v42 = vadd.f32 %v6047_v41, %v6007_v38  ;;  %v7081_v44 = vpop.f32.mrf.mxu1 }
 0x56b   :  { %v6049_v46 = vpop.f32.mrf.mxu0  ;;  %v7082_v61 = vadd.f32 %v7081_v44, %v7080_v40 }
 0x56c   :  { %7895 = vtanh.f32 %v6048_v42  ;;  %v7083_v43 = vpop.f32.mrf.mxu1 }
 0x56d   :  { %v6050_v47 = vpop.f32.mrf.mxu0 }
 0x56e   :  { %v7084_v53 = vpop.f32.mrf.mxu1 }
 0x577   :  { %v7894_v55 = vpop.eup %7893 }
 0x578   :  { %6223 = vst [vmem:[%s8367_s9 + $0x20] sm:$0xff] %v7894_v55 }
 0x579   :  { %v7896_v48 = vpop.eup %7895 }
 0x57a   :  { %6224 = vst [vmem:[%s8367_s9 + $0x28] sm:$0xff] %v7896_v48 }
 0x587   :  { %v7058_v56 = vpop.f32.mrf.mxu0 }
 0x589   :  { %v7059_v30 = vpop.f32.mrf.mxu0 }
 0x58a   :  { %v7060_v12 = vadd.f32 %v7059_v30, %v7058_v56 }
 0x58b   :  { %v7061_v25 = vpop.f32.mrf.mxu0 }
 0x58c   :  { %v6127_v17 = vadd.f32 %v7060_v12, %v6087_v14 }
 0x58d   :  { %v7062_v54 = vpop.f32.mrf.mxu0 }
 0x58e   :  { %v6167_v60 = vadd.f32 %v7082_v61, %v6127_v17 }
 0x5a7   :  { %v7102_v59 = vpop.f32.mrf.mxu0 }
 0x5a9   :  { %v7103_v62 = vpop.f32.mrf.mxu0 }
 0x5aa   :  { %v7104_v4 = vadd.f32 %v7103_v62, %v7102_v59 }
 0x5ab   :  { %v7105_v50 = vpop.f32.mrf.mxu0 }
 0x5ac   :  { %v6207_v34 = vadd.f32 %v7104_v4, %v6167_v60 }
 0x5ad   :  { %v7106_v0 = vpop.f32.mrf.mxu0 }
 0x5ae   :  { %7897 = vtanh.f32 %v6207_v34 }
 0x5bb   :  { %v7898_v1 = vpop.eup %7897 }
 0x5bc   :  { %6226 = vst.msk [vmem:[%s8367_s9 + $0x30] sm:$0xff] %vm6225_vm0, %v7898_v1 }
 0x5bd   :  { %6231 = vsyncpa [#allocation3], 1 }
 0x5be   :  { %6232 = vsyncpa [#allocation5], 1 }
 0x5bf   :  { %6233 = vsyncpa [#allocation8], 1 }
 0x5c0   :  { %6234 = vsyncpa [#allocation11], 1 }
 0x5c1   :  { %6235 = vsyncpa [#allocation14], 1 }

</bundles_post_ra>
